<compile_context>
chip_gen: v7x
topology: tpu7x:2x2x1
jax: 0.10.0
libtpu: 0.0.40
codegen_flags: <defaults>
</compile_context>

<pallas_src>
import jax
import jax.numpy as jnp
from jax.experimental import pallas as pl
from jax.experimental.pallas import tpu as pltpu

# Conv hyper-parameters implied by MyNet (fc1 expects 31*31*64 features).
KH = KW = 11
STRIDE, PAD = 4, 2


def _round_up(x, m):
    return (x + m - 1) // m * m


def _tensorcores_per_chip():
    try:
        kind = jax.devices()[0].device_kind.lower()
    except Exception:
        return 1
    return 2 if ("v7" in kind or "7x" in kind) else 1


def _mynet_kernel(p_ref, wc_ref, bc_ref, wf_ref, bf_ref, o_ref):
    # p_ref : (NB, S, Kpad)     bf16 im2col patches (feature order (ci,kh,kw), zero-padded K)
    # wc_ref: (Kpad, Cout)      bf16 conv weights as a matmul operand
    # bc_ref: (1, Cout)         f32 conv bias
    # wf_ref: (S, nc*Cout)      f32 fc weights, class c occupies lanes [c*Cout,(c+1)*Cout)
    # bf_ref: (1, nc)           f32 fc bias
    # o_ref : (NB, 1, nc)
    nb = p_ref.shape[0]
    cout = bc_ref.shape[1]
    nc = bf_ref.shape[1]

    wc = wc_ref[...]
    bc = bc_ref[...]
    wf = wf_ref[...]
    bf = bf_ref[...].astype(jnp.float32)

    lane_ids = jax.lax.broadcasted_iota(jnp.int32, (1, nc * cout), 1)
    out_cols = jax.lax.broadcasted_iota(jnp.int32, (1, nc), 1)

    for b in range(nb):  # static unroll: 1 (v7x, per-core image) or N (v5e/v6e, fused batch)
        # Conv as ONE MXU matmul (bf16 in, f32 accumulate) + bias + ReLU; stays in VMEM.
        conv = jnp.dot(p_ref[b], wc, preferred_element_type=jnp.float32)     # (S, Cout) f32
        relu = jnp.maximum(conv + bc, 0.0)                                   # (S, Cout)

        # FC head, lane-packed: nc*Cout = 128 lanes -> full vreg-lane occupancy.
        # One multiply + one sublane reduction over the whole activation.
        relu_t = jnp.concatenate([relu] * nc, axis=1)                        # (S, nc*Cout)
        colsum = jnp.sum(relu_t * wf, axis=0, keepdims=True)                 # (1, nc*Cout)

        fc = bf                                                              # (1, nc)
        for c in range(nc):
            in_cls = (lane_ids >= c * cout) & (lane_ids < (c + 1) * cout)
            s_c = jnp.sum(jnp.where(in_cls, colsum, 0.0), axis=1, keepdims=True)  # (1, 1)
            fc = fc + jnp.where(out_cols == c, s_c, 0.0)
        o_ref[b] = fc.astype(o_ref.dtype)


def prepare_params(params, *, oh=31, ow=31):
    """One-time repack of MyNet parameters into kernel-friendly layouts (not per forward)."""
    cout, cin, kh, kw = params["w_conv"].shape
    nc = params["w_fc"].shape[0]
    s = oh * ow
    kdim = cin * kh * kw
    kpad = _round_up(kdim, 128)

    # Conv weight OIHW -> (ci,kh,kw) x co (matches patch feature order), K padded, bf16.
    wc = params["w_conv"].transpose(1, 2, 3, 0).reshape(kdim, cout)
    wc = jnp.pad(wc, ((0, kpad - kdim), (0, 0))).astype(jnp.bfloat16)
    bc = params["b_conv"].reshape(1, cout).astype(jnp.float32)
    # fc weight: torch flatten of (Cout,OH,OW) is (co,oh,ow); repack to (s, nc*Cout)
    # with class c on lanes [c*Cout, (c+1)*Cout)  -> wf[s, c*Cout+co] = w_fc[c, co*S + s].
    wf = params["w_fc"].reshape(nc, cout, s).transpose(2, 0, 1).reshape(s, nc * cout)
    bf = params["b_fc"].reshape(1, nc).astype(jnp.float32)
    return {"wc": wc, "bc": bc, "wf": wf.astype(jnp.float32), "bf": bf}


def mynet_forward(x_nchw, packed):
    """Forward of MyNet. x_nchw: (N, Cin, H, W) f32; packed = prepare_params(...)."""
    N, Cin, H, W = x_nchw.shape
    OH = (H + 2 * PAD - KH) // STRIDE + 1
    OW = (W + 2 * PAD - KW) // STRIDE + 1
    S = OH * OW
    Kdim = Cin * KH * KW
    Kpad, Cout = packed["wc"].shape
    nc = packed["bf"].shape[1]

    # ---- patch extraction: ONE fused XLA op; NHWC out -> contiguous reshape ----
    # Feature order of the extracted patches is (ci, kh, kw), matching packed["wc"].
    patches = jax.lax.conv_general_dilated_patches(
        x_nchw.astype(jnp.bfloat16),
        filter_shape=(KH, KW), window_strides=(STRIDE, STRIDE),
        padding=((PAD, PAD), (PAD, PAD)),
        dimension_numbers=("NCHW", "OIHW", "NHWC"))            # (N, OH, OW, Kdim) bf16
    patches = patches.reshape(N, S, Kdim)
    patches = jnp.pad(patches, ((0, 0), (0, 0), (0, Kpad - Kdim)))   # K -> 384

    # v7x (2 TCs): one image per "parallel" grid step so both cores get work.
    # v5e/v6e (1 TC): fuse the whole batch into a single grid step.
    NB = 1 if (_tensorcores_per_chip() >= 2 and N > 1) else N
    grid = (N // NB,)

    flops = 2 * N * S * Kdim * Cout + 2 * N * S * Cout * nc
    bytes_acc = int(patches.size * 2 + packed["wc"].size * 2
                    + 4 * (packed["bc"].size + packed["wf"].size
                           + packed["bf"].size + N * nc))

    out = pl.pallas_call(
        _mynet_kernel,
        out_shape=jax.ShapeDtypeStruct((N, 1, nc), x_nchw.dtype),
        grid=grid,
        in_specs=[
            pl.BlockSpec((NB, S, Kpad), lambda n: (n, 0, 0)),
            pl.BlockSpec((Kpad, Cout), lambda n: (0, 0)),
            pl.BlockSpec((1, Cout), lambda n: (0, 0)),
            pl.BlockSpec((S, nc * Cout), lambda n: (0, 0)),
            pl.BlockSpec((1, nc), lambda n: (0, 0)),
        ],
        out_specs=pl.BlockSpec((NB, 1, nc), lambda n: (n, 0, 0)),
        compiler_params=pltpu.CompilerParams(dimension_semantics=("parallel",)),
        cost_estimate=pl.CostEstimate(flops=flops, transcendentals=0,
                                      bytes_accessed=bytes_acc),
    )(patches, packed["wc"], packed["bc"], packed["wf"], packed["bf"])
    return out.reshape(N, nc)


def _reference_forward(x_nchw, params):
    """Pure-JAX reference matching PyTorch MyNet.forward semantics."""
    w_hwio = jnp.transpose(params["w_conv"], (2, 3, 1, 0))      # OIHW -> HWIO
    conv = jax.lax.conv_general_dilated(
        x_nchw, w_hwio, window_strides=(STRIDE, STRIDE),
        padding=((PAD, PAD), (PAD, PAD)),
        dimension_numbers=("NCHW", "HWIO", "NCHW"),
        precision=jax.lax.Precision.HIGHEST)
    conv = conv + params["b_conv"][None, :, None, None]
    relu = jnp.maximum(conv, 0.0)                               # (N, 64, 31, 31)
    flat = relu.reshape(relu.shape[0], -1)                      # torch.flatten(x, 1)
    return jnp.dot(flat, params["w_fc"].T,
                   precision=jax.lax.Precision.HIGHEST) + params["b_fc"]


if __name__ == "__main__":
    # fc1 expects 31*31*64 features -> the 11x11/stride-4/pad-2 conv must output 31x31,
    # so the input spatial size implied by the module is 128x128.
    N, Cin, H, W = 2, 3, 128, 128
    Cout, num_classes = 64, 2
    OH = OW = 31

    key = jax.random.PRNGKey(0)
    k = jax.random.split(key, 5)
    x = jax.random.normal(k[0], (N, Cin, H, W), dtype=jnp.float32)

    params = {
        "w_conv": jax.random.normal(k[1], (Cout, Cin, KH, KW), jnp.float32) * 0.05,
        "b_conv": jax.random.normal(k[2], (Cout,), jnp.float32) * 0.1,
        "w_fc": jax.random.normal(k[3], (num_classes, OH * OW * Cout), jnp.float32) * 0.01,
        "b_fc": jax.random.normal(k[4], (num_classes,), jnp.float32) * 0.1,
    }

    # One-time weight repacking (hoisted out of the forward pass).
    packed = prepare_params(params, oh=OH, ow=OW)

    fwd = jax.jit(mynet_forward)
    out = jax.block_until_ready(fwd(x, packed))
    ref = jax.block_until_ready(_reference_forward(x, params))

    assert out.shape == (N, num_classes)
    max_err = float(jnp.max(jnp.abs(out - ref)))
    assert jnp.allclose(out, ref, atol=2e-2, rtol=2e-3), max_err

    print("KERNEL_OK")
</pallas_src>

<mosaic_0001>
module attributes {stable_mosaic.version = 11 : i64} {
  func.func @_mynet_kernel(%arg0: i32, %arg1: memref<2x961x384xbf16, #tpu.memory_space<vmem>>, %arg2: memref<384x64xbf16, #tpu.memory_space<vmem>>, %arg3: memref<1x64xf32, #tpu.memory_space<vmem>>, %arg4: memref<961x128xf32, #tpu.memory_space<vmem>>, %arg5: memref<1x2xf32, #tpu.memory_space<vmem>>, %arg6: memref<2x1x2xf32, #tpu.memory_space<vmem>>) attributes {dimension_semantics = [#tpu.dimension_semantics<parallel>], iteration_bounds = array<i64: 1>, scalar_prefetch = 0 : i64, scratch_operands = 0 : i64, tpu.core_type = #tpu.core_type<tc>, window_params = [{transform_indices = @transform_0, window_bounds = array<i64: 2, 961, 384>}, {pipeline_mode = #tpu.pipeline_mode<synchronous>, transform_indices = @transform_1, window_bounds = array<i64: 384, 64>}, {pipeline_mode = #tpu.pipeline_mode<synchronous>, transform_indices = @transform_2, window_bounds = array<i64: 1, 64>}, {pipeline_mode = #tpu.pipeline_mode<synchronous>, transform_indices = @transform_3, window_bounds = array<i64: 961, 128>}, {pipeline_mode = #tpu.pipeline_mode<synchronous>, transform_indices = @transform_4, window_bounds = array<i64: 1, 2>}, {transform_indices = @transform_5, window_bounds = array<i64: 2, 1, 2>}]} {
    %c0 = arith.constant 0 : index
    %c0_0 = arith.constant 0 : index
    %0 = vector.load %arg2[%c0, %c0_0] : memref<384x64xbf16, #tpu.memory_space<vmem>>, vector<384x64xbf16>
    %c0_1 = arith.constant 0 : index
    %c0_2 = arith.constant 0 : index
    %1 = vector.load %arg3[%c0_1, %c0_2] : memref<1x64xf32, #tpu.memory_space<vmem>>, vector<1x64xf32>
    %c0_3 = arith.constant 0 : index
    %c0_4 = arith.constant 0 : index
    %2 = vector.load %arg4[%c0_3, %c0_4] : memref<961x128xf32, #tpu.memory_space<vmem>>, vector<961x128xf32>
    %c0_5 = arith.constant 0 : index
    %c0_6 = arith.constant 0 : index
    %3 = vector.load %arg5[%c0_5, %c0_6] : memref<1x2xf32, #tpu.memory_space<vmem>>, vector<1x2xf32>
    %4 = tpu.iota {dimensions = array<i32: 1>} : vector<1x128xi32>
    %5 = tpu.iota {dimensions = array<i32: 1>} : vector<1x2xi32>
    %c0_7 = arith.constant 0 : index
    %c0_8 = arith.constant 0 : index
    %c0_9 = arith.constant 0 : index
    %6 = vector.load %arg1[%c0_7, %c0_8, %c0_9] : memref<2x961x384xbf16, #tpu.memory_space<vmem>>, vector<1x961x384xbf16>
    %7 = vector.shape_cast %6 : vector<1x961x384xbf16> to vector<961x384xbf16>
    %cst = arith.constant dense<0.000000e+00> : vector<961x64xf32>
    %8 = tpu.matmul %7, %0, %cst {dimension_numbers = #tpu.dot_dimension_numbers<[1], [0], [0], [1], [0, 0, 1, 1], [], []>} : vector<961x384xbf16>, vector<384x64xbf16>, vector<961x64xf32> -> vector<961x64xf32>
    %9 = vector.broadcast %1 : vector<1x64xf32> to vector<961x64xf32>
    %10 = arith.addf %8, %9 : vector<961x64xf32>
    %cst_10 = arith.constant 0.000000e+00 : f32
    %11 = vector.broadcast %cst_10 : f32 to vector<961x64xf32>
    %12 = arith.maximumf %10, %11 : vector<961x64xf32>
    %13 = tpu.concatenate %12, %12 in 1 : vector<961x64xf32>, vector<961x64xf32> -> vector<961x128xf32>
    %14 = arith.mulf %13, %2 : vector<961x128xf32>
    %cst_11 = arith.constant dense<0.000000e+00> : vector<128xf32>
    %15 = vector.multi_reduction <add>, %14, %cst_11 [0] : vector<961x128xf32> to vector<128xf32>
    %16 = vector.shape_cast %15 : vector<128xf32> to vector<1x128xf32>
    %c0_i32 = arith.constant 0 : i32
    %17 = vector.broadcast %c0_i32 : i32 to vector<1x128xi32>
    %18 = arith.cmpi sge, %4, %17 : vector<1x128xi32>
    %c64_i32 = arith.constant 64 : i32
    %19 = vector.broadcast %c64_i32 : i32 to vector<1x128xi32>
    %20 = arith.cmpi slt, %4, %19 : vector<1x128xi32>
    %21 = arith.andi %18, %20 : vector<1x128xi1>
    %cst_12 = arith.constant 0.000000e+00 : f32
    %22 = vector.broadcast %cst_12 : f32 to vector<1x128xf32>
    %23 = arith.select %21, %16, %22 : vector<1x128xi1>, vector<1x128xf32>
    %cst_13 = arith.constant dense<0.000000e+00> : vector<1xf32>
    %24 = vector.multi_reduction <add>, %23, %cst_13 [1] : vector<1x128xf32> to vector<1xf32>
    %25 = vector.shape_cast %24 : vector<1xf32> to vector<1x1xf32>
    %c0_i32_14 = arith.constant 0 : i32
    %26 = vector.broadcast %c0_i32_14 : i32 to vector<1x2xi32>
    %27 = arith.cmpi eq, %5, %26 : vector<1x2xi32>
    %cst_15 = arith.constant 0.000000e+00 : f32
    %28 = vector.shape_cast %25 : vector<1x1xf32> to vector<1x1xf32>
    %29 = vector.broadcast %28 : vector<1x1xf32> to vector<1x2xf32>
    %30 = vector.broadcast %cst_15 : f32 to vector<1x2xf32>
    %31 = arith.select %27, %29, %30 : vector<1x2xi1>, vector<1x2xf32>
    %32 = arith.addf %3, %31 : vector<1x2xf32>
    %c64_i32_16 = arith.constant 64 : i32
    %33 = vector.broadcast %c64_i32_16 : i32 to vector<1x128xi32>
    %34 = arith.cmpi sge, %4, %33 : vector<1x128xi32>
    %c128_i32 = arith.constant 128 : i32
    %35 = vector.broadcast %c128_i32 : i32 to vector<1x128xi32>
    %36 = arith.cmpi slt, %4, %35 : vector<1x128xi32>
    %37 = arith.andi %34, %36 : vector<1x128xi1>
    %cst_17 = arith.constant 0.000000e+00 : f32
    %38 = vector.broadcast %cst_17 : f32 to vector<1x128xf32>
    %39 = arith.select %37, %16, %38 : vector<1x128xi1>, vector<1x128xf32>
    %cst_18 = arith.constant dense<0.000000e+00> : vector<1xf32>
    %40 = vector.multi_reduction <add>, %39, %cst_18 [1] : vector<1x128xf32> to vector<1xf32>
    %41 = vector.shape_cast %40 : vector<1xf32> to vector<1x1xf32>
    %c1_i32 = arith.constant 1 : i32
    %42 = vector.broadcast %c1_i32 : i32 to vector<1x2xi32>
    %43 = arith.cmpi eq, %5, %42 : vector<1x2xi32>
    %cst_19 = arith.constant 0.000000e+00 : f32
    %44 = vector.shape_cast %41 : vector<1x1xf32> to vector<1x1xf32>
    %45 = vector.broadcast %44 : vector<1x1xf32> to vector<1x2xf32>
    %46 = vector.broadcast %cst_19 : f32 to vector<1x2xf32>
    %47 = arith.select %43, %45, %46 : vector<1x2xi1>, vector<1x2xf32>
    %48 = arith.addf %32, %47 : vector<1x2xf32>
    %c0_20 = arith.constant 0 : index
    %c0_21 = arith.constant 0 : index
    %c0_22 = arith.constant 0 : index
    %49 = vector.load %arg6[%c0_20, %c0_21, %c0_22] : memref<2x1x2xf32, #tpu.memory_space<vmem>>, vector<1x1x2xf32>
    %50 = vector.shape_cast %49 : vector<1x1x2xf32> to vector<1x2xf32>
    %51 = vector.shape_cast %48 : vector<1x2xf32> to vector<1x1x2xf32>
    tpu.vector_store %arg6[%c0_20, %c0_21, %c0_22], %51 {strides = array<i32>} : memref<2x1x2xf32, #tpu.memory_space<vmem>>, vector<1x1x2xf32>,
    %c1 = arith.constant 1 : index
    %c0_23 = arith.constant 0 : index
    %c0_24 = arith.constant 0 : index
    %52 = vector.load %arg1[%c1, %c0_23, %c0_24] : memref<2x961x384xbf16, #tpu.memory_space<vmem>>, vector<1x961x384xbf16>
    %53 = vector.shape_cast %52 : vector<1x961x384xbf16> to vector<961x384xbf16>
    %cst_25 = arith.constant dense<0.000000e+00> : vector<961x64xf32>
    %54 = tpu.matmul %53, %0, %cst_25 {dimension_numbers = #tpu.dot_dimension_numbers<[1], [0], [0], [1], [0, 0, 1, 1], [], []>} : vector<961x384xbf16>, vector<384x64xbf16>, vector<961x64xf32> -> vector<961x64xf32>
    %55 = vector.broadcast %1 : vector<1x64xf32> to vector<961x64xf32>
    %56 = arith.addf %54, %55 : vector<961x64xf32>
    %cst_26 = arith.constant 0.000000e+00 : f32
    %57 = vector.broadcast %cst_26 : f32 to vector<961x64xf32>
    %58 = arith.maximumf %56, %57 : vector<961x64xf32>
    %59 = tpu.concatenate %58, %58 in 1 : vector<961x64xf32>, vector<961x64xf32> -> vector<961x128xf32>
    %60 = arith.mulf %59, %2 : vector<961x128xf32>
    %cst_27 = arith.constant dense<0.000000e+00> : vector<128xf32>
    %61 = vector.multi_reduction <add>, %60, %cst_27 [0] : vector<961x128xf32> to vector<128xf32>
    %62 = vector.shape_cast %61 : vector<128xf32> to vector<1x128xf32>
    %c0_i32_28 = arith.constant 0 : i32
    %63 = vector.broadcast %c0_i32_28 : i32 to vector<1x128xi32>
    %64 = arith.cmpi sge, %4, %63 : vector<1x128xi32>
    %c64_i32_29 = arith.constant 64 : i32
    %65 = vector.broadcast %c64_i32_29 : i32 to vector<1x128xi32>
    %66 = arith.cmpi slt, %4, %65 : vector<1x128xi32>
    %67 = arith.andi %64, %66 : vector<1x128xi1>
    %cst_30 = arith.constant 0.000000e+00 : f32
    %68 = vector.broadcast %cst_30 : f32 to vector<1x128xf32>
    %69 = arith.select %67, %62, %68 : vector<1x128xi1>, vector<1x128xf32>
    %cst_31 = arith.constant dense<0.000000e+00> : vector<1xf32>
    %70 = vector.multi_reduction <add>, %69, %cst_31 [1] : vector<1x128xf32> to vector<1xf32>
    %71 = vector.shape_cast %70 : vector<1xf32> to vector<1x1xf32>
    %c0_i32_32 = arith.constant 0 : i32
    %72 = vector.broadcast %c0_i32_32 : i32 to vector<1x2xi32>
    %73 = arith.cmpi eq, %5, %72 : vector<1x2xi32>
    %cst_33 = arith.constant 0.000000e+00 : f32
    %74 = vector.shape_cast %71 : vector<1x1xf32> to vector<1x1xf32>
    %75 = vector.broadcast %74 : vector<1x1xf32> to vector<1x2xf32>
    %76 = vector.broadcast %cst_33 : f32 to vector<1x2xf32>
    %77 = arith.select %73, %75, %76 : vector<1x2xi1>, vector<1x2xf32>
    %78 = arith.addf %3, %77 : vector<1x2xf32>
    %c64_i32_34 = arith.constant 64 : i32
    %79 = vector.broadcast %c64_i32_34 : i32 to vector<1x128xi32>
    %80 = arith.cmpi sge, %4, %79 : vector<1x128xi32>
    %c128_i32_35 = arith.constant 128 : i32
    %81 = vector.broadcast %c128_i32_35 : i32 to vector<1x128xi32>
    %82 = arith.cmpi slt, %4, %81 : vector<1x128xi32>
    %83 = arith.andi %80, %82 : vector<1x128xi1>
    %cst_36 = arith.constant 0.000000e+00 : f32
    %84 = vector.broadcast %cst_36 : f32 to vector<1x128xf32>
    %85 = arith.select %83, %62, %84 : vector<1x128xi1>, vector<1x128xf32>
    %cst_37 = arith.constant dense<0.000000e+00> : vector<1xf32>
    %86 = vector.multi_reduction <add>, %85, %cst_37 [1] : vector<1x128xf32> to vector<1xf32>
    %87 = vector.shape_cast %86 : vector<1xf32> to vector<1x1xf32>
    %c1_i32_38 = arith.constant 1 : i32
    %88 = vector.broadcast %c1_i32_38 : i32 to vector<1x2xi32>
    %89 = arith.cmpi eq, %5, %88 : vector<1x2xi32>
    %cst_39 = arith.constant 0.000000e+00 : f32
    %90 = vector.shape_cast %87 : vector<1x1xf32> to vector<1x1xf32>
    %91 = vector.broadcast %90 : vector<1x1xf32> to vector<1x2xf32>
    %92 = vector.broadcast %cst_39 : f32 to vector<1x2xf32>
    %93 = arith.select %89, %91, %92 : vector<1x2xi1>, vector<1x2xf32>
    %94 = arith.addf %78, %93 : vector<1x2xf32>
    %c1_40 = arith.constant 1 : index
    %c0_41 = arith.constant 0 : index
    %c0_42 = arith.constant 0 : index
    %95 = vector.load %arg6[%c1_40, %c0_41, %c0_42] : memref<2x1x2xf32, #tpu.memory_space<vmem>>, vector<1x1x2xf32>
    %96 = vector.shape_cast %95 : vector<1x1x2xf32> to vector<1x2xf32>
    %97 = vector.shape_cast %94 : vector<1x2xf32> to vector<1x1x2xf32>
    tpu.vector_store %arg6[%c1_40, %c0_41, %c0_42], %97 {strides = array<i32>} : memref<2x1x2xf32, #tpu.memory_space<vmem>>, vector<1x1x2xf32>,
    return
  }
  func.func @transform_0(%arg0: i32) -> (i32, i32, i32) {
    %c0_i32 = arith.constant 0 : i32
    %c0_i32_0 = arith.constant 0 : i32
    %c0_i32_1 = arith.constant 0 : i32
    return %arg0, %c0_i32, %c0_i32_0 : i32, i32, i32
  }
  func.func @transform_1(%arg0: i32) -> (i32, i32) {
    %c0_i32 = arith.constant 0 : i32
    %c0_i32_0 = arith.constant 0 : i32
    %c0_i32_1 = arith.constant 0 : i32
    return %c0_i32, %c0_i32_0 : i32, i32
  }
  func.func @transform_2(%arg0: i32) -> (i32, i32) {
    %c0_i32 = arith.constant 0 : i32
    %c0_i32_0 = arith.constant 0 : i32
    %c0_i32_1 = arith.constant 0 : i32
    return %c0_i32, %c0_i32_0 : i32, i32
  }
  func.func @transform_3(%arg0: i32) -> (i32, i32) {
    %c0_i32 = arith.constant 0 : i32
    %c0_i32_0 = arith.constant 0 : i32
    %c0_i32_1 = arith.constant 0 : i32
    return %c0_i32, %c0_i32_0 : i32, i32
  }
  func.func @transform_4(%arg0: i32) -> (i32, i32) {
    %c0_i32 = arith.constant 0 : i32
    %c0_i32_0 = arith.constant 0 : i32
    %c0_i32_1 = arith.constant 0 : i32
    return %c0_i32, %c0_i32_0 : i32, i32
  }
  func.func @transform_5(%arg0: i32) -> (i32, i32, i32) {
    %c0_i32 = arith.constant 0 : i32
    %c0_i32_0 = arith.constant 0 : i32
    %c0_i32_1 = arith.constant 0 : i32
    return %arg0, %c0_i32, %c0_i32_0 : i32, i32, i32
  }
}

</mosaic_0001>

<bundles_post_ra>
// kernel: mynet_forward.1
= control target key start
LH: loop header
LB: loop body
LE: loop exit
PB: predicated region body
PF: predicated region fallthrough
CT: control target
= control target key end

     0   :  { %v9416_v1 = vmov 0   ;;  %v14279_v22 = vmov 0.0   ;;  %s14224_s0 = inlined_call_operand.vmem [shape: bf16[2,961,384], index: 0, kind: input, shape index: {}]   ;;  %s14225_s1 = inlined_call_operand.vmem [shape: bf16[384,64], index: 1, kind: input, shape index: {}]   ;;  %s14226_s2 = inlined_call_operand.vmem [shape: f32[1,64], index: 2, kind: input, shape index: {}]   ;;  %s14227_s3 = inlined_call_operand.vmem [shape: f32[961,128], index: 3, kind: input, shape index: {}]   ;;  %s14228_s4 = inlined_call_operand.vmem [shape: f32[1,2], index: 4, kind: input, shape index: {}]   ;;  %s14229_s5 = inlined_call_operand.hbm [shape: f32[2,1,2], index: 5, kind: output, shape index: {}]  }
   0x1   :  { %v8878_v0 = vld [vmem:[%s14225_s1] sm:$0xff]   ;;  %1558 = vmatprep.subr.bf16.mxu0 %v9416_v1  ;;  %4808 = vmatprep.subr.bf16.mxu1 %v9416_v1  ;;  %v8879_v2 = vld [vmem:[%s14225_s1 + $0x8] sm:$0xff]   ;;  %v8880_v3 = vld [vmem:[%s14225_s1 + $0x10] sm:$0xff]  }
   0x2   :  { %1559 = vmatpush1.bf16.msra.mxu0 %v8878_v0  ;;  %4809 = vmatpush1.bf16.msra.mxu1 %v8878_v0  ;;  %v8881_v4 = vld [vmem:[%s14225_s1 + $0x18] sm:$0xff]   ;;  %v8882_v5 = vld [vmem:[%s14225_s1 + $0x20] sm:$0xff]   ;;  %v8883_v7 = vld [vmem:[%s14225_s1 + $0x28] sm:$0xff]  }
   0x3   :  { %1560 = vmatprep.subr.bf16.mxu0 %v9416_v1  ;;  %4810 = vmatprep.subr.bf16.mxu1 %v9416_v1  ;;  %v8896_v6 = vld [vmem:[%s14224_s0 + $0x4] ss:$12 sps:$4 sm:$0xff]   ;;  %v8885_v10 = vld [vmem:[%s14225_s1 + $0x38] sm:$0xff]   ;;  %v8887_v12 = vld [vmem:[%s14225_s1 + $0x48] sm:$0xff]  }
   0x4   :  { %v8899_v8 = vld [vmem:[%s14224_s0 + $0x5b0] ss:$12 sps:$4 sm:$0xff]   ;;  %1590 = vmatprep.mubr.bf16.mxu0 %v8896_v6  ;;  %v8886_v11 = vld [vmem:[%s14225_s1 + $0x40] sm:$0xff]   ;;  %v8891_v16 = vld [vmem:[%s14225_s1 + $0x68] sm:$0xff]  }
   0x5   :  { %4840 = vmatprep.mubr.bf16.mxu1 %v8899_v8  ;;  %v8884_v9 = vld [vmem:[%s14225_s1 + $0x30] sm:$0xff]   ;;  %v8889_v14 = vld [vmem:[%s14225_s1 + $0x58] sm:$0xff]   ;;  %v8890_v15 = vld [vmem:[%s14225_s1 + $0x60] sm:$0xff]  }
   0x6   :  { %1561 = vmatpush1.bf16.msra.mxu0 %v8879_v2  ;;  %4811 = vmatpush1.bf16.msra.mxu1 %v8879_v2  ;;  %v8888_v13 = vld [vmem:[%s14225_s1 + $0x50] sm:$0xff]   ;;  %v8893_v18 = vld [vmem:[%s14225_s1 + $0x78] sm:$0xff]   ;;  %v8894_v19 = vld [vmem:[%s14224_s0] ss:$12 sps:$4 sm:$0xff]  }
   0x7   :  { %1562 = vmatprep.subr.bf16.mxu0 %v9416_v1  ;;  %4812 = vmatprep.subr.bf16.mxu1 %v9416_v1  ;;  %v8892_v17 = vld [vmem:[%s14225_s1 + $0x70] sm:$0xff]   ;;  %v8897_v20 = vld [vmem:[%s14224_s0 + $0x5ac] ss:$12 sps:$4 sm:$0xff]   ;;  %v8900_v21 = vld [vmem:[%s14225_s1 + $0x80] sm:$0xff]  }
   0x8   :  { %v8901_v23 = vld [vmem:[%s14224_s0 + $0x1c] ss:$12 sps:$4 sm:$0xff]   ;;  %v8905_v26 = vld [vmem:[%s14224_s0 + $0x18] ss:$12 sps:$4 sm:$0xff]   ;;  %v8907_v28 = vld [vmem:[%s14224_s0 + $0x34] ss:$12 sps:$4 sm:$0xff]  }
   0x9   :  { %v8903_v24 = vld [vmem:[%s14224_s0 + $0x5c8] ss:$12 sps:$4 sm:$0xff]   ;;  %v8906_v27 = vld [vmem:[%s14224_s0 + $0x5c4] ss:$12 sps:$4 sm:$0xff]   ;;  %v8909_v29 = vld [vmem:[%s14224_s0 + $0x5e0] ss:$12 sps:$4 sm:$0xff]  }
   0xa   :  { %1563 = vmatpush1.bf16.msra.mxu0 %v8880_v3  ;;  %4813 = vmatpush1.bf16.msra.mxu1 %v8880_v3  ;;  %v8943_v25 = vld [vmem:[%s14225_s1 + $0x88] sm:$0xff]   ;;  %v8992_v30 = vld [vmem:[%s14225_s1 + $0x90] sm:$0xff]   ;;  %v8915_v34 = vld [vmem:[%s14224_s0 + $0x5f8] ss:$12 sps:$4 sm:$0xff]  }
   0xb   :  { %1564 = vmatprep.subr.bf16.mxu0 %v9416_v1  ;;  %4814 = vmatprep.subr.bf16.mxu1 %v9416_v1  ;;  %v8911_v31 = vld [vmem:[%s14224_s0 + $0x30] ss:$12 sps:$4 sm:$0xff]   ;;  %v8913_v33 = vld [vmem:[%s14224_s0 + $0x4c] ss:$12 sps:$4 sm:$0xff]   ;;  %v8917_v35 = vld [vmem:[%s14224_s0 + $0x48] ss:$12 sps:$4 sm:$0xff]  }
   0xc   :  { %v8912_v32 = vld [vmem:[%s14224_s0 + $0x5dc] ss:$12 sps:$4 sm:$0xff]   ;;  %v8918_v36 = vld [vmem:[%s14224_s0 + $0x5f4] ss:$12 sps:$4 sm:$0xff]   ;;  %v8919_v37 = vld [vmem:[%s14224_s0 + $0x64] ss:$12 sps:$4 sm:$0xff]  }
   0xd   :  { %v8921_v38 = vld [vmem:[%s14224_s0 + $0x610] ss:$12 sps:$4 sm:$0xff]   ;;  %v8923_v39 = vld [vmem:[%s14224_s0 + $0x60] ss:$12 sps:$4 sm:$0xff]   ;;  %v8927_v42 = vld [vmem:[%s14224_s0 + $0x628] ss:$12 sps:$4 sm:$0xff]  }
   0xe   :  { %1565 = vmatpush1.bf16.msra.mxu0 %v8881_v4  ;;  %4815 = vmatpush1.bf16.msra.mxu1 %v8881_v4  ;;  %v8924_v40 = vld [vmem:[%s14224_s0 + $0x60c] ss:$12 sps:$4 sm:$0xff]   ;;  %v8925_v41 = vld [vmem:[%s14224_s0 + $0x7c] ss:$12 sps:$4 sm:$0xff]   ;;  %v8930_v44 = vld [vmem:[%s14224_s0 + $0x624] ss:$12 sps:$4 sm:$0xff]  }
   0xf   :  { %1566 = vmatprep.subr.bf16.mxu0 %v9416_v1  ;;  %4816 = vmatprep.subr.bf16.mxu1 %v9416_v1  ;;  %v8929_v43 = vld [vmem:[%s14224_s0 + $0x78] ss:$12 sps:$4 sm:$0xff]   ;;  %v8931_v45 = vld [vmem:[%s14224_s0 + $0x94] ss:$12 sps:$4 sm:$0xff]   ;;  %v8935_v47 = vld [vmem:[%s14224_s0 + $0x90] ss:$12 sps:$4 sm:$0xff]  }
  0x10   :  { %v8933_v46 = vld [vmem:[%s14224_s0 + $0x640] ss:$12 sps:$4 sm:$0xff]   ;;  %v8936_v48 = vld [vmem:[%s14224_s0 + $0x63c] ss:$12 sps:$4 sm:$0xff]   ;;  %v8939_v50 = vld [vmem:[%s14224_s0 + $0x658] ss:$12 sps:$4 sm:$0xff]  }
  0x11   :  { %v8937_v49 = vld [vmem:[%s14224_s0 + $0xac] ss:$12 sps:$4 sm:$0xff]   ;;  %v8941_v51 = vld [vmem:[%s14224_s0 + $0xa8] ss:$12 sps:$4 sm:$0xff]   ;;  %v8944_v53 = vld [vmem:[%s14224_s0 + $0xc4] ss:$12 sps:$4 sm:$0xff]  }
  0x12   :  { %1567 = vmatpush1.bf16.msra.mxu0 %v8882_v5  ;;  %4817 = vmatpush1.bf16.msra.mxu1 %v8882_v5  ;;  %v8942_v52 = vld [vmem:[%s14224_s0 + $0x654] ss:$12 sps:$4 sm:$0xff]   ;;  %v8946_v54 = vld [vmem:[%s14224_s0 + $0x670] ss:$12 sps:$4 sm:$0xff]   ;;  %v8949_v57 = vld [vmem:[%s14224_s0 + $0x66c] ss:$12 sps:$4 sm:$0xff]  }
  0x13   :  { %1568 = vmatprep.subr.bf16.mxu0 %v9416_v1  ;;  %4818 = vmatprep.subr.bf16.mxu1 %v9416_v1  ;;  %v9040_v55 = vld [vmem:[%s14225_s1 + $0x98] sm:$0xff]   ;;  %v8948_v56 = vld [vmem:[%s14224_s0 + $0xc0] ss:$12 sps:$4 sm:$0xff]   ;;  %v8952_v59 = vld [vmem:[%s14224_s0 + $0x688] ss:$12 sps:$4 sm:$0xff]  }
  0x14   :  { %v8950_v58 = vld [vmem:[%s14224_s0 + $0xdc] ss:$12 sps:$4 sm:$0xff]   ;;  %v8954_v60 = vld [vmem:[%s14224_s0 + $0xd8] ss:$12 sps:$4 sm:$0xff]   ;;  %v8956_v62 = vld [vmem:[%s14224_s0 + $0xf4] ss:$12 sps:$4 sm:$0xff]  }
  0x15   :  { %v8955_v61 = vld [vmem:[%s14224_s0 + $0x684] ss:$12 sps:$4 sm:$0xff]   ;;  %v8958_v63 = vld [vmem:[%s14224_s0 + $0x6a0] ss:$12 sps:$4 sm:$0xff]   ;;  %v8966_v4 = vld [vmem:[%s14224_s0 + $0x108] ss:$12 sps:$4 sm:$0xff]  }
  0x16   :  { %1569 = vmatpush1.bf16.msra.mxu0 %v8883_v7  ;;  %4819 = vmatpush1.bf16.msra.mxu1 %v8883_v7  ;;  %v8960_v0 = vld [vmem:[%s14224_s0 + $0xf0] ss:$12 sps:$4 sm:$0xff]   ;;  %v8962_v2 = vld [vmem:[%s14224_s0 + $0x10c] ss:$12 sps:$4 sm:$0xff]   ;;  %v8967_v5 = vld [vmem:[%s14224_s0 + $0x6b4] ss:$12 sps:$4 sm:$0xff]  }
  0x17   :  { %1570 = vmatprep.subr.bf16.mxu0 %v9416_v1  ;;  %4820 = vmatprep.subr.bf16.mxu1 %v9416_v1  ;;  %v8964_v3 = vld [vmem:[%s14224_s0 + $0x6b8] ss:$12 sps:$4 sm:$0xff]   ;;  %v8970_v7 = vld [vmem:[%s14224_s0 + $0x6d0] ss:$12 sps:$4 sm:$0xff]   ;;  %v8972_v8 = vld [vmem:[%s14224_s0 + $0x120] ss:$12 sps:$4 sm:$0xff]  }
  0x18   :  { %v8968_v6 = vld [vmem:[%s14224_s0 + $0x124] ss:$12 sps:$4 sm:$0xff]  }
  0x1a   :  { %1571 = vmatpush1.bf16.msra.mxu0 %v8884_v9  ;;  %4821 = vmatpush1.bf16.msra.mxu1 %v8884_v9  ;;  %v8973_v9 = vld [vmem:[%s14224_s0 + $0x6cc] ss:$12 sps:$4 sm:$0xff]  }
  0x1b   :  { %1572 = vmatprep.subr.bf16.mxu0 %v9416_v1  ;;  %4822 = vmatprep.subr.bf16.mxu1 %v9416_v1 }
  0x1e   :  { %1573 = vmatpush1.bf16.msra.mxu0 %v8885_v10  ;;  %4823 = vmatpush1.bf16.msra.mxu1 %v8885_v10  ;;  %v8974_v10 = vld [vmem:[%s14224_s0 + $0x13c] ss:$12 sps:$4 sm:$0xff]  }
  0x1f   :  { %1574 = vmatprep.subr.bf16.mxu0 %v9416_v1  ;;  %4824 = vmatprep.subr.bf16.mxu1 %v9416_v1 }
  0x22   :  { %1575 = vmatpush1.bf16.msra.mxu0 %v8886_v11  ;;  %4825 = vmatpush1.bf16.msra.mxu1 %v8886_v11  ;;  %v8976_v11 = vld [vmem:[%s14224_s0 + $0x6e8] ss:$12 sps:$4 sm:$0xff]  }
  0x23   :  { %1576 = vmatprep.subr.bf16.mxu0 %v9416_v1  ;;  %4826 = vmatprep.subr.bf16.mxu1 %v9416_v1 }
  0x26   :  { %1577 = vmatpush1.bf16.msra.mxu0 %v8887_v12  ;;  %4827 = vmatpush1.bf16.msra.mxu1 %v8887_v12  ;;  %v8978_v12 = vld [vmem:[%s14224_s0 + $0x138] ss:$12 sps:$4 sm:$0xff]  }
  0x27   :  { %1578 = vmatprep.subr.bf16.mxu0 %v9416_v1  ;;  %4828 = vmatprep.subr.bf16.mxu1 %v9416_v1 }
  0x2a   :  { %1579 = vmatpush1.bf16.msra.mxu0 %v8888_v13  ;;  %4829 = vmatpush1.bf16.msra.mxu1 %v8888_v13  ;;  %v8979_v13 = vld [vmem:[%s14224_s0 + $0x6e4] ss:$12 sps:$4 sm:$0xff]  }
  0x2b   :  { %1580 = vmatprep.subr.bf16.mxu0 %v9416_v1  ;;  %4830 = vmatprep.subr.bf16.mxu1 %v9416_v1 }
  0x2e   :  { %1581 = vmatpush1.bf16.msra.mxu0 %v8889_v14  ;;  %4831 = vmatpush1.bf16.msra.mxu1 %v8889_v14  ;;  %v8980_v14 = vld [vmem:[%s14224_s0 + $0x154] ss:$12 sps:$4 sm:$0xff]  }
  0x2f   :  { %1582 = vmatprep.subr.bf16.mxu0 %v9416_v1  ;;  %4832 = vmatprep.subr.bf16.mxu1 %v9416_v1 }
  0x32   :  { %1583 = vmatpush1.bf16.msra.mxu0 %v8890_v15  ;;  %4833 = vmatpush1.bf16.msra.mxu1 %v8890_v15  ;;  %v8982_v15 = vld [vmem:[%s14224_s0 + $0x700] ss:$12 sps:$4 sm:$0xff]  }
  0x33   :  { %1584 = vmatprep.subr.bf16.mxu0 %v9416_v1  ;;  %4834 = vmatprep.subr.bf16.mxu1 %v9416_v1 }
  0x36   :  { %1585 = vmatpush1.bf16.msra.mxu0 %v8891_v16  ;;  %4835 = vmatpush1.bf16.msra.mxu1 %v8891_v16  ;;  %v8984_v16 = vld [vmem:[%s14224_s0 + $0x150] ss:$12 sps:$4 sm:$0xff]  }
  0x37   :  { %1586 = vmatprep.subr.bf16.mxu0 %v9416_v1  ;;  %4836 = vmatprep.subr.bf16.mxu1 %v9416_v1 }
  0x3a   :  { %1587 = vmatpush1.bf16.msra.mxu0 %v8892_v17  ;;  %4837 = vmatpush1.bf16.msra.mxu1 %v8892_v17  ;;  %v8985_v17 = vld [vmem:[%s14224_s0 + $0x6fc] ss:$12 sps:$4 sm:$0xff]  }
  0x3b   :  { %1588 = vmatprep.subr.bf16.mxu0 %v9416_v1  ;;  %4838 = vmatprep.subr.bf16.mxu1 %v9416_v1  ;;  %v8961_v1 = vld [vmem:[%s14224_s0 + $0x69c] ss:$12 sps:$4 sm:$0xff]  }
  0x3e   :  { %1589 = vmatpush1.bf16.msra.mxu0 %v8893_v18  ;;  %4839 = vmatpush1.bf16.msra.mxu1 %v8893_v18  ;;  %v8986_v18 = vld [vmem:[%s14224_s0 + $0x16c] ss:$12 sps:$4 sm:$0xff]  }
  0x3f   :  { %7621 = vmatprep.subr.bf16.mxu0 %v14279_v22  ;;  %7881 = vmatprep.subr.bf16.mxu1 %v14279_v22 }
  0x41   :  { %1591 = vmatmul.mubr.bf16.vlgmr.msra.gmra.mrb[0].mxu0 %v8894_v19  ;;  %4841 = vmatmul.mubr.bf16.vlgmr.msra.gmra.mrb[0].mxu1 %v8897_v20  ;;  %v8988_v19 = vld [vmem:[%s14224_s0 + $0x718] ss:$12 sps:$4 sm:$0xff]  }
  0x42   :  { %7622 = vmatpush3.bf16.msra.mxu0 %v8900_v21  ;;  %7882 = vmatpush3.bf16.msra.mxu1 %v8900_v21  ;;  %v9084_v20 = vld [vmem:[%s14225_s1 + $0xa0] sm:$0xff]   ;;  %v8990_v21 = vld [vmem:[%s14224_s0 + $0x168] ss:$12 sps:$4 sm:$0xff]  }
  0x43   :  { %1598 = vmatprep.mubr.bf16.mxu0 %v8901_v23  ;;  %4848 = vmatprep.mubr.bf16.mxu1 %v8903_v24  ;;  %v8991_v23 = vld [vmem:[%s14224_s0 + $0x714] ss:$12 sps:$4 sm:$0xff]   ;;  %v8993_v24 = vld [vmem:[%s14224_s0 + $0x184] ss:$12 sps:$4 sm:$0xff]  }
  0x44   :  { %7623 = vmatprep.subr.bf16.mxu0 %v14279_v22  ;;  %7883 = vmatprep.subr.bf16.mxu1 %v14279_v22 }
  0x46   :  { %7624 = vmatpush3.bf16.msra.mxu0 %v8943_v25  ;;  %7884 = vmatpush3.bf16.msra.mxu1 %v8943_v25  ;;  %v8995_v25 = vld [vmem:[%s14224_s0 + $0x730] ss:$12 sps:$4 sm:$0xff]  }
  0x47   :  { %7625 = vmatprep.subr.bf16.mxu0 %v14279_v22  ;;  %7885 = vmatprep.subr.bf16.mxu1 %v14279_v22 }
  0x49   :  { %1599 = vmatmul.mubr.bf16.gmra.mrb[4].mxu0 %v8905_v26  ;;  %4849 = vmatmul.mubr.bf16.gmra.mrb[4].mxu1 %v8906_v27  ;;  %v8997_v26 = vld [vmem:[%s14224_s0 + $0x180] ss:$12 sps:$4 sm:$0xff]  }
  0x4a   :  { %1606 = vmatprep.mubr.bf16.mxu0 %v8907_v28  ;;  %4856 = vmatprep.mubr.bf16.mxu1 %v8909_v29  ;;  %v8998_v27 = vld [vmem:[%s14224_s0 + $0x72c] ss:$12 sps:$4 sm:$0xff]   ;;  %v8999_v28 = vld [vmem:[%s14224_s0 + $0x19c] ss:$12 sps:$4 sm:$0xff]  }
  0x4b   :  { %7626 = vmatpush3.bf16.msra.mxu0 %v8992_v30  ;;  %7886 = vmatpush3.bf16.msra.mxu1 %v8992_v30  ;;  %v9001_v29 = vld [vmem:[%s14224_s0 + $0x748] ss:$12 sps:$4 sm:$0xff]   ;;  %v9003_v30 = vld [vmem:[%s14224_s0 + $0x198] ss:$12 sps:$4 sm:$0xff]  }
  0x4c   :  { %7627 = vmatprep.subr.bf16.mxu0 %v14279_v22  ;;  %7887 = vmatprep.subr.bf16.mxu1 %v14279_v22 }
  0x4f   :  { %7628 = vmatpush3.bf16.msra.mxu0 %v9040_v55  ;;  %7888 = vmatpush3.bf16.msra.mxu1 %v9040_v55 }
  0x50   :  { %7629 = vmatprep.subr.bf16.mxu0 %v14279_v22  ;;  %7889 = vmatprep.subr.bf16.mxu1 %v14279_v22 }
  0x51   :  { %1607 = vmatmul.mubr.bf16.gmra.mrb[8].mxu0 %v8911_v31  ;;  %4857 = vmatmul.mubr.bf16.gmra.mrb[8].mxu1 %v8912_v32  ;;  %v9004_v31 = vld [vmem:[%s14224_s0 + $0x744] ss:$12 sps:$4 sm:$0xff]   ;;  %v9005_v32 = vld [vmem:[%s14224_s0 + $0x1b4] ss:$12 sps:$4 sm:$0xff]  }
  0x52   :  { %1614 = vmatprep.mubr.bf16.mxu0 %v8913_v33  ;;  %4864 = vmatprep.mubr.bf16.mxu1 %v8915_v34  ;;  %v9007_v33 = vld [vmem:[%s14224_s0 + $0x760] ss:$12 sps:$4 sm:$0xff]   ;;  %v9009_v34 = vld [vmem:[%s14224_s0 + $0x1b0] ss:$12 sps:$4 sm:$0xff]  }
  0x53   :  { %7630 = vmatpush3.bf16.msra.mxu0 %v9084_v20  ;;  %7890 = vmatpush3.bf16.msra.mxu1 %v9084_v20 }
  0x54   :  { %7631 = vmatprep.subr.bf16.mxu0 %v14279_v22  ;;  %7891 = vmatprep.subr.bf16.mxu1 %v14279_v22 }
  0x59   :  { %1615 = vmatmul.mubr.bf16.gmra.mrb[12].mxu0 %v8917_v35  ;;  %4865 = vmatmul.mubr.bf16.gmra.mrb[12].mxu1 %v8918_v36  ;;  %v9010_v35 = vld [vmem:[%s14224_s0 + $0x75c] ss:$12 sps:$4 sm:$0xff]   ;;  %v9011_v36 = vld [vmem:[%s14224_s0 + $0x1cc] ss:$12 sps:$4 sm:$0xff]  }
  0x5a   :  { %1622 = vmatprep.mubr.bf16.mxu0 %v8919_v37  ;;  %4872 = vmatprep.mubr.bf16.mxu1 %v8921_v38  ;;  %v9013_v37 = vld [vmem:[%s14224_s0 + $0x778] ss:$12 sps:$4 sm:$0xff]   ;;  %v9015_v38 = vld [vmem:[%s14224_s0 + $0x1c8] ss:$12 sps:$4 sm:$0xff]  }
  0x61   :  { %1623 = vmatmul.mubr.bf16.gmra.mrb[16].mxu0 %v8923_v39  ;;  %4873 = vmatmul.mubr.bf16.gmra.mrb[16].mxu1 %v8924_v40  ;;  %v9016_v39 = vld [vmem:[%s14224_s0 + $0x774] ss:$12 sps:$4 sm:$0xff]   ;;  %v9017_v40 = vld [vmem:[%s14224_s0 + $0x1e4] ss:$12 sps:$4 sm:$0xff]  }
  0x62   :  { %1630 = vmatprep.mubr.bf16.mxu0 %v8925_v41  ;;  %4880 = vmatprep.mubr.bf16.mxu1 %v8927_v42  ;;  %v9019_v41 = vld [vmem:[%s14224_s0 + $0x790] ss:$12 sps:$4 sm:$0xff]   ;;  %v9021_v42 = vld [vmem:[%s14224_s0 + $0x1e0] ss:$12 sps:$4 sm:$0xff]  }
  0x69   :  { %1631 = vmatmul.mubr.bf16.gmra.mrb[20].mxu0 %v8929_v43  ;;  %4881 = vmatmul.mubr.bf16.gmra.mrb[20].mxu1 %v8930_v44  ;;  %v9022_v43 = vld [vmem:[%s14224_s0 + $0x78c] ss:$12 sps:$4 sm:$0xff]   ;;  %v9023_v44 = vld [vmem:[%s14224_s0 + $0x1fc] ss:$12 sps:$4 sm:$0xff]  }
  0x6a   :  { %1638 = vmatprep.mubr.bf16.mxu0 %v8931_v45  ;;  %4888 = vmatprep.mubr.bf16.mxu1 %v8933_v46  ;;  %v9025_v45 = vld [vmem:[%s14224_s0 + $0x7a8] ss:$12 sps:$4 sm:$0xff]   ;;  %v9027_v46 = vld [vmem:[%s14224_s0 + $0x1f8] ss:$12 sps:$4 sm:$0xff]  }
  0x71   :  { %1639 = vmatmul.mubr.bf16.gmra.mrb[24].mxu0 %v8935_v47  ;;  %4889 = vmatmul.mubr.bf16.gmra.mrb[24].mxu1 %v8936_v48  ;;  %v9028_v47 = vld [vmem:[%s14224_s0 + $0x7a4] ss:$12 sps:$4 sm:$0xff]   ;;  %v9029_v48 = vld [vmem:[%s14224_s0 + $0x214] ss:$12 sps:$4 sm:$0xff]  }
  0x72   :  { %1646 = vmatprep.mubr.bf16.mxu0 %v8937_v49  ;;  %4896 = vmatprep.mubr.bf16.mxu1 %v8939_v50  ;;  %v9031_v49 = vld [vmem:[%s14224_s0 + $0x7c0] ss:$12 sps:$4 sm:$0xff]  }
  0x79   :  { %1647 = vmatmul.mubr.bf16.gmra.mrb[28].mxu0 %v8941_v51  ;;  %4897 = vmatmul.mubr.bf16.gmra.mrb[28].mxu1 %v8942_v52 }
  0x7a   :  { %1654 = vmatprep.mubr.bf16.mxu0 %v8944_v53  ;;  %4904 = vmatprep.mubr.bf16.mxu1 %v8946_v54 }
  0x81   :  { %1655 = vmatmul.mubr.bf16.gmra.mrb[32].mxu0 %v8948_v56  ;;  %4905 = vmatmul.mubr.bf16.gmra.mrb[32].mxu1 %v8949_v57 }
  0x82   :  { %1662 = vmatprep.mubr.bf16.mxu0 %v8950_v58  ;;  %4912 = vmatprep.mubr.bf16.mxu1 %v8952_v59 }
  0x89   :  { %1663 = vmatmul.mubr.bf16.gmra.mrb[36].mxu0 %v8954_v60  ;;  %4913 = vmatmul.mubr.bf16.gmra.mrb[36].mxu1 %v8955_v61 }
  0x8a   :  { %1670 = vmatprep.mubr.bf16.mxu0 %v8956_v62  ;;  %4920 = vmatprep.mubr.bf16.mxu1 %v8958_v63 }
  0x91   :  { %1671 = vmatmul.mubr.bf16.gmra.mrb[40].mxu0 %v8960_v0  ;;  %4921 = vmatmul.mubr.bf16.gmra.mrb[40].mxu1 %v8961_v1 }
  0x92   :  { %1678 = vmatprep.mubr.bf16.mxu0 %v8962_v2  ;;  %4928 = vmatprep.mubr.bf16.mxu1 %v8964_v3 }
  0x99   :  { %1679 = vmatmul.mubr.bf16.gmra.mrb[44].mxu0 %v8966_v4  ;;  %4929 = vmatmul.mubr.bf16.gmra.mrb[44].mxu1 %v8967_v5 }
  0x9a   :  { %1686 = vmatprep.mubr.bf16.mxu0 %v8968_v6  ;;  %4936 = vmatprep.mubr.bf16.mxu1 %v8970_v7 }
  0xa1   :  { %1687 = vmatmul.mubr.bf16.gmra.mrb[48].mxu0 %v8972_v8  ;;  %4937 = vmatmul.mubr.bf16.gmra.mrb[48].mxu1 %v8973_v9 }
  0xa2   :  { %1694 = vmatprep.mubr.bf16.mxu0 %v8974_v10  ;;  %4944 = vmatprep.mubr.bf16.mxu1 %v8976_v11 }
  0xa9   :  { %1695 = vmatmul.mubr.bf16.gmra.mrb[52].mxu0 %v8978_v12  ;;  %4945 = vmatmul.mubr.bf16.gmra.mrb[52].mxu1 %v8979_v13 }
  0xaa   :  { %1702 = vmatprep.mubr.bf16.mxu0 %v8980_v14  ;;  %4952 = vmatprep.mubr.bf16.mxu1 %v8982_v15 }
  0xb1   :  { %1703 = vmatmul.mubr.bf16.gmra.mrb[56].mxu0 %v8984_v16  ;;  %4953 = vmatmul.mubr.bf16.gmra.mrb[56].mxu1 %v8985_v17 }
  0xb2   :  { %1710 = vmatprep.mubr.bf16.mxu0 %v8986_v18  ;;  %4960 = vmatprep.mubr.bf16.mxu1 %v8988_v19 }
  0xb9   :  { %1711 = vmatmul.mubr.bf16.gmra.mrb[60].mxu0 %v8990_v21  ;;  %4961 = vmatmul.mubr.bf16.gmra.mrb[60].mxu1 %v8991_v23 }
  0xba   :  { %1718 = vmatprep.mubr.bf16.mxu0 %v8993_v24  ;;  %4968 = vmatprep.mubr.bf16.mxu1 %v8995_v25 }
  0xc1   :  { %1719 = vmatmul.mubr.bf16.gmra.mrb[64].mxu0 %v8997_v26  ;;  %4969 = vmatmul.mubr.bf16.gmra.mrb[64].mxu1 %v8998_v27 }
  0xc2   :  { %1726 = vmatprep.mubr.bf16.mxu0 %v8999_v28  ;;  %4976 = vmatprep.mubr.bf16.mxu1 %v9001_v29 }
  0xc9   :  { %1727 = vmatmul.mubr.bf16.gmra.mrb[68].mxu0 %v9003_v30  ;;  %4977 = vmatmul.mubr.bf16.gmra.mrb[68].mxu1 %v9004_v31 }
  0xca   :  { %1734 = vmatprep.mubr.bf16.mxu0 %v9005_v32  ;;  %4984 = vmatprep.mubr.bf16.mxu1 %v9007_v33 }
  0xd1   :  { %1735 = vmatmul.mubr.bf16.gmra.mrb[72].mxu0 %v9009_v34  ;;  %4985 = vmatmul.mubr.bf16.gmra.mrb[72].mxu1 %v9010_v35 }
  0xd2   :  { %1742 = vmatprep.mubr.bf16.mxu0 %v9011_v36  ;;  %4992 = vmatprep.mubr.bf16.mxu1 %v9013_v37 }
  0xd9   :  { %1743 = vmatmul.mubr.bf16.gmra.mrb[76].mxu0 %v9015_v38  ;;  %4993 = vmatmul.mubr.bf16.gmra.mrb[76].mxu1 %v9016_v39 }
  0xda   :  { %1750 = vmatprep.mubr.bf16.mxu0 %v9017_v40  ;;  %5000 = vmatprep.mubr.bf16.mxu1 %v9019_v41 }
  0xe1   :  { %1751 = vmatmul.mubr.bf16.gmra.mrb[80].mxu0 %v9021_v42  ;;  %5001 = vmatmul.mubr.bf16.gmra.mrb[80].mxu1 %v9022_v43 }
  0xe2   :  { %1758 = vmatprep.mubr.bf16.mxu0 %v9023_v44  ;;  %5008 = vmatprep.mubr.bf16.mxu1 %v9025_v45 }
  0xe9   :  { %1759 = vmatmul.mubr.bf16.gmra.mrb[84].mxu0 %v9027_v46  ;;  %5009 = vmatmul.mubr.bf16.gmra.mrb[84].mxu1 %v9028_v47 }
  0xea   :  { %1766 = vmatprep.mubr.bf16.mxu0 %v9029_v48  ;;  %5016 = vmatprep.mubr.bf16.mxu1 %v9031_v49 }
  0xeb   :  { %10 = vsyncpa [#allocation3], 0  ;;  %v9033_v50 = vld [vmem:[%s14224_s0 + $0x210] ss:$12 sps:$4 sm:$0xff]   ;;  %v9035_v52 = vld [vmem:[%s14224_s0 + $0x22c] ss:$12 sps:$4 sm:$0xff]  }
  0xec   :  { %v9034_v51 = vld [vmem:[%s14224_s0 + $0x7bc] ss:$12 sps:$4 sm:$0xff]   ;;  %v9037_v53 = vld [vmem:[%s14224_s0 + $0x7d8] ss:$12 sps:$4 sm:$0xff]   ;;  %v9041_v56 = vld [vmem:[%s14224_s0 + $0x7d4] ss:$12 sps:$4 sm:$0xff]  }
  0xed   :  { %v9133_v54 = vld [vmem:[%s14225_s1 + $0xa8] sm:$0xff]   ;;  %v9042_v57 = vld [vmem:[%s14224_s0 + $0x244] ss:$12 sps:$4 sm:$0xff]   ;;  %v9054_v1 = vld [vmem:[%s14224_s0 + $0x274] ss:$12 sps:$4 sm:$0xff]   ;;  %vm9418_vm0 = vmmov 0  }
  0xee   :  { %7632 = vmatpush3.bf16.msra.mxu0 %v9133_v54  ;;  %7892 = vmatpush3.bf16.msra.mxu1 %v9133_v54  ;;  %v9039_v55 = vld [vmem:[%s14224_s0 + $0x228] ss:$12 sps:$4 sm:$0xff]   ;;  %v9044_v58 = vld [vmem:[%s14224_s0 + $0x7f0] ss:$12 sps:$4 sm:$0xff]   ;;  %v9046_v59 = vld [vmem:[%s14224_s0 + $0x240] ss:$12 sps:$4 sm:$0xff]  }
  0xef   :  { %7633 = vmatprep.subr.bf16.mxu0 %v14279_v22  ;;  %7893 = vmatprep.subr.bf16.mxu1 %v14279_v22  ;;  %v9047_v60 = vld [vmem:[%s14224_s0 + $0x7ec] ss:$12 sps:$4 sm:$0xff]   ;;  %v9048_v61 = vld [vmem:[%s14224_s0 + $0x25c] ss:$12 sps:$4 sm:$0xff]   ;;  %v9053_v0 = vld [vmem:[%s14224_s0 + $0x804] ss:$12 sps:$4 sm:$0xff]  }
  0xf0   :  { %v9050_v62 = vld [vmem:[%s14224_s0 + $0x808] ss:$12 sps:$4 sm:$0xff]   ;;  %v9052_v63 = vld [vmem:[%s14224_s0 + $0x258] ss:$12 sps:$4 sm:$0xff]   ;;  %v9056_v2 = vld [vmem:[%s14224_s0 + $0x820] ss:$12 sps:$4 sm:$0xff]  }
  0xf1   :  { %1767 = vmatmul.mubr.bf16.gmra.mrb[88].mxu0 %v9033_v50  ;;  %5017 = vmatmul.mubr.bf16.gmra.mrb[88].mxu1 %v9034_v51  ;;  %v9058_v3 = vld [vmem:[%s14224_s0 + $0x270] ss:$12 sps:$4 sm:$0xff]   ;;  %v9060_v5 = vld [vmem:[%s14224_s0 + $0x28c] ss:$12 sps:$4 sm:$0xff]   ;;  %v9064_v7 = vld [vmem:[%s14224_s0 + $0x288] ss:$12 sps:$4 sm:$0xff]  }
  0xf2   :  { %1774 = vmatprep.mubr.bf16.mxu0 %v9035_v52  ;;  %5024 = vmatprep.mubr.bf16.mxu1 %v9037_v53  ;;  %v9059_v4 = vld [vmem:[%s14224_s0 + $0x81c] ss:$12 sps:$4 sm:$0xff]   ;;  %v9062_v6 = vld [vmem:[%s14224_s0 + $0x838] ss:$12 sps:$4 sm:$0xff]   ;;  %v9065_v8 = vld [vmem:[%s14224_s0 + $0x834] ss:$12 sps:$4 sm:$0xff]  }
  0xf3   :  { %v9066_v9 = vld [vmem:[%s14224_s0 + $0x2a4] ss:$12 sps:$4 sm:$0xff]   ;;  %v9070_v11 = vld [vmem:[%s14224_s0 + $0x2a0] ss:$12 sps:$4 sm:$0xff]   ;;  %v9072_v13 = vld [vmem:[%s14224_s0 + $0x2bc] ss:$12 sps:$4 sm:$0xff]  }
  0xf4   :  { %v9068_v10 = vld [vmem:[%s14224_s0 + $0x850] ss:$12 sps:$4 sm:$0xff]   ;;  %v9071_v12 = vld [vmem:[%s14224_s0 + $0x84c] ss:$12 sps:$4 sm:$0xff]   ;;  %v9074_v14 = vld [vmem:[%s14224_s0 + $0x868] ss:$12 sps:$4 sm:$0xff]  }
  0xf5   :  { %v9076_v15 = vld [vmem:[%s14224_s0 + $0x2b8] ss:$12 sps:$4 sm:$0xff]   ;;  %v9078_v17 = vld [vmem:[%s14224_s0 + $0x2d4] ss:$12 sps:$4 sm:$0xff]   ;;  %v9082_v20 = vld [vmem:[%s14224_s0 + $0x2d0] ss:$12 sps:$4 sm:$0xff]  }
  0xf6   :  { %v9077_v16 = vld [vmem:[%s14224_s0 + $0x864] ss:$12 sps:$4 sm:$0xff]   ;;  %v9080_v18 = vld [vmem:[%s14224_s0 + $0x880] ss:$12 sps:$4 sm:$0xff]   ;;  %v9083_v21 = vld [vmem:[%s14224_s0 + $0x87c] ss:$12 sps:$4 sm:$0xff]  }
  0xf7   :  { %v9178_v19 = vld [vmem:[%s14225_s1 + $0xb0] sm:$0xff]   ;;  %v9085_v23 = vld [vmem:[%s14224_s0 + $0x2ec] ss:$12 sps:$4 sm:$0xff]   ;;  %v9097_v31 = vld [vmem:[%s14224_s0 + $0x31c] ss:$12 sps:$4 sm:$0xff]   ;;  %s9419_s28 = smov 64  }
  0xf8   :  { %7634 = vmatpush3.bf16.msra.mxu0 %v9178_v19  ;;  %7894 = vmatpush3.bf16.msra.mxu1 %v9178_v19  ;;  %v9087_v24 = vld [vmem:[%s14224_s0 + $0x898] ss:$12 sps:$4 sm:$0xff]   ;;  %v9089_v25 = vld [vmem:[%s14224_s0 + $0x2e8] ss:$12 sps:$4 sm:$0xff]   ;;  %v9093_v28 = vld [vmem:[%s14224_s0 + $0x8b0] ss:$12 sps:$4 sm:$0xff]  }
  0xf9   :  { %1775 = vmatmul.mubr.bf16.gmra.mrb[92].mxu0 %v9039_v55  ;;  %5025 = vmatmul.mubr.bf16.gmra.mrb[92].mxu1 %v9041_v56  ;;  %v9090_v26 = vld [vmem:[%s14224_s0 + $0x894] ss:$12 sps:$4 sm:$0xff]   ;;  %v9091_v27 = vld [vmem:[%s14224_s0 + $0x304] ss:$12 sps:$4 sm:$0xff]   ;;  %v9096_v30 = vld [vmem:[%s14224_s0 + $0x8ac] ss:$12 sps:$4 sm:$0xff]  }
  0xfa   :  { %1782 = vmatprep.mubr.bf16.mxu0 %v9042_v57  ;;  %5032 = vmatprep.mubr.bf16.mxu1 %v9044_v58  ;;  %v9095_v29 = vld [vmem:[%s14224_s0 + $0x300] ss:$12 sps:$4 sm:$0xff]   ;;  %v9099_v32 = vld [vmem:[%s14224_s0 + $0x8c8] ss:$12 sps:$4 sm:$0xff]   ;;  %v9101_v33 = vld [vmem:[%s14224_s0 + $0x318] ss:$12 sps:$4 sm:$0xff]  }
  0xfb   :  { %7635 = vmatprep.subr.bf16.mxu0 %v14279_v22  ;;  %7895 = vmatprep.subr.bf16.mxu1 %v14279_v22  ;;  %v9102_v34 = vld [vmem:[%s14224_s0 + $0x8c4] ss:$12 sps:$4 sm:$0xff]   ;;  %v9103_v35 = vld [vmem:[%s14224_s0 + $0x334] ss:$12 sps:$4 sm:$0xff]   ;;  %v9108_v38 = vld [vmem:[%s14224_s0 + $0x8dc] ss:$12 sps:$4 sm:$0xff]  }
  0xfc   :  { %v9105_v36 = vld [vmem:[%s14224_s0 + $0x8e0] ss:$12 sps:$4 sm:$0xff]   ;;  %v9107_v37 = vld [vmem:[%s14224_s0 + $0x330] ss:$12 sps:$4 sm:$0xff]   ;;  %v9111_v40 = vld [vmem:[%s14224_s0 + $0x8f8] ss:$12 sps:$4 sm:$0xff]  }
  0xfd   :  { %v9109_v39 = vld [vmem:[%s14224_s0 + $0x34c] ss:$12 sps:$4 sm:$0xff]   ;;  %v9113_v41 = vld [vmem:[%s14224_s0 + $0x348] ss:$12 sps:$4 sm:$0xff]   ;;  %v9115_v43 = vld [vmem:[%s14224_s0 + $0x364] ss:$12 sps:$4 sm:$0xff]  }
  0xfe   :  { %v9114_v42 = vld [vmem:[%s14224_s0 + $0x8f4] ss:$12 sps:$4 sm:$0xff]   ;;  %v9117_v44 = vld [vmem:[%s14224_s0 + $0x910] ss:$12 sps:$4 sm:$0xff]   ;;  %v9120_v46 = vld [vmem:[%s14224_s0 + $0x90c] ss:$12 sps:$4 sm:$0xff]  }
  0xff   :  { %v9119_v45 = vld [vmem:[%s14224_s0 + $0x360] ss:$12 sps:$4 sm:$0xff]   ;;  %v9121_v47 = vld [vmem:[%s14224_s0 + $0x37c] ss:$12 sps:$4 sm:$0xff]   ;;  %v9125_v49 = vld [vmem:[%s14224_s0 + $0x378] ss:$12 sps:$4 sm:$0xff]  }
 0x100   :  { %v9123_v48 = vld [vmem:[%s14224_s0 + $0x928] ss:$12 sps:$4 sm:$0xff]   ;;  %v9126_v50 = vld [vmem:[%s14224_s0 + $0x924] ss:$12 sps:$4 sm:$0xff]   ;;  %v9129_v52 = vld [vmem:[%s14224_s0 + $0x940] ss:$12 sps:$4 sm:$0xff]  }
 0x101   :  { %1783 = vmatmul.mubr.bf16.gmra.mrb[96].mxu0 %v9046_v59  ;;  %5033 = vmatmul.mubr.bf16.gmra.mrb[96].mxu1 %v9047_v60  ;;  %v9127_v51 = vld [vmem:[%s14224_s0 + $0x394] ss:$12 sps:$4 sm:$0xff]   ;;  %v9225_v53 = vld [vmem:[%s14225_s1 + $0xb8] sm:$0xff]   ;;  %v9140_v60 = vld [vmem:[%s14224_s0 + $0x3c4] ss:$12 sps:$4 sm:$0xff]   ;;  %vm3203_vm1 = vcmask 523264  }
 0x102   :  { %1790 = vmatprep.mubr.bf16.mxu0 %v9048_v61  ;;  %5040 = vmatprep.mubr.bf16.mxu1 %v9050_v62  ;;  %v9131_v54 = vld [vmem:[%s14224_s0 + $0x390] ss:$12 sps:$4 sm:$0xff]   ;;  %v9134_v56 = vld [vmem:[%s14224_s0 + $0x3ac] ss:$12 sps:$4 sm:$0xff]   ;;  %v9138_v58 = vld [vmem:[%s14224_s0 + $0x3a8] ss:$12 sps:$4 sm:$0xff]  }
 0x103   :  { %7636 = vmatpush3.bf16.msra.mxu0 %v9225_v53  ;;  %7896 = vmatpush3.bf16.msra.mxu1 %v9225_v53  ;;  %v9132_v55 = vld [vmem:[%s14224_s0 + $0x93c] ss:$12 sps:$4 sm:$0xff]   ;;  %v9136_v57 = vld [vmem:[%s14224_s0 + $0x958] ss:$12 sps:$4 sm:$0xff]   ;;  %v9139_v59 = vld [vmem:[%s14224_s0 + $0x954] ss:$12 sps:$4 sm:$0xff]  }
 0x104   :  { %v9142_v61 = vld [vmem:[%s14224_s0 + $0x970] ss:$12 sps:$4 sm:$0xff]   ;;  %v9144_v62 = vld [vmem:[%s14224_s0 + $0x3c0] ss:$12 sps:$4 sm:$0xff]   ;;  %vm3565_vm2 = vcmask 1040384   ;;  %vm3592_vm7 = vcmask 8192  }
 0x105   :  { %v9175_v19 = vld [vmem:[%s14224_s0 + $0x9e4] ss:$12 sps:$4 sm:$0xff]   ;;  %v9226_v53 = vld [vmem:[%s14224_s0 + $0x514] ss:$12 sps:$4 sm:$0xff]   ;;  %s9420_s22 = smov [#allocation2]  }
 0x106   :  { %s6839_s23 = sshll.u32 %s9420_s22, 4  ;;  %s6840_s23 = int_to_ptr.vmem [resolvable:$true] %s6839_s23 }
 0x107   :  { %s9392_s24 = scalar_lea.vmem %s6840_s23, 32  ;;  %p9397_p1 = scmp.lt.s32.totalorder %s6840_s23, %s6840_s23 }
 0x108   :  { %p9393_p0 = scmp.ne.s32.totalorder %s6840_s23, %s9392_s24  ;;  %p9398_p2 = scmp.lt.s32.totalorder %s9392_s24, %s9392_s24 }
 0x109   :  { %1791 = vmatmul.mubr.bf16.gmra.mrb[100].mxu0 %v9052_v63  ;;  %5041 = vmatmul.mubr.bf16.gmra.mrb[100].mxu1 %v9053_v0  ;;  %v9145_v63 = vld [vmem:[%s14224_s0 + $0x96c] ss:$12 sps:$4 sm:$0xff]   ;;  %v9146_v0 = vld [vmem:[%s14224_s0 + $0x3dc] ss:$12 sps:$4 sm:$0xff]  }
 0x10a   :  { %1798 = vmatprep.mubr.bf16.mxu0 %v9054_v1  ;;  %5048 = vmatprep.mubr.bf16.mxu1 %v9056_v2  ;;  %v9148_v1 = vld [vmem:[%s14224_s0 + $0x988] ss:$12 sps:$4 sm:$0xff]   ;;  %v9150_v2 = vld [vmem:[%s14224_s0 + $0x3d8] ss:$12 sps:$4 sm:$0xff]   ;;  %p9399_p3 = por %p9398_p2, %p9397_p1 }
 0x10c   :  { %p9400_p4 = pnand %p9399_p3, %p9393_p0 }
 0x111   :  { %1799 = vmatmul.mubr.bf16.gmra.mrb[104].mxu0 %v9058_v3  ;;  %5049 = vmatmul.mubr.bf16.gmra.mrb[104].mxu1 %v9059_v4  ;;  %v9151_v3 = vld [vmem:[%s14224_s0 + $0x984] ss:$12 sps:$4 sm:$0xff]   ;;  %v9152_v4 = vld [vmem:[%s14224_s0 + $0x3f4] ss:$12 sps:$4 sm:$0xff]  }
 0x112   :  { %1806 = vmatprep.mubr.bf16.mxu0 %v9060_v5  ;;  %5056 = vmatprep.mubr.bf16.mxu1 %v9062_v6  ;;  %v9154_v5 = vld [vmem:[%s14224_s0 + $0x9a0] ss:$12 sps:$4 sm:$0xff]   ;;  %v9156_v6 = vld [vmem:[%s14224_s0 + $0x3f0] ss:$12 sps:$4 sm:$0xff]  }
 0x119   :  { %1807 = vmatmul.mubr.bf16.gmra.mrb[108].mxu0 %v9064_v7  ;;  %5057 = vmatmul.mubr.bf16.gmra.mrb[108].mxu1 %v9065_v8  ;;  %v9157_v7 = vld [vmem:[%s14224_s0 + $0x99c] ss:$12 sps:$4 sm:$0xff]   ;;  %v9158_v8 = vld [vmem:[%s14224_s0 + $0x40c] ss:$12 sps:$4 sm:$0xff]  }
 0x11a   :  { %1814 = vmatprep.mubr.bf16.mxu0 %v9066_v9  ;;  %5064 = vmatprep.mubr.bf16.mxu1 %v9068_v10  ;;  %v9160_v9 = vld [vmem:[%s14224_s0 + $0x9b8] ss:$12 sps:$4 sm:$0xff]   ;;  %v9162_v10 = vld [vmem:[%s14224_s0 + $0x408] ss:$12 sps:$4 sm:$0xff]  }
 0x121   :  { %1815 = vmatmul.mubr.bf16.gmra.mrb[112].mxu0 %v9070_v11  ;;  %5065 = vmatmul.mubr.bf16.gmra.mrb[112].mxu1 %v9071_v12  ;;  %v9163_v11 = vld [vmem:[%s14224_s0 + $0x9b4] ss:$12 sps:$4 sm:$0xff]   ;;  %v9164_v12 = vld [vmem:[%s14224_s0 + $0x424] ss:$12 sps:$4 sm:$0xff]  }
 0x122   :  { %1822 = vmatprep.mubr.bf16.mxu0 %v9072_v13  ;;  %5072 = vmatprep.mubr.bf16.mxu1 %v9074_v14  ;;  %v9166_v13 = vld [vmem:[%s14224_s0 + $0x9d0] ss:$12 sps:$4 sm:$0xff]   ;;  %v9168_v14 = vld [vmem:[%s14224_s0 + $0x420] ss:$12 sps:$4 sm:$0xff]  }
 0x129   :  { %1823 = vmatmul.mubr.bf16.gmra.mrb[116].mxu0 %v9076_v15  ;;  %5073 = vmatmul.mubr.bf16.gmra.mrb[116].mxu1 %v9077_v16  ;;  %v9169_v15 = vld [vmem:[%s14224_s0 + $0x9cc] ss:$12 sps:$4 sm:$0xff]   ;;  %v9170_v16 = vld [vmem:[%s14224_s0 + $0x43c] ss:$12 sps:$4 sm:$0xff]  }
 0x12a   :  { %1830 = vmatprep.mubr.bf16.mxu0 %v9078_v17  ;;  %5080 = vmatprep.mubr.bf16.mxu1 %v9080_v18  ;;  %v9172_v17 = vld [vmem:[%s14224_s0 + $0x9e8] ss:$12 sps:$4 sm:$0xff]   ;;  %v9174_v18 = vld [vmem:[%s14224_s0 + $0x438] ss:$12 sps:$4 sm:$0xff]  }
 0x131   :  { %1831 = vmatmul.mubr.bf16.gmra.mrb[120].mxu0 %v9082_v20  ;;  %5081 = vmatmul.mubr.bf16.gmra.mrb[120].mxu1 %v9083_v21  ;;  %v9176_v20 = vld [vmem:[%s14224_s0 + $0x454] ss:$12 sps:$4 sm:$0xff]  }
 0x132   :  { %1838 = vmatprep.mubr.bf16.mxu0 %v9085_v23  ;;  %5088 = vmatprep.mubr.bf16.mxu1 %v9087_v24  ;;  %v9179_v21 = vld [vmem:[%s14224_s0 + $0xa00] ss:$12 sps:$4 sm:$0xff]   ;;  %v9181_v23 = vld [vmem:[%s14224_s0 + $0x450] ss:$12 sps:$4 sm:$0xff]  }
 0x133   :  { %v9182_v24 = vld [vmem:[%s14224_s0 + $0x9fc] ss:$12 sps:$4 sm:$0xff]  }
 0x139   :  { %1839 = vmatmul.mubr.bf16.gmra.mrb[124].mxu0 %v9089_v25  ;;  %5089 = vmatmul.mubr.bf16.gmra.mrb[124].mxu1 %v9090_v26  ;;  %v9183_v25 = vld [vmem:[%s14224_s0 + $0x46c] ss:$12 sps:$4 sm:$0xff]  }
 0x13a   :  { %1846 = vmatprep.mubr.bf16.mxu0 %v9091_v27  ;;  %5096 = vmatprep.mubr.bf16.mxu1 %v9093_v28  ;;  %v9185_v26 = vld [vmem:[%s14224_s0 + $0xa18] ss:$12 sps:$4 sm:$0xff]   ;;  %v9187_v27 = vld [vmem:[%s14224_s0 + $0x468] ss:$12 sps:$4 sm:$0xff]  }
 0x13b   :  { %v9188_v28 = vld [vmem:[%s14224_s0 + $0xa14] ss:$12 sps:$4 sm:$0xff]  }
 0x141   :  { %1847 = vmatmul.mubr.bf16.gmra.mrb[128].mxu0 %v9095_v29  ;;  %5097 = vmatmul.mubr.bf16.gmra.mrb[128].mxu1 %v9096_v30  ;;  %v9189_v29 = vld [vmem:[%s14224_s0 + $0x484] ss:$12 sps:$4 sm:$0xff]  }
 0x142   :  { %1854 = vmatprep.mubr.bf16.mxu0 %v9097_v31  ;;  %5104 = vmatprep.mubr.bf16.mxu1 %v9099_v32  ;;  %v9191_v30 = vld [vmem:[%s14224_s0 + $0xa30] ss:$12 sps:$4 sm:$0xff]   ;;  %v9193_v31 = vld [vmem:[%s14224_s0 + $0x480] ss:$12 sps:$4 sm:$0xff]  }
 0x143   :  { %v9194_v32 = vld [vmem:[%s14224_s0 + $0xa2c] ss:$12 sps:$4 sm:$0xff]  }
 0x149   :  { %1855 = vmatmul.mubr.bf16.gmra.mrb[132].mxu0 %v9101_v33  ;;  %5105 = vmatmul.mubr.bf16.gmra.mrb[132].mxu1 %v9102_v34  ;;  %v9195_v33 = vld [vmem:[%s14224_s0 + $0x49c] ss:$12 sps:$4 sm:$0xff]  }
 0x14a   :  { %1862 = vmatprep.mubr.bf16.mxu0 %v9103_v35  ;;  %5112 = vmatprep.mubr.bf16.mxu1 %v9105_v36  ;;  %v9197_v34 = vld [vmem:[%s14224_s0 + $0xa48] ss:$12 sps:$4 sm:$0xff]   ;;  %v9199_v35 = vld [vmem:[%s14224_s0 + $0x498] ss:$12 sps:$4 sm:$0xff]  }
 0x14b   :  { %v9200_v36 = vld [vmem:[%s14224_s0 + $0xa44] ss:$12 sps:$4 sm:$0xff]  }
 0x151   :  { %1863 = vmatmul.mubr.bf16.gmra.mrb[136].mxu0 %v9107_v37  ;;  %5113 = vmatmul.mubr.bf16.gmra.mrb[136].mxu1 %v9108_v38  ;;  %v9201_v37 = vld [vmem:[%s14224_s0 + $0x4b4] ss:$12 sps:$4 sm:$0xff]  }
 0x152   :  { %1870 = vmatprep.mubr.bf16.mxu0 %v9109_v39  ;;  %5120 = vmatprep.mubr.bf16.mxu1 %v9111_v40  ;;  %v9203_v38 = vld [vmem:[%s14224_s0 + $0xa60] ss:$12 sps:$4 sm:$0xff]   ;;  %v9205_v39 = vld [vmem:[%s14224_s0 + $0x4b0] ss:$12 sps:$4 sm:$0xff]  }
 0x153   :  { %v9206_v40 = vld [vmem:[%s14224_s0 + $0xa5c] ss:$12 sps:$4 sm:$0xff]  }
 0x159   :  { %1871 = vmatmul.mubr.bf16.gmra.mrb[140].mxu0 %v9113_v41  ;;  %5121 = vmatmul.mubr.bf16.gmra.mrb[140].mxu1 %v9114_v42  ;;  %v9207_v41 = vld [vmem:[%s14224_s0 + $0x4cc] ss:$12 sps:$4 sm:$0xff]  }
 0x15a   :  { %1878 = vmatprep.mubr.bf16.mxu0 %v9115_v43  ;;  %5128 = vmatprep.mubr.bf16.mxu1 %v9117_v44  ;;  %v9209_v42 = vld [vmem:[%s14224_s0 + $0xa78] ss:$12 sps:$4 sm:$0xff]   ;;  %v9211_v43 = vld [vmem:[%s14224_s0 + $0x4c8] ss:$12 sps:$4 sm:$0xff]  }
 0x15b   :  { %v9212_v44 = vld [vmem:[%s14224_s0 + $0xa74] ss:$12 sps:$4 sm:$0xff]  }
 0x161   :  { %1879 = vmatmul.mubr.bf16.gmra.mrb[144].mxu0 %v9119_v45  ;;  %5129 = vmatmul.mubr.bf16.gmra.mrb[144].mxu1 %v9120_v46  ;;  %v9213_v45 = vld [vmem:[%s14224_s0 + $0x4e4] ss:$12 sps:$4 sm:$0xff]  }
 0x162   :  { %1886 = vmatprep.mubr.bf16.mxu0 %v9121_v47  ;;  %5136 = vmatprep.mubr.bf16.mxu1 %v9123_v48  ;;  %v9215_v46 = vld [vmem:[%s14224_s0 + $0xa90] ss:$12 sps:$4 sm:$0xff]   ;;  %v9217_v47 = vld [vmem:[%s14224_s0 + $0x4e0] ss:$12 sps:$4 sm:$0xff]  }
 0x163   :  { %v9218_v48 = vld [vmem:[%s14224_s0 + $0xa8c] ss:$12 sps:$4 sm:$0xff]  }
 0x169   :  { %1887 = vmatmul.mubr.bf16.gmra.mrb[148].mxu0 %v9125_v49  ;;  %5137 = vmatmul.mubr.bf16.gmra.mrb[148].mxu1 %v9126_v50  ;;  %v9219_v49 = vld [vmem:[%s14224_s0 + $0x4fc] ss:$12 sps:$4 sm:$0xff]  }
 0x16a   :  { %1894 = vmatprep.mubr.bf16.mxu0 %v9127_v51  ;;  %5144 = vmatprep.mubr.bf16.mxu1 %v9129_v52  ;;  %v9221_v50 = vld [vmem:[%s14224_s0 + $0xaa8] ss:$12 sps:$4 sm:$0xff]   ;;  %v9223_v51 = vld [vmem:[%s14224_s0 + $0x4f8] ss:$12 sps:$4 sm:$0xff]  }
 0x16b   :  { %v9224_v52 = vld [vmem:[%s14224_s0 + $0xaa4] ss:$12 sps:$4 sm:$0xff]  }
 0x171   :  { %1895 = vmatmul.mubr.bf16.gmra.mrb[152].mxu0 %v9131_v54  ;;  %5145 = vmatmul.mubr.bf16.gmra.mrb[152].mxu1 %v9132_v55  ;;  %v9228_v54 = vld [vmem:[%s14224_s0 + $0xac0] ss:$12 sps:$4 sm:$0xff]   ;;  %v9230_v55 = vld [vmem:[%s14224_s0 + $0x510] ss:$12 sps:$4 sm:$0xff]  }
 0x172   :  { %1902 = vmatprep.mubr.bf16.mxu0 %v9134_v56  ;;  %5152 = vmatprep.mubr.bf16.mxu1 %v9136_v57  ;;  %v9231_v56 = vld [vmem:[%s14224_s0 + $0xabc] ss:$12 sps:$4 sm:$0xff]   ;;  %v9232_v57 = vld [vmem:[%s14224_s0 + $0x52c] ss:$12 sps:$4 sm:$0xff]  }
 0x179   :  { %1903 = vmatmul.mubr.bf16.gmra.mrb[156].mxu0 %v9138_v58  ;;  %5153 = vmatmul.mubr.bf16.gmra.mrb[156].mxu1 %v9139_v59  ;;  %v9234_v58 = vld [vmem:[%s14224_s0 + $0xad8] ss:$12 sps:$4 sm:$0xff]   ;;  %v9236_v59 = vld [vmem:[%s14224_s0 + $0x528] ss:$12 sps:$4 sm:$0xff]  }
 0x17a   :  { %1910 = vmatprep.mubr.bf16.mxu0 %v9140_v60  ;;  %5160 = vmatprep.mubr.bf16.mxu1 %v9142_v61  ;;  %v9237_v60 = vld [vmem:[%s14224_s0 + $0xad4] ss:$12 sps:$4 sm:$0xff]   ;;  %v9238_v61 = vld [vmem:[%s14224_s0 + $0x544] ss:$12 sps:$4 sm:$0xff]  }
 0x181   :  { %1911 = vmatmul.mubr.bf16.gmra.mrb[160].mxu0 %v9144_v62  ;;  %5161 = vmatmul.mubr.bf16.gmra.mrb[160].mxu1 %v9145_v63  ;;  %v9240_v62 = vld [vmem:[%s14224_s0 + $0xaf0] ss:$12 sps:$4 sm:$0xff]   ;;  %v9242_v63 = vld [vmem:[%s14224_s0 + $0x540] ss:$12 sps:$4 sm:$0xff]  }
 0x182   :  { %1918 = vmatprep.mubr.bf16.mxu0 %v9146_v0  ;;  %5168 = vmatprep.mubr.bf16.mxu1 %v9148_v1  ;;  %v9243_v0 = vld [vmem:[%s14224_s0 + $0xaec] ss:$12 sps:$4 sm:$0xff]   ;;  %v9244_v1 = vld [vmem:[%s14224_s0 + $0x55c] ss:$12 sps:$4 sm:$0xff]  }
 0x189   :  { %1919 = vmatmul.mubr.bf16.gmra.mrb[164].mxu0 %v9150_v2  ;;  %5169 = vmatmul.mubr.bf16.gmra.mrb[164].mxu1 %v9151_v3  ;;  %v9246_v2 = vld [vmem:[%s14224_s0 + $0xb08] ss:$12 sps:$4 sm:$0xff]   ;;  %v9248_v3 = vld [vmem:[%s14224_s0 + $0x558] ss:$12 sps:$4 sm:$0xff]  }
 0x18a   :  { %1926 = vmatprep.mubr.bf16.mxu0 %v9152_v4  ;;  %5176 = vmatprep.mubr.bf16.mxu1 %v9154_v5  ;;  %v9249_v4 = vld [vmem:[%s14224_s0 + $0xb04] ss:$12 sps:$4 sm:$0xff]   ;;  %v9250_v5 = vld [vmem:[%s14224_s0 + $0x574] ss:$12 sps:$4 sm:$0xff]  }
 0x191   :  { %1927 = vmatmul.mubr.bf16.gmra.mrb[168].mxu0 %v9156_v6  ;;  %5177 = vmatmul.mubr.bf16.gmra.mrb[168].mxu1 %v9157_v7  ;;  %v9252_v6 = vld [vmem:[%s14224_s0 + $0xb20] ss:$12 sps:$4 sm:$0xff]   ;;  %v9254_v7 = vld [vmem:[%s14224_s0 + $0x570] ss:$12 sps:$4 sm:$0xff]  }
 0x192   :  { %1934 = vmatprep.mubr.bf16.mxu0 %v9158_v8  ;;  %5184 = vmatprep.mubr.bf16.mxu1 %v9160_v9  ;;  %v9255_v8 = vld [vmem:[%s14224_s0 + $0xb1c] ss:$12 sps:$4 sm:$0xff]   ;;  %v9256_v9 = vld [vmem:[%s14224_s0 + $0x58c] ss:$12 sps:$4 sm:$0xff]  }
 0x199   :  { %1935 = vmatmul.mubr.bf16.gmra.mrb[172].mxu0 %v9162_v10  ;;  %5185 = vmatmul.mubr.bf16.gmra.mrb[172].mxu1 %v9163_v11  ;;  %v9258_v10 = vld [vmem:[%s14224_s0 + $0xb38] ss:$12 sps:$4 sm:$0xff]  }
 0x19a   :  { %1942 = vmatprep.mubr.bf16.mxu0 %v9164_v12  ;;  %5192 = vmatprep.mubr.bf16.mxu1 %v9166_v13  ;;  %v435_v11 = vld [vmem:[%s14224_s0 + $0x5a0] sm:$0x11]  ;;  %v7298_v12 = vld [vmem:[%s14224_s0 + $0xb4c] sm:$0x11]  ;;  %v9260_v13 = vld [vmem:[%s14224_s0 + $0x588] ss:$12 sps:$4 sm:$0xff]  }
 0x1a1   :  { %1943 = vmatmul.mubr.bf16.gmra.mrb[176].mxu0 %v9168_v14  ;;  %5193 = vmatmul.mubr.bf16.gmra.mrb[176].mxu1 %v9169_v15  ;;  %v9261_v14 = vld [vmem:[%s14224_s0 + $0xb34] ss:$12 sps:$4 sm:$0xff]   ;;  %v7032_v15 = vcombine.high %v435_v11, %v435_v11 }
 0x1a2   :  { %1950 = vmatprep.mubr.bf16.mxu0 %v9170_v16  ;;  %5200 = vmatprep.mubr.bf16.mxu1 %v9172_v17  ;;  %v7481_v16 = vcombine.high %v7298_v12, %v7298_v12  ;;  %v7031_v17 = vcombine.low %v435_v11, %v435_v11 }
 0x1a9   :  { %1951 = vmatmul.mubr.bf16.gmra.mrb[180].mxu0 %v9174_v18  ;;  %5201 = vmatmul.mubr.bf16.gmra.mrb[180].mxu1 %v9175_v19  ;;  %v7480_v18 = vcombine.low %v7298_v12, %v7298_v12  ;;  %v9266_v19 = vld [vmem:[%s14224_s0 + $0x8] ss:$12 sps:$4 sm:$0xff]  }
 0x1aa   :  { %1958 = vmatprep.mubr.bf16.mxu0 %v9176_v20  ;;  %5208 = vmatprep.mubr.bf16.mxu1 %v9179_v21  ;;  %v9267_v20 = vld [vmem:[%s14224_s0 + $0x5b4] ss:$12 sps:$4 sm:$0xff]  }
 0x1ab   :  { %v9268_v21 = vld [vmem:[%s14224_s0 + $0x20] ss:$12 sps:$4 sm:$0xff]  }
 0x1b1   :  { %1959 = vmatmul.mubr.bf16.gmra.mrb[184].mxu0 %v9181_v23  ;;  %5209 = vmatmul.mubr.bf16.gmra.mrb[184].mxu1 %v9182_v24  ;;  %v9269_v23 = vld [vmem:[%s14224_s0 + $0x5cc] ss:$12 sps:$4 sm:$0xff]  }
 0x1b2   :  { %1966 = vmatprep.mubr.bf16.mxu0 %v9183_v25  ;;  %5216 = vmatprep.mubr.bf16.mxu1 %v9185_v26  ;;  %v9270_v24 = vld [vmem:[%s14224_s0 + $0x38] ss:$12 sps:$4 sm:$0xff]   ;;  %v9272_v26 = vld [vmem:[%s14224_s0 + $0x50] ss:$12 sps:$4 sm:$0xff]  }
 0x1b3   :  { %v9271_v25 = vld [vmem:[%s14224_s0 + $0x5e4] ss:$12 sps:$4 sm:$0xff]  }
 0x1b9   :  { %1967 = vmatmul.mubr.bf16.gmra.mrb[188].mxu0 %v9187_v27  ;;  %5217 = vmatmul.mubr.bf16.gmra.mrb[188].mxu1 %v9188_v28  ;;  %v9273_v27 = vld [vmem:[%s14224_s0 + $0x5fc] ss:$12 sps:$4 sm:$0xff]  }
 0x1ba   :  { %1974 = vmatprep.mubr.bf16.mxu0 %v9189_v29  ;;  %5224 = vmatprep.mubr.bf16.mxu1 %v9191_v30  ;;  %v9274_v28 = vld [vmem:[%s14224_s0 + $0x68] ss:$12 sps:$4 sm:$0xff]   ;;  %v9276_v30 = vld [vmem:[%s14224_s0 + $0x80] ss:$12 sps:$4 sm:$0xff]  }
 0x1bb   :  { %v9275_v29 = vld [vmem:[%s14224_s0 + $0x614] ss:$12 sps:$4 sm:$0xff]  }
 0x1c1   :  { %1975 = vmatmul.mubr.bf16.gmra.mrb[192].mxu0 %v9193_v31  ;;  %5225 = vmatmul.mubr.bf16.gmra.mrb[192].mxu1 %v9194_v32  ;;  %v9277_v31 = vld [vmem:[%s14224_s0 + $0x62c] ss:$12 sps:$4 sm:$0xff]  }
 0x1c2   :  { %1982 = vmatprep.mubr.bf16.mxu0 %v9195_v33  ;;  %5232 = vmatprep.mubr.bf16.mxu1 %v9197_v34  ;;  %v9278_v32 = vld [vmem:[%s14224_s0 + $0x98] ss:$12 sps:$4 sm:$0xff]   ;;  %v9280_v34 = vld [vmem:[%s14224_s0 + $0xb0] ss:$12 sps:$4 sm:$0xff]  }
 0x1c3   :  { %v9279_v33 = vld [vmem:[%s14224_s0 + $0x644] ss:$12 sps:$4 sm:$0xff]  }
 0x1c9   :  { %1983 = vmatmul.mubr.bf16.gmra.mrb[196].mxu0 %v9199_v35  ;;  %5233 = vmatmul.mubr.bf16.gmra.mrb[196].mxu1 %v9200_v36  ;;  %v9281_v35 = vld [vmem:[%s14224_s0 + $0x65c] ss:$12 sps:$4 sm:$0xff]  }
 0x1ca   :  { %1990 = vmatprep.mubr.bf16.mxu0 %v9201_v37  ;;  %5240 = vmatprep.mubr.bf16.mxu1 %v9203_v38  ;;  %v9282_v36 = vld [vmem:[%s14224_s0 + $0xc8] ss:$12 sps:$4 sm:$0xff]   ;;  %v9284_v38 = vld [vmem:[%s14224_s0 + $0xe0] ss:$12 sps:$4 sm:$0xff]  }
 0x1cb   :  { %v9283_v37 = vld [vmem:[%s14224_s0 + $0x674] ss:$12 sps:$4 sm:$0xff]  }
 0x1d1   :  { %1991 = vmatmul.mubr.bf16.gmra.mrb[200].mxu0 %v9205_v39  ;;  %5241 = vmatmul.mubr.bf16.gmra.mrb[200].mxu1 %v9206_v40  ;;  %v9285_v39 = vld [vmem:[%s14224_s0 + $0x68c] ss:$12 sps:$4 sm:$0xff]  }
 0x1d2   :  { %1998 = vmatprep.mubr.bf16.mxu0 %v9207_v41  ;;  %5248 = vmatprep.mubr.bf16.mxu1 %v9209_v42  ;;  %v9286_v40 = vld [vmem:[%s14224_s0 + $0xf8] ss:$12 sps:$4 sm:$0xff]   ;;  %v9288_v42 = vld [vmem:[%s14224_s0 + $0x110] ss:$12 sps:$4 sm:$0xff]  }
 0x1d3   :  { %v9287_v41 = vld [vmem:[%s14224_s0 + $0x6a4] ss:$12 sps:$4 sm:$0xff]  }
 0x1d9   :  { %1999 = vmatmul.mubr.bf16.gmra.mrb[204].mxu0 %v9211_v43  ;;  %5249 = vmatmul.mubr.bf16.gmra.mrb[204].mxu1 %v9212_v44  ;;  %v9289_v43 = vld [vmem:[%s14224_s0 + $0x6bc] ss:$12 sps:$4 sm:$0xff]  }
 0x1da   :  { %2006 = vmatprep.mubr.bf16.mxu0 %v9213_v45  ;;  %5256 = vmatprep.mubr.bf16.mxu1 %v9215_v46  ;;  %v9290_v44 = vld [vmem:[%s14224_s0 + $0x128] ss:$12 sps:$4 sm:$0xff]   ;;  %v9292_v46 = vld [vmem:[%s14224_s0 + $0x140] ss:$12 sps:$4 sm:$0xff]  }
 0x1db   :  { %v9291_v45 = vld [vmem:[%s14224_s0 + $0x6d4] ss:$12 sps:$4 sm:$0xff]  }
 0x1e1   :  { %2007 = vmatmul.mubr.bf16.gmra.mrb[208].mxu0 %v9217_v47  ;;  %5257 = vmatmul.mubr.bf16.gmra.mrb[208].mxu1 %v9218_v48  ;;  %v9293_v47 = vld [vmem:[%s14224_s0 + $0x6ec] ss:$12 sps:$4 sm:$0xff]  }
 0x1e2   :  { %2014 = vmatprep.mubr.bf16.mxu0 %v9219_v49  ;;  %5264 = vmatprep.mubr.bf16.mxu1 %v9221_v50  ;;  %v9294_v48 = vld [vmem:[%s14224_s0 + $0x158] ss:$12 sps:$4 sm:$0xff]   ;;  %v9296_v50 = vld [vmem:[%s14224_s0 + $0x170] ss:$12 sps:$4 sm:$0xff]  }
 0x1e3   :  { %v9295_v49 = vld [vmem:[%s14224_s0 + $0x704] ss:$12 sps:$4 sm:$0xff]  }
 0x1e9   :  { %2015 = vmatmul.mubr.bf16.gmra.mrb[212].mxu0 %v9223_v51  ;;  %5265 = vmatmul.mubr.bf16.gmra.mrb[212].mxu1 %v9224_v52  ;;  %v9297_v51 = vld [vmem:[%s14224_s0 + $0x71c] ss:$12 sps:$4 sm:$0xff]  }
 0x1ea   :  { %2022 = vmatprep.mubr.bf16.mxu0 %v9226_v53  ;;  %5272 = vmatprep.mubr.bf16.mxu1 %v9228_v54  ;;  %v9298_v52 = vld [vmem:[%s14224_s0 + $0x188] ss:$12 sps:$4 sm:$0xff]   ;;  %v9300_v54 = vld [vmem:[%s14224_s0 + $0x1a0] ss:$12 sps:$4 sm:$0xff]  }
 0x1eb   :  { %v9299_v53 = vld [vmem:[%s14224_s0 + $0x734] ss:$12 sps:$4 sm:$0xff]  }
 0x1f1   :  { %2023 = vmatmul.mubr.bf16.gmra.mrb[216].mxu0 %v9230_v55  ;;  %5273 = vmatmul.mubr.bf16.gmra.mrb[216].mxu1 %v9231_v56  ;;  %v9301_v55 = vld [vmem:[%s14224_s0 + $0x74c] ss:$12 sps:$4 sm:$0xff]  }
 0x1f2   :  { %2030 = vmatprep.mubr.bf16.mxu0 %v9232_v57  ;;  %5280 = vmatprep.mubr.bf16.mxu1 %v9234_v58  ;;  %v9302_v56 = vld [vmem:[%s14224_s0 + $0x1b8] ss:$12 sps:$4 sm:$0xff]   ;;  %v9304_v58 = vld [vmem:[%s14224_s0 + $0x1d0] ss:$12 sps:$4 sm:$0xff]  }
 0x1f3   :  { %v9303_v57 = vld [vmem:[%s14224_s0 + $0x764] ss:$12 sps:$4 sm:$0xff]  }
 0x1f9   :  { %2031 = vmatmul.mubr.bf16.gmra.mrb[220].mxu0 %v9236_v59  ;;  %5281 = vmatmul.mubr.bf16.gmra.mrb[220].mxu1 %v9237_v60  ;;  %v9305_v59 = vld [vmem:[%s14224_s0 + $0x77c] ss:$12 sps:$4 sm:$0xff]  }
 0x1fa   :  { %2038 = vmatprep.mubr.bf16.mxu0 %v9238_v61  ;;  %5288 = vmatprep.mubr.bf16.mxu1 %v9240_v62  ;;  %v9306_v60 = vld [vmem:[%s14224_s0 + $0x1e8] ss:$12 sps:$4 sm:$0xff]   ;;  %v9308_v62 = vld [vmem:[%s14224_s0 + $0x200] ss:$12 sps:$4 sm:$0xff]  }
 0x1fb   :  { %v9307_v61 = vld [vmem:[%s14224_s0 + $0x794] ss:$12 sps:$4 sm:$0xff]  }
 0x201   :  { %2039 = vmatmul.mubr.bf16.gmra.mrb[224].mxu0 %v9242_v63  ;;  %5289 = vmatmul.mubr.bf16.gmra.mrb[224].mxu1 %v9243_v0  ;;  %v9309_v63 = vld [vmem:[%s14224_s0 + $0x7ac] ss:$12 sps:$4 sm:$0xff]  }
 0x202   :  { %2046 = vmatprep.mubr.bf16.mxu0 %v9244_v1  ;;  %5296 = vmatprep.mubr.bf16.mxu1 %v9246_v2  ;;  %v9310_v0 = vld [vmem:[%s14224_s0 + $0x218] ss:$12 sps:$4 sm:$0xff]   ;;  %v9312_v2 = vld [vmem:[%s14224_s0 + $0x230] ss:$12 sps:$4 sm:$0xff]  }
 0x203   :  { %v9311_v1 = vld [vmem:[%s14224_s0 + $0x7c4] ss:$12 sps:$4 sm:$0xff]  }
 0x209   :  { %2047 = vmatmul.mubr.bf16.gmra.mrb[228].mxu0 %v9248_v3  ;;  %5297 = vmatmul.mubr.bf16.gmra.mrb[228].mxu1 %v9249_v4  ;;  %v9313_v3 = vld [vmem:[%s14224_s0 + $0x7dc] ss:$12 sps:$4 sm:$0xff]  }
 0x20a   :  { %2054 = vmatprep.mubr.bf16.mxu0 %v9250_v5  ;;  %5304 = vmatprep.mubr.bf16.mxu1 %v9252_v6  ;;  %v9314_v4 = vld [vmem:[%s14224_s0 + $0x248] ss:$12 sps:$4 sm:$0xff]   ;;  %v9316_v6 = vld [vmem:[%s14224_s0 + $0x260] ss:$12 sps:$4 sm:$0xff]  }
 0x20b   :  { %v9315_v5 = vld [vmem:[%s14224_s0 + $0x7f4] ss:$12 sps:$4 sm:$0xff]  }
 0x211   :  { %2055 = vmatmul.mubr.bf16.gmra.mrb[232].mxu0 %v9254_v7  ;;  %5305 = vmatmul.mubr.bf16.gmra.mrb[232].mxu1 %v9255_v8  ;;  %v9317_v7 = vld [vmem:[%s14224_s0 + $0x80c] ss:$12 sps:$4 sm:$0xff]  }
 0x212   :  { %2062 = vmatprep.mubr.bf16.mxu0 %v9256_v9  ;;  %5312 = vmatprep.mubr.bf16.mxu1 %v9258_v10  ;;  %v9318_v8 = vld [vmem:[%s14224_s0 + $0x278] ss:$12 sps:$4 sm:$0xff]   ;;  %v10572_v10 = vld [vmem:[%s14226_s2] ss:$0 sm:$0xff] }
 0x213   :  { %v9319_v9 = vld [vmem:[%s14224_s0 + $0x824] ss:$12 sps:$4 sm:$0xff]  }
 0x219   :  { %2063 = vmatmul.mubr.bf16.gmra.mrb[236].mxu0 %v9260_v13  ;;  %5313 = vmatmul.mubr.bf16.gmra.mrb[236].mxu1 %v9261_v14 }
 0x21a   :  { %2070 = vmatprep.mubr.bf16.mxu0 %v7032_v15  ;;  %5320 = vmatprep.mubr.bf16.mxu1 %v7481_v16 }
 0x221   :  { %2071 = vmatmul.mubr.bf16.gmra.mrb[240].mxu0 %v7031_v17  ;;  %5321 = vmatmul.mubr.bf16.gmra.mrb[240].mxu1 %v7480_v18  ;;  %v9320_v17 = vld [vmem:[%s14224_s0 + $0x83c] ss:$12 sps:$4 sm:$0xff]  }
 0x222   :  { %7637 = vmatprep.mubr.msk.bf16.mxu0 %vm9418_vm0, %v14279_v22  ;;  %7897 = vmatprep.mubr.msk.bf16.mxu1 %vm9418_vm0, %v14279_v22 }
 0x229   :  { %7638 = vmatmul.mubr.bf16.vlgmr.msra.gmra.mrb[0].mxu0 %v9266_v19  ;;  %7898 = vmatmul.mubr.bf16.vlgmr.msra.gmra.mrb[0].mxu1 %v9267_v20  ;;  %v9321_v20 = vld [vmem:[%s14224_s0 + $0x290] ss:$12 sps:$4 sm:$0xff]  }
 0x22a   :  { %7641 = vmatprep.mubr.msk.bf16.mxu0 %vm9418_vm0, %v14279_v22  ;;  %7901 = vmatprep.mubr.msk.bf16.mxu1 %vm9418_vm0, %v14279_v22 }
 0x231   :  { %7642 = vmatmul.mubr.bf16.gmra.mrb[4].mxu0 %v9268_v21  ;;  %7902 = vmatmul.mubr.bf16.gmra.mrb[4].mxu1 %v9269_v23 }
 0x232   :  { %7645 = vmatprep.mubr.msk.bf16.mxu0 %vm9418_vm0, %v14279_v22  ;;  %7905 = vmatprep.mubr.msk.bf16.mxu1 %vm9418_vm0, %v14279_v22 }
 0x239   :  { %7646 = vmatmul.mubr.bf16.gmra.mrb[8].mxu0 %v9270_v24  ;;  %7906 = vmatmul.mubr.bf16.gmra.mrb[8].mxu1 %v9271_v25 }
 0x23a   :  { %7649 = vmatprep.mubr.msk.bf16.mxu0 %vm9418_vm0, %v14279_v22  ;;  %7909 = vmatprep.mubr.msk.bf16.mxu1 %vm9418_vm0, %v14279_v22 }
 0x241   :  { %7650 = vmatmul.mubr.bf16.gmra.mrb[12].mxu0 %v9272_v26  ;;  %7910 = vmatmul.mubr.bf16.gmra.mrb[12].mxu1 %v9273_v27 }
 0x242   :  { %7653 = vmatprep.mubr.msk.bf16.mxu0 %vm9418_vm0, %v14279_v22  ;;  %7913 = vmatprep.mubr.msk.bf16.mxu1 %vm9418_vm0, %v14279_v22 }
 0x249   :  { %7654 = vmatmul.mubr.bf16.gmra.mrb[16].mxu0 %v9274_v28  ;;  %7914 = vmatmul.mubr.bf16.gmra.mrb[16].mxu1 %v9275_v29 }
 0x24a   :  { %7657 = vmatprep.mubr.msk.bf16.mxu0 %vm9418_vm0, %v14279_v22  ;;  %7917 = vmatprep.mubr.msk.bf16.mxu1 %vm9418_vm0, %v14279_v22 }
 0x251   :  { %7658 = vmatmul.mubr.bf16.gmra.mrb[20].mxu0 %v9276_v30  ;;  %7918 = vmatmul.mubr.bf16.gmra.mrb[20].mxu1 %v9277_v31 }
 0x252   :  { %7661 = vmatprep.mubr.msk.bf16.mxu0 %vm9418_vm0, %v14279_v22  ;;  %7921 = vmatprep.mubr.msk.bf16.mxu1 %vm9418_vm0, %v14279_v22 }
 0x259   :  { %7662 = vmatmul.mubr.bf16.gmra.mrb[24].mxu0 %v9278_v32  ;;  %7922 = vmatmul.mubr.bf16.gmra.mrb[24].mxu1 %v9279_v33 }
 0x25a   :  { %7665 = vmatprep.mubr.msk.bf16.mxu0 %vm9418_vm0, %v14279_v22  ;;  %7925 = vmatprep.mubr.msk.bf16.mxu1 %vm9418_vm0, %v14279_v22 }
 0x261   :  { %7666 = vmatmul.mubr.bf16.gmra.mrb[28].mxu0 %v9280_v34  ;;  %7926 = vmatmul.mubr.bf16.gmra.mrb[28].mxu1 %v9281_v35  ;;  %v9323_v34 = vld [vmem:[%s14224_s0 + $0x854] ss:$12 sps:$4 sm:$0xff]  }
 0x262   :  { %7669 = vmatprep.mubr.msk.bf16.mxu0 %vm9418_vm0, %v14279_v22  ;;  %7929 = vmatprep.mubr.msk.bf16.mxu1 %vm9418_vm0, %v14279_v22 }
 0x269   :  { %7670 = vmatmul.mubr.bf16.gmra.mrb[32].mxu0 %v9282_v36  ;;  %7930 = vmatmul.mubr.bf16.gmra.mrb[32].mxu1 %v9283_v37  ;;  %v9322_v37 = vld [vmem:[%s14224_s0 + $0x2a8] ss:$12 sps:$4 sm:$0xff]  }
 0x26a   :  { %7673 = vmatprep.mubr.msk.bf16.mxu0 %vm9418_vm0, %v14279_v22  ;;  %7933 = vmatprep.mubr.msk.bf16.mxu1 %vm9418_vm0, %v14279_v22 }
 0x271   :  { %7674 = vmatmul.mubr.bf16.gmra.mrb[36].mxu0 %v9284_v38  ;;  %7934 = vmatmul.mubr.bf16.gmra.mrb[36].mxu1 %v9285_v39 }
 0x272   :  { %7677 = vmatprep.mubr.msk.bf16.mxu0 %vm9418_vm0, %v14279_v22  ;;  %7937 = vmatprep.mubr.msk.bf16.mxu1 %vm9418_vm0, %v14279_v22 }
 0x279   :  { %7678 = vmatmul.mubr.bf16.gmra.mrb[40].mxu0 %v9286_v40  ;;  %7938 = vmatmul.mubr.bf16.gmra.mrb[40].mxu1 %v9287_v41 }
 0x27a   :  { %7681 = vmatprep.mubr.msk.bf16.mxu0 %vm9418_vm0, %v14279_v22  ;;  %7941 = vmatprep.mubr.msk.bf16.mxu1 %vm9418_vm0, %v14279_v22 }
 0x281   :  { %7682 = vmatmul.mubr.bf16.gmra.mrb[44].mxu0 %v9288_v42  ;;  %7942 = vmatmul.mubr.bf16.gmra.mrb[44].mxu1 %v9289_v43 }
 0x282   :  { %7685 = vmatprep.mubr.msk.bf16.mxu0 %vm9418_vm0, %v14279_v22  ;;  %7945 = vmatprep.mubr.msk.bf16.mxu1 %vm9418_vm0, %v14279_v22 }
 0x289   :  { %7686 = vmatmul.mubr.bf16.gmra.mrb[48].mxu0 %v9290_v44  ;;  %7946 = vmatmul.mubr.bf16.gmra.mrb[48].mxu1 %v9291_v45 }
 0x28a   :  { %7689 = vmatprep.mubr.msk.bf16.mxu0 %vm9418_vm0, %v14279_v22  ;;  %7949 = vmatprep.mubr.msk.bf16.mxu1 %vm9418_vm0, %v14279_v22 }
 0x291   :  { %7690 = vmatmul.mubr.bf16.gmra.mrb[52].mxu0 %v9292_v46  ;;  %7950 = vmatmul.mubr.bf16.gmra.mrb[52].mxu1 %v9293_v47 }
 0x292   :  { %7693 = vmatprep.mubr.msk.bf16.mxu0 %vm9418_vm0, %v14279_v22  ;;  %7953 = vmatprep.mubr.msk.bf16.mxu1 %vm9418_vm0, %v14279_v22 }
 0x299   :  { %7694 = vmatmul.mubr.bf16.gmra.mrb[56].mxu0 %v9294_v48  ;;  %7954 = vmatmul.mubr.bf16.gmra.mrb[56].mxu1 %v9295_v49 }
 0x29a   :  { %7697 = vmatprep.mubr.msk.bf16.mxu0 %vm9418_vm0, %v14279_v22  ;;  %7957 = vmatprep.mubr.msk.bf16.mxu1 %vm9418_vm0, %v14279_v22 }
 0x2a1   :  { %7698 = vmatmul.mubr.bf16.gmra.mrb[60].mxu0 %v9296_v50  ;;  %7958 = vmatmul.mubr.bf16.gmra.mrb[60].mxu1 %v9297_v51 }
 0x2a2   :  { %7701 = vmatprep.mubr.msk.bf16.mxu0 %vm9418_vm0, %v14279_v22  ;;  %7961 = vmatprep.mubr.msk.bf16.mxu1 %vm9418_vm0, %v14279_v22 }
 0x2a9   :  { %7702 = vmatmul.mubr.bf16.gmra.mrb[64].mxu0 %v9298_v52  ;;  %7962 = vmatmul.mubr.bf16.gmra.mrb[64].mxu1 %v9299_v53  ;;  %v9325_v52 = vld [vmem:[%s14224_s0 + $0x86c] ss:$12 sps:$4 sm:$0xff]  }
 0x2aa   :  { %7705 = vmatprep.mubr.msk.bf16.mxu0 %vm9418_vm0, %v14279_v22  ;;  %7965 = vmatprep.mubr.msk.bf16.mxu1 %vm9418_vm0, %v14279_v22 }
 0x2b1   :  { %7706 = vmatmul.mubr.bf16.gmra.mrb[68].mxu0 %v9300_v54  ;;  %7966 = vmatmul.mubr.bf16.gmra.mrb[68].mxu1 %v9301_v55  ;;  %v9324_v55 = vld [vmem:[%s14224_s0 + $0x2c0] ss:$12 sps:$4 sm:$0xff]  }
 0x2b2   :  { %7709 = vmatprep.mubr.msk.bf16.mxu0 %vm9418_vm0, %v14279_v22  ;;  %7969 = vmatprep.mubr.msk.bf16.mxu1 %vm9418_vm0, %v14279_v22 }
 0x2b9   :  { %7710 = vmatmul.mubr.bf16.gmra.mrb[72].mxu0 %v9302_v56  ;;  %7970 = vmatmul.mubr.bf16.gmra.mrb[72].mxu1 %v9303_v57 }
 0x2ba   :  { %7713 = vmatprep.mubr.msk.bf16.mxu0 %vm9418_vm0, %v14279_v22  ;;  %7973 = vmatprep.mubr.msk.bf16.mxu1 %vm9418_vm0, %v14279_v22 }
 0x2c1   :  { %7714 = vmatmul.mubr.bf16.gmra.mrb[76].mxu0 %v9304_v58  ;;  %7974 = vmatmul.mubr.bf16.gmra.mrb[76].mxu1 %v9305_v59 }
 0x2c2   :  { %7717 = vmatprep.mubr.msk.bf16.mxu0 %vm9418_vm0, %v14279_v22  ;;  %7977 = vmatprep.mubr.msk.bf16.mxu1 %vm9418_vm0, %v14279_v22 }
 0x2c9   :  { %7718 = vmatmul.mubr.bf16.gmra.mrb[80].mxu0 %v9306_v60  ;;  %7978 = vmatmul.mubr.bf16.gmra.mrb[80].mxu1 %v9307_v61 }
 0x2ca   :  { %7721 = vmatprep.mubr.msk.bf16.mxu0 %vm9418_vm0, %v14279_v22  ;;  %7981 = vmatprep.mubr.msk.bf16.mxu1 %vm9418_vm0, %v14279_v22 }
 0x2d1   :  { %7722 = vmatmul.mubr.bf16.gmra.mrb[84].mxu0 %v9308_v62  ;;  %7982 = vmatmul.mubr.bf16.gmra.mrb[84].mxu1 %v9309_v63 }
 0x2d2   :  { %7725 = vmatprep.mubr.msk.bf16.mxu0 %vm9418_vm0, %v14279_v22  ;;  %7985 = vmatprep.mubr.msk.bf16.mxu1 %vm9418_vm0, %v14279_v22 }
 0x2d9   :  { %7726 = vmatmul.mubr.bf16.gmra.mrb[88].mxu0 %v9310_v0  ;;  %7986 = vmatmul.mubr.bf16.gmra.mrb[88].mxu1 %v9311_v1 }
 0x2da   :  { %7729 = vmatprep.mubr.msk.bf16.mxu0 %vm9418_vm0, %v14279_v22  ;;  %7989 = vmatprep.mubr.msk.bf16.mxu1 %vm9418_vm0, %v14279_v22 }
 0x2e1   :  { %7730 = vmatmul.mubr.bf16.gmra.mrb[92].mxu0 %v9312_v2  ;;  %7990 = vmatmul.mubr.bf16.gmra.mrb[92].mxu1 %v9313_v3 }
 0x2e2   :  { %7733 = vmatprep.mubr.msk.bf16.mxu0 %vm9418_vm0, %v14279_v22  ;;  %7993 = vmatprep.mubr.msk.bf16.mxu1 %vm9418_vm0, %v14279_v22 }
 0x2e9   :  { %7734 = vmatmul.mubr.bf16.gmra.mrb[96].mxu0 %v9314_v4  ;;  %7994 = vmatmul.mubr.bf16.gmra.mrb[96].mxu1 %v9315_v5 }
 0x2ea   :  { %7737 = vmatprep.mubr.msk.bf16.mxu0 %vm9418_vm0, %v14279_v22  ;;  %7997 = vmatprep.mubr.msk.bf16.mxu1 %vm9418_vm0, %v14279_v22 }
 0x2f1   :  { %7738 = vmatmul.mubr.bf16.gmra.mrb[100].mxu0 %v9316_v6  ;;  %7998 = vmatmul.mubr.bf16.gmra.mrb[100].mxu1 %v9317_v7  ;;  %v9327_v6 = vld [vmem:[%s14224_s0 + $0x884] ss:$12 sps:$4 sm:$0xff]  }
 0x2f2   :  { %7741 = vmatprep.mubr.msk.bf16.mxu0 %vm9418_vm0, %v14279_v22  ;;  %8001 = vmatprep.mubr.msk.bf16.mxu1 %vm9418_vm0, %v14279_v22 }
 0x2f9   :  { %7742 = vmatmul.mubr.bf16.gmra.mrb[104].mxu0 %v9318_v8  ;;  %8002 = vmatmul.mubr.bf16.gmra.mrb[104].mxu1 %v9319_v9  ;;  %v9326_v9 = vld [vmem:[%s14224_s0 + $0x2d8] ss:$12 sps:$4 sm:$0xff]  }
 0x2fa   :  { %7745 = vmatprep.mubr.msk.bf16.mxu0 %vm9418_vm0, %v14279_v22  ;;  %8005 = vmatprep.mubr.msk.bf16.mxu1 %vm9418_vm0, %v14279_v22 }
 0x2fc   :  { %v2112_v11 = vpop.f32.mrb[0].mxu0  ;;  %v5362_v12 = vpop.f32.mrb[0].mxu1 }
 0x2fd   :  { %v10579_v13 = vadd.f32 %v10572_v10, %v2112_v11  ;;  %v10582_v14 = vadd.f32 %v10572_v10, %v5362_v12  ;;  %v7639_v15 = vpop.f32.mrb[1].mxu0  ;;  %v7899_v16 = vpop.f32.mrb[1].mxu1 }
 0x2fe   :  { %v2115_v18 = vpop.f32.mrb[2].mxu0  ;;  %v5365_v19 = vpop.f32.mrb[2].mxu1 }
 0x2ff   :  { %v14274_v21 = vmax.f32 %v10579_v13, 0.0  ;;  %v14270_v23 = vmax.f32 %v10582_v14, 0.0  ;;  %v7640_v24 = vpop.f32.mrb[3].mxu0  ;;  %v7900_v25 = vpop.f32.mrb[3].mxu1  ;;  %v10593_v26 = vadd.f32 %v10572_v10, %v2115_v18  ;;  %v10607_v28 = vadd.f32 %v10572_v10, %v5365_v19 }
 0x301   :  { %8006 = vmatmul.mubr.bf16.gmra.mrb[108].mxu1 %v9320_v17  ;;  %6090 = vrot.lane.b32.xlu1 %v14270_v23, %s9419_s28  ;;  %v14278_v27 = vmax.f32 %v10593_v26, 0.0  ;;  %v14271_v42 = vmax.f32 %v10607_v28, 0.0 }
 0x302   :  { %7746 = vmatmul.mubr.bf16.gmra.mrb[108].mxu0 %v9321_v20  ;;  %2840 = vrot.lane.b32.xlu0 %v14274_v21, %s9419_s28 }
 0x303   :  { %7749 = vmatprep.mubr.msk.bf16.mxu0 %vm9418_vm0, %v14279_v22  ;;  %8009 = vmatprep.mubr.msk.bf16.mxu1 %vm9418_vm0, %v14279_v22 }
 0x304   :  { %v2120_v29 = vpop.f32.mrb[4].mxu0  ;;  %v5370_v30 = vpop.f32.mrb[4].mxu1 }
 0x305   :  { %v10610_v31 = vadd.f32 %v10572_v10, %v2120_v29  ;;  %v7903_v32 = vpop.f32.mrb[5].mxu1  ;;  %v7643_v33 = vpop.f32.mrb[5].mxu0  ;;  %v10623_v39 = vadd.f32 %v10572_v10, %v5370_v30 }
 0x306   :  { %2842 = vrot.lane.b32.xlu0 %v14278_v27, %s9419_s28  ;;  %v2123_v35 = vpop.f32.mrb[6].mxu0  ;;  %v5373_v36 = vpop.f32.mrb[6].mxu1 }
 0x307   :  { %v14273_v38 = vmax.f32 %v10610_v31, 0.0  ;;  %v7644_v40 = vpop.f32.mrb[7].mxu0  ;;  %v7904_v41 = vpop.f32.mrb[7].mxu1  ;;  %v10627_v43 = vadd.f32 %v10572_v10, %v5373_v36  ;;  %v14266_v44 = vmax.f32 %v10623_v39, 0.0  ;;  %v10637_v45 = vadd.f32 %v10572_v10, %v2123_v35 }
 0x309   :  { %8010 = vmatmul.mubr.bf16.gmra.mrb[112].mxu1 %v9323_v34  ;;  %2844 = vrot.lane.b32.xlu1 %v14273_v38, %s9419_s28  ;;  %v14263_v46 = vmax.f32 %v10627_v43, 0.0  ;;  %v14265_v56 = vmax.f32 %v10637_v45, 0.0  ;;  %v9329_v34 = vld [vmem:[%s14224_s0 + $0x89c] ss:$12 sps:$4 sm:$0xff]  }
 0x30a   :  { %7750 = vmatmul.mubr.bf16.gmra.mrb[112].mxu0 %v9322_v37  ;;  %6092 = vrot.lane.b32.xlu0 %v14271_v42, %s9419_s28  ;;  %v9328_v37 = vld [vmem:[%s14224_s0 + $0x2f0] ss:$12 sps:$4 sm:$0xff]  }
 0x30b   :  { %7753 = vmatprep.mubr.msk.bf16.mxu0 %vm9418_vm0, %v14279_v22  ;;  %8013 = vmatprep.mubr.msk.bf16.mxu1 %vm9418_vm0, %v14279_v22 }
 0x30c   :  { %v2128_v47 = vpop.f32.mrb[8].mxu0  ;;  %v5378_v48 = vpop.f32.mrb[8].mxu1 }
 0x30d   :  { %v10645_v49 = vadd.f32 %v10572_v10, %v2128_v47  ;;  %v7907_v50 = vpop.f32.mrb[9].mxu1  ;;  %6094 = vrot.lane.b32.xlu1 %v14266_v44, %s9419_s28  ;;  %v7647_v51 = vpop.f32.mrb[9].mxu0  ;;  %v10662_v58 = vadd.f32 %v10572_v10, %v5378_v48 }
 0x30e   :  { %6096 = vrot.lane.b32.xlu0 %v14263_v46, %s9419_s28  ;;  %v2131_v53 = vpop.f32.mrb[10].mxu0  ;;  %v5381_v54 = vpop.f32.mrb[10].mxu1 }
 0x30f   :  { %v14262_v57 = vmax.f32 %v10645_v49, 0.0  ;;  %v7648_v59 = vpop.f32.mrb[11].mxu0  ;;  %v7908_v60 = vpop.f32.mrb[11].mxu1  ;;  %v10665_v61 = vadd.f32 %v10572_v10, %v5381_v54  ;;  %v14258_v62 = vmax.f32 %v10662_v58, 0.0  ;;  %v10675_v63 = vadd.f32 %v10572_v10, %v2131_v53 }
 0x311   :  { %8014 = vmatmul.mubr.bf16.gmra.mrb[116].mxu1 %v9325_v52  ;;  %2846 = vrot.lane.b32.xlu1 %v14265_v56, %s9419_s28  ;;  %v14255_v0 = vmax.f32 %v10665_v61, 0.0  ;;  %v14257_v11 = vmax.f32 %v10675_v63, 0.0 }
 0x312   :  { %7754 = vmatmul.mubr.bf16.gmra.mrb[116].mxu0 %v9324_v55  ;;  %2848 = vrot.lane.b32.xlu0 %v14262_v57, %s9419_s28 }
 0x313   :  { %7757 = vmatprep.mubr.msk.bf16.mxu0 %vm9418_vm0, %v14279_v22  ;;  %8017 = vmatprep.mubr.msk.bf16.mxu1 %vm9418_vm0, %v14279_v22 }
 0x314   :  { %v2136_v1 = vpop.f32.mrb[12].mxu0  ;;  %v5386_v2 = vpop.f32.mrb[12].mxu1 }
 0x315   :  { %v10683_v3 = vadd.f32 %v10572_v10, %v2136_v1  ;;  %v7911_v4 = vpop.f32.mrb[13].mxu1  ;;  %6098 = vrot.lane.b32.xlu1 %v14258_v62, %s9419_s28  ;;  %v7651_v5 = vpop.f32.mrb[13].mxu0  ;;  %v10700_v15 = vadd.f32 %v10572_v10, %v5386_v2 }
 0x316   :  { %6100 = vrot.lane.b32.xlu0 %v14255_v0, %s9419_s28  ;;  %v2139_v7 = vpop.f32.mrb[14].mxu0  ;;  %v5389_v8 = vpop.f32.mrb[14].mxu1  ;;  %v9331_v4 = vld [vmem:[%s14224_s0 + $0x8b4] ss:$12 sps:$4 sm:$0xff]  }
 0x317   :  { %v14254_v12 = vmax.f32 %v10683_v3, 0.0  ;;  %v7652_v16 = vpop.f32.mrb[15].mxu0  ;;  %v7912_v17 = vpop.f32.mrb[15].mxu1  ;;  %v10703_v18 = vadd.f32 %v10572_v10, %v5389_v8  ;;  %v14250_v19 = vmax.f32 %v10700_v15, 0.0  ;;  %v10713_v20 = vadd.f32 %v10572_v10, %v2139_v7  ;;  %v9330_v7 = vld [vmem:[%s14224_s0 + $0x308] ss:$12 sps:$4 sm:$0xff]  }
 0x319   :  { %8018 = vmatmul.mubr.bf16.gmra.mrb[120].mxu1 %v9327_v6  ;;  %2850 = vrot.lane.b32.xlu1 %v14257_v11, %s9419_s28  ;;  %v14247_v24 = vmax.f32 %v10703_v18, 0.0  ;;  %v14249_v40 = vmax.f32 %v10713_v20, 0.0 }
 0x31a   :  { %7758 = vmatmul.mubr.bf16.gmra.mrb[120].mxu0 %v9326_v9  ;;  %2852 = vrot.lane.b32.xlu0 %v14254_v12, %s9419_s28 }
 0x31b   :  { %7761 = vmatprep.mubr.msk.bf16.mxu0 %vm9418_vm0, %v14279_v22  ;;  %8021 = vmatprep.mubr.msk.bf16.mxu1 %vm9418_vm0, %v14279_v22 }
 0x31c   :  { %v2144_v25 = vpop.f32.mrb[16].mxu0  ;;  %v5394_v29 = vpop.f32.mrb[16].mxu1 }
 0x31d   :  { %v10721_v30 = vadd.f32 %v10572_v10, %v2144_v25  ;;  %v7915_v32 = vpop.f32.mrb[17].mxu1  ;;  %6102 = vrot.lane.b32.xlu1 %v14250_v19, %s9419_s28  ;;  %v7655_v33 = vpop.f32.mrb[17].mxu0  ;;  %v10738_v47 = vadd.f32 %v10572_v10, %v5394_v29 }
 0x31e   :  { %6104 = vrot.lane.b32.xlu0 %v14247_v24, %s9419_s28  ;;  %v2147_v35 = vpop.f32.mrb[18].mxu0  ;;  %v5397_v36 = vpop.f32.mrb[18].mxu1 }
 0x31f   :  { %v14242_v41 = vmax.f32 %v10721_v30, 0.0  ;;  %v7656_v48 = vpop.f32.mrb[19].mxu0  ;;  %v7916_v50 = vpop.f32.mrb[19].mxu1  ;;  %v10741_v51 = vadd.f32 %v10572_v10, %v5397_v36  ;;  %v14246_v52 = vmax.f32 %v10738_v47, 0.0  ;;  %v10751_v53 = vadd.f32 %v10572_v10, %v2147_v35 }
 0x321   :  { %8022 = vmatmul.mubr.bf16.gmra.mrb[124].mxu1 %v9329_v34  ;;  %2854 = vrot.lane.b32.xlu1 %v14249_v40, %s9419_s28  ;;  %v14239_v54 = vmax.f32 %v10741_v51, 0.0  ;;  %v14241_v8 = vmax.f32 %v10751_v53, 0.0 }
 0x322   :  { %7762 = vmatmul.mubr.bf16.gmra.mrb[124].mxu0 %v9328_v37  ;;  %2856 = vrot.lane.b32.xlu0 %v14242_v41, %s9419_s28 }
 0x323   :  { %7765 = vmatprep.mubr.msk.bf16.mxu0 %vm9418_vm0, %v14279_v22  ;;  %8025 = vmatprep.mubr.msk.bf16.mxu1 %vm9418_vm0, %v14279_v22 }
 0x324   :  { %v2152_v55 = vpop.f32.mrb[20].mxu0  ;;  %v5402_v59 = vpop.f32.mrb[20].mxu1 }
 0x325   :  { %v10759_v60 = vadd.f32 %v10572_v10, %v2152_v55  ;;  %v7919_v1 = vpop.f32.mrb[21].mxu1  ;;  %6106 = vrot.lane.b32.xlu1 %v14246_v52, %s9419_s28  ;;  %v7659_v2 = vpop.f32.mrb[21].mxu0  ;;  %v10776_v16 = vadd.f32 %v10572_v10, %v5402_v59  ;;  %v9333_v55 = vld [vmem:[%s14224_s0 + $0x8cc] ss:$12 sps:$4 sm:$0xff]  }
 0x326   :  { %6108 = vrot.lane.b32.xlu0 %v14239_v54, %s9419_s28  ;;  %v2155_v5 = vpop.f32.mrb[22].mxu0  ;;  %v5405_v6 = vpop.f32.mrb[22].mxu1  ;;  %v9332_v2 = vld [vmem:[%s14224_s0 + $0x320] ss:$12 sps:$4 sm:$0xff]  }
 0x327   :  { %v14234_v9 = vmax.f32 %v10759_v60, 0.0  ;;  %v7660_v17 = vpop.f32.mrb[23].mxu0  ;;  %v7920_v25 = vpop.f32.mrb[23].mxu1  ;;  %v10779_v29 = vadd.f32 %v10572_v10, %v5405_v6  ;;  %v14238_v32 = vmax.f32 %v10776_v16, 0.0  ;;  %v10789_v33 = vadd.f32 %v10572_v10, %v2155_v5 }
 0x329   :  { %14593 = vst [vmem:[#allocation5_spill] sm:$0xff] %v10779_v29  ;;  %8026 = vmatmul.mubr.bf16.gmra.mrb[128].mxu1 %v9331_v4  ;;  %2858 = vrot.lane.b32.xlu1 %v14241_v8, %s9419_s28  ;;  %14594 = vst [vmem:[#allocation6_spill] sm:$0xff] %v10789_v33  ;;  %v14231_v34 = vmax.f32 %v10779_v29, 0.0  ;;  %v14233_v4 = vmax.f32 %v10789_v33, 0.0 }
 0x32a   :  { %7766 = vmatmul.mubr.bf16.gmra.mrb[128].mxu0 %v9330_v7  ;;  %2860 = vrot.lane.b32.xlu0 %v14234_v9, %s9419_s28 }
 0x32b   :  { %7769 = vmatprep.mubr.msk.bf16.mxu0 %vm9418_vm0, %v14279_v22  ;;  %8029 = vmatprep.mubr.msk.bf16.mxu1 %vm9418_vm0, %v14279_v22 }
 0x32c   :  { %v2160_v35 = vpop.f32.mrb[24].mxu0  ;;  %v5410_v36 = vpop.f32.mrb[24].mxu1 }
 0x32d   :  { %v10797_v37 = vadd.f32 %v10572_v10, %v2160_v35  ;;  %v7923_v48 = vpop.f32.mrb[25].mxu1  ;;  %6110 = vrot.lane.b32.xlu1 %v14238_v32, %s9419_s28  ;;  %v7663_v50 = vpop.f32.mrb[25].mxu0  ;;  %v10814_v6 = vadd.f32 %v10572_v10, %v5410_v36 }
 0x32e   :  { %6112 = vrot.lane.b32.xlu0 %v14231_v34, %s9419_s28  ;;  %v2163_v59 = vpop.f32.mrb[26].mxu0  ;;  %v5413_v1 = vpop.f32.mrb[26].mxu1 }
 0x32f   :  { %14595 = vst [vmem:[#allocation7_spill] sm:$0xff] %v10797_v37  ;;  %v14230_v5 = vmax.f32 %v10797_v37, 0.0  ;;  %14596 = vst [vmem:[#allocation8_spill] sm:$0xff] %v10814_v6  ;;  %v7664_v7 = vpop.f32.mrb[27].mxu0  ;;  %v7924_v17 = vpop.f32.mrb[27].mxu1  ;;  %v10817_v25 = vadd.f32 %v10572_v10, %v5413_v1  ;;  %v14232_v35 = vmax.f32 %v10814_v6, 0.0  ;;  %v10827_v36 = vadd.f32 %v10572_v10, %v2163_v59 }
 0x330   :  { %v9335_v7 = vld [vmem:[%s14224_s0 + $0x8e4] ss:$12 sps:$4 sm:$0xff]  }
 0x331   :  { %14597 = vst [vmem:[#allocation9_spill] sm:$0xff] %v10817_v25  ;;  %8030 = vmatmul.mubr.bf16.gmra.mrb[132].mxu1 %v9333_v55  ;;  %2862 = vrot.lane.b32.xlu1 %v14233_v4, %s9419_s28  ;;  %14598 = vst [vmem:[#allocation10_spill] sm:$0xff] %v10827_v36  ;;  %v14235_v48 = vmax.f32 %v10817_v25, 0.0 }
 0x332   :  { %7770 = vmatmul.mubr.bf16.gmra.mrb[132].mxu0 %v9332_v2  ;;  %2864 = vrot.lane.b32.xlu0 %v14230_v5, %s9419_s28 }
 0x333   :  { %7773 = vmatprep.mubr.msk.bf16.mxu0 %vm9418_vm0, %v14279_v22  ;;  %8033 = vmatprep.mubr.msk.bf16.mxu1 %vm9418_vm0, %v14279_v22 }
 0x334   :  { %v2168_v50 = vpop.f32.mrb[28].mxu0  ;;  %v5418_v55 = vpop.f32.mrb[28].mxu1 }
 0x335   :  { %v10835_v1 = vadd.f32 %v10572_v10, %v2168_v50  ;;  %v7927_v2 = vpop.f32.mrb[29].mxu1  ;;  %6114 = vrot.lane.b32.xlu1 %v14232_v35, %s9419_s28  ;;  %v7667_v59 = vpop.f32.mrb[29].mxu0  ;;  %v9334_v50 = vld [vmem:[%s14224_s0 + $0x338] ss:$12 sps:$4 sm:$0xff]  }
 0x336   :  { %6116 = vrot.lane.b32.xlu0 %v14235_v48, %s9419_s28  ;;  %v2171_v17 = vpop.f32.mrb[30].mxu0  ;;  %v5421_v5 = vpop.f32.mrb[30].mxu1  ;;  %v14237_v2 = vmax.f32 %v10827_v36, 0.0  ;;  %v10852_v59 = vadd.f32 %v10572_v10, %v5418_v55 }
 0x337   :  { %14599 = vst [vmem:[#allocation11_spill] sm:$0xff] %v10835_v1  ;;  %v14236_v34 = vmax.f32 %v10835_v1, 0.0  ;;  %v7668_v35 = vpop.f32.mrb[31].mxu0  ;;  %v7928_v4 = vpop.f32.mrb[31].mxu1  ;;  %v10855_v9 = vadd.f32 %v10572_v10, %v5421_v5  ;;  %v10865_v55 = vadd.f32 %v10572_v10, %v2171_v17 }
 0x338   :  { %14600 = vst [vmem:[#allocation12_spill] sm:$0xff] %v10852_v59  ;;  %v14240_v48 = vmax.f32 %v10852_v59, 0.0 }
 0x339   :  { %14601 = vst [vmem:[#allocation13_spill] sm:$0xff] %v10855_v9  ;;  %8034 = vmatmul.mubr.bf16.gmra.mrb[136].mxu1 %v9335_v7  ;;  %2866 = vrot.lane.b32.xlu1 %v14237_v2, %s9419_s28  ;;  %14602 = vst [vmem:[#allocation14_spill] sm:$0xff] %v10865_v55  ;;  %v14243_v4 = vmax.f32 %v10855_v9, 0.0 }
 0x33a   :  { %7774 = vmatmul.mubr.bf16.gmra.mrb[136].mxu0 %v9334_v50  ;;  %2868 = vrot.lane.b32.xlu0 %v14236_v34, %s9419_s28  ;;  %v9337_v34 = vld [vmem:[%s14224_s0 + $0x8fc] ss:$12 sps:$4 sm:$0xff]  }
 0x33b   :  { %7777 = vmatprep.mubr.msk.bf16.mxu0 %vm9418_vm0, %v14279_v22  ;;  %8037 = vmatprep.mubr.msk.bf16.mxu1 %vm9418_vm0, %v14279_v22 }
 0x33c   :  { %v2176_v5 = vpop.f32.mrb[32].mxu0  ;;  %v5426_v35 = vpop.f32.mrb[32].mxu1 }
 0x33d   :  { %v10873_v7 = vadd.f32 %v10572_v10, %v2176_v5  ;;  %v7931_v50 = vpop.f32.mrb[33].mxu1  ;;  %6118 = vrot.lane.b32.xlu1 %v14240_v48, %s9419_s28  ;;  %v7671_v17 = vpop.f32.mrb[33].mxu0  ;;  %v9336_v5 = vld [vmem:[%s14224_s0 + $0x350] ss:$12 sps:$4 sm:$0xff]  }
 0x33e   :  { %6120 = vrot.lane.b32.xlu0 %v14243_v4, %s9419_s28  ;;  %v2179_v2 = vpop.f32.mrb[34].mxu0  ;;  %v5429_v32 = vpop.f32.mrb[34].mxu1  ;;  %v14245_v50 = vmax.f32 %v10865_v55, 0.0  ;;  %v10890_v17 = vadd.f32 %v10572_v10, %v5426_v35 }
 0x33f   :  { %14603 = vst [vmem:[#allocation15_spill] sm:$0xff] %v10873_v7  ;;  %v14244_v54 = vmax.f32 %v10873_v7, 0.0  ;;  %v7672_v48 = vpop.f32.mrb[35].mxu0  ;;  %v7932_v8 = vpop.f32.mrb[35].mxu1  ;;  %v10893_v41 = vadd.f32 %v10572_v10, %v5429_v32  ;;  %v10903_v35 = vadd.f32 %v10572_v10, %v2179_v2 }
 0x340   :  { %14604 = vst [vmem:[#allocation16_spill] sm:$0xff] %v10890_v17  ;;  %v14248_v4 = vmax.f32 %v10890_v17, 0.0 }
 0x341   :  { %14605 = vst [vmem:[#allocation17_spill] sm:$0xff] %v10893_v41  ;;  %8038 = vmatmul.mubr.bf16.gmra.mrb[140].mxu1 %v9337_v34  ;;  %2870 = vrot.lane.b32.xlu1 %v14245_v50, %s9419_s28  ;;  %14606 = vst [vmem:[#allocation18_spill] sm:$0xff] %v10903_v35  ;;  %v14251_v8 = vmax.f32 %v10893_v41, 0.0 }
 0x342   :  { %7778 = vmatmul.mubr.bf16.gmra.mrb[140].mxu0 %v9336_v5  ;;  %2872 = vrot.lane.b32.xlu0 %v14244_v54, %s9419_s28  ;;  %v9339_v54 = vld [vmem:[%s14224_s0 + $0x914] ss:$12 sps:$4 sm:$0xff]  }
 0x343   :  { %7781 = vmatprep.mubr.msk.bf16.mxu0 %vm9418_vm0, %v14279_v22  ;;  %8041 = vmatprep.mubr.msk.bf16.mxu1 %vm9418_vm0, %v14279_v22 }
 0x344   :  { %v2184_v32 = vpop.f32.mrb[36].mxu0  ;;  %v5434_v34 = vpop.f32.mrb[36].mxu1 }
 0x345   :  { %v10911_v48 = vadd.f32 %v10572_v10, %v2184_v32  ;;  %v7935_v5 = vpop.f32.mrb[37].mxu1  ;;  %6122 = vrot.lane.b32.xlu1 %v14248_v4, %s9419_s28  ;;  %v7675_v2 = vpop.f32.mrb[37].mxu0  ;;  %v9338_v32 = vld [vmem:[%s14224_s0 + $0x368] ss:$12 sps:$4 sm:$0xff]  }
 0x346   :  { %6124 = vrot.lane.b32.xlu0 %v14251_v8, %s9419_s28  ;;  %v2187_v50 = vpop.f32.mrb[38].mxu0  ;;  %v5437_v52 = vpop.f32.mrb[38].mxu1  ;;  %v14253_v5 = vmax.f32 %v10903_v35, 0.0  ;;  %v10928_v2 = vadd.f32 %v10572_v10, %v5434_v34 }
 0x347   :  { %14607 = vst [vmem:[#allocation19_spill] sm:$0xff] %v10911_v48  ;;  %v14252_v24 = vmax.f32 %v10911_v48, 0.0  ;;  %v7676_v4 = vpop.f32.mrb[39].mxu0  ;;  %v7936_v40 = vpop.f32.mrb[39].mxu1  ;;  %v10931_v19 = vadd.f32 %v10572_v10, %v5437_v52  ;;  %v10941_v34 = vadd.f32 %v10572_v10, %v2187_v50 }
 0x348   :  { %14608 = vst [vmem:[#allocation20_spill] sm:$0xff] %v10928_v2  ;;  %v14256_v8 = vmax.f32 %v10928_v2, 0.0 }
 0x349   :  { %14609 = vst [vmem:[#allocation21_spill] sm:$0xff] %v10931_v19  ;;  %8042 = vmatmul.mubr.bf16.gmra.mrb[144].mxu1 %v9339_v54  ;;  %2874 = vrot.lane.b32.xlu1 %v14253_v5, %s9419_s28  ;;  %14610 = vst [vmem:[#allocation22_spill] sm:$0xff] %v10941_v34  ;;  %v14259_v40 = vmax.f32 %v10931_v19, 0.0 }
 0x34a   :  { %7782 = vmatmul.mubr.bf16.gmra.mrb[144].mxu0 %v9338_v32  ;;  %2876 = vrot.lane.b32.xlu0 %v14252_v24, %s9419_s28  ;;  %v9341_v24 = vld [vmem:[%s14224_s0 + $0x92c] ss:$12 sps:$4 sm:$0xff]  }
 0x34b   :  { %7785 = vmatprep.mubr.msk.bf16.mxu0 %vm9418_vm0, %v14279_v22  ;;  %8045 = vmatprep.mubr.msk.bf16.mxu1 %vm9418_vm0, %v14279_v22 }
 0x34c   :  { %v2192_v52 = vpop.f32.mrb[40].mxu0  ;;  %v5442_v54 = vpop.f32.mrb[40].mxu1 }
 0x34d   :  { %v10949_v4 = vadd.f32 %v10572_v10, %v2192_v52  ;;  %v7939_v32 = vpop.f32.mrb[41].mxu1  ;;  %6126 = vrot.lane.b32.xlu1 %v14256_v8, %s9419_s28  ;;  %v7679_v50 = vpop.f32.mrb[41].mxu0  ;;  %v9340_v52 = vld [vmem:[%s14224_s0 + $0x380] ss:$12 sps:$4 sm:$0xff]  }
 0x34e   :  { %6128 = vrot.lane.b32.xlu0 %v14259_v40, %s9419_s28  ;;  %v2195_v5 = vpop.f32.mrb[42].mxu0  ;;  %v5445_v12 = vpop.f32.mrb[42].mxu1  ;;  %v14261_v32 = vmax.f32 %v10941_v34, 0.0  ;;  %v10966_v50 = vadd.f32 %v10572_v10, %v5442_v54 }
 0x34f   :  { %14611 = vst [vmem:[#allocation23_spill] sm:$0xff] %v10949_v4  ;;  %v14260_v0 = vmax.f32 %v10949_v4, 0.0  ;;  %v7680_v8 = vpop.f32.mrb[43].mxu0  ;;  %v7940_v11 = vpop.f32.mrb[43].mxu1  ;;  %v10969_v62 = vadd.f32 %v10572_v10, %v5445_v12  ;;  %v10979_v54 = vadd.f32 %v10572_v10, %v2195_v5 }
 0x350   :  { %14612 = vst [vmem:[#allocation24_spill] sm:$0xff] %v10966_v50  ;;  %v14264_v40 = vmax.f32 %v10966_v50, 0.0 }
 0x351   :  { %14613 = vst [vmem:[#allocation25_spill] sm:$0xff] %v10969_v62  ;;  %8046 = vmatmul.mubr.bf16.gmra.mrb[148].mxu1 %v9341_v24  ;;  %2878 = vrot.lane.b32.xlu1 %v14261_v32, %s9419_s28  ;;  %14614 = vst [vmem:[#allocation26_spill] sm:$0xff] %v10979_v54  ;;  %v14267_v11 = vmax.f32 %v10969_v62, 0.0 }
 0x352   :  { %7786 = vmatmul.mubr.bf16.gmra.mrb[148].mxu0 %v9340_v52  ;;  %2880 = vrot.lane.b32.xlu0 %v14260_v0, %s9419_s28  ;;  %v9343_v0 = vld [vmem:[%s14224_s0 + $0x944] ss:$12 sps:$4 sm:$0xff]  }
 0x353   :  { %7789 = vmatprep.mubr.msk.bf16.mxu0 %vm9418_vm0, %v14279_v22  ;;  %8049 = vmatprep.mubr.msk.bf16.mxu1 %vm9418_vm0, %v14279_v22 }
 0x354   :  { %v2200_v12 = vpop.f32.mrb[44].mxu0  ;;  %v5450_v24 = vpop.f32.mrb[44].mxu1 }
 0x355   :  { %v10987_v8 = vadd.f32 %v10572_v10, %v2200_v12  ;;  %v7943_v52 = vpop.f32.mrb[45].mxu1  ;;  %6130 = vrot.lane.b32.xlu1 %v14264_v40, %s9419_s28  ;;  %v7683_v5 = vpop.f32.mrb[45].mxu0  ;;  %v9342_v12 = vld [vmem:[%s14224_s0 + $0x398] ss:$12 sps:$4 sm:$0xff]  }
 0x356   :  { %6132 = vrot.lane.b32.xlu0 %v14267_v11, %s9419_s28  ;;  %v2203_v32 = vpop.f32.mrb[46].mxu0  ;;  %v5453_v57 = vpop.f32.mrb[46].mxu1  ;;  %v14269_v52 = vmax.f32 %v10979_v54, 0.0  ;;  %v11004_v5 = vadd.f32 %v10572_v10, %v5450_v24 }
 0x357   :  { %14615 = vst [vmem:[#allocation27_spill] sm:$0xff] %v10987_v8  ;;  %v14268_v46 = vmax.f32 %v10987_v8, 0.0  ;;  %v7684_v40 = vpop.f32.mrb[47].mxu0  ;;  %v7944_v56 = vpop.f32.mrb[47].mxu1  ;;  %v11007_v44 = vadd.f32 %v10572_v10, %v5453_v57  ;;  %v11017_v24 = vadd.f32 %v10572_v10, %v2203_v32 }
 0x358   :  { %14616 = vst [vmem:[#allocation28_spill] sm:$0xff] %v11004_v5  ;;  %v14272_v11 = vmax.f32 %v11004_v5, 0.0 }
 0x359   :  { %14617 = vst [vmem:[#allocation29_spill] sm:$0xff] %v11007_v44  ;;  %8050 = vmatmul.mubr.bf16.gmra.mrb[152].mxu1 %v9343_v0  ;;  %2882 = vrot.lane.b32.xlu1 %v14269_v52, %s9419_s28  ;;  %14618 = vst [vmem:[#allocation30_spill] sm:$0xff] %v11017_v24  ;;  %v14275_v56 = vmax.f32 %v11007_v44, 0.0 }
 0x35a   :  { %7790 = vmatmul.mubr.bf16.gmra.mrb[152].mxu0 %v9342_v12  ;;  %2884 = vrot.lane.b32.xlu0 %v14268_v46, %s9419_s28  ;;  %v9345_v46 = vld [vmem:[%s14224_s0 + $0x95c] ss:$12 sps:$4 sm:$0xff]  }
 0x35b   :  { %7793 = vmatprep.mubr.msk.bf16.mxu0 %vm9418_vm0, %v14279_v22  ;;  %8053 = vmatprep.mubr.msk.bf16.mxu1 %vm9418_vm0, %v14279_v22 }
 0x35c   :  { %v2208_v57 = vpop.f32.mrb[48].mxu0  ;;  %v5458_v0 = vpop.f32.mrb[48].mxu1 }
 0x35d   :  { %v11025_v40 = vadd.f32 %v10572_v10, %v2208_v57  ;;  %v7947_v12 = vpop.f32.mrb[49].mxu1  ;;  %6134 = vrot.lane.b32.xlu1 %v14272_v11, %s9419_s28  ;;  %v7687_v32 = vpop.f32.mrb[49].mxu0  ;;  %v9344_v57 = vld [vmem:[%s14224_s0 + $0x3b0] ss:$12 sps:$4 sm:$0xff]  }
 0x35e   :  { %6136 = vrot.lane.b32.xlu0 %v14275_v56, %s9419_s28  ;;  %v2211_v52 = vpop.f32.mrb[50].mxu0  ;;  %v5461_v23 = vpop.f32.mrb[50].mxu1  ;;  %v14277_v12 = vmax.f32 %v11017_v24, 0.0  ;;  %v11042_v32 = vadd.f32 %v10572_v10, %v5458_v0 }
 0x35f   :  { %14619 = vst [vmem:[#allocation31_spill] sm:$0xff] %v11025_v40  ;;  %v14276_v42 = vmax.f32 %v11025_v40, 0.0  ;;  %v7688_v11 = vpop.f32.mrb[51].mxu0  ;;  %v7948_v38 = vpop.f32.mrb[51].mxu1  ;;  %v11045_v21 = vadd.f32 %v10572_v10, %v5461_v23  ;;  %v11055_v0 = vadd.f32 %v10572_v10, %v2211_v52 }
 0x360   :  { %14620 = vst [vmem:[#allocation32_spill] sm:$0xff] %v11042_v32  ;;  %v14281_v56 = vmax.f32 %v11042_v32, 0.0 }
 0x361   :  { %14621 = vst [vmem:[#allocation33_spill] sm:$0xff] %v11045_v21  ;;  %8054 = vmatmul.mubr.bf16.gmra.mrb[156].mxu1 %v9345_v46  ;;  %2886 = vrot.lane.b32.xlu1 %v14277_v12, %s9419_s28  ;;  %14622 = vst [vmem:[#allocation34_spill] sm:$0xff] %v11055_v0  ;;  %v14284_v23 = vmax.f32 %v11045_v21, 0.0 }
 0x362   :  { %7794 = vmatmul.mubr.bf16.gmra.mrb[156].mxu0 %v9344_v57  ;;  %2888 = vrot.lane.b32.xlu0 %v14276_v42, %s9419_s28  ;;  %v9347_v42 = vld [vmem:[%s14224_s0 + $0x974] ss:$12 sps:$4 sm:$0xff]  }
 0x363   :  { %7797 = vmatprep.mubr.msk.bf16.mxu0 %vm9418_vm0, %v14279_v22  ;;  %8057 = vmatprep.mubr.msk.bf16.mxu1 %vm9418_vm0, %v14279_v22 }
 0x364   :  { %v2216_v38 = vpop.f32.mrb[52].mxu0  ;;  %v5466_v46 = vpop.f32.mrb[52].mxu1 }
 0x365   :  { %v11063_v11 = vadd.f32 %v10572_v10, %v2216_v38  ;;  %v7951_v57 = vpop.f32.mrb[53].mxu1  ;;  %6138 = vrot.lane.b32.xlu1 %v14281_v56, %s9419_s28  ;;  %v7691_v52 = vpop.f32.mrb[53].mxu0  ;;  %v9346_v38 = vld [vmem:[%s14224_s0 + $0x3c8] ss:$12 sps:$4 sm:$0xff]  }
 0x366   :  { %6140 = vrot.lane.b32.xlu0 %v14284_v23, %s9419_s28  ;;  %v2219_v12 = vpop.f32.mrb[54].mxu0  ;;  %v5469_v27 = vpop.f32.mrb[54].mxu1  ;;  %v14285_v57 = vmax.f32 %v11055_v0, 0.0  ;;  %v11080_v52 = vadd.f32 %v10572_v10, %v5466_v46 }
 0x367   :  { %14623 = vst [vmem:[#allocation35_spill] sm:$0xff] %v11063_v11  ;;  %v14286_v22 = vmax.f32 %v11063_v11, 0.0  ;;  %v7692_v56 = vpop.f32.mrb[55].mxu0  ;;  %v7952_v32 = vpop.f32.mrb[55].mxu1  ;;  %v11083_v40 = vadd.f32 %v10572_v10, %v5469_v27  ;;  %v11093_v46 = vadd.f32 %v10572_v10, %v2219_v12 }
 0x368   :  { %14624 = vst [vmem:[#allocation36_spill] sm:$0xff] %v11080_v52  ;;  %v14290_v23 = vmax.f32 %v11080_v52, 0.0  ;;  %v14627_v56 = vmov 0.0  }
 0x369   :  { %14625 = vst [vmem:[#allocation37_spill] sm:$0xff] %v11083_v40  ;;  %8058 = vmatmul.mubr.bf16.gmra.mrb[160].mxu1 %v9347_v42  ;;  %2890 = vrot.lane.b32.xlu1 %v14285_v57, %s9419_s28  ;;  %14626 = vst [vmem:[#allocation38_spill] sm:$0xff] %v11093_v46  ;;  %v14293_v27 = vmax.f32 %v11083_v40, 0.0 }
 0x36a   :  { %7798 = vmatmul.mubr.bf16.gmra.mrb[160].mxu0 %v9346_v38  ;;  %2892 = vrot.lane.b32.xlu0 %v14286_v22, %s9419_s28  ;;  %v9349_v22 = vld [vmem:[%s14224_s0 + $0x98c] ss:$12 sps:$4 sm:$0xff]  }
 0x36b   :  { %7801 = vmatprep.mubr.msk.bf16.mxu0 %vm9418_vm0, %v14627_v56  ;;  %8061 = vmatprep.mubr.msk.bf16.mxu1 %vm9418_vm0, %v14627_v56 }
 0x36c   :  { %v2224_v42 = vpop.f32.mrb[56].mxu0  ;;  %v5474_v32 = vpop.f32.mrb[56].mxu1 }
 0x36d   :  { %v11101_v38 = vadd.f32 %v10572_v10, %v2224_v42  ;;  %v7955_v57 = vpop.f32.mrb[57].mxu1  ;;  %6142 = vrot.lane.b32.xlu1 %v14290_v23, %s9419_s28  ;;  %v7695_v12 = vpop.f32.mrb[57].mxu0  ;;  %v9348_v42 = vld [vmem:[%s14224_s0 + $0x3e0] ss:$12 sps:$4 sm:$0xff]  }
 0x36e   :  { %6144 = vrot.lane.b32.xlu0 %v14293_v27, %s9419_s28  ;;  %v2227_v11 = vpop.f32.mrb[58].mxu0  ;;  %v5477_v21 = vpop.f32.mrb[58].mxu1  ;;  %v14295_v57 = vmax.f32 %v11093_v46, 0.0  ;;  %v11118_v12 = vadd.f32 %v10572_v10, %v5474_v32 }
 0x36f   :  { %14628 = vst [vmem:[#allocation39_spill] sm:$0xff] %v11101_v38  ;;  %v14294_v52 = vmax.f32 %v11101_v38, 0.0  ;;  %v7696_v23 = vpop.f32.mrb[59].mxu0  ;;  %v7956_v0 = vpop.f32.mrb[59].mxu1  ;;  %v11121_v44 = vadd.f32 %v10572_v10, %v5477_v21  ;;  %v11131_v32 = vadd.f32 %v10572_v10, %v2227_v11 }
 0x370   :  { %14629 = vst [vmem:[#allocation40_spill] sm:$0xff] %v11118_v12  ;;  %v14300_v27 = vmax.f32 %v11118_v12, 0.0 }
 0x371   :  { %14630 = vst [vmem:[#allocation41_spill] sm:$0xff] %v11121_v44  ;;  %8062 = vmatmul.mubr.bf16.gmra.mrb[164].mxu1 %v9349_v22  ;;  %2894 = vrot.lane.b32.xlu1 %v14295_v57, %s9419_s28  ;;  %14631 = vst [vmem:[#allocation42_spill] sm:$0xff] %v11131_v32  ;;  %v14305_v22 = vmax.f32 %v11121_v44, 0.0  ;;  %v9351_v57 = vld [vmem:[%s14224_s0 + $0x9a4] ss:$12 sps:$4 sm:$0xff]   ;;  %v14306_v46 = vmax.f32 %v11131_v32, 0.0 }
 0x372   :  { %7802 = vmatmul.mubr.bf16.gmra.mrb[164].mxu0 %v9348_v42  ;;  %2896 = vrot.lane.b32.xlu0 %v14294_v52, %s9419_s28 }
 0x373   :  { %v11133_v23 = vpop.permute.xlu1 %6090  ;;  %7805 = vmatprep.mubr.msk.bf16.mxu0 %vm9418_vm0, %v14627_v56  ;;  %8065 = vmatprep.mubr.msk.bf16.mxu1 %vm9418_vm0, %v14627_v56 }
 0x374   :  { %v11140_v21 = vpop.permute.xlu0 %2840  ;;  %v2232_v0 = vpop.f32.mrb[60].mxu0 }
 0x375   :  { %v11143_v42 = vadd.f32 %v10572_v10, %v2232_v0  ;;  %v5482_v52 = vpop.f32.mrb[60].mxu1  ;;  %6146 = vrot.lane.b32.xlu1 %v14300_v27, %s9419_s28  ;;  %v7699_v11 = vpop.f32.mrb[61].mxu0  ;;  %v9350_v0 = vld [vmem:[%s14224_s0 + $0x3f8] ss:$12 sps:$4 sm:$0xff]  }
 0x376   :  { %v7959_v38 = vpop.f32.mrb[61].mxu1  ;;  %6148 = vrot.lane.b32.xlu0 %v14305_v22, %s9419_s28  ;;  %v2235_v40 = vpop.f32.mrb[62].mxu0  ;;  %v11160_v11 = vadd.f32 %v10572_v10, %v5482_v52 }
 0x377   :  { %14632 = vst [vmem:[#allocation43_spill] sm:$0xff] %v11143_v42  ;;  %v14304_v12 = vmax.f32 %v11143_v42, 0.0  ;;  %v5485_v27 = vpop.f32.mrb[62].mxu1  ;;  %v7700_v24 = vpop.f32.mrb[63].mxu0 }
 0x378   :  { %14633 = vst [vmem:[#allocation44_spill] sm:$0xff] %v11160_v11  ;;  %v11163_v38 = vadd.f32 %v10572_v10, %v5485_v27  ;;  %v7960_v5 = vpop.f32.mrb[63].mxu1  ;;  %v11165_v44 = vpop.permute.xlu0 %2842  ;;  %v14311_v52 = vmax.f32 %v11160_v11, 0.0  ;;  %v11175_v24 = vadd.f32 %v10572_v10, %v2235_v40 }
 0x379   :  { %8066 = vmatmul.mubr.bf16.gmra.mrb[168].mxu1 %v9351_v57  ;;  %2898 = vrot.lane.b32.xlu1 %v14306_v46, %s9419_s28  ;;  %v9353_v46 = vld [vmem:[%s14224_s0 + $0x9bc] ss:$12 sps:$4 sm:$0xff]  }
 0x37a   :  { %14634 = vst [vmem:[#allocation45_spill] sm:$0xff] %v11163_v38  ;;  %7806 = vmatmul.mubr.bf16.gmra.mrb[168].mxu0 %v9350_v0  ;;  %2900 = vrot.lane.b32.xlu0 %v14304_v12, %s9419_s28  ;;  %14635 = vst [vmem:[#allocation46_spill] sm:$0xff] %v11175_v24  ;;  %v14314_v5 = vmax.f32 %v11163_v38, 0.0  ;;  %v14318_v8 = vmax.f32 %v11175_v24, 0.0 }
 0x37b   :  { %v11177_v27 = vpop.permute.xlu1 %2844  ;;  %7809 = vmatprep.mubr.msk.bf16.mxu0 %vm9418_vm0, %v14627_v56  ;;  %8069 = vmatprep.mubr.msk.bf16.mxu1 %vm9418_vm0, %v14627_v56 }
 0x37c   :  { %v11184_v57 = vpop.permute.xlu0 %6092  ;;  %v2240_v0 = vpop.f32.mrb[64].mxu0 }
 0x37d   :  { %v11187_v12 = vadd.f32 %v10572_v10, %v2240_v0  ;;  %v5490_v22 = vpop.f32.mrb[64].mxu1  ;;  %6150 = vrot.lane.b32.xlu1 %v14311_v52, %s9419_s28  ;;  %v7703_v40 = vpop.f32.mrb[65].mxu0  ;;  %v9352_v0 = vld [vmem:[%s14224_s0 + $0x410] ss:$12 sps:$4 sm:$0xff]  }
 0x37e   :  { %v7963_v42 = vpop.f32.mrb[65].mxu1  ;;  %6152 = vrot.lane.b32.xlu0 %v14314_v5, %s9419_s28  ;;  %v2243_v32 = vpop.f32.mrb[66].mxu0  ;;  %v11204_v40 = vadd.f32 %v10572_v10, %v5490_v22 }
 0x37f   :  { %14636 = vst [vmem:[#allocation47_spill] sm:$0xff] %v11187_v12  ;;  %v14317_v11 = vmax.f32 %v11187_v12, 0.0  ;;  %v5493_v52 = vpop.f32.mrb[66].mxu1  ;;  %v11206_v62 = vpop.permute.xlu1 %6094  ;;  %v11221_v4 = vadd.f32 %v10572_v10, %v2243_v32 }
 0x380   :  { %14637 = vst [vmem:[#allocation48_spill] sm:$0xff] %v11204_v40  ;;  %v11209_v42 = vadd.f32 %v10572_v10, %v5493_v52  ;;  %v7964_v38 = vpop.f32.mrb[67].mxu1  ;;  %v11211_v5 = vpop.permute.xlu0 %6096  ;;  %v14323_v22 = vmax.f32 %v11204_v40, 0.0 }
 0x381   :  { %v7704_v54 = vpop.f32.mrb[67].mxu0  ;;  %8070 = vmatmul.mubr.bf16.gmra.mrb[172].mxu1 %v9353_v46  ;;  %2902 = vrot.lane.b32.xlu1 %v14318_v8, %s9419_s28  ;;  %14639 = vst [vmem:[#allocation50_spill] sm:$0xff] %v11221_v4  ;;  %v9355_v8 = vld [vmem:[%s14224_s0 + $0x9d4] ss:$12 sps:$4 sm:$0xff]   ;;  %v14330_v50 = vmax.f32 %v11221_v4, 0.0 }
 0x382   :  { %14638 = vst [vmem:[#allocation49_spill] sm:$0xff] %v11209_v42  ;;  %7810 = vmatmul.mubr.bf16.gmra.mrb[172].mxu0 %v9352_v0  ;;  %2904 = vrot.lane.b32.xlu0 %v14317_v11, %s9419_s28  ;;  %v14326_v54 = vmax.f32 %v11209_v42, 0.0 }
 0x383   :  { %v11223_v52 = vpop.permute.xlu1 %2846  ;;  %7813 = vmatprep.mubr.msk.bf16.mxu0 %vm9418_vm0, %v14627_v56  ;;  %8073 = vmatprep.mubr.msk.bf16.mxu1 %vm9418_vm0, %v14627_v56 }
 0x384   :  { %v11230_v46 = vpop.permute.xlu0 %2848  ;;  %v2248_v38 = vpop.f32.mrb[68].mxu0 }
 0x385   :  { %v11233_v0 = vadd.f32 %v10572_v10, %v2248_v38  ;;  %v5498_v11 = vpop.f32.mrb[68].mxu1  ;;  %6154 = vrot.lane.b32.xlu1 %v14323_v22, %s9419_s28  ;;  %v7707_v32 = vpop.f32.mrb[69].mxu0  ;;  %v9354_v38 = vld [vmem:[%s14224_s0 + $0x428] ss:$12 sps:$4 sm:$0xff]  }
 0x386   :  { %v7967_v12 = vpop.f32.mrb[69].mxu1  ;;  %6156 = vrot.lane.b32.xlu0 %v14326_v54, %s9419_s28  ;;  %v2251_v24 = vpop.f32.mrb[70].mxu0  ;;  %v11250_v32 = vadd.f32 %v10572_v10, %v5498_v11 }
 0x387   :  { %14640 = vst [vmem:[#allocation51_spill] sm:$0xff] %v11233_v0  ;;  %v14329_v40 = vmax.f32 %v11233_v0, 0.0  ;;  %v5501_v22 = vpop.f32.mrb[70].mxu1  ;;  %v11252_v19 = vpop.permute.xlu1 %6098  ;;  %v11267_v48 = vadd.f32 %v10572_v10, %v2251_v24 }
 0x388   :  { %14641 = vst [vmem:[#allocation52_spill] sm:$0xff] %v11250_v32  ;;  %v11255_v12 = vadd.f32 %v10572_v10, %v5501_v22  ;;  %v7968_v42 = vpop.f32.mrb[71].mxu1  ;;  %v11257_v54 = vpop.permute.xlu0 %6100  ;;  %v14335_v11 = vmax.f32 %v11250_v32, 0.0 }
 0x389   :  { %v7708_v34 = vpop.f32.mrb[71].mxu0  ;;  %8074 = vmatmul.mubr.bf16.gmra.mrb[176].mxu1 %v9355_v8  ;;  %2906 = vrot.lane.b32.xlu1 %v14330_v50, %s9419_s28  ;;  %14643 = vst [vmem:[#allocation54_spill] sm:$0xff] %v11267_v48  ;;  %v9357_v50 = vld [vmem:[%s14224_s0 + $0x9ec] ss:$12 sps:$4 sm:$0xff]   ;;  %v14342_v2 = vmax.f32 %v11267_v48, 0.0 }
 0x38a   :  { %14642 = vst [vmem:[#allocation53_spill] sm:$0xff] %v11255_v12  ;;  %7814 = vmatmul.mubr.bf16.gmra.mrb[176].mxu0 %v9354_v38  ;;  %2908 = vrot.lane.b32.xlu0 %v14329_v40, %s9419_s28  ;;  %v14338_v34 = vmax.f32 %v11255_v12, 0.0 }
 0x38b   :  { %v11269_v22 = vpop.permute.xlu1 %2850  ;;  %7817 = vmatprep.mubr.msk.bf16.mxu0 %vm9418_vm0, %v14627_v56  ;;  %8077 = vmatprep.mubr.msk.bf16.mxu1 %vm9418_vm0, %v14627_v56 }
 0x38c   :  { %v11276_v8 = vpop.permute.xlu0 %2852  ;;  %v2256_v42 = vpop.f32.mrb[72].mxu0 }
 0x38d   :  { %v11279_v38 = vadd.f32 %v10572_v10, %v2256_v42  ;;  %v5506_v40 = vpop.f32.mrb[72].mxu1  ;;  %6158 = vrot.lane.b32.xlu1 %v14335_v11, %s9419_s28  ;;  %v7711_v24 = vpop.f32.mrb[73].mxu0  ;;  %v9356_v42 = vld [vmem:[%s14224_s0 + $0x440] ss:$12 sps:$4 sm:$0xff]  }
 0x38e   :  { %v7971_v0 = vpop.f32.mrb[73].mxu1  ;;  %6160 = vrot.lane.b32.xlu0 %v14338_v34, %s9419_s28  ;;  %v2259_v4 = vpop.f32.mrb[74].mxu0  ;;  %v11296_v24 = vadd.f32 %v10572_v10, %v5506_v40 }
 0x38f   :  { %14644 = vst [vmem:[#allocation55_spill] sm:$0xff] %v11279_v38  ;;  %v14341_v32 = vmax.f32 %v11279_v38, 0.0  ;;  %v5509_v11 = vpop.f32.mrb[74].mxu1  ;;  %v11298_v41 = vpop.permute.xlu1 %6102  ;;  %v11313_v17 = vadd.f32 %v10572_v10, %v2259_v4 }
 0x390   :  { %14645 = vst [vmem:[#allocation56_spill] sm:$0xff] %v11296_v24  ;;  %v11301_v0 = vadd.f32 %v10572_v10, %v5509_v11  ;;  %v7972_v12 = vpop.f32.mrb[75].mxu1  ;;  %v11303_v34 = vpop.permute.xlu0 %6104  ;;  %v14347_v40 = vmax.f32 %v11296_v24, 0.0 }
 0x391   :  { %v7712_v35 = vpop.f32.mrb[75].mxu0  ;;  %8078 = vmatmul.mubr.bf16.gmra.mrb[180].mxu1 %v9357_v50  ;;  %2910 = vrot.lane.b32.xlu1 %v14342_v2, %s9419_s28  ;;  %14647 = vst [vmem:[#allocation58_spill] sm:$0xff] %v11313_v17  ;;  %v9359_v2 = vld [vmem:[%s14224_s0 + $0xa04] ss:$12 sps:$4 sm:$0xff]   ;;  %v14353_v7 = vmax.f32 %v11313_v17, 0.0 }
 0x392   :  { %14646 = vst [vmem:[#allocation57_spill] sm:$0xff] %v11301_v0  ;;  %7818 = vmatmul.mubr.bf16.gmra.mrb[180].mxu0 %v9356_v42  ;;  %2912 = vrot.lane.b32.xlu0 %v14341_v32, %s9419_s28  ;;  %v11327_v42 = vld [vmem:[%s14226_s2] ss:$0 sm:$0xff]  ;;  %v14649_v38 = vmax.f32 %v11301_v0, 0.0 }
 0x393   :  { %v11315_v11 = vpop.permute.xlu1 %2854  ;;  %7821 = vmatprep.mubr.msk.bf16.mxu0 %vm9418_vm0, %v14627_v56  ;;  %8081 = vmatprep.mubr.msk.bf16.mxu1 %vm9418_vm0, %v14627_v56 }
 0x394   :  { %v11322_v50 = vpop.permute.xlu0 %2856  ;;  %v2264_v12 = vpop.f32.mrb[76].mxu0 }
 0x395   :  { %v11330_v10 = vadd.f32 %v11327_v42, %v2264_v12  ;;  %v5514_v4 = vpop.f32.mrb[76].mxu1  ;;  %6162 = vrot.lane.b32.xlu1 %v14347_v40, %s9419_s28  ;;  %v7715_v32 = vpop.f32.mrb[77].mxu0  ;;  %v9358_v12 = vld [vmem:[%s14224_s0 + $0x458] ss:$12 sps:$4 sm:$0xff]  }
 0x396   :  { %v7975_v35 = vpop.f32.mrb[77].mxu1  ;;  %6164 = vrot.lane.b32.xlu0 %v14649_v38, %s9419_s28  ;;  %v2267_v48 = vpop.f32.mrb[78].mxu0  ;;  %v11347_v32 = vadd.f32 %v11327_v42, %v5514_v4 }
 0x397   :  { %14648 = vst [vmem:[#allocation59_spill] sm:$0xff] %v11330_v10  ;;  %v14352_v24 = vmax.f32 %v11330_v10, 0.0  ;;  %v5517_v40 = vpop.f32.mrb[78].mxu1  ;;  %v11349_v9 = vpop.permute.xlu1 %6106  ;;  %v11364_v59 = vadd.f32 %v11327_v42, %v2267_v48 }
 0x398   :  { %14650 = vst [vmem:[#allocation60_spill] sm:$0xff] %v11347_v32  ;;  %v11352_v35 = vadd.f32 %v11327_v42, %v5517_v40  ;;  %v7976_v0 = vpop.f32.mrb[79].mxu1  ;;  %v11354_v38 = vpop.permute.xlu0 %6108  ;;  %v14358_v4 = vmax.f32 %v11347_v32, 0.0 }
 0x399   :  { %v7716_v55 = vpop.f32.mrb[79].mxu0  ;;  %8082 = vmatmul.mubr.bf16.gmra.mrb[184].mxu1 %v9359_v2  ;;  %2914 = vrot.lane.b32.xlu1 %v14353_v7, %s9419_s28  ;;  %14652 = vst [vmem:[#allocation62_spill] sm:$0xff] %v11364_v59  ;;  %v9361_v7 = vld [vmem:[%s14224_s0 + $0xa1c] ss:$12 sps:$4 sm:$0xff]   ;;  %v14365_v1 = vmax.f32 %v11364_v59, 0.0 }
 0x39a   :  { %14651 = vst [vmem:[#allocation61_spill] sm:$0xff] %v11352_v35  ;;  %7822 = vmatmul.mubr.bf16.gmra.mrb[184].mxu0 %v9358_v12  ;;  %2916 = vrot.lane.b32.xlu0 %v14352_v24, %s9419_s28  ;;  %v14361_v55 = vmax.f32 %v11352_v35, 0.0 }
 0x39b   :  { %v11366_v40 = vpop.permute.xlu1 %2858  ;;  %7825 = vmatprep.mubr.msk.bf16.mxu0 %vm9418_vm0, %v14627_v56  ;;  %8085 = vmatprep.mubr.msk.bf16.mxu1 %vm9418_vm0, %v14627_v56 }
 0x39c   :  { %v11373_v2 = vpop.permute.xlu0 %2860  ;;  %v2272_v0 = vpop.f32.mrb[80].mxu0 }
 0x39d   :  { %v11376_v12 = vadd.f32 %v11327_v42, %v2272_v0  ;;  %v5522_v24 = vpop.f32.mrb[80].mxu1  ;;  %6166 = vrot.lane.b32.xlu1 %v14358_v4, %s9419_s28  ;;  %v7719_v48 = vpop.f32.mrb[81].mxu0  ;;  %v9360_v0 = vld [vmem:[%s14224_s0 + $0x470] ss:$12 sps:$4 sm:$0xff]  }
 0x39e   :  { %v7979_v10 = vpop.f32.mrb[81].mxu1  ;;  %6168 = vrot.lane.b32.xlu0 %v14361_v55, %s9419_s28  ;;  %v2275_v17 = vpop.f32.mrb[82].mxu0  ;;  %v11393_v48 = vadd.f32 %v11327_v42, %v5522_v24 }
 0x39f   :  { %14653 = vst [vmem:[#allocation63_spill] sm:$0xff] %v11376_v12  ;;  %v14364_v32 = vmax.f32 %v11376_v12, 0.0  ;;  %v5525_v4 = vpop.f32.mrb[82].mxu1  ;;  %v11395_v25 = vpop.permute.xlu1 %6110  ;;  %v11410_v6 = vadd.f32 %v11327_v42, %v2275_v17 }
 0x3a0   :  { %14654 = vst [vmem:[#allocation64_spill] sm:$0xff] %v11393_v48  ;;  %v11398_v10 = vadd.f32 %v11327_v42, %v5525_v4  ;;  %v7980_v35 = vpop.f32.mrb[83].mxu1  ;;  %v11400_v55 = vpop.permute.xlu0 %6112  ;;  %v14370_v24 = vmax.f32 %v11393_v48, 0.0 }
 0x3a1   :  { %14656 = vst [vmem:[#allocation66_spill] sm:$0xff] %v11400_v55  ;;  %v7720_v36 = vpop.f32.mrb[83].mxu0  ;;  %8086 = vmatmul.mubr.bf16.gmra.mrb[188].mxu1 %v9361_v7  ;;  %2918 = vrot.lane.b32.xlu1 %v14365_v1, %s9419_s28  ;;  %14657 = vst [vmem:[#allocation67_spill] sm:$0xff] %v11410_v6  ;;  %v9363_v1 = vld [vmem:[%s14224_s0 + $0xa34] ss:$12 sps:$4 sm:$0xff]   ;;  %v14375_v37 = vmax.f32 %v11410_v6, 0.0 }
 0x3a2   :  { %14655 = vst [vmem:[#allocation65_spill] sm:$0xff] %v11398_v10  ;;  %7826 = vmatmul.mubr.bf16.gmra.mrb[188].mxu0 %v9360_v0  ;;  %2920 = vrot.lane.b32.xlu0 %v14364_v32, %s9419_s28  ;;  %v14372_v36 = vmax.f32 %v11398_v10, 0.0 }
 0x3a3   :  { %v11412_v4 = vpop.permute.xlu1 %2862  ;;  %7829 = vmatprep.mubr.msk.bf16.mxu0 %vm9418_vm0, %v14627_v56  ;;  %8089 = vmatprep.mubr.msk.bf16.mxu1 %vm9418_vm0, %v14627_v56 }
 0x3a4   :  { %v11419_v7 = vpop.permute.xlu0 %2864  ;;  %v2280_v35 = vpop.f32.mrb[84].mxu0 }
 0x3a5   :  { %14658 = vst [vmem:[#allocation68_spill] sm:$0xff] %v11419_v7  ;;  %v11422_v0 = vadd.f32 %v11327_v42, %v2280_v35  ;;  %v5530_v32 = vpop.f32.mrb[84].mxu1  ;;  %6170 = vrot.lane.b32.xlu1 %v14370_v24, %s9419_s28  ;;  %v7723_v17 = vpop.f32.mrb[85].mxu0  ;;  %v9362_v35 = vld [vmem:[%s14224_s0 + $0x488] ss:$12 sps:$4 sm:$0xff]  }
 0x3a6   :  { %v7983_v12 = vpop.f32.mrb[85].mxu1  ;;  %6172 = vrot.lane.b32.xlu0 %v14372_v36, %s9419_s28  ;;  %v2283_v59 = vpop.f32.mrb[86].mxu0  ;;  %v11439_v17 = vadd.f32 %v11327_v42, %v5530_v32 }
 0x3a7   :  { %14659 = vst [vmem:[#allocation69_spill] sm:$0xff] %v11422_v0  ;;  %v14374_v48 = vmax.f32 %v11422_v0, 0.0  ;;  %v5533_v24 = vpop.f32.mrb[86].mxu1  ;;  %v11441_v7 = vpop.permute.xlu1 %6114 }
 0x3a8   :  { %14660 = vst [vmem:[#allocation70_spill] sm:$0xff] %v11439_v17  ;;  %14661 = vst [vmem:[#allocation71_spill] sm:$0xff] %v11441_v7  ;;  %v11444_v12 = vadd.f32 %v11327_v42, %v5533_v24  ;;  %v7984_v10 = vpop.f32.mrb[87].mxu1  ;;  %v11446_v36 = vpop.permute.xlu0 %6116  ;;  %v14379_v32 = vmax.f32 %v11439_v17, 0.0  ;;  %v11456_v7 = vadd.f32 %v11327_v42, %v2283_v59 }
 0x3a9   :  { %14663 = vst [vmem:[#allocation73_spill] sm:$0xff] %v11446_v36  ;;  %v7724_v29 = vpop.f32.mrb[87].mxu0  ;;  %8090 = vmatmul.mubr.bf16.gmra.mrb[192].mxu1 %v9363_v1  ;;  %2922 = vrot.lane.b32.xlu1 %v14375_v37, %s9419_s28  ;;  %v9365_v37 = vld [vmem:[%s14224_s0 + $0xa4c] ss:$12 sps:$4 sm:$0xff]  }
 0x3aa   :  { %14662 = vst [vmem:[#allocation72_spill] sm:$0xff] %v11444_v12  ;;  %7830 = vmatmul.mubr.bf16.gmra.mrb[192].mxu0 %v9362_v35  ;;  %2924 = vrot.lane.b32.xlu0 %v14374_v48, %s9419_s28  ;;  %14664 = vst [vmem:[#allocation74_spill] sm:$0xff] %v11456_v7  ;;  %v14381_v29 = vmax.f32 %v11444_v12, 0.0 }
 0x3ab   :  { %v11458_v24 = vpop.permute.xlu1 %2866  ;;  %7833 = vmatprep.mubr.msk.bf16.mxu0 %vm9418_vm0, %v14627_v56  ;;  %8093 = vmatprep.mubr.msk.bf16.mxu1 %vm9418_vm0, %v14627_v56 }
 0x3ac   :  { %14665 = vst [vmem:[#allocation75_spill] sm:$0xff] %v11458_v24  ;;  %v11465_v1 = vpop.permute.xlu0 %2868  ;;  %v2288_v10 = vpop.f32.mrb[88].mxu0 }
 0x3ad   :  { %14666 = vst [vmem:[#allocation76_spill] sm:$0xff] %v11465_v1  ;;  %v11468_v35 = vadd.f32 %v11327_v42, %v2288_v10  ;;  %v5538_v48 = vpop.f32.mrb[88].mxu1  ;;  %6174 = vrot.lane.b32.xlu1 %v14379_v32, %s9419_s28  ;;  %v7727_v59 = vpop.f32.mrb[89].mxu0  ;;  %v9364_v10 = vld [vmem:[%s14224_s0 + $0x4a0] ss:$12 sps:$4 sm:$0xff]   ;;  %v14383_v1 = vmax.f32 %v11456_v7, 0.0 }
 0x3ae   :  { %v7987_v0 = vpop.f32.mrb[89].mxu1  ;;  %6176 = vrot.lane.b32.xlu0 %v14381_v29, %s9419_s28  ;;  %v2291_v6 = vpop.f32.mrb[90].mxu0  ;;  %v11485_v59 = vadd.f32 %v11327_v42, %v5538_v48 }
 0x3af   :  { %14667 = vst [vmem:[#allocation77_spill] sm:$0xff] %v11468_v35  ;;  %v14382_v17 = vmax.f32 %v11468_v35, 0.0  ;;  %v5541_v32 = vpop.f32.mrb[90].mxu1  ;;  %v11487_v36 = vpop.permute.xlu1 %6118 }
 0x3b0   :  { %14668 = vst [vmem:[#allocation78_spill] sm:$0xff] %v11485_v59  ;;  %14669 = vst [vmem:[#allocation79_spill] sm:$0xff] %v11487_v36  ;;  %v11490_v0 = vadd.f32 %v11327_v42, %v5541_v32  ;;  %v7988_v12 = vpop.f32.mrb[91].mxu1  ;;  %v11492_v29 = vpop.permute.xlu0 %6120  ;;  %v14386_v48 = vmax.f32 %v11485_v59, 0.0  ;;  %v11502_v36 = vadd.f32 %v11327_v42, %v2291_v6 }
 0x3b1   :  { %14671 = vst [vmem:[#allocation81_spill] sm:$0xff] %v11492_v29  ;;  %v7728_v24 = vpop.f32.mrb[91].mxu0  ;;  %8094 = vmatmul.mubr.bf16.gmra.mrb[196].mxu1 %v9365_v37  ;;  %2926 = vrot.lane.b32.xlu1 %v14383_v1, %s9419_s28  ;;  %v9367_v1 = vld [vmem:[%s14224_s0 + $0xa64] ss:$12 sps:$4 sm:$0xff]  }
 0x3b2   :  { %14670 = vst [vmem:[#allocation80_spill] sm:$0xff] %v11490_v0  ;;  %7834 = vmatmul.mubr.bf16.gmra.mrb[196].mxu0 %v9364_v10  ;;  %2928 = vrot.lane.b32.xlu0 %v14382_v17, %s9419_s28  ;;  %14672 = vst [vmem:[#allocation82_spill] sm:$0xff] %v11502_v36  ;;  %v14388_v37 = vmax.f32 %v11490_v0, 0.0 }
 0x3b3   :  { %v11504_v32 = vpop.permute.xlu1 %2870  ;;  %7837 = vmatprep.mubr.msk.bf16.mxu0 %vm9418_vm0, %v14627_v56  ;;  %8097 = vmatprep.mubr.msk.bf16.mxu1 %vm9418_vm0, %v14627_v56 }
 0x3b4   :  { %14673 = vst [vmem:[#allocation83_spill] sm:$0xff] %v11504_v32  ;;  %v11511_v12 = vpop.permute.xlu0 %2872  ;;  %v2296_v24 = vpop.f32.mrb[92].mxu0 }
 0x3b5   :  { %14674 = vst [vmem:[#allocation84_spill] sm:$0xff] %v11511_v12  ;;  %v11514_v10 = vadd.f32 %v11327_v42, %v2296_v24  ;;  %v5546_v17 = vpop.f32.mrb[92].mxu1  ;;  %6178 = vrot.lane.b32.xlu1 %v14386_v48, %s9419_s28  ;;  %v7731_v6 = vpop.f32.mrb[93].mxu0  ;;  %v9366_v24 = vld [vmem:[%s14224_s0 + $0x4b8] ss:$12 sps:$4 sm:$0xff]  }
 0x3b6   :  { %v7991_v35 = vpop.f32.mrb[93].mxu1  ;;  %6180 = vrot.lane.b32.xlu0 %v14388_v37, %s9419_s28  ;;  %v2299_v7 = vpop.f32.mrb[94].mxu0  ;;  %v11531_v6 = vadd.f32 %v11327_v42, %v5546_v17  ;;  %v14678_v37 = vmax.f32 %v10593_v26, 0.0  ;;  %v71_v17 = vld [vmem:[%s14227_s3] sm:$0xff]  ;;  %v14681_v26 = vmax.f32 %v11502_v36, 0.0 }
 0x3b7   :  { %14675 = vst [vmem:[#allocation85_spill] sm:$0xff] %v11514_v10  ;;  %v5549_v59 = vpop.f32.mrb[94].mxu1  ;;  %v11533_v29 = vpop.permute.xlu1 %6122  ;;  %v72_v35 = vld [vmem:[%s14227_s3 + $0x8] sm:$0xff] }
 0x3b8   :  { %14676 = vst [vmem:[#allocation86_spill] sm:$0xff] %v11531_v6  ;;  %14677 = vst [vmem:[#allocation87_spill] sm:$0xff] %v11533_v29  ;;  %v3205_v0 = vsel %vm3203_vm1, %v14678_v37, %v11165_v44  ;;  %v11543_v32 = vadd.f32 %v11327_v42, %v5549_v59  ;;  %v7992_v12 = vpop.f32.mrb[95].mxu1  ;;  %v11545_v48 = vpop.permute.xlu0 %6124  ;;  %v14680_v29 = vmax.f32 %v10579_v13, 0.0  ;;  %v73_v44 = vld [vmem:[%s14227_s3 + $0x10] sm:$0xff]  ;;  %v14682_v59 = vmax.f32 %v10610_v31, 0.0 }
 0x3b9   :  { %v7732_v33 = vpop.f32.mrb[95].mxu0  ;;  %8098 = vmatmul.mubr.bf16.gmra.mrb[200].mxu1 %v9367_v1  ;;  %2930 = vrot.lane.b32.xlu1 %v14681_v26, %s9419_s28  ;;  %v14683_v13 = vmax.f32 %v11514_v10, 0.0  ;;  %v11573_v12 = vadd.f32 %v11327_v42, %v2299_v7  ;;  %v14685_v31 = vmax.f32 %v10582_v14, 0.0 }
 0x3ba   :  { %14679 = vst [vmem:[#allocation88_spill] sm:$0xff] %v11543_v32  ;;  %v3204_v55 = vsel %vm3203_vm1, %v14680_v29, %v11140_v21  ;;  %v3206_v37 = vsel %vm3203_vm1, %v14682_v59, %v11177_v27  ;;  %7838 = vmatmul.mubr.bf16.gmra.mrb[200].mxu0 %v9366_v24  ;;  %v3326_v33 = vmul.f32 %v3205_v0, %v72_v35  ;;  %v14684_v21 = vmax.f32 %v10607_v28, 0.0 }
 0x3bb   :  { %2932 = vrot.lane.b32.xlu0 %v14683_v13, %s9419_s28  ;;  %v11575_v26 = vpop.permute.xlu1 %2874  ;;  %7841 = vmatprep.mubr.msk.bf16.mxu0 %vm9418_vm0, %v14627_v56  ;;  %v6453_v28 = vsel %vm3203_vm1, %v14685_v31, %v11133_v23  ;;  %v3325_v27 = vmul.f32 %v3204_v55, %v71_v17  ;;  %v3327_v24 = vmul.f32 %v3206_v37, %v73_v44  ;;  %v14686_v59 = vmax.f32 %v10623_v39, 0.0  ;;  %v9369_v39 = vld [vmem:[%s14224_s0 + $0xa7c] ss:$12 sps:$4 sm:$0xff]  }
 0x3bc   :  { %v6454_v29 = vsel %vm3203_vm1, %v14684_v21, %v11184_v57  ;;  %8101 = vmatprep.mubr.msk.bf16.mxu1 %vm9418_vm0, %v14627_v56  ;;  %v14391_v57 = vmax.f32 %v11543_v32, 0.0  ;;  %v11586_v0 = vpop.permute.xlu0 %2876  ;;  %v2304_v7 = vpop.f32.mrb[96].mxu0  ;;  %v14687_v21 = vmax.f32 %v10637_v45, 0.0  ;;  %v14688_v55 = vmax.f32 %v11531_v6, 0.0 }
 0x3bd   :  { %v6455_v13 = vsel %vm3203_vm1, %v14686_v59, %v11206_v62  ;;  %v11597_v14 = vadd.f32 %v11327_v42, %v2304_v7  ;;  %v5554_v23 = vpop.f32.mrb[96].mxu1  ;;  %v7735_v31 = vpop.f32.mrb[97].mxu0  ;;  %v6575_v37 = vmul.f32 %v6454_v29, %v72_v35  ;;  %v3446_v7 = vadd.f32 %v3326_v33, %v3325_v27  ;;  %v74_v59 = vld [vmem:[%s14227_s3 + $0x18] sm:$0xff] }
 0x3be   :  { %v3207_v1 = vsel %vm3203_vm1, %v14687_v21, %v11223_v52  ;;  %6182 = vrot.lane.b32.xlu1 %v14688_v55, %s9419_s28  ;;  %v7995_v62 = vpop.f32.mrb[97].mxu1  ;;  %v2307_v45 = vpop.f32.mrb[98].mxu0  ;;  %v9368_v52 = vld [vmem:[%s14224_s0 + $0x4d0] ss:$12 sps:$4 sm:$0xff]   ;;  %v14410_v21 = vmax.f32 %v11573_v12, 0.0  ;;  %v11617_v35 = vadd.f32 %v11327_v42, %v5554_v23  ;;  %v14689_v55 = vmax.f32 %v10627_v43, 0.0 }
 0x3bf   :  { %6184 = vrot.lane.b32.xlu0 %v14391_v57, %s9419_s28  ;;  %v5557_v29 = vpop.f32.mrb[98].mxu1  ;;  %v11619_v31 = vpop.permute.xlu1 %6126  ;;  %v6574_v62 = vmul.f32 %v6453_v28, %v71_v17  ;;  %v6576_v57 = vmul.f32 %v6455_v13, %v73_v44  ;;  %v3328_v32 = vmul.f32 %v3207_v1, %v74_v59  ;;  %v3447_v10 = vadd.f32 %v3446_v7, %v3327_v24  ;;  %v75_v28 = vld [vmem:[%s14227_s3 + $0x20] sm:$0xff] }
 0x3c0   :  { %v11622_v6 = vadd.f32 %v11327_v42, %v5557_v29  ;;  %v7996_v33 = vpop.f32.mrb[99].mxu1  ;;  %v11624_v27 = vpop.permute.xlu0 %6128  ;;  %v6456_v17 = vsel %vm3203_vm1, %v14689_v55, %v11211_v5  ;;  %v14690_v44 = vmax.f32 %v10645_v49, 0.0  ;;  %v14692_v24 = vmax.f32 %v10662_v58, 0.0 }
 0x3c1   :  { %v7736_v36 = vpop.f32.mrb[99].mxu0  ;;  %8102 = vmatmul.mubr.bf16.gmra.mrb[204].mxu1 %v9369_v39  ;;  %v6695_v23 = vadd.f32 %v6575_v37, %v6574_v62  ;;  %v14693_v5 = vmax.f32 %v10675_v63, 0.0  ;;  %v11653_v13 = vadd.f32 %v11327_v42, %v2307_v45  ;;  %v76_v45 = vld [vmem:[%s14227_s3 + $0x28] sm:$0xff] }
 0x3c2   :  { %2934 = vrot.lane.b32.xlu1 %v14410_v21, %s9419_s28  ;;  %v3208_v1 = vsel %vm3203_vm1, %v14690_v44, %v11230_v46  ;;  %7842 = vmatmul.mubr.bf16.gmra.mrb[204].mxu0 %v9368_v52  ;;  %v14691_v36 = vmax.f32 %v11597_v14, 0.0  ;;  %v6457_v43 = vsel %vm3203_vm1, %v14692_v24, %v11252_v19  ;;  %v14409_v46 = vmax.f32 %v11617_v35, 0.0  ;;  %v9370_v44 = vld [vmem:[%s14224_s0 + $0x4e8] ss:$12 sps:$4 sm:$0xff]  }
 0x3c3   :  { %v3209_v49 = vsel %vm3203_vm1, %v14693_v5, %v11269_v22  ;;  %v11655_v39 = vpop.permute.xlu1 %2878  ;;  %7845 = vmatprep.mubr.msk.bf16.mxu0 %vm9418_vm0, %v14627_v56  ;;  %8105 = vmatprep.mubr.msk.bf16.mxu1 %vm9418_vm0, %v14627_v56  ;;  %v6696_v58 = vadd.f32 %v6695_v23, %v6576_v57  ;;  %v3448_v19 = vadd.f32 %v3447_v10, %v3328_v32  ;;  %v14396_v37 = vmax.f32 %v11622_v6, 0.0  ;;  %v9371_v32 = vld [vmem:[%s14224_s0 + $0xa94] ss:$12 sps:$4 sm:$0xff]  }
 0x3c4   :  { %2936 = vrot.lane.b32.xlu0 %v14691_v36, %s9419_s28  ;;  %v11662_v63 = vpop.permute.xlu0 %2880  ;;  %v2312_v22 = vpop.f32.mrb[100].mxu0  ;;  %v6577_v10 = vmul.f32 %v6456_v17, %v74_v59  ;;  %v3329_v57 = vmul.f32 %v3208_v1, %v75_v28  ;;  %v6578_v29 = vmul.f32 %v6457_v43, %v75_v28  ;;  %v3330_v62 = vmul.f32 %v3209_v49, %v76_v45 }
 0x3c5   :  { %v11668_v52 = vadd.f32 %v11327_v42, %v2312_v22  ;;  %v5562_v7 = vpop.f32.mrb[100].mxu1  ;;  %v7739_v55 = vpop.f32.mrb[101].mxu0  ;;  %v14408_v36 = vmax.f32 %v11653_v13, 0.0 }
 0x3c6   :  { %6186 = vrot.lane.b32.xlu1 %v14409_v46, %s9419_s28  ;;  %v7999_v33 = vpop.f32.mrb[101].mxu1  ;;  %v2315_v23 = vpop.f32.mrb[102].mxu0  ;;  %v11685_v5 = vadd.f32 %v11327_v42, %v5562_v7  ;;  %v6697_v1 = vadd.f32 %v6696_v58, %v6577_v10  ;;  %v3449_v28 = vadd.f32 %v3448_v19, %v3329_v57  ;;  %v14694_v55 = vmax.f32 %v10665_v61, 0.0  ;;  %v77_v7 = vld [vmem:[%s14227_s3 + $0x30] sm:$0xff] }
 0x3c7   :  { %v14405_v24 = vmax.f32 %v11668_v52, 0.0  ;;  %v5565_v59 = vpop.f32.mrb[102].mxu1  ;;  %v11687_v17 = vpop.permute.xlu1 %6130  ;;  %v14696_v19 = vmax.f32 %v10700_v15, 0.0 }
 0x3c8   :  { %6188 = vrot.lane.b32.xlu0 %v14396_v37, %s9419_s28  ;;  %v11690_v43 = vadd.f32 %v11327_v42, %v5565_v59  ;;  %v8000_v49 = vpop.f32.mrb[103].mxu1  ;;  %v11692_v22 = vpop.permute.xlu0 %6132  ;;  %v6458_v33 = vsel %vm3203_vm1, %v14694_v55, %v11257_v54  ;;  %v14695_v37 = vmax.f32 %v10683_v3, 0.0  ;;  %v6698_v61 = vadd.f32 %v6697_v1, %v6578_v29 }
 0x3c9   :  { %v6459_v10 = vsel %vm3203_vm1, %v14696_v19, %v11298_v41  ;;  %v7740_v57 = vpop.f32.mrb[103].mxu0  ;;  %8106 = vmatmul.mubr.bf16.gmra.mrb[208].mxu1 %v9371_v32  ;;  %v3450_v54 = vadd.f32 %v3449_v28, %v3330_v62  ;;  %v14697_v59 = vmax.f32 %v10713_v20, 0.0  ;;  %v14404_v15 = vmax.f32 %v11685_v5, 0.0  ;;  %v78_v32 = vld [vmem:[%s14227_s3 + $0x38] sm:$0xff] }
 0x3ca   :  { %v3210_v58 = vsel %vm3203_vm1, %v14695_v37, %v11276_v8  ;;  %2938 = vrot.lane.b32.xlu1 %v14408_v36, %s9419_s28  ;;  %7846 = vmatmul.mubr.bf16.gmra.mrb[208].mxu0 %v9370_v44  ;;  %v11721_v41 = vadd.f32 %v11327_v42, %v2315_v23  ;;  %v6579_v20 = vmul.f32 %v6458_v33, %v76_v45  ;;  %v14402_v29 = vmax.f32 %v11690_v43, 0.0  ;;  %v9373_v49 = vld [vmem:[%s14224_s0 + $0xaac] ss:$12 sps:$4 sm:$0xff]  }
 0x3cb   :  { %v3211_v3 = vsel %vm3203_vm1, %v14697_v59, %v11315_v11  ;;  %v11723_v8 = vpop.permute.xlu1 %2882  ;;  %7849 = vmatprep.mubr.msk.bf16.mxu0 %vm9418_vm0, %v14627_v56  ;;  %8109 = vmatprep.mubr.msk.bf16.mxu1 %vm9418_vm0, %v14627_v56  ;;  %v3331_v11 = vmul.f32 %v3210_v58, %v77_v7  ;;  %v6580_v37 = vmul.f32 %v6459_v10, %v77_v7  ;;  %v14698_v7 = vmax.f32 %v10703_v18, 0.0  ;;  %v9372_v57 = vld [vmem:[%s14224_s0 + $0x500] ss:$12 sps:$4 sm:$0xff]  }
 0x3cc   :  { %2940 = vrot.lane.b32.xlu0 %v14405_v24, %s9419_s28  ;;  %v11733_v62 = vpop.permute.xlu0 %2884  ;;  %v2320_v23 = vpop.f32.mrb[104].mxu0  ;;  %v3332_v44 = vmul.f32 %v3211_v3, %v78_v32  ;;  %v6699_v55 = vadd.f32 %v6698_v61, %v6579_v20  ;;  %v14699_v59 = vmax.f32 %v10738_v47, 0.0  ;;  %v14701_v47 = vmax.f32 %v10721_v30, 0.0 }
 0x3cd   :  { %v11736_v1 = vadd.f32 %v11327_v42, %v2320_v23  ;;  %v5570_v28 = vpop.f32.mrb[104].mxu1  ;;  %v7743_v45 = vpop.f32.mrb[105].mxu0  ;;  %v3451_v33 = vadd.f32 %v3450_v54, %v3331_v11  ;;  %v6460_v58 = vsel %vm3203_vm1, %v14698_v7, %v11303_v34  ;;  %v14403_v54 = vmax.f32 %v11721_v41, 0.0  ;;  %v79_v23 = vld [vmem:[%s14227_s3 + $0x40] sm:$0xff] }
 0x3ce   :  { %6190 = vrot.lane.b32.xlu1 %v14404_v15, %s9419_s28  ;;  %v8003_v19 = vpop.f32.mrb[105].mxu1  ;;  %v2323_v10 = vpop.f32.mrb[106].mxu0  ;;  %v6461_v61 = vsel %vm3203_vm1, %v14699_v59, %v11349_v9  ;;  %v11761_v34 = vadd.f32 %v11327_v42, %v5570_v28  ;;  %v6700_v11 = vadd.f32 %v6699_v55, %v6580_v37  ;;  %v3212_v9 = vsel %vm3203_vm1, %v14701_v47, %v11322_v50 }
 0x3cf   :  { %v14399_v18 = vmax.f32 %v11736_v1, 0.0  ;;  %v5573_v3 = vpop.f32.mrb[106].mxu1  ;;  %v11763_v20 = vpop.permute.xlu1 %6134  ;;  %v3452_v28 = vadd.f32 %v3451_v33, %v3332_v44  ;;  %v14703_v59 = vmax.f32 %v10751_v53, 0.0  ;;  %v6581_v30 = vmul.f32 %v6460_v58, %v78_v32  ;;  %v80_v53 = vld [vmem:[%s14227_s3 + $0x48] sm:$0xff] }
 0x3d0   :  { %6192 = vrot.lane.b32.xlu0 %v14402_v29, %s9419_s28  ;;  %14700 = vst [vmem:[#allocation89_spill] sm:$0xff] %v11761_v34  ;;  %v11773_v45 = vadd.f32 %v11327_v42, %v5573_v3  ;;  %v8004_v7 = vpop.f32.mrb[107].mxu1  ;;  %v11775_v19 = vpop.permute.xlu0 %6136  ;;  %v6582_v50 = vmul.f32 %v6461_v61, %v79_v23  ;;  %v3333_v3 = vmul.f32 %v3212_v9, %v79_v23  ;;  %v14724_v29 = vld [vmem:[#allocation10_spill] sm:$0xff] }
 0x3d1   :  { %v3213_v37 = vsel %vm3203_vm1, %v14703_v59, %v11366_v40  ;;  %v7744_v55 = vpop.f32.mrb[107].mxu0  ;;  %8110 = vmatmul.mubr.bf16.gmra.mrb[212].mxu1 %v9373_v49  ;;  %v14398_v40 = vmax.f32 %v11761_v34, 0.0  ;;  %v11792_v44 = vadd.f32 %v11327_v42, %v2323_v10  ;;  %v6701_v32 = vadd.f32 %v6700_v11, %v6581_v30  ;;  %v9375_v10 = vld [vmem:[%s14224_s0 + $0xac4] ss:$12 sps:$4 sm:$0xff]  }
 0x3d2   :  { %14702 = vst [vmem:[#allocation90_spill] sm:$0xff] %v11773_v45  ;;  %2942 = vrot.lane.b32.xlu1 %v14403_v54, %s9419_s28  ;;  %7850 = vmatmul.mubr.bf16.gmra.mrb[212].mxu0 %v9372_v57  ;;  %v3334_v33 = vmul.f32 %v3213_v37, %v80_v53  ;;  %v14397_v58 = vmax.f32 %v11773_v45, 0.0  ;;  %v3453_v23 = vadd.f32 %v3452_v28, %v3333_v3  ;;  %v14705_v11 = vmax.f32 %v10741_v51, 0.0  ;;  %v9374_v51 = vld [vmem:[%s14224_s0 + $0x518] ss:$12 sps:$4 sm:$0xff]   ;;  %v14755_v34 = vld [vmem:[#allocation18_spill] sm:$0xff] }
 0x3d3   :  { %14704 = vst [vmem:[#allocation91_spill] sm:$0xff] %v11792_v44  ;;  %v11794_v49 = vpop.permute.xlu1 %2886  ;;  %7853 = vmatprep.mubr.msk.bf16.mxu0 %vm9418_vm0, %v14627_v56  ;;  %8113 = vmatprep.mubr.msk.bf16.mxu1 %vm9418_vm0, %v14627_v56  ;;  %v6702_v7 = vadd.f32 %v6701_v32, %v6582_v50  ;;  %v14706_v37 = vmax.f32 %v10776_v16, 0.0  ;;  %v14708_v16 = vmax.f32 %v10759_v60, 0.0  ;;  %v14709_v50 = vld [vmem:[#allocation6_spill] sm:$0xff]  ;;  %v14725_v54 = vmax.f32 %v14724_v29, 0.0 }
 0x3d4   :  { %2944 = vrot.lane.b32.xlu0 %v14399_v18, %s9419_s28  ;;  %v11801_v57 = vpop.permute.xlu0 %2888  ;;  %v5578_v61 = vpop.f32.mrb[108].mxu1  ;;  %v6462_v59 = vsel %vm3203_vm1, %v14705_v11, %v11354_v38  ;;  %v81_v38 = vld [vmem:[%s14227_s3 + $0x50] sm:$0xff]  ;;  %v14710_v32 = vmax.f32 %v14709_v50, 0.0 }
 0x3d5   :  { %v2328_v47 = vpop.f32.mrb[108].mxu0  ;;  %v8007_v9 = vpop.f32.mrb[109].mxu1  ;;  %v6463_v28 = vsel %vm3203_vm1, %v14706_v37, %v11395_v25  ;;  %v3214_v25 = vsel %vm3203_vm1, %v14708_v16, %v11373_v2  ;;  %v11839_v11 = vadd.f32 %v11327_v42, %v5578_v61  ;;  %v6583_v16 = vmul.f32 %v6462_v59, %v80_v53 }
 0x3d6   :  { %6194 = vrot.lane.b32.xlu1 %v14398_v40, %s9419_s28  ;;  %v11818_v55 = vadd.f32 %v11327_v42, %v2328_v47  ;;  %v7747_v30 = vpop.f32.mrb[109].mxu0  ;;  %v5581_v3 = vpop.f32.mrb[110].mxu1  ;;  %v3215_v47 = vsel %vm3203_vm1, %v14710_v32, %v11412_v4  ;;  %v14401_v9 = vmax.f32 %v11792_v44, 0.0  ;;  %v6584_v50 = vmul.f32 %v6463_v28, %v81_v38  ;;  %v82_v4 = vld [vmem:[%s14227_s3 + $0x58] sm:$0xff]  ;;  %v14714_v28 = vld [vmem:[#allocation66_spill] sm:$0xff] }
 0x3d7   :  { %14711 = vst [vmem:[#allocation6_spill] sm:$0xff] %v11839_v11  ;;  %v2331_v37 = vpop.f32.mrb[110].mxu0  ;;  %v8008_v30 = vpop.f32.mrb[111].mxu1  ;;  %v11843_v18 = vadd.f32 %v11327_v42, %v5581_v3  ;;  %v6703_v3 = vadd.f32 %v6702_v7, %v6583_v16  ;;  %v14407_v53 = vmax.f32 %v11839_v11, 0.0  ;;  %v83_v7 = vld [vmem:[%s14227_s3 + $0x60] sm:$0xff] }
 0x3d8   :  { %14707 = vst [vmem:[#allocation92_spill] sm:$0xff] %v11818_v55  ;;  %6196 = vrot.lane.b32.xlu0 %v14397_v58, %s9419_s28  ;;  %v3454_v58 = vadd.f32 %v3453_v23, %v3334_v33  ;;  %v14400_v40 = vmax.f32 %v11818_v55, 0.0  ;;  %v11845_v60 = vpop.permute.xlu1 %6138  ;;  %v11847_v2 = vpop.permute.xlu0 %6140  ;;  %v3335_v33 = vmul.f32 %v3214_v25, %v81_v38  ;;  %v3336_v23 = vmul.f32 %v3215_v47, %v82_v4  ;;  %v14715_v38 = vld [vmem:[#allocation5_spill] sm:$0xff]  ;;  %v14717_v32 = vld [vmem:[#allocation68_spill] sm:$0xff]  ;;  %v14718_v47 = vld [vmem:[#allocation7_spill] sm:$0xff] }
 0x3d9   :  { %14712 = vst [vmem:[#allocation93_spill] sm:$0xff] %v11843_v18  ;;  %v7748_v61 = vpop.f32.mrb[111].mxu0  ;;  %8114 = vmatmul.mubr.bf16.gmra.mrb[216].mxu1 %v9375_v10  ;;  %v11860_v59 = vadd.f32 %v11327_v42, %v2331_v37  ;;  %v14719_v37 = vmax.f32 %v14718_v47, 0.0  ;;  %v14406_v16 = vmax.f32 %v11843_v18, 0.0  ;;  %v14748_v55 = vld [vmem:[#allocation84_spill] sm:$0xff] }
 0x3da   :  { %2946 = vrot.lane.b32.xlu1 %v14401_v9, %s9419_s28  ;;  %7854 = vmatmul.mubr.bf16.gmra.mrb[216].mxu0 %v9374_v51  ;;  %v3455_v10 = vadd.f32 %v3454_v58, %v3335_v33  ;;  %v14716_v51 = vmax.f32 %v14715_v38, 0.0  ;;  %v6704_v58 = vadd.f32 %v6703_v3, %v6584_v50  ;;  %v14720_v33 = vld [vmem:[#allocation71_spill] sm:$0xff]  ;;  %v14721_v38 = vld [vmem:[#allocation8_spill] sm:$0xff] }
 0x3db   :  { %14713 = vst [vmem:[#allocation94_spill] sm:$0xff] %v11860_v59  ;;  %7857 = vmatprep.mubr.msk.bf16.mxu0 %vm9418_vm0, %v14627_v56  ;;  %8117 = vmatprep.mubr.msk.bf16.mxu1 %vm9418_vm0, %v14627_v56  ;;  %v3216_v30 = vsel %vm3203_vm1, %v14719_v37, %v14717_v32  ;;  %v14722_v9 = vmax.f32 %v14721_v38, 0.0  ;;  %v9377_v50 = vld [vmem:[%s14224_s0 + $0xadc] ss:$12 sps:$4 sm:$0xff]  }
 0x3dc   :  { %2948 = vrot.lane.b32.xlu0 %v14400_v40, %s9419_s28  ;;  %v6464_v25 = vsel %vm3203_vm1, %v14716_v51, %v14714_v28  ;;  %v11878_v61 = vpop.permute.xlu1 %2890  ;;  %v11880_v40 = vpop.permute.xlu0 %2892  ;;  %v14723_v51 = vld [vmem:[#allocation75_spill] sm:$0xff]  ;;  %v3456_v3 = vadd.f32 %v3455_v10, %v3336_v23  ;;  %v84_v38 = vld [vmem:[%s14227_s3 + $0x68] sm:$0xff]  ;;  %v14412_v23 = vmax.f32 %v11860_v59, 0.0 }
 0x3dd   :  { %v6465_v28 = vsel %vm3203_vm1, %v14722_v9, %v14720_v33  ;;  %v3217_v15 = vsel %vm3203_vm1, %v14725_v54, %v14723_v51  ;;  %v2336_v47 = vpop.f32.mrb[112].mxu0  ;;  %v5586_v24 = vpop.f32.mrb[112].mxu1  ;;  %v9376_v54 = vld [vmem:[%s14224_s0 + $0x530] ss:$12 sps:$4 sm:$0xff]   ;;  %v6585_v37 = vmul.f32 %v6464_v25, %v82_v4  ;;  %v3337_v33 = vmul.f32 %v3216_v30, %v83_v7  ;;  %v14746_v59 = vld [vmem:[#allocation13_spill] sm:$0xff] }
 0x3de   :  { %6198 = vrot.lane.b32.xlu1 %v14407_v53, %s9419_s28  ;;  %v11897_v32 = vadd.f32 %v11327_v42, %v2336_v47  ;;  %v8011_v9 = vpop.f32.mrb[113].mxu1  ;;  %v7751_v29 = vpop.f32.mrb[113].mxu0  ;;  %v11910_v10 = vadd.f32 %v11327_v42, %v5586_v24  ;;  %v14747_v11 = vmax.f32 %v14746_v59, 0.0 }
 0x3df   :  { %v2339_v51 = vpop.f32.mrb[114].mxu0  ;;  %v5589_v47 = vpop.f32.mrb[114].mxu1  ;;  %v6586_v9 = vmul.f32 %v6465_v28, %v83_v7  ;;  %v6705_v30 = vadd.f32 %v6704_v58, %v6585_v37  ;;  %v3457_v24 = vadd.f32 %v3456_v3, %v3337_v33  ;;  %v14729_v7 = vld [vmem:[#allocation73_spill] sm:$0xff]  ;;  %v14733_v29 = vld [vmem:[#allocation11_spill] sm:$0xff]  ;;  %v14737_v3 = vld [vmem:[#allocation12_spill] sm:$0xff] }
 0x3e0   :  { %14726 = vst [vmem:[#allocation66_spill] sm:$0xff] %v11897_v32  ;;  %6200 = vrot.lane.b32.xlu0 %v14406_v16, %s9419_s28  ;;  %14727 = vst [vmem:[#allocation5_spill] sm:$0xff] %v11910_v10  ;;  %v3338_v16 = vmul.f32 %v3217_v15, %v84_v38  ;;  %v11914_v53 = vadd.f32 %v11327_v42, %v5589_v47  ;;  %v8012_v4 = vpop.f32.mrb[115].mxu1  ;;  %v11916_v25 = vpop.permute.xlu1 %6142  ;;  %v14730_v15 = vld [vmem:[#allocation9_spill] sm:$0xff]  ;;  %v14732_v47 = vld [vmem:[#allocation76_spill] sm:$0xff]  ;;  %v14738_v37 = vmax.f32 %v14737_v3, 0.0 }
 0x3e1   :  { %v11918_v36 = vpop.permute.xlu0 %6144  ;;  %v7752_v46 = vpop.f32.mrb[115].mxu0  ;;  %8118 = vmatmul.mubr.bf16.gmra.mrb[220].mxu1 %v9377_v50  ;;  %v14731_v28 = vmax.f32 %v14730_v15, 0.0  ;;  %v14734_v4 = vmax.f32 %v14733_v29, 0.0  ;;  %v85_v58 = vld [vmem:[%s14227_s3 + $0x70] sm:$0xff] }
 0x3e2   :  { %14728 = vst [vmem:[#allocation68_spill] sm:$0xff] %v11914_v53  ;;  %2950 = vrot.lane.b32.xlu1 %v14412_v23, %s9419_s28  ;;  %7858 = vmatmul.mubr.bf16.gmra.mrb[220].mxu0 %v9376_v54  ;;  %v14735_v46 = vmax.f32 %v11897_v32, 0.0  ;;  %v14736_v50 = vld [vmem:[#allocation79_spill] sm:$0xff]  ;;  %v14740_v15 = vld [vmem:[#allocation14_spill] sm:$0xff]  ;;  %v14413_v54 = vmax.f32 %v11910_v10, 0.0 }
 0x3e3   :  { %v6466_v21 = vsel %vm3203_vm1, %v14731_v28, %v14729_v7  ;;  %v3218_v18 = vsel %vm3203_vm1, %v14734_v4, %v14732_v47  ;;  %v6467_v33 = vsel %vm3203_vm1, %v14738_v37, %v14736_v50  ;;  %v14739_v7 = vld [vmem:[#allocation83_spill] sm:$0xff]  ;;  %v14741_v28 = vmax.f32 %v14740_v15, 0.0  ;;  %7861 = vmatprep.mubr.msk.bf16.mxu0 %vm9418_vm0, %v14627_v56  ;;  %8121 = vmatprep.mubr.msk.bf16.mxu1 %vm9418_vm0, %v14627_v56 }
 0x3e4   :  { %2952 = vrot.lane.b32.xlu0 %v14735_v46, %s9419_s28  ;;  %v11947_v47 = vadd.f32 %v11327_v42, %v2339_v51  ;;  %v6706_v4 = vadd.f32 %v6705_v30, %v6586_v9  ;;  %v3458_v46 = vadd.f32 %v3457_v24, %v3338_v16  ;;  %v14416_v50 = vmax.f32 %v11914_v53, 0.0  ;;  %v11954_v3 = vpop.permute.xlu1 %2894  ;;  %v5594_v37 = vpop.f32.mrb[116].mxu1  ;;  %v9379_v16 = vld [vmem:[%s14224_s0 + $0xaf4] ss:$12 sps:$4 sm:$0xff]  }
 0x3e5   :  { %v3219_v29 = vsel %vm3203_vm1, %v14741_v28, %v14739_v7  ;;  %v6587_v15 = vmul.f32 %v6466_v21, %v84_v38  ;;  %v86_v7 = vld [vmem:[%s14227_s3 + $0x78] sm:$0xff]  ;;  %v11959_v51 = vpop.permute.xlu0 %2896  ;;  %v2344_v28 = vpop.f32.mrb[116].mxu0  ;;  %v3339_v9 = vmul.f32 %v3218_v18, %v85_v58  ;;  %v6588_v30 = vmul.f32 %v6467_v33, %v85_v58  ;;  %v14745_v53 = vld [vmem:[#allocation81_spill] sm:$0xff] }
 0x3e6   :  { %6202 = vrot.lane.b32.xlu1 %v14413_v54, %s9419_s28  ;;  %v3340_v24 = vmul.f32 %v3219_v29, %v86_v7  ;;  %v11968_v21 = vadd.f32 %v11327_v42, %v2344_v28  ;;  %v8015_v38 = vpop.f32.mrb[117].mxu1  ;;  %v7755_v23 = vpop.f32.mrb[117].mxu0  ;;  %v9378_v54 = vld [vmem:[%s14224_s0 + $0x548] ss:$12 sps:$4 sm:$0xff]   ;;  %v11978_v32 = vadd.f32 %v11327_v42, %v5594_v37  ;;  %v6468_v10 = vsel %vm3203_vm1, %v14747_v11, %v14745_v53  ;;  %v87_v37 = vld [vmem:[%s14227_s3 + $0x80] sm:$0xff] }
 0x3e7   :  { %v2347_v18 = vpop.f32.mrb[118].mxu0  ;;  %v5597_v58 = vpop.f32.mrb[118].mxu1  ;;  %v6707_v33 = vadd.f32 %v6706_v4, %v6587_v15  ;;  %v3459_v29 = vadd.f32 %v3458_v46, %v3339_v9  ;;  %v14749_v4 = vld [vmem:[#allocation15_spill] sm:$0xff]  ;;  %v14754_v11 = vmax.f32 %v11947_v47, 0.0 }
 0x3e8   :  { %14742 = vst [vmem:[#allocation7_spill] sm:$0xff] %v11968_v21  ;;  %6204 = vrot.lane.b32.xlu0 %v14416_v50, %s9419_s28  ;;  %14743 = vst [vmem:[#allocation71_spill] sm:$0xff] %v11978_v32  ;;  %v11982_v38 = vadd.f32 %v11327_v42, %v5597_v58  ;;  %v8016_v50 = vpop.f32.mrb[119].mxu1  ;;  %v11984_v23 = vpop.permute.xlu1 %6146  ;;  %v14750_v46 = vmax.f32 %v14749_v4, 0.0  ;;  %v14751_v9 = vld [vmem:[#allocation87_spill] sm:$0xff]  ;;  %v14752_v58 = vld [vmem:[#allocation16_spill] sm:$0xff] }
 0x3e9   :  { %v14753_v28 = vmax.f32 %v14752_v58, 0.0  ;;  %v12001_v45 = vpop.permute.xlu0 %6148  ;;  %v7756_v44 = vpop.f32.mrb[119].mxu0  ;;  %8122 = vmatmul.mubr.bf16.gmra.mrb[224].mxu1 %v9379_v16  ;;  %v6708_v53 = vadd.f32 %v6707_v33, %v6588_v30  ;;  %v3460_v59 = vadd.f32 %v3459_v29, %v3340_v24  ;;  %v14756_v4 = vmax.f32 %v14755_v34, 0.0 }
 0x3ea   :  { %14744 = vst [vmem:[#allocation8_spill] sm:$0xff] %v11982_v38  ;;  %v3220_v15 = vsel %vm3203_vm1, %v14750_v46, %v14748_v55  ;;  %2954 = vrot.lane.b32.xlu1 %v14754_v11, %s9419_s28  ;;  %7862 = vmatmul.mubr.bf16.gmra.mrb[224].mxu0 %v9378_v54  ;;  %v14757_v46 = vmax.f32 %v11968_v21, 0.0  ;;  %v12015_v44 = vadd.f32 %v11327_v42, %v2347_v18  ;;  %v14424_v54 = vmax.f32 %v11982_v38, 0.0  ;;  %v9380_v11 = vld [vmem:[%s14224_s0 + $0x560] ss:$12 sps:$4 sm:$0xff]  }
 0x3eb   :  { %v6469_v50 = vsel %vm3203_vm1, %v14753_v28, %v14751_v9  ;;  %v3221_v55 = vsel %vm3203_vm1, %v14756_v4, %v11575_v26  ;;  %v14425_v28 = vmax.f32 %v11978_v32, 0.0  ;;  %7865 = vmatprep.mubr.msk.bf16.mxu0 %vm9418_vm0, %v14627_v56  ;;  %8125 = vmatprep.mubr.msk.bf16.mxu1 %vm9418_vm0, %v14627_v56  ;;  %v6589_v16 = vmul.f32 %v6468_v10, %v86_v7  ;;  %v88_v26 = vld [vmem:[%s14227_s3 + $0x88] sm:$0xff] }
 0x3ec   :  { %2956 = vrot.lane.b32.xlu0 %v14757_v46, %s9419_s28  ;;  %v3341_v34 = vmul.f32 %v3220_v15, %v87_v37  ;;  %v6590_v30 = vmul.f32 %v6469_v50, %v87_v37  ;;  %v12025_v24 = vpop.permute.xlu1 %2898  ;;  %v5602_v33 = vpop.f32.mrb[120].mxu1  ;;  %v3342_v18 = vmul.f32 %v3221_v55, %v88_v26  ;;  %v9381_v10 = vld [vmem:[%s14224_s0 + $0xb0c] ss:$12 sps:$4 sm:$0xff]   ;;  %v14758_v4 = vld [vmem:[#allocation17_spill] sm:$0xff] }
 0x3ed   :  { %v12027_v29 = vpop.permute.xlu0 %2900  ;;  %v2352_v9 = vpop.f32.mrb[120].mxu0  ;;  %v6709_v7 = vadd.f32 %v6708_v53, %v6589_v16  ;;  %v14759_v55 = vmax.f32 %v14758_v4, 0.0  ;;  %v14760_v53 = vld [vmem:[#allocation20_spill] sm:$0xff]  ;;  %v14762_v4 = vld [vmem:[#allocation19_spill] sm:$0xff] }
 0x3ee   :  { %6206 = vrot.lane.b32.xlu1 %v14425_v28, %s9419_s28  ;;  %v3461_v37 = vadd.f32 %v3460_v59, %v3341_v34  ;;  %v12036_v15 = vadd.f32 %v11327_v42, %v2352_v9  ;;  %v8019_v58 = vpop.f32.mrb[121].mxu1  ;;  %v7759_v50 = vpop.f32.mrb[121].mxu0  ;;  %v14761_v59 = vmax.f32 %v14760_v53, 0.0  ;;  %v12054_v9 = vadd.f32 %v11327_v42, %v5602_v33  ;;  %v89_v28 = vld [vmem:[%s14227_s3 + $0x90] sm:$0xff] }
 0x3ef   :  { %v6470_v46 = vsel %vm3203_vm1, %v14759_v55, %v11545_v48  ;;  %v2355_v58 = vpop.f32.mrb[122].mxu0  ;;  %v5605_v50 = vpop.f32.mrb[122].mxu1  ;;  %v14763_v48 = vmax.f32 %v14762_v4, 0.0 }
 0x3f0   :  { %6208 = vrot.lane.b32.xlu0 %v14424_v54, %s9419_s28  ;;  %v6471_v16 = vsel %vm3203_vm1, %v14761_v59, %v11619_v31  ;;  %v6710_v54 = vadd.f32 %v6709_v7, %v6590_v30  ;;  %v14431_v53 = vmax.f32 %v12036_v15, 0.0  ;;  %v12065_v31 = vadd.f32 %v11327_v42, %v5605_v50  ;;  %v8020_v59 = vpop.f32.mrb[123].mxu1  ;;  %v12067_v33 = vpop.permute.xlu1 %6150  ;;  %v14765_v30 = vld [vmem:[#allocation22_spill] sm:$0xff] }
 0x3f1   :  { %v3222_v55 = vsel %vm3203_vm1, %v14763_v48, %v11586_v0  ;;  %v3462_v34 = vadd.f32 %v3461_v37, %v3342_v18  ;;  %v14766_v7 = vmax.f32 %v14765_v30, 0.0  ;;  %v12073_v21 = vpop.permute.xlu0 %6152  ;;  %v7760_v32 = vpop.f32.mrb[123].mxu0  ;;  %8126 = vmatmul.mubr.bf16.gmra.mrb[228].mxu1 %v9381_v10  ;;  %v14767_v0 = vmax.f32 %v12015_v44, 0.0 }
 0x3f2   :  { %14764 = vst [vmem:[#allocation75_spill] sm:$0xff] %v12065_v31  ;;  %v6591_v4 = vmul.f32 %v6470_v46, %v88_v26  ;;  %v6592_v50 = vmul.f32 %v6471_v16, %v89_v28  ;;  %7866 = vmatmul.mubr.bf16.gmra.mrb[228].mxu0 %v9380_v11  ;;  %v3343_v18 = vmul.f32 %v3222_v55, %v89_v28  ;;  %v14429_v37 = vmax.f32 %v12054_v9, 0.0 }
 0x3f3   :  { %v3223_v38 = vsel %vm3203_vm1, %v14766_v7, %v11655_v39  ;;  %2958 = vrot.lane.b32.xlu1 %v14767_v0, %s9419_s28  ;;  %v90_v39 = vld [vmem:[%s14227_s3 + $0x98] sm:$0xff]  ;;  %v12086_v32 = vadd.f32 %v11327_v42, %v2355_v58  ;;  %7869 = vmatprep.mubr.msk.bf16.mxu0 %vm9418_vm0, %v14627_v56  ;;  %v14430_v11 = vmax.f32 %v12065_v31, 0.0  ;;  %v9383_v58 = vld [vmem:[%s14224_s0 + $0xb24] ss:$12 sps:$4 sm:$0xff]  }
 0x3f4   :  { %2960 = vrot.lane.b32.xlu0 %v14431_v53, %s9419_s28  ;;  %8129 = vmatprep.mubr.msk.bf16.mxu1 %vm9418_vm0, %v14627_v56  ;;  %v6711_v26 = vadd.f32 %v6710_v54, %v6591_v4  ;;  %v3344_v10 = vmul.f32 %v3223_v38, %v90_v39  ;;  %v12093_v28 = vpop.permute.xlu1 %2902  ;;  %v5610_v46 = vpop.f32.mrb[124].mxu1  ;;  %v3463_v16 = vadd.f32 %v3462_v34, %v3343_v18  ;;  %v14769_v38 = vld [vmem:[#allocation21_spill] sm:$0xff]  ;;  %v14771_v7 = vld [vmem:[#allocation24_spill] sm:$0xff] }
 0x3f5   :  { %14768 = vst [vmem:[#allocation10_spill] sm:$0xff] %v12086_v32  ;;  %v12095_v48 = vpop.permute.xlu0 %2904  ;;  %v2360_v55 = vpop.f32.mrb[124].mxu0  ;;  %v14770_v54 = vmax.f32 %v14769_v38, 0.0  ;;  %v14772_v34 = vmax.f32 %v14771_v7, 0.0  ;;  %v14776_v38 = vld [vmem:[#allocation26_spill] sm:$0xff] }
 0x3f6   :  { %v6712_v59 = vadd.f32 %v6711_v26, %v6592_v50  ;;  %v12112_v4 = vadd.f32 %v11327_v42, %v2360_v55  ;;  %v8023_v18 = vpop.f32.mrb[125].mxu1  ;;  %v9382_v50 = vld [vmem:[%s14224_s0 + $0x578] ss:$12 sps:$4 sm:$0xff]   ;;  %v3464_v53 = vadd.f32 %v3463_v16, %v3344_v10 }
 0x3f7   :  { %6210 = vrot.lane.b32.xlu1 %v14429_v37, %s9419_s28  ;;  %v6472_v30 = vsel %vm3203_vm1, %v14770_v54, %v11624_v27  ;;  %v6473_v0 = vsel %vm3203_vm1, %v14772_v34, %v11687_v17  ;;  %v7763_v37 = vpop.f32.mrb[125].mxu0  ;;  %v91_v27 = vld [vmem:[%s14227_s3 + $0xa0] sm:$0xff]  ;;  %v14774_v26 = vld [vmem:[#allocation23_spill] sm:$0xff]  ;;  %v14777_v54 = vmax.f32 %v14776_v38, 0.0  ;;  %v12133_v34 = vadd.f32 %v11327_v42, %v5610_v46  ;;  %v92_v42 = vld [vmem:[%s14227_s3 + $0xa8] sm:$0xff] }
 0x3f8   :  { %14773 = vst [vmem:[#allocation73_spill] sm:$0xff] %v12112_v4  ;;  %6212 = vrot.lane.b32.xlu0 %v14430_v11, %s9419_s28  ;;  %v14775_v17 = vmax.f32 %v14774_v26, 0.0  ;;  %v14434_v37 = vmax.f32 %v12086_v32, 0.0  ;;  %v2363_v18 = vpop.f32.mrb[126].mxu0  ;;  %v5613_v11 = vpop.f32.mrb[126].mxu1  ;;  %v14433_v31 = vmax.f32 %v12112_v4, 0.0  ;;  %v6593_v38 = vmul.f32 %v6472_v30, %v90_v39 }
 0x3f9   :  { %v3225_v7 = vsel %vm3203_vm1, %v14777_v54, %v11723_v8  ;;  %14778 = vst [vmem:[#allocation9_spill] sm:$0xff] %v12133_v34  ;;  %v12139_v26 = vld [vmem:[%s14226_s2] ss:$0 sm:$0xff]  ;;  %v12144_v8 = vpop.permute.xlu1 %6154  ;;  %v6594_v54 = vmul.f32 %v6473_v0, %v91_v27  ;;  %v12149_v10 = vpop.permute.xlu0 %6156  ;;  %8130 = vmatmul.mubr.bf16.gmra.mrb[232].mxu1 %v9383_v58 }
 0x3fa   :  { %v3224_v55 = vsel %vm3203_vm1, %v14775_v17, %v11662_v63  ;;  %v12142_v63 = vadd.f32 %v12139_v26, %v5613_v11  ;;  %v8024_v17 = vpop.f32.mrb[127].mxu1  ;;  %v7764_v46 = vpop.f32.mrb[127].mxu0  ;;  %v3346_v11 = vmul.f32 %v3225_v7, %v92_v42  ;;  %7870 = vmatmul.mubr.bf16.gmra.mrb[232].mxu0 %v9382_v50  ;;  %v6713_v39 = vadd.f32 %v6712_v59, %v6593_v38  ;;  %v93_v59 = vld [vmem:[%s14227_s3 + $0xb0] sm:$0xff] }
 0x3fb   :  { %2962 = vrot.lane.b32.xlu1 %v14434_v37, %s9419_s28  ;;  %v3345_v16 = vmul.f32 %v3224_v55, %v91_v27  ;;  %v12159_v0 = vadd.f32 %v12139_v26, %v2363_v18  ;;  %7873 = vmatprep.mubr.msk.bf16.mxu0 %vm9418_vm0, %v14627_v56  ;;  %v14780_v27 = vld [vmem:[#allocation25_spill] sm:$0xff]  ;;  %v14782_v7 = vld [vmem:[#allocation27_spill] sm:$0xff] }
 0x3fc   :  { %14779 = vst [vmem:[#allocation76_spill] sm:$0xff] %v12142_v63  ;;  %2964 = vrot.lane.b32.xlu0 %v14433_v31, %s9419_s28  ;;  %8133 = vmatprep.mubr.msk.bf16.mxu1 %vm9418_vm0, %v14627_v56  ;;  %v14781_v50 = vmax.f32 %v14780_v27, 0.0  ;;  %v14783_v18 = vmax.f32 %v14782_v7, 0.0  ;;  %v14436_v38 = vmax.f32 %v12142_v63, 0.0  ;;  %v5618_v31 = vpop.f32.mrb[128].mxu1 }
 0x3fd   :  { %v3465_v58 = vadd.f32 %v3464_v53, %v3345_v16  ;;  %v12177_v46 = vpop.permute.xlu1 %2906  ;;  %v6714_v53 = vadd.f32 %v6713_v39, %v6594_v54  ;;  %v14784_v16 = vld [vmem:[#allocation28_spill] sm:$0xff]  ;;  %v12187_v4 = vpop.permute.xlu0 %2908 }
 0x3fe   :  { %v6474_v55 = vsel %vm3203_vm1, %v14781_v50, %v11692_v22  ;;  %v3226_v17 = vsel %vm3203_vm1, %v14783_v18, %v11733_v62  ;;  %v14785_v27 = vmax.f32 %v14784_v16, 0.0  ;;  %v14786_v50 = vld [vmem:[#allocation30_spill] sm:$0xff]  ;;  %v2368_v7 = vpop.f32.mrb[128].mxu0  ;;  %v14788_v62 = vmax.f32 %v12133_v34, 0.0 }
 0x3ff   :  { %v14787_v37 = vmax.f32 %v14786_v50, 0.0  ;;  %v9385_v54 = vld [vmem:[%s14224_s0 + $0xb3c] ss:$12 sps:$4 sm:$0xff]   ;;  %v3466_v39 = vadd.f32 %v3465_v58, %v3346_v11  ;;  %v12196_v18 = vadd.f32 %v12139_v26, %v2368_v7  ;;  %v6595_v16 = vmul.f32 %v6474_v55, %v92_v42 }
 0x400   :  { %v6475_v22 = vsel %vm3203_vm1, %v14785_v27, %v11763_v20  ;;  %6214 = vrot.lane.b32.xlu1 %v14788_v62, %s9419_s28  ;;  %v8027_v20 = vpop.f32.mrb[129].mxu1  ;;  %6216 = vrot.lane.b32.xlu0 %v14436_v38, %s9419_s28  ;;  %v3347_v27 = vmul.f32 %v3226_v17, %v93_v59  ;;  %v94_v50 = vld [vmem:[%s14227_s3 + $0xb8] sm:$0xff]  ;;  %v14442_v11 = vmax.f32 %v12159_v0, 0.0  ;;  %v12209_v58 = vadd.f32 %v12139_v26, %v5618_v31 }
 0x401   :  { %v3227_v30 = vsel %vm3203_vm1, %v14787_v37, %v11794_v49  ;;  %14789 = vst [vmem:[#allocation11_spill] sm:$0xff] %v12196_v18  ;;  %v7767_v49 = vpop.f32.mrb[129].mxu0  ;;  %v9384_v37 = vld [vmem:[%s14224_s0 + $0x590] ss:$12 sps:$4 sm:$0xff]   ;;  %v5621_v62 = vpop.f32.mrb[130].mxu1  ;;  %v6596_v20 = vmul.f32 %v6475_v22, %v93_v59  ;;  %v6715_v17 = vadd.f32 %v6714_v53, %v6595_v16  ;;  %8134 = vmatmul.mubr.bf16.gmra.mrb[236].mxu1 %v9385_v54  ;;  %v95_v53 = vld [vmem:[%s14227_s3 + $0xc0] sm:$0xff] }
 0x402   :  { %14790 = vst [vmem:[#allocation79_spill] sm:$0xff] %v12209_v58  ;;  %v2371_v7 = vpop.f32.mrb[130].mxu0  ;;  %v3348_v38 = vmul.f32 %v3227_v30, %v94_v50  ;;  %v12213_v63 = vadd.f32 %v12139_v26, %v5621_v62  ;;  %v8028_v42 = vpop.f32.mrb[131].mxu1  ;;  %v3467_v31 = vadd.f32 %v3466_v39, %v3347_v27  ;;  %v14792_v30 = vld [vmem:[#allocation29_spill] sm:$0xff]  ;;  %v14794_v62 = vld [vmem:[#allocation31_spill] sm:$0xff]  ;;  %7874 = vmatmul.mubr.bf16.gmra.mrb[236].mxu0 %v9384_v37  ;;  %v14797_v54 = vld [vmem:[#allocation32_spill] sm:$0xff] }
 0x403   :  { %v12215_v55 = vpop.permute.xlu1 %6158  ;;  %v12217_v34 = vpop.permute.xlu0 %6160  ;;  %v14793_v59 = vmax.f32 %v14792_v30, 0.0  ;;  %v14795_v42 = vmax.f32 %v14794_v62, 0.0  ;;  %v14798_v39 = vmax.f32 %v14797_v54, 0.0  ;;  %v12246_v37 = vadd.f32 %v12139_v26, %v2371_v7  ;;  %7877 = vmatprep.mubr.msk.bf16.mxu0 %vm9418_vm0, %v14627_v56  ;;  %8137 = vmatprep.mubr.msk.bf16.mxu1 %vm9418_vm0, %v14627_v56  ;;  %v9387_v56 = vld [vmem:[%s14224_s0 + $0xb54] ss:$0 sps:$4 sm:$0x11]  }
 0x404   :  { %14791 = vst [vmem:[#allocation12_spill] sm:$0xff] %v12213_v63  ;;  %v7768_v32 = vpop.f32.mrb[131].mxu0  ;;  %2966 = vrot.lane.b32.xlu1 %v14442_v11, %s9419_s28  ;;  %v3468_v62 = vadd.f32 %v3467_v31, %v3348_v38  ;;  %v14802_v11 = vld [vmem:[#allocation33_spill] sm:$0xff] }
 0x405   :  { %v6476_v22 = vsel %vm3203_vm1, %v14793_v59, %v11775_v19  ;;  %v3228_v49 = vsel %vm3203_vm1, %v14795_v42, %v11801_v57  ;;  %v14796_v32 = vmax.f32 %v12196_v18, 0.0  ;;  %v6477_v16 = vsel %vm3203_vm1, %v14798_v39, %v11845_v60  ;;  %v14799_v19 = vld [vmem:[#allocation34_spill] sm:$0xff]  ;;  %v2376_v39 = vpop.f32.mrb[132].mxu0 }
 0x406   :  { %v14800_v27 = vmax.f32 %v14799_v19, 0.0  ;;  %v14440_v57 = vmax.f32 %v12209_v58, 0.0  ;;  %v6716_v59 = vadd.f32 %v6715_v17, %v6596_v20  ;;  %v14441_v60 = vmax.f32 %v12213_v63, 0.0  ;;  %v9386_v19 = vld [vmem:[%s14224_s0 + $0x5a8] ss:$0 sps:$4 sm:$0x11]  }
 0x407   :  { %2968 = vrot.lane.b32.xlu0 %v14796_v32, %s9419_s28  ;;  %v12253_v42 = vpop.permute.xlu1 %2910  ;;  %v5626_v32 = vpop.f32.mrb[132].mxu1  ;;  %v6597_v54 = vmul.f32 %v6476_v22, %v94_v50  ;;  %v3349_v38 = vmul.f32 %v3228_v49, %v95_v53  ;;  %v6598_v20 = vmul.f32 %v6477_v16, %v95_v53  ;;  %v12267_v50 = vadd.f32 %v12139_v26, %v2376_v39  ;;  %v14809_v18 = vld [vmem:[#allocation38_spill] sm:$0xff] }
 0x408   :  { %v3229_v30 = vsel %vm3203_vm1, %v14800_v27, %v11878_v61  ;;  %v96_v61 = vld [vmem:[%s14227_s3 + $0xc8] sm:$0xff]  ;;  %v12258_v7 = vpop.permute.xlu0 %2912  ;;  %6218 = vrot.lane.b32.xlu1 %v14440_v57, %s9419_s28  ;;  %v8031_v31 = vpop.f32.mrb[133].mxu1  ;;  %v12277_v57 = vadd.f32 %v12139_v26, %v5626_v32  ;;  %v14803_v63 = vmax.f32 %v14802_v11, 0.0  ;;  %v97_v32 = vld [vmem:[%s14227_s3 + $0xd0] sm:$0xff] }
 0x409   :  { %v3350_v17 = vmul.f32 %v3229_v30, %v96_v61  ;;  %v7771_v22 = vpop.f32.mrb[133].mxu0  ;;  %v5629_v53 = vpop.f32.mrb[134].mxu1  ;;  %v6717_v16 = vadd.f32 %v6716_v59, %v6597_v54  ;;  %v3469_v30 = vadd.f32 %v3468_v62, %v3349_v38  ;;  %v14804_v59 = vld [vmem:[#allocation35_spill] sm:$0xff]  ;;  %v14806_v38 = vld [vmem:[#allocation36_spill] sm:$0xff]  ;;  %8138 = vmatmul.mubr.bf16.gmra.mrb[240].mxu1 %v9387_v56 }
 0x40a   :  { %v2379_v49 = vpop.f32.mrb[134].mxu0  ;;  %v12281_v31 = vadd.f32 %v12139_v26, %v5629_v53  ;;  %v6478_v27 = vsel %vm3203_vm1, %v14803_v63, %v11847_v2  ;;  %v14805_v62 = vmax.f32 %v14804_v59, 0.0  ;;  %v14807_v53 = vmax.f32 %v14806_v38, 0.0  ;;  %7878 = vmatmul.mubr.bf16.gmra.mrb[240].mxu0 %v9386_v19 }
 0x40b   :  { %6220 = vrot.lane.b32.xlu0 %v14441_v60, %s9419_s28  ;;  %v8032_v60 = vpop.f32.mrb[135].mxu1  ;;  %v12283_v22 = vpop.permute.xlu1 %6162  ;;  %v14808_v2 = vmax.f32 %v12246_v37, 0.0  ;;  %v6718_v63 = vadd.f32 %v6717_v16, %v6598_v20  ;;  %v3470_v11 = vadd.f32 %v3469_v30, %v3350_v17  ;;  %v14810_v59 = vmax.f32 %v14809_v18, 0.0  ;;  %v98_v20 = vld [vmem:[%s14227_s3 + $0xd8] sm:$0xff] }
 0x40c   :  { %14801 = vst [vmem:[#allocation83_spill] sm:$0xff] %v12281_v31  ;;  %v3230_v54 = vsel %vm3203_vm1, %v14805_v62, %v11880_v40  ;;  %v6479_v60 = vsel %vm3203_vm1, %v14807_v53, %v11916_v25  ;;  %v12300_v39 = vpop.permute.xlu0 %6164  ;;  %v7772_v58 = vpop.f32.mrb[135].mxu0  ;;  %v14811_v62 = vmax.f32 %v12267_v50, 0.0  ;;  %v14447_v25 = vmax.f32 %v12277_v57, 0.0 }
 0x40d   :  { %2970 = vrot.lane.b32.xlu1 %v14808_v2, %s9419_s28  ;;  %v3231_v40 = vsel %vm3203_vm1, %v14810_v59, %v11954_v3  ;;  %v12314_v58 = vadd.f32 %v12139_v26, %v2379_v49  ;;  %v6599_v56 = vmul.f32 %v6478_v27, %v96_v61  ;;  %v3351_v38 = vmul.f32 %v3230_v54, %v97_v32  ;;  %v5634_v17 = vpop.f32.mrb[136].mxu1  ;;  %v2384_v30 = vpop.f32.mrb[136].mxu0 }
 0x40e   :  { %v6600_v53 = vmul.f32 %v6479_v60, %v97_v32  ;;  %v14446_v18 = vmax.f32 %v12281_v31, 0.0  ;;  %v3352_v19 = vmul.f32 %v3231_v40, %v98_v20  ;;  %v12328_v49 = vadd.f32 %v12139_v26, %v2384_v30  ;;  %v8035_v32 = vpop.f32.mrb[137].mxu1  ;;  %v7775_v54 = vpop.f32.mrb[137].mxu0  ;;  %v14813_v60 = vld [vmem:[#allocation37_spill] sm:$0xff]  ;;  %v14815_v40 = vld [vmem:[#allocation40_spill] sm:$0xff] }
 0x40f   :  { %2972 = vrot.lane.b32.xlu0 %v14811_v62, %s9419_s28  ;;  %v12320_v3 = vpop.permute.xlu1 %2914  ;;  %v6719_v61 = vadd.f32 %v6718_v63, %v6599_v56  ;;  %v3471_v27 = vadd.f32 %v3470_v11, %v3351_v38  ;;  %v14814_v2 = vmax.f32 %v14813_v60, 0.0  ;;  %v14816_v62 = vmax.f32 %v14815_v40, 0.0  ;;  %v2387_v38 = vpop.f32.mrb[138].mxu0  ;;  %v99_v54 = vld [vmem:[%s14227_s3 + $0xe0] sm:$0xff]  ;;  %v14818_v60 = vld [vmem:[#allocation39_spill] sm:$0xff] }
 0x410   :  { %v12322_v16 = vpop.permute.xlu0 %2916  ;;  %14812 = vst [vmem:[#allocation14_spill] sm:$0xff] %v12328_v49  ;;  %v12343_v56 = vadd.f32 %v12139_v26, %v5634_v17  ;;  %v5637_v30 = vpop.f32.mrb[138].mxu1  ;;  %v14449_v40 = vmax.f32 %v12328_v49, 0.0 }
 0x411   :  { %6222 = vrot.lane.b32.xlu1 %v14447_v25, %s9419_s28  ;;  %v6480_v59 = vsel %vm3203_vm1, %v14814_v2, %v11918_v36  ;;  %v6481_v63 = vsel %vm3203_vm1, %v14816_v62, %v11984_v23  ;;  %v6720_v32 = vadd.f32 %v6719_v61, %v6600_v53  ;;  %v14819_v36 = vmax.f32 %v14818_v60, 0.0  ;;  %v8036_v62 = vpop.f32.mrb[139].mxu1  ;;  %v14821_v53 = vld [vmem:[#allocation42_spill] sm:$0xff]  ;;  %v7776_v31 = vpop.f32.mrb[139].mxu0 }
 0x412   :  { %14817 = vst [vmem:[#allocation81_spill] sm:$0xff] %v12343_v56  ;;  %v12354_v23 = vadd.f32 %v12139_v26, %v2387_v38  ;;  %v14822_v61 = vmax.f32 %v14821_v53, 0.0  ;;  %v6601_v60 = vmul.f32 %v6480_v59, %v98_v20 }
 0x413   :  { %6224 = vrot.lane.b32.xlu0 %v14446_v18, %s9419_s28  ;;  %v3232_v2 = vsel %vm3203_vm1, %v14819_v36, %v11959_v51  ;;  %v12356_v17 = vpop.permute.xlu1 %6166  ;;  %v3472_v18 = vadd.f32 %v3471_v27, %v3352_v19  ;;  %v14823_v51 = vmax.f32 %v12314_v58, 0.0  ;;  %v6602_v36 = vmul.f32 %v6481_v63, %v99_v54  ;;  %v100_v19 = vld [vmem:[%s14227_s3 + $0xe8] sm:$0xff] }
 0x414   :  { %14820 = vst [vmem:[#allocation13_spill] sm:$0xff] %v12354_v23  ;;  %v3233_v25 = vsel %vm3203_vm1, %v14822_v61, %v12025_v24  ;;  %v12362_v11 = vpop.permute.xlu0 %6168  ;;  %v3353_v38 = vmul.f32 %v3232_v2, %v99_v54  ;;  %v14450_v24 = vmax.f32 %v12343_v56, 0.0  ;;  %v12375_v27 = vadd.f32 %v12139_v26, %v5637_v30  ;;  %v5642_v59 = vpop.f32.mrb[140].mxu1 }
 0x415   :  { %2974 = vrot.lane.b32.xlu1 %v14823_v51, %s9419_s28  ;;  %v6721_v31 = vadd.f32 %v6720_v32, %v6601_v60  ;;  %v3354_v62 = vmul.f32 %v3233_v25, %v100_v19  ;;  %v14451_v53 = vmax.f32 %v12354_v23, 0.0  ;;  %v2392_v54 = vpop.f32.mrb[140].mxu0  ;;  %v14825_v51 = vld [vmem:[#allocation41_spill] sm:$0xff]  ;;  %v14827_v25 = vld [vmem:[#allocation43_spill] sm:$0xff] }
 0x416   :  { %14824 = vst [vmem:[#allocation84_spill] sm:$0xff] %v12375_v27  ;;  %v3473_v63 = vadd.f32 %v3472_v18, %v3353_v38  ;;  %v14826_v30 = vmax.f32 %v14825_v51, 0.0  ;;  %v14828_v60 = vmax.f32 %v14827_v25, 0.0  ;;  %v12394_v18 = vadd.f32 %v12139_v26, %v2392_v54  ;;  %v8039_v38 = vpop.f32.mrb[141].mxu1 }
 0x417   :  { %2976 = vrot.lane.b32.xlu0 %v14449_v40, %s9419_s28  ;;  %v12378_v20 = vpop.permute.xlu1 %2918  ;;  %v6722_v2 = vadd.f32 %v6721_v31, %v6602_v36  ;;  %v101_v36 = vld [vmem:[%s14227_s3 + $0xf0] sm:$0xff]  ;;  %v14457_v25 = vmax.f32 %v12375_v27, 0.0  ;;  %v5645_v38 = vpop.f32.mrb[142].mxu1 }
 0x418   :  { %v12380_v61 = vpop.permute.xlu0 %2920  ;;  %v6482_v32 = vsel %vm3203_vm1, %v14826_v30, %v12001_v45  ;;  %v3234_v40 = vsel %vm3203_vm1, %v14828_v60, %v12027_v29  ;;  %14829 = vst [vmem:[#allocation15_spill] sm:$0xff] %v12394_v18  ;;  %v14830_v45 = vld [vmem:[#allocation44_spill] sm:$0xff]  ;;  %v14832_v29 = vld [vmem:[#allocation46_spill] sm:$0xff]  ;;  %v12412_v60 = vadd.f32 %v12139_v26, %v5642_v59  ;;  %v14456_v23 = vmax.f32 %v12394_v18, 0.0 }
 0x419   :  { %6226 = vrot.lane.b32.xlu1 %v14450_v24, %s9419_s28  ;;  %v7779_v24 = vpop.f32.mrb[141].mxu0  ;;  %v14831_v31 = vmax.f32 %v14830_v45, 0.0  ;;  %v14833_v30 = vmax.f32 %v14832_v29, 0.0  ;;  %v8040_v45 = vpop.f32.mrb[143].mxu1 }
 0x41a   :  { %v2395_v24 = vpop.f32.mrb[142].mxu0 }
 0x41b   :  { %2978 = vrot.lane.b32.xlu0 %v14451_v53, %s9419_s28  ;;  %v6483_v51 = vsel %vm3203_vm1, %v14831_v31, %v12067_v33  ;;  %v3235_v54 = vsel %vm3203_vm1, %v14833_v30, %v12093_v28  ;;  %v3474_v53 = vadd.f32 %v3473_v63, %v3354_v62  ;;  %v12416_v49 = vadd.f32 %v12139_v26, %v2395_v24  ;;  %v12418_v33 = vpop.permute.xlu1 %6170  ;;  %v102_v28 = vld [vmem:[%s14227_s3 + $0xf8] sm:$0xff]  ;;  %v7780_v59 = vpop.f32.mrb[143].mxu0 }
 0x41c   :  { %v6603_v31 = vmul.f32 %v6482_v32, %v100_v19  ;;  %v12423_v29 = vpop.permute.xlu0 %6172  ;;  %v3355_v62 = vmul.f32 %v3234_v40, %v101_v36  ;;  %v6604_v63 = vmul.f32 %v6483_v51, %v101_v36  ;;  %v3356_v30 = vmul.f32 %v3235_v54, %v102_v28  ;;  %v14836_v59 = vld [vmem:[#allocation45_spill] sm:$0xff]  ;;  %v14838_v36 = vld [vmem:[#allocation47_spill] sm:$0xff] }
 0x41d   :  { %14834 = vst [vmem:[#allocation87_spill] sm:$0xff] %v12416_v49  ;;  %6228 = vrot.lane.b32.xlu1 %v14457_v25, %s9419_s28  ;;  %v14459_v19 = vmax.f32 %v12412_v60, 0.0  ;;  %v12433_v32 = vadd.f32 %v12139_v26, %v5645_v38  ;;  %v14837_v56 = vmax.f32 %v14836_v59, 0.0  ;;  %v103_v40 = vld [vmem:[%s14227_s3 + $0x100] sm:$0xff]  ;;  %v14839_v51 = vmax.f32 %v14838_v36, 0.0  ;;  %v5650_v38 = vpop.f32.mrb[144].mxu1 }
 0x41e   :  { %v6723_v24 = vadd.f32 %v6722_v2, %v6603_v31  ;;  %v3475_v45 = vadd.f32 %v3474_v53, %v3355_v62  ;;  %v14840_v53 = vld [vmem:[#allocation48_spill] sm:$0xff]  ;;  %v2400_v36 = vpop.f32.mrb[144].mxu0 }
 0x41f   :  { %2980 = vrot.lane.b32.xlu0 %v14456_v23, %s9419_s28  ;;  %14835 = vst [vmem:[#allocation16_spill] sm:$0xff] %v12433_v32  ;;  %v6484_v27 = vsel %vm3203_vm1, %v14837_v56, %v12073_v21  ;;  %v3236_v2 = vsel %vm3203_vm1, %v14839_v51, %v12095_v48  ;;  %v12447_v31 = vpop.permute.xlu1 %2922  ;;  %v14841_v62 = vmax.f32 %v14840_v53, 0.0  ;;  %v14842_v21 = vld [vmem:[#allocation50_spill] sm:$0xff]  ;;  %v12463_v54 = vadd.f32 %v12139_v26, %v2400_v36  ;;  %v8043_v53 = vpop.f32.mrb[145].mxu1 }
 0x420   :  { %v14843_v56 = vmax.f32 %v14842_v21, 0.0  ;;  %v12457_v25 = vpop.permute.xlu0 %2924  ;;  %v6724_v48 = vadd.f32 %v6723_v24, %v6604_v63  ;;  %v3476_v51 = vadd.f32 %v3475_v45, %v3356_v30  ;;  %v6605_v21 = vmul.f32 %v6484_v27, %v102_v28  ;;  %v5653_v24 = vpop.f32.mrb[146].mxu1 }
 0x421   :  { %v6485_v59 = vsel %vm3203_vm1, %v14841_v62, %v12144_v8  ;;  %6230 = vrot.lane.b32.xlu1 %v14459_v19, %s9419_s28  ;;  %14844 = vst [vmem:[#allocation18_spill] sm:$0xff] %v12463_v54  ;;  %v14845_v8 = vmax.f32 %v12416_v49, 0.0  ;;  %v7783_v62 = vpop.f32.mrb[145].mxu0  ;;  %v14461_v18 = vmax.f32 %v12433_v32, 0.0  ;;  %v12473_v63 = vadd.f32 %v12139_v26, %v5650_v38  ;;  %v8044_v27 = vpop.f32.mrb[147].mxu1 }
 0x422   :  { %v3237_v23 = vsel %vm3203_vm1, %v14843_v56, %v12177_v46  ;;  %v3357_v46 = vmul.f32 %v3236_v2, %v103_v40  ;;  %v104_v56 = vld [vmem:[%s14227_s3 + $0x108] sm:$0xff]  ;;  %v2403_v30 = vpop.f32.mrb[146].mxu0  ;;  %v6606_v45 = vmul.f32 %v6485_v59, %v103_v40  ;;  %v6725_v38 = vadd.f32 %v6724_v48, %v6605_v21  ;;  %v14853_v48 = vld [vmem:[#allocation52_spill] sm:$0xff] }
 0x423   :  { %2982 = vrot.lane.b32.xlu0 %v14845_v8, %s9419_s28  ;;  %14846 = vst [vmem:[#allocation17_spill] sm:$0xff] %v12473_v63  ;;  %v3358_v36 = vmul.f32 %v3237_v23, %v104_v56  ;;  %v12477_v8 = vadd.f32 %v12139_v26, %v2403_v30  ;;  %v12479_v28 = vpop.permute.xlu1 %6174  ;;  %v7784_v62 = vpop.f32.mrb[147].mxu0  ;;  %v14848_v40 = vld [vmem:[#allocation49_spill] sm:$0xff]  ;;  %v14850_v30 = vld [vmem:[#allocation51_spill] sm:$0xff]  ;;  %v14852_v49 = vmax.f32 %v12463_v54, 0.0 }
 0x424   :  { %v12481_v2 = vpop.permute.xlu0 %6176  ;;  %v3477_v19 = vadd.f32 %v3476_v51, %v3357_v46  ;;  %v14849_v23 = vmax.f32 %v14848_v40, 0.0  ;;  %v14851_v53 = vmax.f32 %v14850_v30, 0.0  ;;  %v105_v62 = vld [vmem:[%s14227_s3 + $0x110] sm:$0xff]  ;;  %v14854_v51 = vmax.f32 %v14853_v48, 0.0  ;;  %v5658_v54 = vpop.f32.mrb[148].mxu1 }
 0x425   :  { %14847 = vst [vmem:[#allocation20_spill] sm:$0xff] %v12477_v8  ;;  %6232 = vrot.lane.b32.xlu1 %v14461_v18, %s9419_s28  ;;  %v14465_v30 = vmax.f32 %v12477_v8, 0.0  ;;  %v14866_v8 = vld [vmem:[#allocation58_spill] sm:$0xff] }
 0x426   :  { %v6486_v59 = vsel %vm3203_vm1, %v14849_v23, %v12149_v10  ;;  %v3238_v27 = vsel %vm3203_vm1, %v14851_v53, %v12187_v4  ;;  %v6487_v21 = vsel %vm3203_vm1, %v14854_v51, %v12215_v55  ;;  %v14855_v10 = vld [vmem:[#allocation54_spill] sm:$0xff]  ;;  %v14464_v4 = vmax.f32 %v12473_v63, 0.0  ;;  %v106_v55 = vld [vmem:[%s14227_s3 + $0x118] sm:$0xff] }
 0x427   :  { %2984 = vrot.lane.b32.xlu0 %v14852_v49, %s9419_s28  ;;  %v14856_v46 = vmax.f32 %v14855_v10, 0.0  ;;  %v12510_v53 = vadd.f32 %v12139_v26, %v5653_v24  ;;  %v6726_v49 = vadd.f32 %v6725_v38, %v6606_v45  ;;  %v3478_v23 = vadd.f32 %v3477_v19, %v3358_v36  ;;  %v12513_v18 = vpop.permute.xlu1 %2926  ;;  %v8047_v38 = vpop.f32.mrb[149].mxu1 }
 0x428   :  { %v6607_v48 = vmul.f32 %v6486_v59, %v104_v56  ;;  %v12518_v51 = vpop.permute.xlu0 %2928  ;;  %v3359_v24 = vmul.f32 %v3238_v27, %v105_v62  ;;  %v6608_v45 = vmul.f32 %v6487_v21, %v105_v62  ;;  %v12531_v10 = vadd.f32 %v12139_v26, %v5658_v54  ;;  %v5661_v63 = vpop.f32.mrb[150].mxu1  ;;  %v14859_v38 = vld [vmem:[#allocation53_spill] sm:$0xff] }
 0x429   :  { %v3239_v40 = vsel %vm3203_vm1, %v14856_v46, %v12253_v42  ;;  %v2408_v42 = vpop.f32.mrb[148].mxu0  ;;  %6234 = vrot.lane.b32.xlu1 %v14464_v4, %s9419_s28  ;;  %v107_v54 = vld [vmem:[%s14227_s3 + $0x120] sm:$0xff]  ;;  %v14867_v32 = vmax.f32 %v14866_v8, 0.0 }
 0x42a   :  { %v3360_v19 = vmul.f32 %v3239_v40, %v106_v55  ;;  %v12524_v36 = vadd.f32 %v12139_v26, %v2408_v42  ;;  %v7787_v56 = vpop.f32.mrb[149].mxu0  ;;  %14857 = vst [vmem:[#allocation19_spill] sm:$0xff] %v12531_v10  ;;  %v6727_v4 = vadd.f32 %v6726_v49, %v6607_v48  ;;  %v3479_v27 = vadd.f32 %v3478_v23, %v3359_v24  ;;  %v8048_v40 = vpop.f32.mrb[151].mxu1  ;;  %v14861_v49 = vld [vmem:[#allocation55_spill] sm:$0xff]  ;;  %v14863_v24 = vld [vmem:[#allocation56_spill] sm:$0xff] }
 0x42b   :  { %2986 = vrot.lane.b32.xlu0 %v14465_v30, %s9419_s28  ;;  %v2411_v46 = vpop.f32.mrb[150].mxu0  ;;  %v12537_v42 = vpop.permute.xlu1 %6178  ;;  %v14860_v56 = vmax.f32 %v14859_v38, 0.0  ;;  %v14862_v23 = vmax.f32 %v14861_v49, 0.0  ;;  %v3241_v49 = vsel %vm3203_vm1, %v14867_v32, %v12320_v3 }
 0x42c   :  { %v12535_v21 = vadd.f32 %v12139_v26, %v2411_v46  ;;  %v14864_v46 = vmax.f32 %v14863_v24, 0.0  ;;  %v12554_v62 = vpop.permute.xlu0 %6180  ;;  %v7788_v59 = vpop.f32.mrb[151].mxu0  ;;  %v6728_v38 = vadd.f32 %v6727_v4, %v6608_v45  ;;  %v108_v4 = vld [vmem:[%s14227_s3 + $0x128] sm:$0xff] }
 0x42d   :  { %v6488_v30 = vsel %vm3203_vm1, %v14860_v56, %v12217_v34  ;;  %v3240_v48 = vsel %vm3203_vm1, %v14862_v23, %v12258_v7  ;;  %v14865_v34 = vmax.f32 %v12510_v53, 0.0  ;;  %v3480_v56 = vadd.f32 %v3479_v27, %v3360_v19  ;;  %v5666_v3 = vpop.f32.mrb[152].mxu1  ;;  %v2416_v27 = vpop.f32.mrb[152].mxu0 }
 0x42e   :  { %14858 = vst [vmem:[#allocation22_spill] sm:$0xff] %v12535_v21  ;;  %v6489_v40 = vsel %vm3203_vm1, %v14864_v46, %v12283_v22  ;;  %v14868_v7 = vmax.f32 %v12524_v36, 0.0  ;;  %v14470_v22 = vmax.f32 %v12531_v10, 0.0  ;;  %v12568_v23 = vadd.f32 %v12139_v26, %v5661_v63 }
 0x42f   :  { %6236 = vrot.lane.b32.xlu1 %v14865_v34, %s9419_s28  ;;  %v6609_v59 = vmul.f32 %v6488_v30, %v106_v55  ;;  %v3361_v24 = vmul.f32 %v3240_v48, %v107_v54  ;;  %v6610_v46 = vmul.f32 %v6489_v40, %v107_v54  ;;  %v14469_v8 = vmax.f32 %v12535_v21, 0.0  ;;  %v12574_v45 = vpop.permute.xlu1 %2930  ;;  %v8051_v54 = vpop.f32.mrb[153].mxu1  ;;  %v14870_v40 = vld [vmem:[#allocation57_spill] sm:$0xff] }
 0x430   :  { %2988 = vrot.lane.b32.xlu0 %v14868_v7, %s9419_s28  ;;  %v3362_v32 = vmul.f32 %v3241_v49, %v108_v4  ;;  %v12576_v19 = vpop.permute.xlu0 %2932  ;;  %v12582_v55 = vadd.f32 %v12139_v26, %v2416_v27  ;;  %v7791_v48 = vpop.f32.mrb[153].mxu0  ;;  %v14871_v34 = vmax.f32 %v14870_v40, 0.0  ;;  %v14872_v7 = vld [vmem:[#allocation60_spill] sm:$0xff]  ;;  %v14875_v40 = vld [vmem:[#allocation59_spill] sm:$0xff] }
 0x431   :  { %v6729_v63 = vadd.f32 %v6728_v38, %v6609_v59  ;;  %v3481_v30 = vadd.f32 %v3480_v56, %v3361_v24  ;;  %v14873_v10 = vmax.f32 %v14872_v7, 0.0  ;;  %v12597_v59 = vadd.f32 %v12139_v26, %v5666_v3  ;;  %v2419_v24 = vpop.f32.mrb[154].mxu0  ;;  %v5669_v27 = vpop.f32.mrb[154].mxu1  ;;  %v109_v48 = vld [vmem:[%s14227_s3 + $0x130] sm:$0xff] }
 0x432   :  { %14869 = vst [vmem:[#allocation21_spill] sm:$0xff] %v12582_v55  ;;  %v6490_v49 = vsel %vm3203_vm1, %v14871_v34, %v12300_v39  ;;  %v14876_v39 = vmax.f32 %v14875_v40, 0.0  ;;  %v14472_v7 = vmax.f32 %v12582_v55, 0.0  ;;  %v7792_v21 = vpop.f32.mrb[155].mxu0 }
 0x433   :  { %6238 = vrot.lane.b32.xlu1 %v14470_v22, %s9419_s28  ;;  %v6491_v38 = vsel %vm3203_vm1, %v14873_v10, %v12356_v17  ;;  %14874 = vst [vmem:[#allocation24_spill] sm:$0xff] %v12597_v59  ;;  %v6730_v54 = vadd.f32 %v6729_v63, %v6610_v46  ;;  %v12608_v17 = vadd.f32 %v12139_v26, %v2419_v24  ;;  %v8052_v10 = vpop.f32.mrb[155].mxu1  ;;  %v12610_v3 = vpop.permute.xlu1 %6182  ;;  %v14878_v46 = vld [vmem:[#allocation62_spill] sm:$0xff] }
 0x434   :  { %2990 = vrot.lane.b32.xlu0 %v14469_v8, %s9419_s28  ;;  %v3242_v34 = vsel %vm3203_vm1, %v14876_v39, %v12322_v16  ;;  %v3482_v8 = vadd.f32 %v3481_v30, %v3362_v32  ;;  %v14879_v63 = vmax.f32 %v14878_v46, 0.0  ;;  %v12616_v56 = vpop.permute.xlu0 %6184  ;;  %v14880_v16 = vmax.f32 %v12568_v23, 0.0  ;;  %v110_v32 = vld [vmem:[%s14227_s3 + $0x138] sm:$0xff] }
 0x435   :  { %14877 = vst [vmem:[#allocation23_spill] sm:$0xff] %v12608_v17  ;;  %v6611_v40 = vmul.f32 %v6490_v49, %v108_v4  ;;  %v6612_v39 = vmul.f32 %v6491_v38, %v109_v48  ;;  %v3363_v24 = vmul.f32 %v3242_v34, %v109_v48  ;;  %v12629_v30 = vadd.f32 %v12139_v26, %v5669_v27  ;;  %v5674_v49 = vpop.f32.mrb[156].mxu1  ;;  %v2424_v48 = vpop.f32.mrb[156].mxu0 }
 0x436   :  { %v3243_v22 = vsel %vm3203_vm1, %v14879_v63, %v12378_v20  ;;  %v14473_v20 = vmax.f32 %v12597_v59, 0.0  ;;  %v14474_v46 = vmax.f32 %v12608_v17, 0.0 }
 0x437   :  { %6240 = vrot.lane.b32.xlu1 %v14880_v16, %s9419_s28  ;;  %14881 = vst [vmem:[#allocation26_spill] sm:$0xff] %v12629_v30  ;;  %v6731_v21 = vadd.f32 %v6730_v54, %v6611_v40  ;;  %v3364_v10 = vmul.f32 %v3243_v22, %v110_v32  ;;  %v12632_v4 = vpop.permute.xlu1 %2934  ;;  %v3483_v38 = vadd.f32 %v3482_v8, %v3363_v24  ;;  %v14882_v16 = vld [vmem:[#allocation61_spill] sm:$0xff]  ;;  %v14884_v22 = vld [vmem:[#allocation63_spill] sm:$0xff]  ;;  %v8055_v24 = vpop.f32.mrb[157].mxu1 }
 0x438   :  { %2992 = vrot.lane.b32.xlu0 %v14472_v7, %s9419_s28  ;;  %v12634_v63 = vpop.permute.xlu0 %2936  ;;  %v14883_v27 = vmax.f32 %v14882_v16, 0.0  ;;  %v14885_v40 = vmax.f32 %v14884_v22, 0.0  ;;  %v12648_v8 = vadd.f32 %v12139_v26, %v2424_v48  ;;  %v14480_v22 = vmax.f32 %v12629_v30, 0.0  ;;  %v5677_v24 = vpop.f32.mrb[158].mxu1 }
 0x439   :  { %v6732_v34 = vadd.f32 %v6731_v21, %v6612_v39  ;;  %v111_v39 = vld [vmem:[%s14227_s3 + $0x140] sm:$0xff] }
 0x43a   :  { %v6492_v54 = vsel %vm3203_vm1, %v14883_v27, %v12362_v11  ;;  %v3244_v7 = vsel %vm3203_vm1, %v14885_v40, %v12380_v61  ;;  %v14886_v11 = vld [vmem:[#allocation64_spill] sm:$0xff]  ;;  %v14888_v61 = vld [vmem:[#allocation67_spill] sm:$0xff]  ;;  %v12666_v40 = vadd.f32 %v12139_v26, %v5674_v49  ;;  %v14479_v17 = vmax.f32 %v12648_v8, 0.0 }
 0x43b   :  { %6242 = vrot.lane.b32.xlu1 %v14473_v20, %s9419_s28  ;;  %v7795_v20 = vpop.f32.mrb[157].mxu0  ;;  %v14887_v21 = vmax.f32 %v14886_v11, 0.0  ;;  %v14889_v27 = vmax.f32 %v14888_v61, 0.0  ;;  %v8056_v11 = vpop.f32.mrb[159].mxu1 }
 0x43c   :  { %2994 = vrot.lane.b32.xlu0 %v14474_v46, %s9419_s28  ;;  %14890 = vst [vmem:[#allocation25_spill] sm:$0xff] %v12666_v40  ;;  %v2427_v20 = vpop.f32.mrb[158].mxu0  ;;  %v3484_v46 = vadd.f32 %v3483_v38, %v3364_v10  ;;  %v12677_v61 = vpop.permute.xlu0 %6188  ;;  %v3365_v10 = vmul.f32 %v3244_v7, %v111_v39  ;;  %v113_v7 = vld [vmem:[%s14227_s3 + $0x150] sm:$0xff] }
 0x43d   :  { %v6493_v16 = vsel %vm3203_vm1, %v14887_v21, %v12418_v33  ;;  %v3245_v48 = vsel %vm3203_vm1, %v14889_v27, %v12447_v31  ;;  %v12670_v59 = vadd.f32 %v12139_v26, %v2427_v20  ;;  %v12672_v33 = vpop.permute.xlu1 %6186  ;;  %v6613_v21 = vmul.f32 %v6492_v54, %v110_v32  ;;  %v112_v31 = vld [vmem:[%s14227_s3 + $0x148] sm:$0xff]  ;;  %v7796_v49 = vpop.f32.mrb[159].mxu0 }
 0x43e   :  { %v6614_v38 = vmul.f32 %v6493_v16, %v111_v39  ;;  %v3366_v27 = vmul.f32 %v3245_v48, %v112_v31  ;;  %v14482_v32 = vmax.f32 %v12666_v40, 0.0  ;;  %v12687_v54 = vadd.f32 %v12139_v26, %v5677_v24  ;;  %v14892_v49 = vld [vmem:[#allocation65_spill] sm:$0xff]  ;;  %v5682_v24 = vpop.f32.mrb[160].mxu1 }
 0x43f   :  { %14891 = vst [vmem:[#allocation27_spill] sm:$0xff] %v12670_v59  ;;  %6244 = vrot.lane.b32.xlu1 %v14480_v22, %s9419_s28  ;;  %v6733_v20 = vadd.f32 %v6732_v34, %v6613_v21  ;;  %v3485_v11 = vadd.f32 %v3484_v46, %v3365_v10  ;;  %v14893_v55 = vmax.f32 %v14892_v49, 0.0  ;;  %v14894_v39 = vld [vmem:[#allocation69_spill] sm:$0xff]  ;;  %v14896_v46 = vld [vmem:[#allocation70_spill] sm:$0xff] }
 0x440   :  { %2996 = vrot.lane.b32.xlu0 %v14479_v17, %s9419_s28  ;;  %v14895_v16 = vmax.f32 %v14894_v39, 0.0  ;;  %v14897_v10 = vmax.f32 %v14896_v46, 0.0  ;;  %v12711_v22 = vpop.permute.xlu0 %2940  ;;  %v2432_v39 = vpop.f32.mrb[160].mxu0  ;;  %v14484_v40 = vmax.f32 %v12687_v54, 0.0 }
 0x441   :  { %v6494_v30 = vsel %vm3203_vm1, %v14893_v55, %v12423_v29  ;;  %v12701_v21 = vpop.permute.xlu1 %2938  ;;  %v14898_v29 = vld [vmem:[#allocation74_spill] sm:$0xff]  ;;  %v12717_v48 = vadd.f32 %v12139_v26, %v2432_v39  ;;  %v8059_v46 = vpop.f32.mrb[161].mxu1 }
 0x442   :  { %v3246_v34 = vsel %vm3203_vm1, %v14895_v16, %v12457_v25  ;;  %v6495_v49 = vsel %vm3203_vm1, %v14897_v10, %v12479_v28  ;;  %v14899_v55 = vmax.f32 %v14898_v29, 0.0  ;;  %v6734_v25 = vadd.f32 %v6733_v20, %v6614_v38  ;;  %v7799_v10 = vpop.f32.mrb[161].mxu0  ;;  %v5685_v20 = vpop.f32.mrb[162].mxu1 }
 0x443   :  { %6246 = vrot.lane.b32.xlu1 %v14482_v32, %s9419_s28  ;;  %v3486_v16 = vadd.f32 %v3485_v11, %v3366_v27  ;;  %14900 = vst [vmem:[#allocation28_spill] sm:$0xff] %v12717_v48  ;;  %v14901_v28 = vmax.f32 %v12670_v59, 0.0  ;;  %v6615_v29 = vmul.f32 %v6494_v30, %v112_v31  ;;  %v12727_v38 = vadd.f32 %v12139_v26, %v5682_v24  ;;  %v2435_v27 = vpop.f32.mrb[162].mxu0  ;;  %v8060_v30 = vpop.f32.mrb[163].mxu1 }
 0x444   :  { %v3247_v17 = vsel %vm3203_vm1, %v14899_v55, %v12513_v18  ;;  %v3367_v18 = vmul.f32 %v3246_v34, %v113_v7  ;;  %v114_v55 = vld [vmem:[%s14227_s3 + $0x158] sm:$0xff]  ;;  %v6616_v11 = vmul.f32 %v6495_v49, %v113_v7  ;;  %v12735_v34 = vpop.permute.xlu0 %6192  ;;  %v7800_v10 = vpop.f32.mrb[163].mxu0  ;;  %v14908_v59 = vmax.f32 %v12717_v48, 0.0 }
 0x445   :  { %2998 = vrot.lane.b32.xlu0 %v14901_v28, %s9419_s28  ;;  %14902 = vst [vmem:[#allocation30_spill] sm:$0xff] %v12727_v38  ;;  %v3368_v39 = vmul.f32 %v3247_v17, %v114_v55  ;;  %v12731_v28 = vadd.f32 %v12139_v26, %v2435_v27  ;;  %v12733_v31 = vpop.permute.xlu1 %6190  ;;  %v6735_v24 = vadd.f32 %v6734_v25, %v6615_v29  ;;  %v14904_v7 = vld [vmem:[#allocation72_spill] sm:$0xff]  ;;  %v14906_v27 = vld [vmem:[#allocation77_spill] sm:$0xff]  ;;  %v14909_v25 = vld [vmem:[#allocation78_spill] sm:$0xff]  ;;  %v5690_v48 = vpop.f32.mrb[164].mxu1 }
 0x446   :  { %v3487_v32 = vadd.f32 %v3486_v16, %v3367_v18  ;;  %v14905_v17 = vmax.f32 %v14904_v7, 0.0  ;;  %v14907_v46 = vmax.f32 %v14906_v27, 0.0  ;;  %v115_v10 = vld [vmem:[%s14227_s3 + $0x160] sm:$0xff]  ;;  %v14910_v16 = vmax.f32 %v14909_v25, 0.0 }
 0x447   :  { %14903 = vst [vmem:[#allocation29_spill] sm:$0xff] %v12731_v28  ;;  %6248 = vrot.lane.b32.xlu1 %v14484_v40, %s9419_s28  ;;  %v14488_v27 = vmax.f32 %v12731_v28, 0.0  ;;  %v14920_v28 = vmax.f32 %v11573_v12, 0.0 }
 0x448   :  { %v6496_v49 = vsel %vm3203_vm1, %v14905_v17, %v12481_v2  ;;  %v3248_v30 = vsel %vm3203_vm1, %v14907_v46, %v12518_v51  ;;  %v6497_v29 = vsel %vm3203_vm1, %v14910_v16, %v12537_v42  ;;  %v14911_v2 = vld [vmem:[#allocation82_spill] sm:$0xff]  ;;  %v14487_v51 = vmax.f32 %v12727_v38, 0.0  ;;  %v12772_v16 = vpop.permute.xlu0 %2944 }
 0x449   :  { %3000 = vrot.lane.b32.xlu0 %v14908_v59, %s9419_s28  ;;  %v14912_v18 = vmax.f32 %v14911_v2, 0.0  ;;  %v12764_v46 = vadd.f32 %v12139_v26, %v5685_v20  ;;  %v6736_v59 = vadd.f32 %v6735_v24, %v6616_v11  ;;  %v3488_v17 = vadd.f32 %v3487_v32, %v3368_v39  ;;  %v12767_v40 = vpop.permute.xlu1 %2942  ;;  %v116_v42 = vld [vmem:[%s14227_s3 + $0x168] sm:$0xff]  ;;  %v8063_v24 = vpop.f32.mrb[165].mxu1 }
 0x44a   :  { %v6617_v25 = vmul.f32 %v6496_v49, %v114_v55  ;;  %v3369_v20 = vmul.f32 %v3248_v30, %v115_v10  ;;  %v6618_v11 = vmul.f32 %v6497_v29, %v115_v10  ;;  %v12785_v2 = vadd.f32 %v12139_v26, %v5690_v48  ;;  %v5693_v38 = vpop.f32.mrb[166].mxu1  ;;  %v14913_v24 = vld [vmem:[#allocation80_spill] sm:$0xff]  ;;  %v117_v48 = vld [vmem:[%s14227_s3 + $0x170] sm:$0xff] }
 0x44b   :  { %v3249_v7 = vsel %vm3203_vm1, %v14912_v18, %v12574_v45  ;;  %v2440_v45 = vpop.f32.mrb[164].mxu0  ;;  %6250 = vrot.lane.b32.xlu1 %v14487_v51, %s9419_s28 }
 0x44c   :  { %v3370_v32 = vmul.f32 %v3249_v7, %v116_v42  ;;  %v12778_v39 = vadd.f32 %v12139_v26, %v2440_v45  ;;  %v7803_v55 = vpop.f32.mrb[165].mxu0  ;;  %v6737_v51 = vadd.f32 %v6736_v59, %v6617_v25  ;;  %v3489_v30 = vadd.f32 %v3488_v17, %v3369_v20  ;;  %v8064_v7 = vpop.f32.mrb[167].mxu1  ;;  %v14915_v59 = vld [vmem:[#allocation85_spill] sm:$0xff]  ;;  %v14917_v20 = vld [vmem:[#allocation86_spill] sm:$0xff] }
 0x44d   :  { %3002 = vrot.lane.b32.xlu0 %v14488_v27, %s9419_s28  ;;  %v2443_v18 = vpop.f32.mrb[166].mxu0  ;;  %v12791_v45 = vpop.permute.xlu1 %6194  ;;  %v14914_v55 = vmax.f32 %v14913_v24, 0.0  ;;  %v14916_v17 = vmax.f32 %v14915_v59, 0.0  ;;  %v3251_v59 = vsel %vm3203_vm1, %v14920_v28, %v12632_v4 }
 0x44e   :  { %v12789_v29 = vadd.f32 %v12139_v26, %v2443_v18  ;;  %v14918_v18 = vmax.f32 %v14917_v20, 0.0  ;;  %v12808_v10 = vpop.permute.xlu0 %6196  ;;  %v7804_v49 = vpop.f32.mrb[167].mxu0  ;;  %v6738_v24 = vadd.f32 %v6737_v51, %v6618_v11  ;;  %v118_v51 = vld [vmem:[%s14227_s3 + $0x178] sm:$0xff] }
 0x44f   :  { %v6498_v27 = vsel %vm3203_vm1, %v14914_v55, %v12554_v62  ;;  %v3250_v25 = vsel %vm3203_vm1, %v14916_v17, %v12576_v19  ;;  %v14919_v62 = vmax.f32 %v12764_v46, 0.0  ;;  %v3490_v55 = vadd.f32 %v3489_v30, %v3370_v32  ;;  %v5698_v4 = vpop.f32.mrb[168].mxu1  ;;  %v2448_v30 = vpop.f32.mrb[168].mxu0 }
 0x450   :  { %v6499_v7 = vsel %vm3203_vm1, %v14918_v18, %v12610_v3  ;;  %v14921_v19 = vmax.f32 %v12778_v39, 0.0  ;;  %v14491_v3 = vmax.f32 %v12785_v2, 0.0  ;;  %v12822_v17 = vadd.f32 %v12139_v26, %v5693_v38 }
 0x451   :  { %6252 = vrot.lane.b32.xlu1 %v14919_v62, %s9419_s28  ;;  %v6619_v49 = vmul.f32 %v6498_v27, %v116_v42  ;;  %v3371_v20 = vmul.f32 %v3250_v25, %v117_v48  ;;  %v6620_v18 = vmul.f32 %v6499_v7, %v117_v48  ;;  %v14490_v12 = vmax.f32 %v12789_v29, 0.0  ;;  %v12828_v11 = vpop.permute.xlu1 %2946  ;;  %v8067_v48 = vpop.f32.mrb[169].mxu1  ;;  %v14922_v7 = vld [vmem:[#allocation88_spill] sm:$0xff] }
 0x452   :  { %3004 = vrot.lane.b32.xlu0 %v14921_v19, %s9419_s28  ;;  %v3372_v28 = vmul.f32 %v3251_v59, %v118_v51  ;;  %v12830_v32 = vpop.permute.xlu0 %2948  ;;  %v12836_v42 = vadd.f32 %v12139_v26, %v2448_v30  ;;  %v7807_v25 = vpop.f32.mrb[169].mxu0  ;;  %v14923_v62 = vmax.f32 %v14922_v7, 0.0  ;;  %v14924_v19 = vmax.f32 %v11617_v35, 0.0 }
 0x453   :  { %v6739_v38 = vadd.f32 %v6738_v24, %v6619_v49  ;;  %v3491_v27 = vadd.f32 %v3490_v55, %v3371_v20  ;;  %v14501_v55 = vmax.f32 %v12822_v17, 0.0  ;;  %v12851_v49 = vadd.f32 %v12139_v26, %v5698_v4  ;;  %v2451_v20 = vpop.f32.mrb[170].mxu0  ;;  %v5701_v30 = vpop.f32.mrb[170].mxu1  ;;  %v119_v25 = vld [vmem:[%s14227_s3 + $0x180] sm:$0xff] }
 0x454   :  { %v6500_v59 = vsel %vm3203_vm1, %v14923_v62, %v12616_v56  ;;  %v6501_v24 = vsel %vm3203_vm1, %v14924_v19, %v12672_v33  ;;  %v14925_v56 = vmax.f32 %v11597_v14, 0.0  ;;  %v14498_v35 = vmax.f32 %v12836_v42, 0.0  ;;  %v8068_v62 = vpop.f32.mrb[171].mxu1 }
 0x455   :  { %6254 = vrot.lane.b32.xlu1 %v14491_v3, %s9419_s28  ;;  %v6740_v48 = vadd.f32 %v6739_v38, %v6620_v18  ;;  %v12862_v33 = vadd.f32 %v12139_v26, %v2451_v20  ;;  %v12864_v4 = vpop.permute.xlu1 %6198  ;;  %v3492_v19 = vadd.f32 %v3491_v27, %v3372_v28  ;;  %v14926_v18 = vmax.f32 %v11653_v13, 0.0  ;;  %v7808_v3 = vpop.f32.mrb[171].mxu0  ;;  %v120_v13 = vld [vmem:[%s14227_s3 + $0x188] sm:$0xff] }
 0x456   :  { %3006 = vrot.lane.b32.xlu0 %v14490_v12, %s9419_s28  ;;  %v3252_v7 = vsel %vm3203_vm1, %v14925_v56, %v12634_v63  ;;  %v12870_v12 = vpop.permute.xlu0 %6200  ;;  %v6621_v14 = vmul.f32 %v6500_v59, %v118_v51  ;;  %v6622_v63 = vmul.f32 %v6501_v24, %v119_v25  ;;  %v12883_v28 = vadd.f32 %v12139_v26, %v5701_v30  ;;  %v5706_v59 = vpop.f32.mrb[172].mxu1 }
 0x457   :  { %v3253_v38 = vsel %vm3203_vm1, %v14926_v18, %v12701_v21  ;;  %v3373_v20 = vmul.f32 %v3252_v7, %v119_v25  ;;  %v14493_v21 = vmax.f32 %v12851_v49, 0.0  ;;  %v14492_v56 = vmax.f32 %v12862_v33, 0.0  ;;  %v2456_v25 = vpop.f32.mrb[172].mxu0 }
 0x458   :  { %v6741_v3 = vadd.f32 %v6740_v48, %v6621_v14  ;;  %v3374_v27 = vmul.f32 %v3253_v38, %v120_v13  ;;  %v14927_v30 = vmax.f32 %v11622_v6, 0.0  ;;  %v14928_v18 = vmax.f32 %v11668_v52, 0.0  ;;  %v8071_v14 = vpop.f32.mrb[173].mxu1  ;;  %v121_v6 = vld [vmem:[%s14227_s3 + $0x190] sm:$0xff] }
 0x459   :  { %6256 = vrot.lane.b32.xlu1 %v14501_v55, %s9419_s28  ;;  %v12886_v51 = vpop.permute.xlu1 %2950  ;;  %v3493_v24 = vadd.f32 %v3492_v19, %v3373_v20  ;;  %v12902_v19 = vadd.f32 %v12139_v26, %v2456_v25  ;;  %v7811_v20 = vpop.f32.mrb[173].mxu0  ;;  %v12920_v25 = vadd.f32 %v12139_v26, %v5706_v59  ;;  %v122_v26 = vld [vmem:[%s14227_s3 + $0x198] sm:$0xff] }
 0x45a   :  { %3008 = vrot.lane.b32.xlu0 %v14498_v35, %s9419_s28  ;;  %v12888_v62 = vpop.permute.xlu0 %2952  ;;  %v6742_v7 = vadd.f32 %v6741_v3, %v6622_v63  ;;  %v6502_v48 = vsel %vm3203_vm1, %v14927_v30, %v12677_v61  ;;  %v3254_v38 = vsel %vm3203_vm1, %v14928_v18, %v12711_v22  ;;  %v14929_v61 = vmax.f32 %v11685_v5, 0.0  ;;  %v2459_v30 = vpop.f32.mrb[174].mxu0  ;;  %v12926_v5 = vld [vmem:[%s14226_s2] ss:$0 sm:$0xff] }
 0x45b   :  { %v14930_v22 = vmax.f32 %v11721_v41, 0.0  ;;  %v14495_v3 = vmax.f32 %v12883_v28, 0.0  ;;  %v5709_v18 = vpop.f32.mrb[174].mxu1  ;;  %v3494_v14 = vadd.f32 %v3493_v24, %v3374_v27  ;;  %v14494_v20 = vmax.f32 %v12902_v19, 0.0  ;;  %v7812_v27 = vpop.f32.mrb[175].mxu0 }
 0x45c   :  { %v6503_v52 = vsel %vm3203_vm1, %v14929_v61, %v12733_v31  ;;  %v12929_v31 = vadd.f32 %v12926_v5, %v2459_v30  ;;  %v8072_v41 = vpop.f32.mrb[175].mxu1  ;;  %v6623_v61 = vmul.f32 %v6502_v48, %v120_v13  ;;  %v3375_v24 = vmul.f32 %v3254_v38, %v121_v6  ;;  %v123_v38 = vld [vmem:[%s14227_s3 + $0x1a0] sm:$0xff] }
 0x45d   :  { %6258 = vrot.lane.b32.xlu1 %v14493_v21, %s9419_s28  ;;  %v3255_v63 = vsel %vm3203_vm1, %v14930_v22, %v12767_v40  ;;  %v12931_v40 = vpop.permute.xlu1 %6202  ;;  %v6624_v22 = vmul.f32 %v6503_v52, %v121_v6  ;;  %v14497_v13 = vmax.f32 %v12920_v25, 0.0  ;;  %v12946_v48 = vadd.f32 %v12926_v5, %v5709_v18  ;;  %v5714_v18 = vpop.f32.mrb[176].mxu1 }
 0x45e   :  { %3010 = vrot.lane.b32.xlu0 %v14492_v56, %s9419_s28  ;;  %v12936_v59 = vpop.permute.xlu0 %6204  ;;  %v3376_v56 = vmul.f32 %v3255_v63, %v122_v26  ;;  %v6743_v30 = vadd.f32 %v6742_v7, %v6623_v61  ;;  %v3495_v41 = vadd.f32 %v3494_v14, %v3375_v24  ;;  %v14931_v27 = vmax.f32 %v11690_v43, 0.0  ;;  %v14933_v14 = vld [vmem:[#allocation89_spill] sm:$0xff] }
 0x45f   :  { %v14932_v6 = vmax.f32 %v11736_v1, 0.0  ;;  %v14496_v52 = vmax.f32 %v12929_v31, 0.0  ;;  %v14934_v61 = vmax.f32 %v14933_v14, 0.0  ;;  %v2464_v1 = vpop.f32.mrb[176].mxu0  ;;  %v8075_v14 = vpop.f32.mrb[177].mxu1 }
 0x460   :  { %v6504_v21 = vsel %vm3203_vm1, %v14931_v27, %v12735_v34  ;;  %v14935_v34 = vld [vmem:[#allocation91_spill] sm:$0xff] }
 0x461   :  { %6260 = vrot.lane.b32.xlu1 %v14495_v3, %s9419_s28  ;;  %v3256_v7 = vsel %vm3203_vm1, %v14932_v6, %v12772_v16  ;;  %v12960_v63 = vpop.permute.xlu1 %2954  ;;  %v6505_v43 = vsel %vm3203_vm1, %v14934_v61, %v12791_v45  ;;  %v14936_v24 = vmax.f32 %v14935_v34, 0.0  ;;  %v6744_v16 = vadd.f32 %v6743_v30, %v6624_v22  ;;  %v7815_v45 = vpop.f32.mrb[177].mxu0  ;;  %v124_v34 = vld [vmem:[%s14227_s3 + $0x1a8] sm:$0xff] }
 0x462   :  { %3012 = vrot.lane.b32.xlu0 %v14494_v20, %s9419_s28  ;;  %v12970_v20 = vpop.permute.xlu0 %2956  ;;  %v3496_v6 = vadd.f32 %v3495_v41, %v3376_v56  ;;  %v12976_v3 = vadd.f32 %v12926_v5, %v2464_v1  ;;  %v6625_v61 = vmul.f32 %v6504_v21, %v122_v26  ;;  %v12986_v22 = vadd.f32 %v12926_v5, %v5714_v18  ;;  %v2467_v56 = vpop.f32.mrb[178].mxu0 }
 0x463   :  { %v3257_v27 = vsel %vm3203_vm1, %v14936_v24, %v12828_v11  ;;  %v3377_v11 = vmul.f32 %v3256_v7, %v123_v38  ;;  %v14500_v24 = vmax.f32 %v12946_v48, 0.0  ;;  %v5717_v30 = vpop.f32.mrb[178].mxu1  ;;  %v6626_v41 = vmul.f32 %v6505_v43, %v123_v38  ;;  %v7816_v45 = vpop.f32.mrb[179].mxu0  ;;  %v14939_v38 = vld [vmem:[#allocation90_spill] sm:$0xff] }
 0x464   :  { %14937 = vst [vmem:[#allocation31_spill] sm:$0xff] %v12986_v22  ;;  %v3378_v1 = vmul.f32 %v3257_v27, %v124_v34  ;;  %v14499_v14 = vmax.f32 %v12976_v3, 0.0  ;;  %v8076_v21 = vpop.f32.mrb[179].mxu1  ;;  %v6745_v18 = vadd.f32 %v6744_v16, %v6625_v61  ;;  %v14940_v43 = vmax.f32 %v14939_v38, 0.0  ;;  %v125_v45 = vld [vmem:[%s14227_s3 + $0x1b0] sm:$0xff] }
 0x465   :  { %6262 = vrot.lane.b32.xlu1 %v14497_v13, %s9419_s28  ;;  %v12992_v26 = vpop.permute.xlu1 %6206  ;;  %v3497_v13 = vadd.f32 %v3496_v6, %v3377_v11  ;;  %v14943_v16 = vld [vmem:[#allocation6_spill] sm:$0xff]  ;;  %v5722_v55 = vpop.f32.mrb[180].mxu1 }
 0x466   :  { %3014 = vrot.lane.b32.xlu0 %v14496_v52, %s9419_s28  ;;  %v12990_v52 = vadd.f32 %v12926_v5, %v2467_v56  ;;  %v12994_v7 = vpop.permute.xlu0 %6208  ;;  %v6506_v27 = vsel %vm3203_vm1, %v14940_v43, %v12808_v10  ;;  %v14941_v56 = vld [vmem:[#allocation92_spill] sm:$0xff]  ;;  %v14944_v6 = vmax.f32 %v14943_v16, 0.0  ;;  %v14945_v10 = vld [vmem:[#allocation94_spill] sm:$0xff]  ;;  %v6746_v43 = vadd.f32 %v6745_v18, %v6626_v41  ;;  %v8079_v18 = vpop.f32.mrb[181].mxu1 }
 0x467   :  { %v14942_v35 = vmax.f32 %v14941_v56, 0.0  ;;  %v14946_v11 = vmax.f32 %v14945_v10, 0.0  ;;  %v3498_v56 = vadd.f32 %v3497_v13, %v3378_v1  ;;  %v6627_v16 = vmul.f32 %v6506_v27, %v124_v34  ;;  %v14948_v18 = vld [vmem:[#allocation93_spill] sm:$0xff] }
 0x468   :  { %14938 = vst [vmem:[#allocation32_spill] sm:$0xff] %v12990_v52  ;;  %v6507_v61 = vsel %vm3203_vm1, %v14944_v6, %v12864_v4  ;;  %v126_v4 = vld [vmem:[%s14227_s3 + $0x1b8] sm:$0xff]  ;;  %v13044_v10 = vadd.f32 %v12926_v5, %v5722_v55  ;;  %v127_v55 = vld [vmem:[%s14227_s3 + $0x1c0] sm:$0xff] }
 0x469   :  { %6264 = vrot.lane.b32.xlu1 %v14500_v24, %s9419_s28  ;;  %v3258_v21 = vsel %vm3203_vm1, %v14942_v35, %v12830_v32  ;;  %v3259_v38 = vsel %vm3203_vm1, %v14946_v11, %v12886_v51  ;;  %v14503_v32 = vmax.f32 %v12986_v22, 0.0  ;;  %v13023_v35 = vadd.f32 %v12926_v5, %v5717_v30  ;;  %v13026_v24 = vpop.permute.xlu1 %2958  ;;  %v2472_v51 = vpop.f32.mrb[180].mxu0 }
 0x46a   :  { %3016 = vrot.lane.b32.xlu0 %v14499_v14, %s9419_s28  ;;  %v14504_v14 = vmax.f32 %v12990_v52, 0.0  ;;  %v13031_v6 = vpop.permute.xlu0 %2960  ;;  %v3379_v30 = vmul.f32 %v3258_v21, %v125_v45  ;;  %v6628_v41 = vmul.f32 %v6507_v61, %v125_v45  ;;  %v3380_v13 = vmul.f32 %v3259_v38, %v126_v4  ;;  %v7819_v34 = vpop.f32.mrb[181].mxu0  ;;  %14947 = vst [vmem:[#allocation34_spill] sm:$0xff] %v13044_v10 }
 0x46b   :  { %v13037_v1 = vadd.f32 %v12926_v5, %v2472_v51  ;;  %v2475_v11 = vpop.f32.mrb[182].mxu0  ;;  %v5725_v22 = vpop.f32.mrb[182].mxu1  ;;  %v14949_v34 = vmax.f32 %v14948_v18, 0.0  ;;  %v14955_v52 = vmax.f32 %v11947_v47, 0.0 }
 0x46c   :  { %v3499_v21 = vadd.f32 %v3498_v56, %v3379_v30  ;;  %v13048_v61 = vadd.f32 %v12926_v5, %v2475_v11  ;;  %v8080_v38 = vpop.f32.mrb[183].mxu1  ;;  %v14952_v30 = vld [vmem:[#allocation5_spill] sm:$0xff]  ;;  %v7820_v27 = vpop.f32.mrb[183].mxu0 }
 0x46d   :  { %6266 = vrot.lane.b32.xlu1 %v14503_v32, %s9419_s28  ;;  %v6747_v32 = vadd.f32 %v6746_v43, %v6627_v16  ;;  %v13050_v51 = vpop.permute.xlu1 %6210  ;;  %v14950_v43 = vld [vmem:[#allocation66_spill] sm:$0xff]  ;;  %v14953_v11 = vmax.f32 %v14952_v30, 0.0 }
 0x46e   :  { %3018 = vrot.lane.b32.xlu0 %v14504_v14, %s9419_s28  ;;  %v6508_v14 = vsel %vm3203_vm1, %v14949_v34, %v12870_v12  ;;  %v14951_v56 = vmax.f32 %v14950_v43, 0.0  ;;  %v13067_v45 = vpop.permute.xlu0 %6212  ;;  %v14954_v12 = vmax.f32 %v13023_v35, 0.0  ;;  %v3500_v34 = vadd.f32 %v3499_v21, %v3380_v13  ;;  %v2480_v21 = vpop.f32.mrb[184].mxu0 }
 0x46f   :  { %v6509_v38 = vsel %vm3203_vm1, %v14953_v11, %v12931_v40  ;;  %v6748_v18 = vadd.f32 %v6747_v32, %v6628_v41  ;;  %v3261_v43 = vsel %vm3203_vm1, %v14955_v52, %v12960_v63  ;;  %v14507_v40 = vmax.f32 %v13044_v10, 0.0  ;;  %v128_v32 = vld [vmem:[%s14227_s3 + $0x1c8] sm:$0xff]  ;;  %v5730_v52 = vpop.f32.mrb[184].mxu1 }
 0x470   :  { %v3260_v16 = vsel %vm3203_vm1, %v14951_v56, %v12888_v62  ;;  %v14956_v62 = vmax.f32 %v13037_v1, 0.0  ;;  %v13081_v56 = vadd.f32 %v12926_v5, %v5725_v22  ;;  %v6629_v27 = vmul.f32 %v6508_v14, %v126_v4 }
 0x471   :  { %6268 = vrot.lane.b32.xlu1 %v14954_v12, %s9419_s28  ;;  %v3381_v30 = vmul.f32 %v3260_v16, %v127_v55  ;;  %v6630_v11 = vmul.f32 %v6509_v38, %v127_v55  ;;  %v14508_v47 = vmax.f32 %v13048_v61, 0.0  ;;  %v2963_v41 = vpop.permute.xlu1 %2962  ;;  %v3382_v63 = vmul.f32 %v3261_v43, %v128_v32  ;;  %v8083_v55 = vpop.f32.mrb[185].mxu1  ;;  %v14957_v38 = vld [vmem:[#allocation68_spill] sm:$0xff] }
 0x472   :  { %3020 = vrot.lane.b32.xlu0 %v14956_v62, %s9419_s28  ;;  %v13087_v13 = vpop.permute.xlu0 %2964  ;;  %v6749_v22 = vadd.f32 %v6748_v18, %v6629_v27  ;;  %v13093_v4 = vadd.f32 %v12926_v5, %v2480_v21  ;;  %v7823_v16 = vpop.f32.mrb[185].mxu0  ;;  %v14958_v12 = vmax.f32 %v14957_v38, 0.0  ;;  %v14959_v62 = vld [vmem:[#allocation71_spill] sm:$0xff]  ;;  %v13108_v27 = vadd.f32 %v12926_v5, %v5730_v52 }
 0x473   :  { %v3501_v14 = vadd.f32 %v3500_v34, %v3381_v30  ;;  %v14960_v10 = vmax.f32 %v14959_v62, 0.0  ;;  %v2483_v30 = vpop.f32.mrb[186].mxu0  ;;  %v5733_v21 = vpop.f32.mrb[186].mxu1  ;;  %v129_v16 = vld [vmem:[%s14227_s3 + $0x1d0] sm:$0xff] }
 0x474   :  { %v6510_v43 = vsel %vm3203_vm1, %v14958_v12, %v12936_v59  ;;  %14961 = vst [vmem:[#allocation33_spill] sm:$0xff] %v13108_v27  ;;  %v6750_v55 = vadd.f32 %v6749_v22, %v6630_v11  ;;  %v14962_v38 = vld [vmem:[#allocation7_spill] sm:$0xff]  ;;  %v14509_v62 = vmax.f32 %v13093_v4, 0.0  ;;  %v14964_v11 = vmax.f32 %v12015_v44, 0.0  ;;  %v7824_v34 = vpop.f32.mrb[187].mxu0 }
 0x475   :  { %6270 = vrot.lane.b32.xlu1 %v14507_v40, %s9419_s28  ;;  %v6511_v18 = vsel %vm3203_vm1, %v14960_v10, %v12992_v26  ;;  %v14963_v59 = vmax.f32 %v14962_v38, 0.0  ;;  %v13119_v26 = vadd.f32 %v12926_v5, %v2483_v30  ;;  %v8084_v10 = vpop.f32.mrb[187].mxu1  ;;  %v6215_v52 = vpop.permute.xlu1 %6214  ;;  %v3502_v40 = vadd.f32 %v3501_v14, %v3382_v63  ;;  %v130_v44 = vld [vmem:[%s14227_s3 + $0x1d8] sm:$0xff] }
 0x476   :  { %3022 = vrot.lane.b32.xlu0 %v14508_v47, %s9419_s28  ;;  %v3263_v22 = vsel %vm3203_vm1, %v14964_v11, %v13026_v24  ;;  %v13125_v47 = vpop.permute.xlu0 %6216  ;;  %v14965_v38 = vmax.f32 %v13081_v56, 0.0  ;;  %v14510_v24 = vmax.f32 %v13108_v27, 0.0  ;;  %v13138_v63 = vadd.f32 %v12926_v5, %v5733_v21 }
 0x477   :  { %v3262_v12 = vsel %vm3203_vm1, %v14963_v59, %v12970_v20  ;;  %v6631_v20 = vmul.f32 %v6510_v43, %v128_v32  ;;  %v6632_v59 = vmul.f32 %v6511_v18, %v129_v16  ;;  %v3384_v34 = vmul.f32 %v3263_v22, %v130_v44  ;;  %v5738_v43 = vpop.f32.mrb[188].mxu1 }
 0x478   :  { %v3383_v30 = vmul.f32 %v3262_v12, %v129_v16  ;;  %14966 = vst [vmem:[#allocation35_spill] sm:$0xff] %v13138_v63  ;;  %v14511_v10 = vmax.f32 %v13119_v26, 0.0  ;;  %v14967_v12 = vld [vmem:[#allocation8_spill] sm:$0xff] }
 0x479   :  { %6272 = vrot.lane.b32.xlu1 %v14965_v38, %s9419_s28  ;;  %v6751_v14 = vadd.f32 %v6750_v55, %v6631_v20  ;;  %v2967_v32 = vpop.permute.xlu1 %2966  ;;  %v2488_v38 = vpop.f32.mrb[188].mxu0  ;;  %v14969_v55 = vmax.f32 %v12036_v15, 0.0 }
 0x47a   :  { %3024 = vrot.lane.b32.xlu0 %v14509_v62, %s9419_s28  ;;  %v3503_v18 = vadd.f32 %v3502_v40, %v3383_v30  ;;  %v13141_v11 = vpop.permute.xlu0 %2968  ;;  %v14968_v62 = vmax.f32 %v14967_v12, 0.0  ;;  %v13155_v40 = vadd.f32 %v12926_v5, %v2488_v38  ;;  %v8087_v20 = vpop.f32.mrb[189].mxu1  ;;  %v14514_v38 = vmax.f32 %v13138_v63, 0.0 }
 0x47b   :  { %v6752_v16 = vadd.f32 %v6751_v14, %v6632_v59  ;;  %v3264_v22 = vsel %vm3203_vm1, %v14969_v55, %v13031_v6  ;;  %v7827_v30 = vpop.f32.mrb[189].mxu0  ;;  %v131_v59 = vld [vmem:[%s14227_s3 + $0x1e0] sm:$0xff]  ;;  %v13172_v12 = vadd.f32 %v12926_v5, %v5738_v43  ;;  %v5741_v20 = vpop.f32.mrb[190].mxu1 }
 0x47c   :  { %v6512_v21 = vsel %vm3203_vm1, %v14968_v62, %v12994_v7  ;;  %v14970_v7 = vmax.f32 %v12054_v9, 0.0  ;;  %v14971_v62 = vld [vmem:[#allocation10_spill] sm:$0xff]  ;;  %v2491_v55 = vpop.f32.mrb[190].mxu0  ;;  %v3504_v30 = vadd.f32 %v3503_v18, %v3384_v34  ;;  %v8088_v9 = vpop.f32.mrb[191].mxu1  ;;  %v3385_v34 = vmul.f32 %v3264_v22, %v131_v59 }
 0x47d   :  { %6274 = vrot.lane.b32.xlu1 %v14510_v24, %s9419_s28  ;;  %v14972_v6 = vmax.f32 %v14971_v62, 0.0  ;;  %14973 = vst [vmem:[#allocation36_spill] sm:$0xff] %v13172_v12  ;;  %v14515_v24 = vmax.f32 %v13155_v40, 0.0  ;;  %v6219_v27 = vpop.permute.xlu1 %6218  ;;  %v7828_v62 = vpop.f32.mrb[191].mxu0  ;;  %v14975_v9 = vld [vmem:[#allocation75_spill] sm:$0xff] }
 0x47e   :  { %3026 = vrot.lane.b32.xlu0 %v14511_v10, %s9419_s28  ;;  %v6513_v15 = vsel %vm3203_vm1, %v14970_v7, %v13050_v51  ;;  %v13176_v10 = vadd.f32 %v12926_v5, %v2491_v55  ;;  %v6633_v51 = vmul.f32 %v6512_v21, %v130_v44  ;;  %v13181_v7 = vpop.permute.xlu0 %6220  ;;  %v14516_v44 = vmax.f32 %v13172_v12, 0.0  ;;  %v133_v22 = vld [vmem:[%s14227_s3 + $0x1f0] sm:$0xff]  ;;  %v14983_v12 = vld [vmem:[#allocation76_spill] sm:$0xff] }
 0x47f   :  { %v3265_v14 = vsel %vm3203_vm1, %v14972_v6, %v2963_v41  ;;  %v132_v41 = vld [vmem:[%s14227_s3 + $0x1e8] sm:$0xff]  ;;  %v6634_v43 = vmul.f32 %v6513_v15, %v131_v59  ;;  %v13191_v21 = vadd.f32 %v12926_v5, %v5741_v20  ;;  %v3505_v55 = vadd.f32 %v3504_v30, %v3385_v34  ;;  %v5746_v20 = vpop.f32.mrb[192].mxu1 }
 0x480   :  { %v3386_v18 = vmul.f32 %v3265_v14, %v132_v41  ;;  %v6753_v6 = vadd.f32 %v6752_v16, %v6633_v51  ;;  %v14976_v62 = vmax.f32 %v14975_v9, 0.0  ;;  %v14977_v59 = vld [vmem:[#allocation73_spill] sm:$0xff]  ;;  %v14981_v9 = vmax.f32 %v12159_v0, 0.0  ;;  %v8091_v14 = vpop.f32.mrb[193].mxu1 }
 0x481   :  { %6276 = vrot.lane.b32.xlu1 %v14514_v38, %s9419_s28  ;;  %14974 = vst [vmem:[#allocation38_spill] sm:$0xff] %v13191_v21  ;;  %v14978_v15 = vmax.f32 %v14977_v59, 0.0  ;;  %v2971_v51 = vpop.permute.xlu1 %2970  ;;  %v14979_v38 = vld [vmem:[#allocation9_spill] sm:$0xff] }
 0x482   :  { %3028 = vrot.lane.b32.xlu0 %v14515_v24, %s9419_s28  ;;  %v6514_v63 = vsel %vm3203_vm1, %v14976_v62, %v13067_v45  ;;  %v14980_v30 = vmax.f32 %v14979_v38, 0.0  ;;  %v3267_v45 = vsel %vm3203_vm1, %v14981_v9, %v2967_v32  ;;  %v13211_v62 = vpop.permute.xlu0 %2972  ;;  %v2496_v24 = vpop.f32.mrb[192].mxu0  ;;  %v3506_v59 = vadd.f32 %v3505_v55, %v3386_v18 }
 0x483   :  { %v3266_v16 = vsel %vm3203_vm1, %v14978_v15, %v13087_v13  ;;  %v6754_v13 = vadd.f32 %v6753_v6, %v6634_v43  ;;  %v13217_v15 = vadd.f32 %v12926_v5, %v2496_v24  ;;  %v7831_v0 = vpop.f32.mrb[193].mxu0  ;;  %v6635_v38 = vmul.f32 %v6514_v63, %v132_v41  ;;  %v5749_v24 = vpop.f32.mrb[194].mxu1 }
 0x484   :  { %v6515_v34 = vsel %vm3203_vm1, %v14980_v30, %v6215_v52  ;;  %v14982_v52 = vmax.f32 %v13176_v10, 0.0  ;;  %v3387_v32 = vmul.f32 %v3266_v16, %v133_v22  ;;  %v134_v30 = vld [vmem:[%s14227_s3 + $0x1f8] sm:$0xff]  ;;  %v14518_v9 = vmax.f32 %v13191_v21, 0.0  ;;  %v2499_v18 = vpop.f32.mrb[194].mxu0  ;;  %v8092_v63 = vpop.f32.mrb[195].mxu1 }
 0x485   :  { %6278 = vrot.lane.b32.xlu1 %v14516_v44, %s9419_s28  ;;  %v13227_v43 = vadd.f32 %v12926_v5, %v5746_v20  ;;  %v6636_v6 = vmul.f32 %v6515_v34, %v133_v22  ;;  %v3388_v55 = vmul.f32 %v3267_v45, %v134_v30  ;;  %v14519_v14 = vmax.f32 %v13217_v15, 0.0  ;;  %v6223_v41 = vpop.permute.xlu1 %6222  ;;  %v7832_v0 = vpop.f32.mrb[195].mxu0  ;;  %v14985_v45 = vld [vmem:[#allocation11_spill] sm:$0xff] }
 0x486   :  { %3030 = vrot.lane.b32.xlu0 %v14982_v52, %s9419_s28  ;;  %v13231_v52 = vadd.f32 %v12926_v5, %v2499_v18  ;;  %v13233_v16 = vpop.permute.xlu0 %6224  ;;  %v6755_v20 = vadd.f32 %v6754_v13, %v6635_v38  ;;  %v3507_v44 = vadd.f32 %v3506_v59, %v3387_v32  ;;  %v14984_v22 = vmax.f32 %v14983_v12, 0.0  ;;  %v135_v0 = vld [vmem:[%s14227_s3 + $0x200] sm:$0xff]  ;;  %v14987_v13 = vld [vmem:[#allocation79_spill] sm:$0xff] }
 0x487   :  { %v14986_v18 = vmax.f32 %v14985_v45, 0.0  ;;  %v14988_v59 = vmax.f32 %v14987_v13, 0.0  ;;  %v14989_v12 = vmax.f32 %v12246_v37, 0.0  ;;  %v14521_v32 = vmax.f32 %v13227_v43, 0.0  ;;  %v2504_v37 = vpop.f32.mrb[196].mxu0 }
 0x488   :  { %v6516_v34 = vsel %vm3203_vm1, %v14984_v22, %v13125_v47  ;;  %v6756_v22 = vadd.f32 %v6755_v20, %v6636_v6  ;;  %v3508_v45 = vadd.f32 %v3507_v44, %v3388_v55  ;;  %v13270_v44 = vadd.f32 %v12926_v5, %v2504_v37 }
 0x489   :  { %6280 = vrot.lane.b32.xlu1 %v14518_v9, %s9419_s28  ;;  %v3268_v63 = vsel %vm3203_vm1, %v14986_v18, %v13141_v11  ;;  %v6517_v38 = vsel %vm3203_vm1, %v14988_v59, %v6219_v27  ;;  %v3269_v47 = vsel %vm3203_vm1, %v14989_v12, %v2971_v51  ;;  %v13260_v11 = vadd.f32 %v12926_v5, %v5749_v24  ;;  %v2975_v9 = vpop.permute.xlu1 %2974  ;;  %v136_v27 = vld [vmem:[%s14227_s3 + $0x208] sm:$0xff] }
 0x48a   :  { %3032 = vrot.lane.b32.xlu0 %v14519_v14, %s9419_s28  ;;  %v14522_v18 = vmax.f32 %v13231_v52, 0.0  ;;  %v5754_v14 = vpop.f32.mrb[196].mxu1  ;;  %v6637_v21 = vmul.f32 %v6516_v34, %v134_v30  ;;  %v2977_v13 = vpop.permute.xlu0 %2976  ;;  %v3389_v51 = vmul.f32 %v3268_v63, %v135_v0  ;;  %v6638_v24 = vmul.f32 %v6517_v38, %v135_v0 }
 0x48b   :  { %v3390_v59 = vmul.f32 %v3269_v47, %v136_v27  ;;  %v8095_v6 = vpop.f32.mrb[197].mxu1  ;;  %v7835_v30 = vpop.f32.mrb[197].mxu0  ;;  %v14523_v55 = vmax.f32 %v13260_v11, 0.0  ;;  %v13277_v20 = vadd.f32 %v12926_v5, %v5754_v14  ;;  %v137_v14 = vld [vmem:[%s14227_s3 + $0x210] sm:$0xff] }
 0x48c   :  { %v2507_v34 = vpop.f32.mrb[198].mxu0  ;;  %v5757_v12 = vpop.f32.mrb[198].mxu1  ;;  %v3509_v63 = vadd.f32 %v3508_v45, %v3389_v51  ;;  %v14991_v6 = vld [vmem:[#allocation12_spill] sm:$0xff]  ;;  %v14994_v45 = vmax.f32 %v12277_v57, 0.0 }
 0x48d   :  { %6282 = vrot.lane.b32.xlu1 %v14521_v32, %s9419_s28  ;;  %14990 = vst [vmem:[#allocation37_spill] sm:$0xff] %v13277_v20  ;;  %v6757_v32 = vadd.f32 %v6756_v22, %v6637_v21  ;;  %v13281_v38 = vadd.f32 %v12926_v5, %v2507_v34  ;;  %v8096_v47 = vpop.f32.mrb[199].mxu1  ;;  %v6227_v37 = vpop.permute.xlu1 %6226  ;;  %v14993_v21 = vmax.f32 %v12267_v50, 0.0  ;;  %v14996_v50 = vmax.f32 %v13270_v44, 0.0 }
 0x48e   :  { %3034 = vrot.lane.b32.xlu0 %v14522_v18, %s9419_s28  ;;  %v14992_v18 = vmax.f32 %v14991_v6, 0.0  ;;  %v6519_v51 = vsel %vm3203_vm1, %v14994_v45, %v6223_v41  ;;  %v2979_v34 = vpop.permute.xlu0 %2978  ;;  %v7836_v47 = vpop.f32.mrb[199].mxu0  ;;  %v14995_v6 = vmax.f32 %v12314_v58, 0.0  ;;  %v14524_v57 = vmax.f32 %v13277_v20, 0.0 }
 0x48f   :  { %v3270_v22 = vsel %vm3203_vm1, %v14993_v21, %v13211_v62  ;;  %v13308_v62 = vadd.f32 %v12926_v5, %v5757_v12  ;;  %v6640_v45 = vmul.f32 %v6519_v51, %v137_v14  ;;  %v14525_v58 = vmax.f32 %v13281_v38, 0.0  ;;  %v2512_v47 = vpop.f32.mrb[200].mxu0 }
 0x490   :  { %v6518_v30 = vsel %vm3203_vm1, %v14992_v18, %v13181_v7  ;;  %v6758_v7 = vadd.f32 %v6757_v32, %v6638_v24  ;;  %v3510_v18 = vadd.f32 %v3509_v63, %v3390_v59  ;;  %v3271_v0 = vsel %vm3203_vm1, %v14995_v6, %v2975_v9  ;;  %v138_v32 = vld [vmem:[%s14227_s3 + $0x218] sm:$0xff]  ;;  %v5762_v9 = vpop.f32.mrb[200].mxu1 }
 0x491   :  { %6284 = vrot.lane.b32.xlu1 %v14523_v55, %s9419_s28  ;;  %14997 = vst [vmem:[#allocation40_spill] sm:$0xff] %v13308_v62  ;;  %v6639_v41 = vmul.f32 %v6518_v30, %v136_v27  ;;  %v3391_v21 = vmul.f32 %v3270_v22, %v137_v14  ;;  %v6229_v24 = vpop.permute.xlu1 %6228  ;;  %v3392_v59 = vmul.f32 %v3271_v0, %v138_v32  ;;  %v8099_v30 = vpop.f32.mrb[201].mxu1  ;;  %v14999_v22 = vld [vmem:[#allocation83_spill] sm:$0xff]  ;;  %v15001_v55 = vld [vmem:[#allocation81_spill] sm:$0xff] }
 0x492   :  { %3036 = vrot.lane.b32.xlu0 %v14996_v50, %s9419_s28  ;;  %v2981_v63 = vpop.permute.xlu0 %2980  ;;  %v13318_v27 = vadd.f32 %v12926_v5, %v2512_v47  ;;  %v7839_v14 = vpop.f32.mrb[201].mxu0  ;;  %v15000_v0 = vmax.f32 %v14999_v22, 0.0  ;;  %v139_v30 = vld [vmem:[%s14227_s3 + $0x220] sm:$0xff] }
 0x493   :  { %v6759_v12 = vadd.f32 %v6758_v7, %v6639_v41  ;;  %v3511_v6 = vadd.f32 %v3510_v18, %v3391_v21  ;;  %v13332_v18 = vadd.f32 %v12926_v5, %v5762_v9  ;;  %v2515_v41 = vpop.f32.mrb[202].mxu0  ;;  %v5765_v21 = vpop.f32.mrb[202].mxu1  ;;  %v15004_v14 = vld [vmem:[#allocation14_spill] sm:$0xff] }
 0x494   :  { %14998 = vst [vmem:[#allocation39_spill] sm:$0xff] %v13318_v27  ;;  %v6520_v51 = vsel %vm3203_vm1, %v15000_v0, %v13233_v16  ;;  %v15005_v22 = vmax.f32 %v15004_v14, 0.0  ;;  %v14527_v0 = vmax.f32 %v13318_v27, 0.0  ;;  %v7840_v50 = vpop.f32.mrb[203].mxu0  ;;  %v15008_v14 = vld [vmem:[#allocation84_spill] sm:$0xff] }
 0x495   :  { %6286 = vrot.lane.b32.xlu1 %v14524_v57, %s9419_s28  ;;  %v15002_v57 = vmax.f32 %v15001_v55, 0.0  ;;  %15003 = vst [vmem:[#allocation42_spill] sm:$0xff] %v13332_v18  ;;  %v6760_v47 = vadd.f32 %v6759_v12, %v6640_v45  ;;  %v13342_v55 = vadd.f32 %v12926_v5, %v2515_v41  ;;  %v3512_v9 = vadd.f32 %v3511_v6, %v3392_v59 }
 0x496   :  { %3038 = vrot.lane.b32.xlu0 %v14525_v58, %s9419_s28  ;;  %v3272_v16 = vsel %vm3203_vm1, %v15005_v22, %v2977_v13  ;;  %v2983_v58 = vpop.permute.xlu0 %2982  ;;  %v15007_v45 = vmax.f32 %v13308_v62, 0.0  ;;  %v6641_v12 = vmul.f32 %v6520_v51, %v138_v32  ;;  %v15009_v22 = vmax.f32 %v15008_v14, 0.0  ;;  %v140_v32 = vld [vmem:[%s14227_s3 + $0x228] sm:$0xff] }
 0x497   :  { %v6521_v7 = vsel %vm3203_vm1, %v15002_v57, %v6227_v37  ;;  %15006 = vst [vmem:[#allocation41_spill] sm:$0xff] %v13342_v55  ;;  %v8100_v37 = vpop.f32.mrb[203].mxu1  ;;  %v6231_v57 = vpop.permute.xlu1 %6230  ;;  %v3393_v13 = vmul.f32 %v3272_v16, %v139_v30  ;;  %v13355_v59 = vadd.f32 %v12926_v5, %v5765_v21  ;;  %v15010_v51 = vld [vmem:[#allocation13_spill] sm:$0xff] }
 0x498   :  { %v6642_v20 = vmul.f32 %v6521_v7, %v139_v30  ;;  %v6522_v41 = vsel %vm3203_vm1, %v15009_v22, %v6229_v24  ;;  %v14528_v37 = vmax.f32 %v13332_v18, 0.0  ;;  %v6761_v6 = vadd.f32 %v6760_v47, %v6641_v12  ;;  %v15017_v18 = vld [vmem:[#allocation87_spill] sm:$0xff] }
 0x499   :  { %6288 = vrot.lane.b32.xlu1 %v15007_v45, %s9419_s28  ;;  %v15011_v50 = vmax.f32 %v15010_v51, 0.0  ;;  %v14530_v30 = vmax.f32 %v13342_v55, 0.0  ;;  %v5770_v45 = vpop.f32.mrb[204].mxu1  ;;  %v3513_v14 = vadd.f32 %v3512_v9, %v3393_v13  ;;  %v15012_v24 = vmax.f32 %v12412_v60, 0.0  ;;  %v15013_v51 = vld [vmem:[#allocation15_spill] sm:$0xff] }
 0x49a   :  { %3040 = vrot.lane.b32.xlu0 %v14527_v0, %s9419_s28  ;;  %v2985_v21 = vpop.permute.xlu0 %2984  ;;  %v2520_v0 = vpop.f32.mrb[204].mxu0  ;;  %v6762_v47 = vadd.f32 %v6761_v6, %v6642_v20  ;;  %v6643_v12 = vmul.f32 %v6522_v41, %v140_v32  ;;  %v15015_v41 = vld [vmem:[#allocation16_spill] sm:$0xff]  ;;  %v15021_v27 = vmax.f32 %v13355_v59, 0.0 }
 0x49b   :  { %v3273_v7 = vsel %vm3203_vm1, %v15011_v50, %v2979_v34  ;;  %v6233_v16 = vpop.permute.xlu1 %6232  ;;  %v6523_v22 = vsel %vm3203_vm1, %v15012_v24, %v6231_v57  ;;  %v141_v34 = vld [vmem:[%s14227_s3 + $0x230] sm:$0xff]  ;;  %v15014_v50 = vmax.f32 %v15013_v51, 0.0  ;;  %v13377_v60 = vadd.f32 %v12926_v5, %v2520_v0  ;;  %v8103_v57 = vpop.f32.mrb[205].mxu1 }
 0x49c   :  { %v7843_v13 = vpop.f32.mrb[205].mxu0  ;;  %v3394_v24 = vmul.f32 %v3273_v7, %v140_v32  ;;  %v15016_v6 = vmax.f32 %v15015_v41, 0.0  ;;  %v13387_v51 = vadd.f32 %v12926_v5, %v5770_v45  ;;  %v6644_v0 = vmul.f32 %v6523_v22, %v141_v34  ;;  %v142_v57 = vld [vmem:[%s14227_s3 + $0x238] sm:$0xff] }
 0x49d   :  { %6290 = vrot.lane.b32.xlu1 %v14528_v37, %s9419_s28  ;;  %v3274_v9 = vsel %vm3203_vm1, %v15014_v50, %v2981_v63  ;;  %v2523_v63 = vpop.f32.mrb[206].mxu0  ;;  %v5773_v50 = vpop.f32.mrb[206].mxu1  ;;  %v14534_v7 = vmax.f32 %v13377_v60, 0.0 }
 0x49e   :  { %3042 = vrot.lane.b32.xlu0 %v14530_v30, %s9419_s28  ;;  %v6524_v37 = vsel %vm3203_vm1, %v15016_v6, %v6233_v16  ;;  %v15018_v30 = vmax.f32 %v15017_v18, 0.0  ;;  %v13397_v13 = vadd.f32 %v12926_v5, %v2523_v63  ;;  %v8104_v16 = vpop.f32.mrb[207].mxu1  ;;  %v3395_v45 = vmul.f32 %v3274_v9, %v141_v34  ;;  %v15019_v6 = vld [vmem:[#allocation17_spill] sm:$0xff]  ;;  %v2987_v55 = vpop.permute.xlu0 %2986  ;;  %v15022_v63 = vld [vmem:[#allocation18_spill] sm:$0xff] }
 0x49f   :  { %v6235_v41 = vpop.permute.xlu1 %6234  ;;  %v15020_v20 = vmax.f32 %v15019_v6, 0.0  ;;  %v7844_v62 = vpop.f32.mrb[207].mxu0  ;;  %v6763_v18 = vadd.f32 %v6762_v47, %v6643_v12  ;;  %v15023_v16 = vmax.f32 %v15022_v63, 0.0  ;;  %v3514_v9 = vadd.f32 %v3513_v14, %v3394_v24 }
 0x4a0   :  { %v3275_v32 = vsel %vm3203_vm1, %v15018_v30, %v2983_v58  ;;  %v6645_v58 = vmul.f32 %v6524_v37, %v142_v57  ;;  %v143_v30 = vld [vmem:[%s14227_s3 + $0x240] sm:$0xff]  ;;  %v14536_v47 = vmax.f32 %v13397_v13, 0.0  ;;  %v5778_v14 = vpop.f32.mrb[208].mxu1 }
 0x4a1   :  { %v6525_v22 = vsel %vm3203_vm1, %v15020_v20, %v6235_v41  ;;  %6292 = vrot.lane.b32.xlu1 %v15021_v27, %s9419_s28  ;;  %v3276_v34 = vsel %vm3203_vm1, %v15023_v16, %v2985_v21  ;;  %v3396_v62 = vmul.f32 %v3275_v32, %v142_v57  ;;  %v14535_v20 = vmax.f32 %v13387_v51, 0.0  ;;  %v144_v41 = vld [vmem:[%s14227_s3 + $0x248] sm:$0xff]  ;;  %v15025_v21 = vld [vmem:[#allocation20_spill] sm:$0xff] }
 0x4a2   :  { %3044 = vrot.lane.b32.xlu0 %v14534_v7, %s9419_s28  ;;  %v13416_v27 = vadd.f32 %v12926_v5, %v5773_v50  ;;  %v6764_v37 = vadd.f32 %v6763_v18, %v6644_v0  ;;  %v6646_v12 = vmul.f32 %v6525_v22, %v143_v30  ;;  %v15026_v6 = vmax.f32 %v15025_v21, 0.0  ;;  %v2989_v0 = vpop.permute.xlu0 %2988  ;;  %v2528_v18 = vpop.f32.mrb[208].mxu0 }
 0x4a3   :  { %v6237_v16 = vpop.permute.xlu1 %6236  ;;  %v3515_v24 = vadd.f32 %v3514_v9, %v3395_v45  ;;  %v3397_v57 = vmul.f32 %v3276_v34, %v143_v30  ;;  %v15027_v32 = vmax.f32 %v12510_v53, 0.0  ;;  %v15028_v21 = vmax.f32 %v12524_v36, 0.0  ;;  %v8107_v30 = vpop.f32.mrb[209].mxu1 }
 0x4a4   :  { %15024 = vst [vmem:[#allocation43_spill] sm:$0xff] %v13416_v27  ;;  %v3277_v63 = vsel %vm3203_vm1, %v15026_v6, %v2987_v55  ;;  %v6765_v22 = vadd.f32 %v6764_v37, %v6645_v58  ;;  %v145_v55 = vld [vmem:[%s14227_s3 + $0x250] sm:$0xff]  ;;  %v13438_v53 = vadd.f32 %v12926_v5, %v2528_v18  ;;  %v7847_v34 = vpop.f32.mrb[209].mxu0  ;;  %v14541_v58 = vmax.f32 %v13416_v27, 0.0  ;;  %v5781_v36 = vpop.f32.mrb[210].mxu1 }
 0x4a5   :  { %v6526_v50 = vsel %vm3203_vm1, %v15027_v32, %v6237_v16  ;;  %6294 = vrot.lane.b32.xlu1 %v14535_v20, %s9419_s28  ;;  %v3278_v45 = vsel %vm3203_vm1, %v15028_v21, %v2989_v0  ;;  %v3516_v9 = vadd.f32 %v3515_v24, %v3396_v62  ;;  %v3398_v37 = vmul.f32 %v3277_v63, %v144_v41  ;;  %v2531_v16 = vpop.f32.mrb[210].mxu0  ;;  %v8108_v18 = vpop.f32.mrb[211].mxu1  ;;  %v146_v62 = vld [vmem:[%s14227_s3 + $0x258] sm:$0xff] }
 0x4a6   :  { %v6647_v7 = vmul.f32 %v6526_v50, %v144_v41  ;;  %3046 = vrot.lane.b32.xlu0 %v14536_v47, %s9419_s28  ;;  %v13445_v6 = vadd.f32 %v12926_v5, %v5778_v14  ;;  %v6766_v32 = vadd.f32 %v6765_v22, %v6646_v12  ;;  %v14542_v50 = vmax.f32 %v13438_v53, 0.0  ;;  %v15031_v41 = vld [vmem:[#allocation19_spill] sm:$0xff]  ;;  %v2991_v34 = vpop.permute.xlu0 %2990  ;;  %v7848_v20 = vpop.f32.mrb[211].mxu0 }
 0x4a7   :  { %v13449_v0 = vadd.f32 %v12926_v5, %v2531_v16  ;;  %v6239_v21 = vpop.permute.xlu1 %6238  ;;  %v3517_v24 = vadd.f32 %v3516_v9, %v3397_v57  ;;  %v3399_v30 = vmul.f32 %v3278_v45, %v145_v55  ;;  %v15032_v63 = vmax.f32 %v15031_v41, 0.0  ;;  %v15033_v16 = vld [vmem:[#allocation22_spill] sm:$0xff] }
 0x4a8   :  { %15029 = vst [vmem:[#allocation44_spill] sm:$0xff] %v13445_v6  ;;  %v6767_v12 = vadd.f32 %v6766_v32, %v6647_v7  ;;  %v15034_v18 = vmax.f32 %v15033_v16, 0.0  ;;  %v14537_v45 = vmax.f32 %v13445_v6, 0.0  ;;  %v13468_v9 = vadd.f32 %v12926_v5, %v5781_v36  ;;  %v5786_v32 = vpop.f32.mrb[212].mxu1  ;;  %v15037_v36 = vld [vmem:[#allocation21_spill] sm:$0xff] }
 0x4a9   :  { %15030 = vst [vmem:[#allocation46_spill] sm:$0xff] %v13449_v0  ;;  %v6527_v14 = vsel %vm3203_vm1, %v15032_v63, %v6239_v21  ;;  %6296 = vrot.lane.b32.xlu1 %v14541_v58, %s9419_s28  ;;  %v3518_v57 = vadd.f32 %v3517_v24, %v3398_v37  ;;  %v14538_v21 = vmax.f32 %v13449_v0, 0.0 }
 0x4aa   :  { %v6648_v22 = vmul.f32 %v6527_v14, %v145_v55  ;;  %v3279_v47 = vsel %vm3203_vm1, %v15034_v18, %v2991_v34  ;;  %3048 = vrot.lane.b32.xlu0 %v14542_v50, %s9419_s28  ;;  %15035 = vst [vmem:[#allocation45_spill] sm:$0xff] %v13468_v9  ;;  %v147_v55 = vld [vmem:[%s14227_s3 + $0x260] sm:$0xff]  ;;  %v15036_v14 = vmax.f32 %v12568_v23, 0.0  ;;  %v2993_v24 = vpop.permute.xlu0 %2992  ;;  %v2536_v34 = vpop.f32.mrb[212].mxu0 }
 0x4ab   :  { %v3400_v20 = vmul.f32 %v3279_v47, %v146_v62  ;;  %v6241_v7 = vpop.permute.xlu1 %6240  ;;  %v3519_v63 = vadd.f32 %v3518_v57, %v3399_v30  ;;  %v13484_v16 = vadd.f32 %v12926_v5, %v2536_v34  ;;  %v8111_v18 = vpop.f32.mrb[213].mxu1  ;;  %v14539_v30 = vmax.f32 %v13468_v9, 0.0 }
 0x4ac   :  { %v6768_v41 = vadd.f32 %v6767_v12, %v6648_v22  ;;  %v6528_v37 = vsel %vm3203_vm1, %v15036_v14, %v6241_v7  ;;  %v15038_v12 = vmax.f32 %v15037_v36, 0.0  ;;  %v7851_v23 = vpop.f32.mrb[213].mxu0  ;;  %v13491_v14 = vadd.f32 %v12926_v5, %v5786_v32 }
 0x4ad   :  { %6298 = vrot.lane.b32.xlu1 %v14537_v45, %s9419_s28  ;;  %v6649_v47 = vmul.f32 %v6528_v37, %v146_v62  ;;  %15039 = vst [vmem:[#allocation47_spill] sm:$0xff] %v13484_v16  ;;  %v3520_v57 = vadd.f32 %v3519_v63, %v3400_v20  ;;  %v2539_v62 = vpop.f32.mrb[214].mxu0  ;;  %v5789_v37 = vpop.f32.mrb[214].mxu1  ;;  %v148_v23 = vld [vmem:[%s14227_s3 + $0x268] sm:$0xff]  ;;  %v15042_v20 = vld [vmem:[#allocation24_spill] sm:$0xff] }
 0x4ae   :  { %v3280_v22 = vsel %vm3203_vm1, %v15038_v12, %v2993_v24  ;;  %3050 = vrot.lane.b32.xlu0 %v14538_v21, %s9419_s28  ;;  %15040 = vst [vmem:[#allocation48_spill] sm:$0xff] %v13491_v14  ;;  %v14540_v24 = vmax.f32 %v13484_v16, 0.0  ;;  %v13495_v34 = vadd.f32 %v12926_v5, %v2539_v62  ;;  %v8112_v12 = vpop.f32.mrb[215].mxu1  ;;  %v15043_v63 = vmax.f32 %v15042_v20, 0.0  ;;  %v7852_v21 = vpop.f32.mrb[215].mxu0 }
 0x4af   :  { %v3401_v7 = vmul.f32 %v3280_v22, %v147_v55  ;;  %v6769_v36 = vadd.f32 %v6768_v41, %v6649_v47  ;;  %v6243_v18 = vpop.permute.xlu1 %6242  ;;  %v2995_v22 = vpop.permute.xlu0 %2994  ;;  %v15044_v47 = vld [vmem:[#allocation23_spill] sm:$0xff]  ;;  %v15120_v16 = vmax.f32 %v13023_v35, 0.0 }
 0x4b0   :  { %15041 = vst [vmem:[#allocation50_spill] sm:$0xff] %v13495_v34  ;;  %v6529_v32 = vsel %vm3203_vm1, %v15043_v63, %v6243_v18  ;;  %v15045_v62 = vmax.f32 %v15044_v47, 0.0  ;;  %v14544_v21 = vmax.f32 %v13495_v34, 0.0  ;;  %v15047_v47 = vld [vmem:[#allocation26_spill] sm:$0xff]  ;;  %v2544_v58 = vpop.f32.mrb[216].mxu0 }
 0x4b1   :  { %v3521_v45 = vadd.f32 %v3520_v57, %v3401_v7  ;;  %6300 = vrot.lane.b32.xlu1 %v14539_v30, %s9419_s28  ;;  %v6650_v41 = vmul.f32 %v6529_v32, %v147_v55  ;;  %v14543_v57 = vmax.f32 %v13491_v14, 0.0  ;;  %v13514_v7 = vadd.f32 %v12926_v5, %v5789_v37  ;;  %v149_v55 = vld [vmem:[%s14227_s3 + $0x270] sm:$0xff]  ;;  %v5794_v32 = vpop.f32.mrb[216].mxu1 }
 0x4b2   :  { %v3281_v12 = vsel %vm3203_vm1, %v15045_v62, %v2995_v22  ;;  %3052 = vrot.lane.b32.xlu0 %v14540_v24, %s9419_s28  ;;  %v15048_v62 = vmax.f32 %v15047_v47, 0.0  ;;  %v8115_v50 = vpop.f32.mrb[217].mxu1  ;;  %v13537_v47 = vadd.f32 %v12926_v5, %v5794_v32 }
 0x4b3   :  { %15046 = vst [vmem:[#allocation49_spill] sm:$0xff] %v13514_v7  ;;  %v3402_v18 = vmul.f32 %v3281_v12, %v148_v23  ;;  %v6770_v20 = vadd.f32 %v6769_v36, %v6650_v41  ;;  %v6245_v63 = vpop.permute.xlu1 %6244  ;;  %v2997_v24 = vpop.permute.xlu0 %2996  ;;  %v15049_v36 = vmax.f32 %v12648_v8, 0.0  ;;  %v13530_v12 = vadd.f32 %v12926_v5, %v2544_v58 }
 0x4b4   :  { %v6530_v30 = vsel %vm3203_vm1, %v15048_v62, %v6245_v63  ;;  %15051 = vst [vmem:[#allocation52_spill] sm:$0xff] %v13537_v47 }
 0x4b5   :  { %v3522_v22 = vadd.f32 %v3521_v45, %v3402_v18  ;;  %6302 = vrot.lane.b32.xlu1 %v14543_v57, %s9419_s28  ;;  %v6651_v37 = vmul.f32 %v6530_v30, %v148_v23  ;;  %v3282_v41 = vsel %vm3203_vm1, %v15049_v36, %v2997_v24  ;;  %15050 = vst [vmem:[#allocation51_spill] sm:$0xff] %v13530_v12  ;;  %v7855_v45 = vpop.f32.mrb[217].mxu0  ;;  %v5797_v23 = vpop.f32.mrb[218].mxu1  ;;  %v150_v36 = vld [vmem:[%s14227_s3 + $0x278] sm:$0xff]  ;;  %v15053_v57 = vld [vmem:[#allocation25_spill] sm:$0xff]  ;;  %v15058_v14 = vmax.f32 %v13530_v12, 0.0 }
 0x4b6   :  { %3054 = vrot.lane.b32.xlu0 %v14544_v21, %s9419_s28  ;;  %v3403_v63 = vmul.f32 %v3282_v41, %v149_v55  ;;  %v2547_v30 = vpop.f32.mrb[218].mxu0  ;;  %v8116_v50 = vpop.f32.mrb[219].mxu1  ;;  %v15054_v41 = vmax.f32 %v15053_v57, 0.0  ;;  %v13560_v57 = vadd.f32 %v12926_v5, %v5797_v23  ;;  %v15119_v12 = vmax.f32 %v13037_v1, 0.0 }
 0x4b7   :  { %v6771_v8 = vadd.f32 %v6770_v20, %v6651_v37  ;;  %v13541_v58 = vadd.f32 %v12926_v5, %v2547_v30  ;;  %v6247_v62 = vpop.permute.xlu1 %6246  ;;  %v2999_v21 = vpop.permute.xlu0 %2998  ;;  %v15055_v20 = vmax.f32 %v13514_v7, 0.0  ;;  %v15056_v30 = vld [vmem:[#allocation27_spill] sm:$0xff] }
 0x4b8   :  { %v3523_v45 = vadd.f32 %v3522_v22, %v3403_v63  ;;  %v6531_v32 = vsel %vm3203_vm1, %v15054_v41, %v6247_v62  ;;  %v7856_v18 = vpop.f32.mrb[219].mxu0  ;;  %v15057_v24 = vmax.f32 %v15056_v30, 0.0  ;;  %v14547_v22 = vmax.f32 %v13537_v47, 0.0  ;;  %15059 = vst [vmem:[#allocation53_spill] sm:$0xff] %v13560_v57 }
 0x4b9   :  { %15052 = vst [vmem:[#allocation54_spill] sm:$0xff] %v13541_v58  ;;  %6304 = vrot.lane.b32.xlu1 %v15055_v20, %s9419_s28  ;;  %v6652_v37 = vmul.f32 %v6531_v32, %v149_v55  ;;  %v151_v55 = vld [vmem:[%s14227_s3 + $0x280] sm:$0xff]  ;;  %v5802_v32 = vpop.f32.mrb[220].mxu1  ;;  %v2552_v30 = vpop.f32.mrb[220].mxu0 }
 0x4ba   :  { %v3283_v50 = vsel %vm3203_vm1, %v15057_v24, %v2999_v21  ;;  %3056 = vrot.lane.b32.xlu0 %v15058_v14, %s9419_s28  ;;  %v15060_v24 = vmax.f32 %v12687_v54, 0.0  ;;  %v13576_v18 = vadd.f32 %v12926_v5, %v2552_v30  ;;  %v8119_v7 = vpop.f32.mrb[221].mxu1  ;;  %v15064_v54 = vmax.f32 %v13541_v58, 0.0  ;;  %v161_v58 = vld [vmem:[%s14227_s3 + $0x2d0] sm:$0xff] }
 0x4bb   :  { %v3404_v63 = vmul.f32 %v3283_v50, %v150_v36  ;;  %v6772_v62 = vadd.f32 %v6771_v8, %v6652_v37  ;;  %v6249_v41 = vpop.permute.xlu1 %6248  ;;  %v3001_v20 = vpop.permute.xlu0 %3000  ;;  %v15061_v50 = vld [vmem:[#allocation28_spill] sm:$0xff] }
 0x4bc   :  { %v6532_v14 = vsel %vm3203_vm1, %v15060_v24, %v6249_v41  ;;  %v15062_v8 = vmax.f32 %v15061_v50, 0.0  ;;  %15063 = vst [vmem:[#allocation55_spill] sm:$0xff] %v13576_v18  ;;  %v13583_v24 = vadd.f32 %v12926_v5, %v5802_v32 }
 0x4bd   :  { %v3524_v21 = vadd.f32 %v3523_v45, %v3404_v63  ;;  %6306 = vrot.lane.b32.xlu1 %v14547_v22, %s9419_s28  ;;  %v6653_v23 = vmul.f32 %v6532_v14, %v150_v36  ;;  %v7859_v45 = vpop.f32.mrb[221].mxu0  ;;  %v5805_v14 = vpop.f32.mrb[222].mxu1  ;;  %v15067_v22 = vld [vmem:[#allocation30_spill] sm:$0xff] }
 0x4be   :  { %v3284_v37 = vsel %vm3203_vm1, %v15062_v8, %v3001_v20  ;;  %3058 = vrot.lane.b32.xlu0 %v15064_v54, %s9419_s28  ;;  %15065 = vst [vmem:[#allocation56_spill] sm:$0xff] %v13583_v24  ;;  %v2555_v36 = vpop.f32.mrb[222].mxu0  ;;  %v14549_v20 = vmax.f32 %v13576_v18, 0.0  ;;  %v8120_v7 = vpop.f32.mrb[223].mxu1  ;;  %v152_v54 = vld [vmem:[%s14227_s3 + $0x288] sm:$0xff] }
 0x4bf   :  { %v3405_v41 = vmul.f32 %v3284_v37, %v151_v55  ;;  %v6773_v50 = vadd.f32 %v6772_v62, %v6653_v23  ;;  %v13587_v30 = vadd.f32 %v12926_v5, %v2555_v36  ;;  %v6251_v8 = vpop.permute.xlu1 %6250  ;;  %v15068_v37 = vmax.f32 %v15067_v22, 0.0  ;;  %v3003_v63 = vpop.permute.xlu0 %3002  ;;  %v15070_v5 = vld [vmem:[#allocation29_spill] sm:$0xff]  ;;  %v13608_v22 = vld [vmem:[%s14226_s2] ss:$0 sm:$0xff] }
 0x4c0   :  { %v7860_v47 = vpop.f32.mrb[223].mxu0  ;;  %v15069_v62 = vmax.f32 %v13560_v57, 0.0  ;;  %v15071_v36 = vmax.f32 %v15070_v5, 0.0  ;;  %v15073_v5 = vmax.f32 %v12764_v46, 0.0 }
 0x4c1   :  { %15066 = vst [vmem:[#allocation58_spill] sm:$0xff] %v13587_v30  ;;  %v3525_v45 = vadd.f32 %v3524_v21, %v3405_v41  ;;  %v6533_v32 = vsel %vm3203_vm1, %v15068_v37, %v6251_v8  ;;  %v13611_v47 = vadd.f32 %v13608_v22, %v5805_v14  ;;  %v2560_v21 = vpop.f32.mrb[224].mxu0  ;;  %v15074_v14 = vmax.f32 %v13583_v24, 0.0 }
 0x4c2   :  { %6308 = vrot.lane.b32.xlu1 %v15069_v62, %s9419_s28  ;;  %v6654_v23 = vmul.f32 %v6533_v32, %v151_v55  ;;  %v3285_v7 = vsel %vm3203_vm1, %v15071_v36, %v3003_v63  ;;  %3060 = vrot.lane.b32.xlu0 %v14549_v20, %s9419_s28  ;;  %v153_v63 = vld [vmem:[%s14227_s3 + $0x290] sm:$0xff]  ;;  %v5810_v32 = vpop.f32.mrb[224].mxu1  ;;  %v13627_v55 = vadd.f32 %v13608_v22, %v2560_v21  ;;  %v15077_v46 = vmax.f32 %v13587_v30, 0.0 }
 0x4c3   :  { %15072 = vst [vmem:[#allocation57_spill] sm:$0xff] %v13611_v47  ;;  %v3406_v41 = vmul.f32 %v3285_v7, %v152_v54  ;;  %v6253_v37 = vpop.permute.xlu1 %6252  ;;  %v8123_v57 = vpop.f32.mrb[225].mxu1 }
 0x4c4   :  { %v6774_v8 = vadd.f32 %v6773_v50, %v6654_v23  ;;  %v6534_v36 = vsel %vm3203_vm1, %v15073_v5, %v6253_v37  ;;  %v3005_v20 = vpop.permute.xlu0 %3004  ;;  %v15075_v50 = vmax.f32 %v12778_v39, 0.0  ;;  %15076 = vst [vmem:[#allocation60_spill] sm:$0xff] %v13627_v55  ;;  %v13634_v5 = vadd.f32 %v13608_v22, %v5810_v32 }
 0x4c5   :  { %v3526_v62 = vadd.f32 %v3525_v45, %v3406_v41  ;;  %v6655_v7 = vmul.f32 %v6534_v36, %v152_v54  ;;  %v7863_v45 = vpop.f32.mrb[225].mxu0  ;;  %v5813_v36 = vpop.f32.mrb[226].mxu1 }
 0x4c6   :  { %6310 = vrot.lane.b32.xlu1 %v15074_v14, %s9419_s28  ;;  %v3286_v23 = vsel %vm3203_vm1, %v15075_v50, %v3005_v20  ;;  %3062 = vrot.lane.b32.xlu0 %v15077_v46, %s9419_s28  ;;  %15078 = vst [vmem:[#allocation59_spill] sm:$0xff] %v13634_v5  ;;  %v2563_v54 = vpop.f32.mrb[226].mxu0  ;;  %v14551_v20 = vmax.f32 %v13627_v55, 0.0  ;;  %v8124_v57 = vpop.f32.mrb[227].mxu1  ;;  %v154_v50 = vld [vmem:[%s14227_s3 + $0x298] sm:$0xff] }
 0x4c7   :  { %v3407_v37 = vmul.f32 %v3286_v23, %v153_v63  ;;  %v6775_v39 = vadd.f32 %v6774_v8, %v6655_v7  ;;  %v13638_v21 = vadd.f32 %v13608_v22, %v2563_v54  ;;  %v6255_v14 = vpop.permute.xlu1 %6254  ;;  %v15080_v23 = vmax.f32 %v12785_v2, 0.0  ;;  %v7864_v41 = vpop.f32.mrb[227].mxu0  ;;  %v15117_v55 = vld [vmem:[#allocation32_spill] sm:$0xff] }
 0x4c8   :  { %v3007_v45 = vpop.permute.xlu0 %3006  ;;  %v15081_v8 = vmax.f32 %v13611_v47, 0.0  ;;  %v15082_v54 = vmax.f32 %v12789_v29, 0.0  ;;  %v13657_v2 = vadd.f32 %v13608_v22, %v5813_v36  ;;  %v155_v29 = vld [vmem:[%s14227_s3 + $0x2a0] sm:$0xff]  ;;  %v160_v47 = vld [vmem:[%s14227_s3 + $0x2c8] sm:$0xff]  ;;  %v15118_v24 = vmax.f32 %v15117_v55, 0.0 }
 0x4c9   :  { %15079 = vst [vmem:[#allocation62_spill] sm:$0xff] %v13638_v21  ;;  %v3527_v46 = vadd.f32 %v3526_v62, %v3407_v37  ;;  %v6535_v32 = vsel %vm3203_vm1, %v15080_v23, %v6255_v14  ;;  %v14552_v62 = vmax.f32 %v13634_v5, 0.0  ;;  %v15122_v55 = vmax.f32 %v13048_v61, 0.0 }
 0x4ca   :  { %6312 = vrot.lane.b32.xlu1 %v15081_v8, %s9419_s28  ;;  %v6656_v7 = vmul.f32 %v6535_v32, %v153_v63  ;;  %v3287_v57 = vsel %vm3203_vm1, %v15082_v54, %v3007_v45  ;;  %3064 = vrot.lane.b32.xlu0 %v14551_v20, %s9419_s28  ;;  %15083 = vst [vmem:[#allocation61_spill] sm:$0xff] %v13657_v2  ;;  %v5818_v63 = vpop.f32.mrb[228].mxu1  ;;  %v15084_v45 = vmax.f32 %v12822_v17, 0.0  ;;  %v2568_v20 = vpop.f32.mrb[228].mxu0  ;;  %v15087_v17 = vmax.f32 %v13638_v21, 0.0 }
 0x4cb   :  { %v3408_v37 = vmul.f32 %v3287_v57, %v154_v50  ;;  %v6257_v23 = vpop.permute.xlu1 %6256  ;;  %v13673_v57 = vadd.f32 %v13608_v22, %v2568_v20  ;;  %v8127_v41 = vpop.f32.mrb[229].mxu1 }
 0x4cc   :  { %v6776_v14 = vadd.f32 %v6775_v39, %v6656_v7  ;;  %v6536_v8 = vsel %vm3203_vm1, %v15084_v45, %v6257_v23  ;;  %v3009_v54 = vpop.permute.xlu0 %3008  ;;  %v15085_v39 = vmax.f32 %v12836_v42, 0.0  ;;  %v13680_v45 = vadd.f32 %v13608_v22, %v5818_v63 }
 0x4cd   :  { %v3528_v32 = vadd.f32 %v3527_v46, %v3408_v37  ;;  %v6657_v36 = vmul.f32 %v6536_v8, %v154_v50  ;;  %15086 = vst [vmem:[#allocation63_spill] sm:$0xff] %v13673_v57  ;;  %v7867_v46 = vpop.f32.mrb[229].mxu0  ;;  %v5821_v8 = vpop.f32.mrb[230].mxu1 }
 0x4ce   :  { %6314 = vrot.lane.b32.xlu1 %v14552_v62, %s9419_s28  ;;  %v3288_v7 = vsel %vm3203_vm1, %v15085_v39, %v3009_v54  ;;  %3066 = vrot.lane.b32.xlu0 %v15087_v17, %s9419_s28  ;;  %15088 = vst [vmem:[#allocation64_spill] sm:$0xff] %v13680_v45  ;;  %v2571_v50 = vpop.f32.mrb[230].mxu0  ;;  %v14553_v54 = vmax.f32 %v13673_v57, 0.0  ;;  %v8128_v41 = vpop.f32.mrb[231].mxu1  ;;  %v156_v17 = vld [vmem:[%s14227_s3 + $0x2a8] sm:$0xff] }
 0x4cf   :  { %v3409_v23 = vmul.f32 %v3288_v7, %v155_v29  ;;  %v6777_v42 = vadd.f32 %v6776_v14, %v6657_v36  ;;  %v13684_v20 = vadd.f32 %v13608_v22, %v2571_v50  ;;  %v6259_v39 = vpop.permute.xlu1 %6258  ;;  %v15090_v7 = vmax.f32 %v12851_v49, 0.0  ;;  %v7868_v37 = vpop.f32.mrb[231].mxu0 }
 0x4d0   :  { %v3011_v62 = vpop.permute.xlu0 %3010  ;;  %v15091_v14 = vmax.f32 %v13657_v2, 0.0  ;;  %v15092_v50 = vmax.f32 %v12862_v33, 0.0  ;;  %v13703_v49 = vadd.f32 %v13608_v22, %v5821_v8  ;;  %v157_v33 = vld [vmem:[%s14227_s3 + $0x2b0] sm:$0xff] }
 0x4d1   :  { %15089 = vst [vmem:[#allocation67_spill] sm:$0xff] %v13684_v20  ;;  %v3529_v46 = vadd.f32 %v3528_v32, %v3409_v23  ;;  %v6537_v63 = vsel %vm3203_vm1, %v15090_v7, %v6259_v39  ;;  %v14554_v32 = vmax.f32 %v13680_v45, 0.0 }
 0x4d2   :  { %6316 = vrot.lane.b32.xlu1 %v15091_v14, %s9419_s28  ;;  %v6658_v36 = vmul.f32 %v6537_v63, %v155_v29  ;;  %v3289_v41 = vsel %vm3203_vm1, %v15092_v50, %v3011_v62  ;;  %3068 = vrot.lane.b32.xlu0 %v14553_v54, %s9419_s28  ;;  %15093 = vst [vmem:[#allocation65_spill] sm:$0xff] %v13703_v49  ;;  %v5826_v29 = vpop.f32.mrb[232].mxu1  ;;  %v15094_v63 = vmax.f32 %v12883_v28, 0.0  ;;  %v2576_v54 = vpop.f32.mrb[232].mxu0  ;;  %v15097_v28 = vmax.f32 %v13684_v20, 0.0 }
 0x4d3   :  { %v3410_v23 = vmul.f32 %v3289_v41, %v156_v17  ;;  %v6261_v7 = vpop.permute.xlu1 %6260  ;;  %v13719_v41 = vadd.f32 %v13608_v22, %v2576_v54  ;;  %v8131_v37 = vpop.f32.mrb[233].mxu1 }
 0x4d4   :  { %v6778_v39 = vadd.f32 %v6777_v42, %v6658_v36  ;;  %v6538_v14 = vsel %vm3203_vm1, %v15094_v63, %v6261_v7  ;;  %v3013_v50 = vpop.permute.xlu0 %3012  ;;  %v15095_v42 = vmax.f32 %v12902_v19, 0.0  ;;  %v13726_v63 = vadd.f32 %v13608_v22, %v5826_v29 }
 0x4d5   :  { %v3530_v62 = vadd.f32 %v3529_v46, %v3410_v23  ;;  %v6659_v8 = vmul.f32 %v6538_v14, %v156_v17  ;;  %15096 = vst [vmem:[#allocation69_spill] sm:$0xff] %v13719_v41  ;;  %v7871_v46 = vpop.f32.mrb[233].mxu0  ;;  %v5829_v14 = vpop.f32.mrb[234].mxu1 }
 0x4d6   :  { %6318 = vrot.lane.b32.xlu1 %v14554_v32, %s9419_s28  ;;  %v3290_v36 = vsel %vm3203_vm1, %v15095_v42, %v3013_v50  ;;  %3070 = vrot.lane.b32.xlu0 %v15097_v28, %s9419_s28  ;;  %15098 = vst [vmem:[#allocation70_spill] sm:$0xff] %v13726_v63  ;;  %v2579_v17 = vpop.f32.mrb[234].mxu0  ;;  %v14555_v50 = vmax.f32 %v13719_v41, 0.0  ;;  %v8132_v37 = vpop.f32.mrb[235].mxu1  ;;  %v158_v28 = vld [vmem:[%s14227_s3 + $0x2b8] sm:$0xff] }
 0x4d7   :  { %v3411_v7 = vmul.f32 %v3290_v36, %v157_v33  ;;  %v6779_v19 = vadd.f32 %v6778_v39, %v6659_v8  ;;  %v13730_v54 = vadd.f32 %v13608_v22, %v2579_v17  ;;  %v6263_v42 = vpop.permute.xlu1 %6262  ;;  %v15100_v36 = vmax.f32 %v12920_v25, 0.0  ;;  %v7872_v23 = vpop.f32.mrb[235].mxu0 }
 0x4d8   :  { %v3015_v32 = vpop.permute.xlu0 %3014  ;;  %v15101_v39 = vmax.f32 %v13703_v49, 0.0  ;;  %v15102_v17 = vmax.f32 %v12929_v31, 0.0  ;;  %v13749_v25 = vadd.f32 %v13608_v22, %v5829_v14  ;;  %v159_v31 = vld [vmem:[%s14227_s3 + $0x2c0] sm:$0xff] }
 0x4d9   :  { %15099 = vst [vmem:[#allocation74_spill] sm:$0xff] %v13730_v54  ;;  %v3531_v46 = vadd.f32 %v3530_v62, %v3411_v7  ;;  %v6539_v29 = vsel %vm3203_vm1, %v15100_v36, %v6263_v42  ;;  %v14556_v62 = vmax.f32 %v13726_v63, 0.0 }
 0x4da   :  { %6320 = vrot.lane.b32.xlu1 %v15101_v39, %s9419_s28  ;;  %v6660_v8 = vmul.f32 %v6539_v29, %v157_v33  ;;  %v3291_v37 = vsel %vm3203_vm1, %v15102_v17, %v3015_v32  ;;  %3072 = vrot.lane.b32.xlu0 %v14555_v50, %s9419_s28  ;;  %15103 = vst [vmem:[#allocation72_spill] sm:$0xff] %v13749_v25  ;;  %v5834_v33 = vpop.f32.mrb[236].mxu1  ;;  %v15104_v29 = vmax.f32 %v12946_v48, 0.0  ;;  %v2584_v50 = vpop.f32.mrb[236].mxu0  ;;  %v15107_v48 = vmax.f32 %v13730_v54, 0.0 }
 0x4db   :  { %v3412_v7 = vmul.f32 %v3291_v37, %v158_v28  ;;  %v6265_v36 = vpop.permute.xlu1 %6264  ;;  %v13765_v37 = vadd.f32 %v13608_v22, %v2584_v50  ;;  %v8135_v23 = vpop.f32.mrb[237].mxu1 }
 0x4dc   :  { %v6780_v42 = vadd.f32 %v6779_v19, %v6660_v8  ;;  %v6540_v39 = vsel %vm3203_vm1, %v15104_v29, %v6265_v36  ;;  %v3017_v17 = vpop.permute.xlu0 %3016  ;;  %v15105_v19 = vmax.f32 %v12976_v3, 0.0  ;;  %v13772_v29 = vadd.f32 %v13608_v22, %v5834_v33 }
 0x4dd   :  { %v3532_v32 = vadd.f32 %v3531_v46, %v3412_v7  ;;  %v6661_v14 = vmul.f32 %v6540_v39, %v158_v28  ;;  %15106 = vst [vmem:[#allocation77_spill] sm:$0xff] %v13765_v37  ;;  %v7875_v46 = vpop.f32.mrb[237].mxu0  ;;  %v5837_v39 = vpop.f32.mrb[238].mxu1  ;;  %v15112_v33 = vmax.f32 %v13749_v25, 0.0 }
 0x4de   :  { %6322 = vrot.lane.b32.xlu1 %v14556_v62, %s9419_s28  ;;  %v3292_v8 = vsel %vm3203_vm1, %v15105_v19, %v3017_v17  ;;  %3074 = vrot.lane.b32.xlu0 %v15107_v48, %s9419_s28  ;;  %15108 = vst [vmem:[#allocation78_spill] sm:$0xff] %v13772_v29  ;;  %v2587_v28 = vpop.f32.mrb[238].mxu0  ;;  %v14558_v17 = vmax.f32 %v13765_v37, 0.0  ;;  %v8136_v23 = vpop.f32.mrb[239].mxu1  ;;  %v15110_v48 = vld [vmem:[#allocation31_spill] sm:$0xff] }
 0x4df   :  { %v3413_v36 = vmul.f32 %v3292_v8, %v159_v31  ;;  %v6781_v3 = vadd.f32 %v6780_v42, %v6661_v14  ;;  %v13776_v50 = vadd.f32 %v13608_v22, %v2587_v28  ;;  %v6267_v19 = vpop.permute.xlu1 %6266  ;;  %v15111_v46 = vmax.f32 %v15110_v48, 0.0  ;;  %v7876_v63 = vpop.f32.mrb[239].mxu0 }
 0x4e0   :  { %v3019_v8 = vpop.permute.xlu0 %3018  ;;  %v14560_v14 = vmax.f32 %v13772_v29, 0.0  ;;  %v5842_v63 = vpop.f32.mrb[240].mxu1 }
 0x4e1   :  { %15109 = vst [vmem:[#allocation82_spill] sm:$0xff] %v13776_v50  ;;  %v13778_v62 = vadd.f32 %v3532_v32, %v3413_v36  ;;  %v6541_v7 = vsel %vm3203_vm1, %v15111_v46, %v6267_v19  ;;  %v13791_v32 = vadd.f32 %v13608_v22, %v5837_v39  ;;  %v14562_v36 = vmax.f32 %v13776_v50, 0.0  ;;  %v2592_v48 = vpop.f32.mrb[240].mxu0 }
 0x4e2   :  { %6324 = vrot.lane.b32.xlu1 %v15112_v33, %s9419_s28  ;;  %v6662_v42 = vmul.f32 %v6541_v7, %v159_v31  ;;  %3076 = vrot.lane.b32.xlu0 %v14558_v17, %s9419_s28  ;;  %v13800_v31 = vadd.f32 %v13608_v22, %v2592_v48  ;;  %v8139_v7 = vpop.f32.mrb[241].mxu1  ;;  %v7879_v39 = vpop.f32.mrb[241].mxu0  ;;  %v13807_v46 = vadd.f32 %v13608_v22, %v5842_v63 }
 0x4e3   :  { %15113 = vst [vmem:[#allocation80_spill] sm:$0xff] %v13791_v32  ;;  %v6269_v23 = vpop.permute.xlu1 %6268  ;;  %v2595_v33 = vpop.f32.mrb[242].mxu0  ;;  %v3293_v30 = vsel %vm3203_vm1, %v15118_v24, %v3019_v8  ;;  %v162_v24 = vld [vmem:[%s14227_s3 + $0x2d8] sm:$0xff] }
 0x4e4   :  { %v13794_v28 = vadd.f32 %v6781_v3, %v6662_v42  ;;  %v3021_v19 = vpop.permute.xlu0 %3020  ;;  %15114 = vst [vmem:[#allocation85_spill] sm:$0xff] %v13800_v31  ;;  %v14564_v3 = vmax.f32 %v13791_v32, 0.0  ;;  %15115 = vst [vmem:[#allocation86_spill] sm:$0xff] %v13807_v46  ;;  %v5845_v42 = vpop.f32.mrb[242].mxu1  ;;  %v14566_v17 = vmax.f32 %v13800_v31, 0.0  ;;  %v14570_v7 = vmax.f32 %v13807_v46, 0.0 }
 0x4e5   :  { %v8140_v29 = vpop.f32.mrb[243].mxu1  ;;  %v7880_v48 = vpop.f32.mrb[243].mxu0  ;;  %v3294_v34 = vsel %vm3203_vm1, %v15119_v12, %v3021_v19  ;;  %v3414_v9 = vmul.f32 %v3293_v30, %v160_v47  ;;  %v6542_v6 = vsel %vm3203_vm1, %v15120_v16, %v6269_v23  ;;  %v163_v16 = vld [vmem:[%s14227_s3 + $0x2e0] sm:$0xff]  ;;  %v15125_v23 = vmax.f32 %v13093_v4, 0.0 }
 0x4e6   :  { %6326 = vrot.lane.b32.xlu1 %v14560_v14, %s9419_s28  ;;  %3078 = vrot.lane.b32.xlu0 %v14562_v36, %s9419_s28  ;;  %v3415_v1 = vmul.f32 %v3294_v34, %v161_v58  ;;  %v6663_v35 = vmul.f32 %v6542_v6, %v160_v47  ;;  %v164_v6 = vld [vmem:[%s14227_s3 + $0x2e8] sm:$0xff]  ;;  %v15127_v47 = vmax.f32 %v13119_v26, 0.0 }
 0x4e7   :  { %v6271_v14 = vpop.permute.xlu1 %6270  ;;  %v3534_v61 = vadd.f32 %v13778_v62, %v3414_v9  ;;  %v15128_v62 = vld [vmem:[#allocation33_spill] sm:$0xff] }
 0x4e8   :  { %v3023_v25 = vpop.permute.xlu0 %3022 }
 0x4e9   :  { %v3295_v8 = vsel %vm3203_vm1, %v15122_v55, %v3023_v25  ;;  %v15126_v25 = vmax.f32 %v13081_v56, 0.0 }
 0x4ea   :  { %6328 = vrot.lane.b32.xlu1 %v14564_v3, %s9419_s28  ;;  %3080 = vrot.lane.b32.xlu0 %v14566_v17, %s9419_s28 }
 0x4eb   :  { %v6273_v22 = vpop.permute.xlu1 %6272 }
 0x4ec   :  { %v3025_v63 = vpop.permute.xlu0 %3024  ;;  %v6544_v34 = vsel %vm3203_vm1, %v15126_v25, %v6273_v22  ;;  %v6783_v22 = vadd.f32 %v13794_v28, %v6663_v35  ;;  %v15131_v25 = vld [vmem:[#allocation35_spill] sm:$0xff] }
 0x4ed   :  { %v3296_v19 = vsel %vm3203_vm1, %v15125_v23, %v3025_v63  ;;  %v3535_v63 = vadd.f32 %v3534_v61, %v3415_v1  ;;  %v15132_v1 = vmax.f32 %v15131_v25, 0.0  ;;  %v166_v28 = vld [vmem:[%s14227_s3 + $0x2f8] sm:$0xff] }
 0x4ee   :  { %6330 = vrot.lane.b32.xlu1 %v14570_v7, %s9419_s28  ;;  %v3417_v9 = vmul.f32 %v3296_v19, %v163_v16 }
 0x4ef   :  { %v6275_v29 = vpop.permute.xlu1 %6274 }
 0x4f0   :  { %v3027_v39 = vpop.permute.xlu0 %3026 }
 0x4f1   :  { %v3297_v4 = vsel %vm3203_vm1, %v15127_v47, %v3027_v39 }
 0x4f2   :  { %v3418_v23 = vmul.f32 %v3297_v4, %v164_v6 }
 0x4f3   :  { %v6277_v33 = vpop.permute.xlu1 %6276 }
 0x4f4   :  { %v3029_v42 = vpop.permute.xlu0 %3028  ;;  %v6546_v19 = vsel %vm3203_vm1, %v15132_v1, %v6277_v33 }
 0x4f7   :  { %v6279_v48 = vpop.permute.xlu1 %6278 }
 0x4f8   :  { %v3031_v36 = vpop.permute.xlu0 %3030 }
 0x4fb   :  { %v13820_v32 = vpop.permute.xlu1 %6280 }
 0x4fc   :  { %v13822_v3 = vpop.permute.xlu0 %3032 }
 0x4ff   :  { %v13824_v31 = vpop.permute.xlu1 %6282 }
 0x500   :  { %v13826_v17 = vpop.permute.xlu0 %3034 }
 0x503   :  { %v13828_v50 = vpop.permute.xlu1 %6284 }
 0x504   :  { %v13830_v37 = vpop.permute.xlu0 %3036 }
 0x507   :  { %v13832_v46 = vpop.permute.xlu1 %6286 }
 0x508   :  { %v13834_v7 = vpop.permute.xlu0 %3038 }
 0x50b   :  { %v13836_v54 = vpop.permute.xlu1 %6288 }
 0x50c   :  { %v13838_v49 = vpop.permute.xlu0 %3040 }
 0x50f   :  { %v13840_v41 = vpop.permute.xlu1 %6290 }
 0x510   :  { %v13842_v45 = vpop.permute.xlu0 %3042 }
 0x513   :  { %v13844_v20 = vpop.permute.xlu1 %6292 }
 0x514   :  { %v13846_v2 = vpop.permute.xlu0 %3044 }
 0x517   :  { %v13848_v57 = vpop.permute.xlu1 %6294 }
 0x518   :  { %v13850_v5 = vpop.permute.xlu0 %3046 }
 0x51b   :  { %v13852_v21 = vpop.permute.xlu1 %6296 }
 0x51c   :  { %15116 = vst [vmem:[#allocation88_spill] sm:$0xff] %v13852_v21  ;;  %v13860_v18 = vpop.permute.xlu0 %3048  ;;  %v15123_v21 = vld [vmem:[#allocation34_spill] sm:$0xff] }
 0x51d   :  { %v15124_v12 = vmax.f32 %v15123_v21, 0.0 }
 0x51f   :  { %v13871_v0 = vpop.permute.xlu1 %6298  ;;  %v6543_v30 = vsel %vm3203_vm1, %v15124_v12, %v6271_v14  ;;  %v6665_v12 = vmul.f32 %v6544_v34, %v162_v24  ;;  %v15134_v34 = vld [vmem:[#allocation36_spill] sm:$0xff] }
 0x520   :  { %15121 = vst [vmem:[#allocation89_spill] sm:$0xff] %v13871_v0  ;;  %v13879_v27 = vpop.permute.xlu0 %3050  ;;  %v3416_v0 = vmul.f32 %v3295_v8, %v162_v24  ;;  %v6664_v21 = vmul.f32 %v6543_v30, %v161_v58  ;;  %v15129_v8 = vmax.f32 %v15128_v62, 0.0  ;;  %v165_v58 = vld [vmem:[%s14227_s3 + $0x2f0] sm:$0xff]  ;;  %v15130_v30 = vmax.f32 %v13155_v40, 0.0 }
 0x521   :  { %v15133_v24 = vmax.f32 %v13176_v10, 0.0  ;;  %v15135_v4 = vmax.f32 %v15134_v34, 0.0  ;;  %v6667_v62 = vmul.f32 %v6546_v19, %v164_v6  ;;  %v169_v19 = vld [vmem:[%s14227_s3 + $0x310] sm:$0xff] }
 0x522   :  { %v6545_v56 = vsel %vm3203_vm1, %v15129_v8, %v6275_v29  ;;  %v3298_v26 = vsel %vm3203_vm1, %v15130_v30, %v3029_v42  ;;  %v3536_v39 = vadd.f32 %v3535_v63, %v3416_v0  ;;  %v6784_v29 = vadd.f32 %v6783_v22, %v6664_v21 }
 0x523   :  { %v13894_v55 = vpop.permute.xlu1 %6300  ;;  %v6666_v47 = vmul.f32 %v6545_v56, %v163_v16  ;;  %v3299_v40 = vsel %vm3203_vm1, %v15133_v24, %v3031_v36  ;;  %v3419_v42 = vmul.f32 %v3298_v26, %v165_v58  ;;  %v6547_v33 = vsel %vm3203_vm1, %v15135_v4, %v6279_v48  ;;  %v167_v16 = vld [vmem:[%s14227_s3 + $0x300] sm:$0xff] }
 0x524   :  { %v13902_v14 = vpop.permute.xlu0 %3052  ;;  %v3537_v0 = vadd.f32 %v3536_v39, %v3417_v9  ;;  %v6785_v63 = vadd.f32 %v6784_v29, %v6665_v12  ;;  %v15136_v21 = vmax.f32 %v13217_v15, 0.0  ;;  %v3420_v8 = vmul.f32 %v3299_v40, %v166_v28  ;;  %v15137_v9 = vld [vmem:[#allocation38_spill] sm:$0xff] }
 0x525   :  { %v15138_v56 = vmax.f32 %v15137_v9, 0.0  ;;  %v6668_v6 = vmul.f32 %v6547_v33, %v165_v58  ;;  %v168_v12 = vld [vmem:[%s14227_s3 + $0x308] sm:$0xff]  ;;  %v15139_v15 = vmax.f32 %v13231_v52, 0.0  ;;  %v15141_v52 = vmax.f32 %v13270_v44, 0.0 }
 0x526   :  { %v3300_v10 = vsel %vm3203_vm1, %v15136_v21, %v13822_v3  ;;  %v3538_v36 = vadd.f32 %v3537_v0, %v3418_v23  ;;  %v6786_v48 = vadd.f32 %v6785_v63, %v6666_v47  ;;  %v15142_v24 = vmax.f32 %v13260_v11, 0.0  ;;  %v170_v0 = vld [vmem:[%s14227_s3 + $0x318] sm:$0xff]  ;;  %v15144_v11 = vld [vmem:[#allocation37_spill] sm:$0xff] }
 0x527   :  { %v13917_v61 = vpop.permute.xlu1 %6302  ;;  %v6548_v22 = vsel %vm3203_vm1, %v15138_v56, %v13820_v32  ;;  %v3301_v3 = vsel %vm3203_vm1, %v15139_v15, %v13826_v17  ;;  %v3421_v23 = vmul.f32 %v3300_v10, %v167_v16  ;;  %v15140_v32 = vmax.f32 %v13227_v43, 0.0  ;;  %v15146_v21 = vld [vmem:[#allocation39_spill] sm:$0xff] }
 0x528   :  { %v13925_v35 = vpop.permute.xlu0 %3054  ;;  %v3539_v39 = vadd.f32 %v3538_v36, %v3419_v42  ;;  %v6787_v1 = vadd.f32 %v6786_v48, %v6667_v62  ;;  %v6669_v58 = vmul.f32 %v6548_v22, %v166_v28  ;;  %v3302_v17 = vsel %vm3203_vm1, %v15141_v52, %v13830_v37 }
 0x529   :  { %v6549_v25 = vsel %vm3203_vm1, %v15140_v32, %v13824_v31  ;;  %v3422_v47 = vmul.f32 %v3301_v3, %v168_v12  ;;  %v6550_v43 = vsel %vm3203_vm1, %v15142_v24, %v13828_v50  ;;  %v15143_v44 = vmax.f32 %v13281_v38, 0.0  ;;  %v15152_v32 = vld [vmem:[#allocation42_spill] sm:$0xff] }
 0x52a   :  { %v3540_v29 = vadd.f32 %v3539_v39, %v3420_v8  ;;  %v6788_v31 = vadd.f32 %v6787_v1, %v6668_v6  ;;  %v6670_v28 = vmul.f32 %v6549_v25, %v167_v16  ;;  %v3423_v4 = vmul.f32 %v3302_v17, %v169_v19  ;;  %v171_v16 = vld [vmem:[%s14227_s3 + $0x320] sm:$0xff]  ;;  %v172_v6 = vld [vmem:[%s14227_s3 + $0x328] sm:$0xff] }
 0x52b   :  { %v13941_v30 = vpop.permute.xlu1 %6304  ;;  %v3303_v37 = vsel %vm3203_vm1, %v15143_v44, %v13834_v7  ;;  %v15145_v50 = vmax.f32 %v15144_v11, 0.0  ;;  %v6671_v62 = vmul.f32 %v6550_v43, %v168_v12  ;;  %v15147_v38 = vmax.f32 %v15146_v21, 0.0  ;;  %v15148_v8 = vld [vmem:[#allocation40_spill] sm:$0xff]  ;;  %v15150_v12 = vld [vmem:[#allocation41_spill] sm:$0xff] }
 0x52c   :  { %v13950_v26 = vpop.permute.xlu0 %3056  ;;  %v3541_v34 = vadd.f32 %v3540_v29, %v3421_v23  ;;  %v6789_v63 = vadd.f32 %v6788_v31, %v6669_v58  ;;  %v3424_v36 = vmul.f32 %v3303_v37, %v170_v0  ;;  %v15149_v9 = vmax.f32 %v15148_v8, 0.0  ;;  %v175_v11 = vld [vmem:[%s14227_s3 + $0x340] sm:$0xff] }
 0x52d   :  { %v6551_v33 = vsel %vm3203_vm1, %v15145_v50, %v13832_v46  ;;  %v3304_v7 = vsel %vm3203_vm1, %v15147_v38, %v13838_v49  ;;  %v15151_v15 = vmax.f32 %v15150_v12, 0.0  ;;  %v15154_v52 = vmax.f32 %v13377_v60, 0.0 }
 0x52e   :  { %v3542_v10 = vadd.f32 %v3541_v34, %v3422_v47  ;;  %v6552_v56 = vsel %vm3203_vm1, %v15149_v9, %v13836_v54  ;;  %v6790_v46 = vadd.f32 %v6789_v63, %v6670_v28  ;;  %v6672_v48 = vmul.f32 %v6551_v33, %v169_v19  ;;  %v173_v19 = vld [vmem:[%s14227_s3 + $0x330] sm:$0xff]  ;;  %v174_v28 = vld [vmem:[%s14227_s3 + $0x338] sm:$0xff] }
 0x52f   :  { %v13967_v40 = vpop.permute.xlu1 %6306  ;;  %v3305_v49 = vsel %vm3203_vm1, %v15151_v15, %v13842_v45  ;;  %v3425_v23 = vmul.f32 %v3304_v7, %v171_v16  ;;  %v15153_v54 = vmax.f32 %v15152_v32, 0.0  ;;  %v6673_v58 = vmul.f32 %v6552_v56, %v170_v0  ;;  %v15159_v63 = vld [vmem:[#allocation88_spill] sm:$0xff]  ;;  %v176_v7 = vld [vmem:[%s14227_s3 + $0x348] sm:$0xff] }
 0x530   :  { %v13976_v42 = vpop.permute.xlu0 %3058  ;;  %v3543_v39 = vadd.f32 %v3542_v10, %v3423_v4  ;;  %v6791_v1 = vadd.f32 %v6790_v46, %v6671_v62  ;;  %v3306_v45 = vsel %vm3203_vm1, %v15154_v52, %v13846_v2  ;;  %v3426_v29 = vmul.f32 %v3305_v49, %v172_v6  ;;  %v15160_v62 = vld [vmem:[#allocation43_spill] sm:$0xff]  ;;  %v15162_v10 = vld [vmem:[#allocation46_spill] sm:$0xff]  ;;  %v15164_v56 = vld [vmem:[#allocation89_spill] sm:$0xff] }
 0x531   :  { %v6553_v25 = vsel %vm3203_vm1, %v15153_v54, %v13840_v41  ;;  %v15155_v47 = vmax.f32 %v13355_v59, 0.0  ;;  %v15156_v60 = vmax.f32 %v13397_v13, 0.0  ;;  %v3427_v37 = vmul.f32 %v3306_v45, %v173_v19  ;;  %v15165_v46 = vld [vmem:[#allocation44_spill] sm:$0xff]  ;;  %v177_v49 = vld [vmem:[%s14227_s3 + $0x350] sm:$0xff] }
 0x532   :  { %v3544_v17 = vadd.f32 %v3543_v39, %v3424_v36  ;;  %v6792_v41 = vadd.f32 %v6791_v1, %v6672_v48  ;;  %v6674_v31 = vmul.f32 %v6553_v25, %v171_v16  ;;  %v15157_v59 = vmax.f32 %v13387_v51, 0.0  ;;  %v15167_v39 = vld [vmem:[#allocation47_spill] sm:$0xff]  ;;  %v15169_v25 = vld [vmem:[#allocation45_spill] sm:$0xff] }
 0x533   :  { %v6554_v24 = vsel %vm3203_vm1, %v15155_v47, %v13844_v20  ;;  %v3307_v2 = vsel %vm3203_vm1, %v15156_v60, %v13850_v5  ;;  %v15158_v13 = vmax.f32 %v13438_v53, 0.0  ;;  %v15161_v16 = vmax.f32 %v15160_v62, 0.0  ;;  %v15179_v62 = vld [vmem:[#allocation54_spill] sm:$0xff] }
 0x534   :  { %v13993_v22 = vpop.permute.xlu1 %6308  ;;  %v14002_v3 = vpop.permute.xlu0 %3060  ;;  %v3545_v44 = vadd.f32 %v3544_v17, %v3425_v23  ;;  %v6555_v20 = vsel %vm3203_vm1, %v15157_v59, %v13848_v57  ;;  %v6793_v34 = vadd.f32 %v6792_v41, %v6673_v58  ;;  %v6675_v4 = vmul.f32 %v6554_v24, %v172_v6  ;;  %v178_v17 = vld [vmem:[%s14227_s3 + $0x358] sm:$0xff] }
 0x535   :  { %v3308_v5 = vsel %vm3203_vm1, %v15158_v13, %v13860_v18  ;;  %v3428_v33 = vmul.f32 %v3307_v2, %v174_v28  ;;  %v6556_v51 = vsel %vm3203_vm1, %v15161_v16, %v15159_v63  ;;  %v6676_v38 = vmul.f32 %v6555_v20, %v173_v19  ;;  %v15175_v59 = vld [vmem:[#allocation51_spill] sm:$0xff]  ;;  %v180_v63 = vld [vmem:[%s14227_s3 + $0x368] sm:$0xff] }
 0x536   :  { %v3546_v50 = vadd.f32 %v3545_v44, %v3426_v29  ;;  %v6794_v57 = vadd.f32 %v6793_v34, %v6674_v31  ;;  %v15163_v53 = vmax.f32 %v15162_v10, 0.0  ;;  %v3429_v9 = vmul.f32 %v3308_v5, %v175_v11  ;;  %v15171_v29 = vld [vmem:[#allocation50_spill] sm:$0xff] }
 0x537   :  { %v15166_v48 = vmax.f32 %v15165_v46, 0.0  ;;  %v6677_v15 = vmul.f32 %v6556_v51, %v174_v28  ;;  %v15168_v23 = vmax.f32 %v15167_v39, 0.0  ;;  %v15170_v1 = vmax.f32 %v15169_v25, 0.0  ;;  %v15173_v28 = vld [vmem:[#allocation48_spill] sm:$0xff] }
 0x538   :  { %v14019_v43 = vpop.permute.xlu1 %6310  ;;  %v14028_v0 = vpop.permute.xlu0 %3062  ;;  %v3309_v18 = vsel %vm3203_vm1, %v15163_v53, %v13879_v27  ;;  %v3547_v8 = vadd.f32 %v3546_v50, %v3427_v37  ;;  %v6795_v12 = vadd.f32 %v6794_v57, %v6675_v4  ;;  %v15172_v47 = vmax.f32 %v15171_v29, 0.0  ;;  %v179_v37 = vld [vmem:[%s14227_s3 + $0x360] sm:$0xff] }
 0x539   :  { %v6557_v6 = vsel %vm3203_vm1, %v15166_v48, %v15164_v56  ;;  %v3310_v32 = vsel %vm3203_vm1, %v15168_v23, %v13902_v14  ;;  %v3430_v54 = vmul.f32 %v3309_v18, %v176_v7  ;;  %v6558_v58 = vsel %vm3203_vm1, %v15170_v1, %v13894_v55  ;;  %v182_v23 = vld [vmem:[%s14227_s3 + $0x378] sm:$0xff]  ;;  %v183_v29 = vld [vmem:[%s14227_s3 + $0x380] sm:$0xff] }
 0x53a   :  { %v3548_v27 = vadd.f32 %v3547_v8, %v3428_v33  ;;  %v6796_v52 = vadd.f32 %v6795_v12, %v6676_v38  ;;  %v6678_v45 = vmul.f32 %v6557_v6, %v175_v11  ;;  %v3311_v24 = vsel %vm3203_vm1, %v15172_v47, %v13925_v35  ;;  %v15177_v11 = vld [vmem:[#allocation49_spill] sm:$0xff]  ;;  %v181_v8 = vld [vmem:[%s14227_s3 + $0x370] sm:$0xff]  ;;  %v15191_v47 = vld [vmem:[#allocation60_spill] sm:$0xff] }
 0x53b   :  { %v3431_v31 = vmul.f32 %v3310_v32, %v177_v49  ;;  %v15174_v60 = vmax.f32 %v15173_v28, 0.0  ;;  %v6679_v44 = vmul.f32 %v6558_v58, %v176_v7  ;;  %v15176_v20 = vmax.f32 %v15175_v59, 0.0  ;;  %v15181_v7 = vld [vmem:[#allocation52_spill] sm:$0xff]  ;;  %v15185_v6 = vld [vmem:[#allocation53_spill] sm:$0xff]  ;;  %v15187_v32 = vld [vmem:[#allocation58_spill] sm:$0xff] }
 0x53c   :  { %v14045_v21 = vpop.permute.xlu1 %6312  ;;  %v3065_v36 = vpop.permute.xlu0 %3064  ;;  %v3549_v41 = vadd.f32 %v3548_v27, %v3429_v9  ;;  %v6797_v2 = vadd.f32 %v6796_v52, %v6677_v15  ;;  %v3432_v4 = vmul.f32 %v3311_v24, %v178_v17  ;;  %v15178_v13 = vmax.f32 %v15177_v11, 0.0  ;;  %v15183_v9 = vld [vmem:[#allocation55_spill] sm:$0xff]  ;;  %v15189_v58 = vld [vmem:[#allocation56_spill] sm:$0xff]  ;;  %v15193_v28 = vld [vmem:[#allocation57_spill] sm:$0xff] }
 0x53d   :  { %v6559_v55 = vsel %vm3203_vm1, %v15174_v60, %v13917_v61  ;;  %v3312_v34 = vsel %vm3203_vm1, %v15176_v20, %v13950_v26  ;;  %v15180_v16 = vmax.f32 %v15179_v62, 0.0  ;;  %v15182_v10 = vmax.f32 %v15181_v7, 0.0  ;;  %v15195_v59 = vld [vmem:[#allocation62_spill] sm:$0xff]  ;;  %v15197_v11 = vld [vmem:[#allocation59_spill] sm:$0xff] }
 0x53e   :  { %v3550_v35 = vadd.f32 %v3549_v41, %v3430_v54  ;;  %v6560_v5 = vsel %vm3203_vm1, %v15178_v13, %v13941_v30  ;;  %v6798_v61 = vadd.f32 %v6797_v2, %v6678_v45  ;;  %v6680_v33 = vmul.f32 %v6559_v55, %v177_v49 }
 0x53f   :  { %v3313_v51 = vsel %vm3203_vm1, %v15180_v16, %v13976_v42  ;;  %v3433_v38 = vmul.f32 %v3312_v34, %v179_v37  ;;  %v6561_v30 = vsel %vm3203_vm1, %v15182_v10, %v13967_v40  ;;  %v6681_v18 = vmul.f32 %v6560_v5, %v178_v17 }
 0x540   :  { %v6315_v19 = vpop.permute.xlu1 %6314  ;;  %v3067_v14 = vpop.permute.xlu0 %3066  ;;  %v3551_v57 = vadd.f32 %v3550_v35, %v3431_v31  ;;  %v6799_v53 = vadd.f32 %v6798_v61, %v6679_v44  ;;  %v15184_v56 = vmax.f32 %v15183_v9, 0.0  ;;  %v3434_v48 = vmul.f32 %v3313_v51, %v180_v63 }
 0x541   :  { %v15186_v12 = vmax.f32 %v15185_v6, 0.0  ;;  %v6682_v39 = vmul.f32 %v6561_v30, %v179_v37  ;;  %v15188_v27 = vmax.f32 %v15187_v32, 0.0  ;;  %v15190_v52 = vmax.f32 %v15189_v58, 0.0  ;;  %v184_v37 = vld [vmem:[%s14227_s3 + $0x388] sm:$0xff] }
 0x542   :  { %v3314_v46 = vsel %vm3203_vm1, %v15184_v56, %v14002_v3  ;;  %v3552_v42 = vadd.f32 %v3551_v57, %v3432_v4  ;;  %v6800_v40 = vadd.f32 %v6799_v53, %v6680_v33  ;;  %v15192_v24 = vmax.f32 %v15191_v47, 0.0  ;;  %v185_v33 = vld [vmem:[%s14227_s3 + $0x390] sm:$0xff] }
 0x543   :  { %v6562_v15 = vsel %vm3203_vm1, %v15186_v12, %v13993_v22  ;;  %v3315_v54 = vsel %vm3203_vm1, %v15188_v27, %v14028_v0  ;;  %v3435_v1 = vmul.f32 %v3314_v46, %v181_v8  ;;  %v6563_v22 = vsel %vm3203_vm1, %v15190_v52, %v14019_v43 }
 0x544   :  { %v6317_v50 = vpop.permute.xlu1 %6316  ;;  %v3069_v26 = vpop.permute.xlu0 %3068  ;;  %v3553_v25 = vadd.f32 %v3552_v42, %v3433_v38  ;;  %v6801_v45 = vadd.f32 %v6800_v40, %v6681_v18  ;;  %v6683_v17 = vmul.f32 %v6562_v15, %v180_v63  ;;  %v3316_v41 = vsel %vm3203_vm1, %v15192_v24, %v3065_v36  ;;  %v15199_v63 = vld [vmem:[#allocation63_spill] sm:$0xff]  ;;  %v15205_v42 = vld [vmem:[#allocation64_spill] sm:$0xff]  ;;  %v15207_v40 = vld [vmem:[#allocation69_spill] sm:$0xff] }
 0x545   :  { %v3436_v0 = vmul.f32 %v3315_v54, %v182_v23  ;;  %v15194_v60 = vmax.f32 %v15193_v28, 0.0  ;;  %v6684_v43 = vmul.f32 %v6563_v22, %v181_v8  ;;  %v15196_v20 = vmax.f32 %v15195_v59, 0.0  ;;  %v15203_v18 = vld [vmem:[#allocation67_spill] sm:$0xff]  ;;  %v187_v15 = vld [vmem:[%s14227_s3 + $0x3a0] sm:$0xff]  ;;  %v15211_v22 = vld [vmem:[#allocation74_spill] sm:$0xff] }
 0x546   :  { %v3554_v31 = vadd.f32 %v3553_v25, %v3434_v48  ;;  %v6802_v44 = vadd.f32 %v6801_v45, %v6682_v39  ;;  %v3437_v4 = vmul.f32 %v3316_v41, %v183_v29  ;;  %v15198_v13 = vmax.f32 %v15197_v11, 0.0  ;;  %v15209_v54 = vld [vmem:[#allocation65_spill] sm:$0xff]  ;;  %v15213_v41 = vld [vmem:[#allocation70_spill] sm:$0xff] }
 0x547   :  { %v6564_v55 = vsel %vm3203_vm1, %v15194_v60, %v14045_v21  ;;  %v3317_v34 = vsel %vm3203_vm1, %v15196_v20, %v3067_v14  ;;  %v15200_v62 = vmax.f32 %v15199_v63, 0.0  ;;  %v15201_v14 = vld [vmem:[#allocation61_spill] sm:$0xff]  ;;  %v15204_v8 = vmax.f32 %v15203_v18, 0.0  ;;  %v15217_v20 = vld [vmem:[#allocation72_spill] sm:$0xff] }
 0x548   :  { %v6319_v49 = vpop.permute.xlu1 %6318  ;;  %v3071_v3 = vpop.permute.xlu0 %3070  ;;  %v3555_v36 = vadd.f32 %v3554_v31, %v3435_v1  ;;  %v6565_v5 = vsel %vm3203_vm1, %v15198_v13, %v6315_v19  ;;  %v6803_v61 = vadd.f32 %v6802_v44, %v6683_v17  ;;  %v6685_v21 = vmul.f32 %v6564_v55, %v182_v23  ;;  %v186_v19 = vld [vmem:[%s14227_s3 + $0x398] sm:$0xff]  ;;  %v189_v55 = vld [vmem:[%s14227_s3 + $0x3b0] sm:$0xff] }
 0x549   :  { %v3318_v16 = vsel %vm3203_vm1, %v15200_v62, %v3069_v26  ;;  %v3438_v57 = vmul.f32 %v3317_v34, %v184_v37  ;;  %v15202_v38 = vmax.f32 %v15201_v14, 0.0  ;;  %v6686_v53 = vmul.f32 %v6565_v5, %v183_v29  ;;  %v190_v13 = vld [vmem:[%s14227_s3 + $0x3b8] sm:$0xff] }
 0x54a   :  { %v3556_v51 = vadd.f32 %v3555_v36, %v3436_v0  ;;  %v6804_v30 = vadd.f32 %v6803_v61, %v6684_v43  ;;  %v3319_v9 = vsel %vm3203_vm1, %v15204_v8, %v3071_v3  ;;  %v3439_v26 = vmul.f32 %v3318_v16, %v185_v33  ;;  %v15221_v16 = vld [vmem:[#allocation82_spill] sm:$0xff]  ;;  %v15223_v8 = vld [vmem:[#allocation80_spill] sm:$0xff] }
 0x54b   :  { %v6566_v7 = vsel %vm3203_vm1, %v15202_v38, %v6317_v50  ;;  %v15206_v48 = vmax.f32 %v15205_v42, 0.0  ;;  %v15208_v39 = vmax.f32 %v15207_v40, 0.0  ;;  %v3440_v27 = vmul.f32 %v3319_v9, %v186_v19  ;;  %v15225_v42 = vld [vmem:[#allocation85_spill] sm:$0xff] }
 0x54c   :  { %v6321_v2 = vpop.permute.xlu1 %6320  ;;  %v3073_v35 = vpop.permute.xlu0 %3072  ;;  %v3557_v46 = vadd.f32 %v3556_v51, %v3437_v4  ;;  %v6805_v12 = vadd.f32 %v6804_v30, %v6685_v21  ;;  %v6687_v50 = vmul.f32 %v6566_v7, %v184_v37  ;;  %v15210_v3 = vmax.f32 %v15209_v54, 0.0 }
 0x54d   :  { %v6567_v6 = vsel %vm3203_vm1, %v15206_v48, %v6319_v49  ;;  %v3320_v23 = vsel %vm3203_vm1, %v15208_v39, %v3073_v35  ;;  %v188_v49 = vld [vmem:[%s14227_s3 + $0x3a8] sm:$0xff]  ;;  %v15212_v45 = vmax.f32 %v15211_v22, 0.0  ;;  %v15214_v31 = vmax.f32 %v15213_v41, 0.0 }
 0x54e   :  { %v3558_v32 = vadd.f32 %v3557_v46, %v3438_v57  ;;  %v6568_v25 = vsel %vm3203_vm1, %v15210_v3, %v6321_v2  ;;  %v6806_v58 = vadd.f32 %v6805_v12, %v6686_v53  ;;  %v6688_v52 = vmul.f32 %v6567_v6, %v185_v33  ;;  %v15215_v2 = vld [vmem:[#allocation77_spill] sm:$0xff]  ;;  %v15219_v33 = vld [vmem:[#allocation78_spill] sm:$0xff]  ;;  %v191_v53 = vld [vmem:[%s14227_s3 + $0x3c0] sm:$0x1] }
 0x54f   :  { %v3441_v24 = vmul.f32 %v3320_v23, %v187_v15  ;;  %v6689_v60 = vmul.f32 %v6568_v25, %v186_v19  ;;  %v15216_v44 = vmax.f32 %v15215_v2, 0.0  ;;  %v15218_v34 = vmax.f32 %v15217_v20, 0.0 }
 0x550   :  { %v6323_v10 = vpop.permute.xlu1 %6322  ;;  %v3075_v56 = vpop.permute.xlu0 %3074  ;;  %v3559_v47 = vadd.f32 %v3558_v32, %v3439_v26  ;;  %v6807_v28 = vadd.f32 %v6806_v58, %v6687_v50  ;;  %v15220_v63 = vmax.f32 %v15219_v33, 0.0  ;;  %v15222_v51 = vmax.f32 %v15221_v16, 0.0 }
 0x551   :  { %v3321_v17 = vsel %vm3203_vm1, %v15212_v45, %v3075_v56  ;;  %v6569_v0 = vsel %vm3203_vm1, %v15214_v31, %v6323_v10  ;;  %v15224_v9 = vmax.f32 %v15223_v8, 0.0  ;;  %v15226_v48 = vmax.f32 %v15225_v42, 0.0 }
 0x552   :  { %v3560_v37 = vadd.f32 %v3559_v47, %v3440_v27  ;;  %v3442_v59 = vmul.f32 %v3321_v17, %v188_v49  ;;  %v6808_v4 = vadd.f32 %v6807_v28, %v6688_v52  ;;  %v6690_v11 = vmul.f32 %v6569_v0, %v187_v15  ;;  %v15227_v27 = vld [vmem:[#allocation86_spill] sm:$0xff] }
 0x553   :  { %v15228_v54 = vmax.f32 %v15227_v27, 0.0  ;;  %v193_v45 = vlaneseq }
 0x554   :  { %v6325_v1 = vpop.permute.xlu1 %6324  ;;  %v3077_v29 = vpop.permute.xlu0 %3076  ;;  %v3561_v61 = vadd.f32 %v3560_v37, %v3441_v24  ;;  %v6809_v14 = vadd.f32 %v6808_v4, %v6689_v60 }
 0x555   :  { %v3322_v43 = vsel %vm3203_vm1, %v15216_v44, %v3077_v29  ;;  %v6570_v35 = vsel %vm3203_vm1, %v15218_v34, %v6325_v1  ;;  %v194_v24 = vand.u32 127, %v193_v45 }
 0x556   :  { %v3443_v21 = vmul.f32 %v3322_v43, %v189_v55  ;;  %v6691_v38 = vmul.f32 %v6570_v35, %v188_v49  ;;  %v3562_v7 = vadd.f32 %v3561_v61, %v3442_v59  ;;  %v6810_v19 = vadd.f32 %v6809_v14, %v6690_v11  ;;  %v192_v35 = vld [vmem:[%s14228_s4] sm:$0x1] }
 0x557   :  { %vm3575_vm3 = vcmp.lt.s32.totalorder %v194_v24, 64  ;;  %vm3583_vm4 = vcmp.ge.s32.totalorder %v194_v24, 64  ;;  %vm3580_vm5 = vcmp.eq.s32.totalorder %v194_v24, 0  ;;  %vm3589_vm6 = vcmp.eq.s32.totalorder %v194_v24, 1 }
 0x558   :  { %v6327_v36 = vpop.permute.xlu1 %6326  ;;  %v3079_v5 = vpop.permute.xlu0 %3078  ;;  %v3563_v26 = vadd.f32 %v3562_v7, %v3443_v21  ;;  %v6811_v12 = vadd.f32 %v6810_v19, %v6691_v38 }
 0x559   :  { %v6571_v62 = vsel %vm3203_vm1, %v15220_v63, %v6327_v36  ;;  %v3323_v57 = vsel %vm3203_vm1, %v15222_v51, %v3079_v5 }
 0x55a   :  { %v3444_v10 = vmul.f32 %v3323_v57, %v190_v13  ;;  %v6692_v18 = vmul.f32 %v6571_v62, %v189_v55 }
 0x55c   :  { %v6329_v30 = vpop.permute.xlu1 %6328  ;;  %v3081_v46 = vpop.permute.xlu0 %3080  ;;  %v3564_v40 = vadd.f32 %v3563_v26, %v3444_v10  ;;  %v6812_v23 = vadd.f32 %v6811_v12, %v6692_v18 }
 0x55d   :  { %v6572_v56 = vsel %vm3203_vm1, %v15224_v9, %v6329_v30  ;;  %v3324_v6 = vsel %vm3203_vm1, %v15226_v48, %v3081_v46 }
 0x55e   :  { %v6693_v50 = vmul.f32 %v6572_v56, %v190_v13  ;;  %v3445_v15 = vmul.f32 %v3324_v6, %v191_v53 }
 0x560   :  { %v6331_v39 = vpop.permute.xlu1 %6330  ;;  %v3566_v32 = vsel %vm3565_vm2, %v3445_v15, 0.0  ;;  %v6813_v58 = vadd.f32 %v6812_v23, %v6693_v50 }
 0x561   :  { %v6573_v3 = vsel %vm3203_vm1, %v15228_v54, %v6331_v39  ;;  %v3567_v25 = vadd.f32 %v3566_v32, %v3564_v40 }
 0x562   :  { %v6694_v1 = vmul.f32 %v6573_v3, %v191_v53 }
 0x563   :  { %v3568_v52 = vrot.slane %v3567_v25, 4 }
 0x564   :  { %v6814_v49 = vsel %vm3565_vm2, %v6694_v1, 0.0 }
 0x565   :  { %v6815_v22 = vadd.f32 %v6814_v49, %v6813_v58  ;;  %v3569_v17 = vadd.f32 %v3568_v52, %v3567_v25 }
 0x567   :  { %v6816_v29 = vrot.slane %v6815_v22, 4  ;;  %v3570_v47 = vrot.slane %v3569_v17, 2 }
 0x569   :  { %v6817_v41 = vadd.f32 %v6816_v29, %v6815_v22  ;;  %v3571_v31 = vadd.f32 %v3570_v47, %v3569_v17 }
 0x56b   :  { %v6818_v0 = vrot.slane %v6817_v41, 2  ;;  %v3572_v28 = vrot.slane %v3571_v31, 1 }
 0x56d   :  { %v6819_v60 = vadd.f32 %v6818_v0, %v6817_v41  ;;  %v3573_v55 = vadd.f32 %v3572_v28, %v3571_v31 }
 0x56f   :  { %v6820_v2 = vrot.slane %v6819_v60, 1  ;;  %v3577_v44 = vsel %vm3575_vm3, %v3573_v55, 0.0  ;;  %v3586_v59 = vsel %vm3583_vm4, %v3573_v55, 0.0 }
 0x570   :  { %3578 = vadd.xlane.f32.xlu0 %v3577_v44 }
 0x571   :  { %v6821_v43 = vadd.f32 %v6820_v2, %v6819_v60 }
 0x573   :  { %v6822_v37 = vsel %vm3575_vm3, %v6821_v43, 0.0  ;;  %v6827_v20 = vsel %vm3583_vm4, %v6821_v43, 0.0 }
 0x574   :  { %6823 = vadd.xlane.f32.xlu1 %v6822_v37  ;;  %3587 = vadd.xlane.f32.xlu0 %v3586_v59 }
 0x578   :  { %6828 = vadd.xlane.f32.xlu0 %v6827_v20 }
 0x5fd   :  { %v3579_v34 = vpop.xlane.xlu0 %3578 }
 0x5fe   :  { %v3581_v36 = vsel %vm3580_vm5, %v3579_v34, 0.0 }
 0x5ff   :  { %v3582_v11 = vadd.f32 %v3581_v36, %v192_v35 }
 0x601   :  { %v6824_v4 = vpop.xlane.xlu1 %6823  ;;  %v3588_v13 = vpop.xlane.xlu0 %3587 }
 0x602   :  { %v6825_v5 = vsel %vm3580_vm5, %v6824_v4, 0.0  ;;  %v3590_v61 = vsel %vm3589_vm6, %v3588_v13, 0.0 }
 0x603   :  { %v3591_v21 = vadd.f32 %v3590_v61, %v3582_v11  ;;  %v6826_v33 = vadd.f32 %v6825_v5, %v192_v35 }
 0x605   :  { %3593 = vst.msk [vmem:[#allocation2] sm:$0x1] %vm3592_vm7, %v3591_v21  ;;  %v6829_v63 = vpop.xlane.xlu0 %6828 }
 0x606   :  { %v6830_v62 = vsel %vm3589_vm6, %v6829_v63, 0.0 }
 0x607   :  { %v6831_v16 = vadd.f32 %v6830_v62, %v6826_v33 }
 0x609   :  { %6833 = vst.msk [vmem:[#allocation2 + $0x1] sm:$0x1] %vm3592_vm7, %v6831_v16 }
 0x60a   :  { %9403 = shalt.err (!%p9400_p4)
}
 0x60b   :  { %s9404_s26 = scalar_lea.hbm %s14229_s5, 32 }
 0x60c   :  { %p9405_p5 = scmp.ne.s32.totalorder %s14229_s5, %s9404_s26  ;;  %p9408_p6 = scmp.lt.u32.totalorder %s9404_s26, %s14229_s5 }
 0x60e   :  { %p9410_p7 = pnand %p9408_p6, %p9405_p5 }
 0x610   :  { %9413 = shalt.err (!%p9410_p7)
}
 0x611   :  { %s9421_s6 = smov 16   ;;  %s9422_s1 = smov 1  }
 0x612   :  { %6845 = dma.vmem_to_hbm [thread:$0]  %s6840_s23, 32, %s14229_s5, [#allocation3], %s9421_s6, %s9421_s6, %s9422_s1  }
 0x613   :  { %9414 = dma.done.wait [#allocation3], 32  }
 0x614   :  { %9415 = vsyncadd [#allocation3], 4294967264 }
 0x615   :  { %6849 = vsyncpa [#allocation3], 1 }

</bundles_post_ra>
